<compile_context>
chip_gen: v7x
topology: tpu7x:2x2x1
jax: 0.10.0
libtpu: 0.0.40
codegen_flags: <defaults>
</compile_context>

<pallas_src>
import functools

import jax
import jax.numpy as jnp
from jax import lax
from jax.experimental import pallas as pl
from jax.experimental.pallas import tpu as pltpu

# Fixed architecture constants of CNNMaxPool (conv 5x5 valid, pool 2x2/2, 32x32 input so the
# flattened conv stack is 16*5*5 = fc1.in_features).
KH = KW = 5
GRID_H = GRID_W = 32
IMG = GRID_H * GRID_W                         # 1024 grid lanes per image
C1_OUT, C2_OUT = 6, 16
P2_HW = 5                                     # final pooled map is 5x5
P2_W = 640                                    # per-image pool2 slab width (>= 528, lane aligned)
KTAPS = KH * KW                               # 25
KIM = KTAPS * 8                               # 200: im2col depth (8 padded channels per tap)
# maximum static lane offset each stage reads past its consumed width
S_CONV1 = (KH - 1) * GRID_W + (KW - 1)        # 132  (stride-1 grid)
S_POOL1 = GRID_W + 1                          # 33
S_CONV2 = 2 * ((KH - 1) * GRID_W + (KW - 1))  # 264  (stride-2 grid)
S_POOL2 = 2 * (GRID_W + 1)                    # 66
PAD_LANES = S_CONV1 + S_POOL1 + S_CONV2 + S_POOL2   # 495
CHUNK = 256                                   # conv/pool lane chunk (bounds vreg pressure)


# ----------------------------------------------------------------------------------
# The single fused kernel (one batch tile of `nt` images per grid step).
# ----------------------------------------------------------------------------------
def _cnn_maxpool_kernel(xg_ref, w1s_ref, b1_ref, w2s_ref, b2_ref, sel_ref,
                        w1f_ref, b1f_ref, w2f_ref, b2f_ref, w3f_ref, b3f_ref,
                        out_ref, im_ref, y1_ref, p1_ref, y2_ref, p2_ref):
    nt = out_ref.shape[0]                 # images in this grid step
    wy1 = y1_ref.shape[1]                 # nt*1024 + 363  (conv1 output width)
    wp1 = p1_ref.shape[1]                 # nt*1024 + 330  (pool1 output width, stride-2 grid)
    wy2 = y2_ref.shape[1]                 # nt*1024 + 66   (conv2 output width)

    # ---- conv1 im2col: 25 lane-shifted (8, wy1) windows of xg stacked on sublanes -------------
    for t in range(KTAPS):
        kh, kw = divmod(t, KW)
        im_ref[pl.ds(8 * t, 8), :] = xg_ref[:, pl.ds(kh * GRID_W + kw, wy1)]

    # ---- conv1 + bias + ReLU: one K=200 MXU contraction, chunked over output lanes ------------
    w1s = w1s_ref[...]                    # (8, 200)  tap-stacked weights (padded channels)
    b1 = b1_ref[...]                      # (8, 1)
    for j in range(0, wy1, CHUNK):
        cw = min(CHUNK, wy1 - j)
        acc = jnp.dot(w1s, im_ref[:, pl.ds(j, cw)], preferred_element_type=jnp.float32)
        y1_ref[:, pl.ds(j, cw)] = jnp.maximum(acc + b1, 0.0)

    # ---- 2x2/2 max-pool: max of 4 shifted windows; samples stay on the stride-2 grid ----------
    for j in range(0, wp1, CHUNK):
        cw = min(CHUNK, wp1 - j)
        a = jnp.maximum(y1_ref[:, pl.ds(j, cw)], y1_ref[:, pl.ds(j + 1, cw)])
        b = jnp.maximum(y1_ref[:, pl.ds(j + GRID_W, cw)],
                        y1_ref[:, pl.ds(j + GRID_W + 1, cw)])
        p1_ref[:, pl.ds(j, cw)] = jnp.maximum(a, b)

    # ---- conv2 im2col on the stride-2 grid (tap offsets doubled), reusing the same slab -------
    for t in range(KTAPS):
        kh, kw = divmod(t, KW)
        im_ref[pl.ds(8 * t, 8), pl.ds(0, wy2)] = p1_ref[:, pl.ds(2 * (kh * GRID_W + kw), wy2)]

    # ---- conv2 + bias + ReLU -------------------------------------------------------------------
    w2s = w2s_ref[...]                    # (16, 200)
    b2 = b2_ref[...]                      # (16, 1)
    for j in range(0, wy2, CHUNK):
        cw = min(CHUNK, wy2 - j)
        acc = jnp.dot(w2s, im_ref[:, pl.ds(j, cw)], preferred_element_type=jnp.float32)
        y2_ref[:, pl.ds(j, cw)] = jnp.maximum(acc + b2, 0.0)

    # ---- second 2x2/2 max-pool (stride-2 -> stride-4 grid): one 640-lane slab per image -------
    for i in range(nt):
        base = i * IMG
        a = jnp.maximum(y2_ref[:, pl.ds(base, P2_W)], y2_ref[:, pl.ds(base + 2, P2_W)])
        b = jnp.maximum(y2_ref[:, pl.ds(base + 2 * GRID_W, P2_W)],
                        y2_ref[:, pl.ds(base + 2 * GRID_W + 2, P2_W)])
        p2_ref[i] = jnp.maximum(a, b)

    # ---- flatten-gather: one batched matmul vs the precomputed (640, 32) selection matrix -----
    #      Invariant: sel rows that are not 128*h5+4*w5 (h5,w5<5) and sel cols >= 25 are zero,
    #      and w1f rows >= 25 are zero, so out-of-window garbage lanes never contribute.
    p2_all = p2_ref[...].reshape(nt * C2_OUT, P2_W)
    feat = jnp.dot(p2_all, sel_ref[...], preferred_element_type=jnp.float32)   # (nt*16, 32)
    feat3 = feat.reshape(nt, C2_OUT, 32)

    # ---- fc1 (torch (c,h,w) flatten order pre-folded into w1f) + ReLU, fc2 + ReLU, fc3 --------
    h1 = b1f_ref[...]                                        # (1, 120), broadcasts over images
    for c in range(C2_OUT):
        h1 = h1 + jnp.dot(feat3[:, c, :], w1f_ref[c], preferred_element_type=jnp.float32)
    h1 = jnp.maximum(h1, 0.0)
    h2 = jnp.maximum(jnp.dot(h1, w2f_ref[...], preferred_element_type=jnp.float32)
                     + b2f_ref[...], 0.0)
    out_ref[...] = (jnp.dot(h2, w3f_ref[...], preferred_element_type=jnp.float32)
                    + b3f_ref[...])


# ----------------------------------------------------------------------------------
# One-time parameter layout preparation (hoisted out of the per-call forward).
# ----------------------------------------------------------------------------------
def prepare_params(p):
    f32 = jnp.float32
    cin = p["conv1_w"].shape[1]
    # conv weights -> tap-stacked (C_out, 25*8) matrices matching im2col row order 8*t + ci,
    # with t = 5*kh + kw and channels zero-padded to 8 sublanes.
    w1 = jnp.transpose(p["conv1_w"].astype(f32), (0, 2, 3, 1))            # (6,5,5,cin)
    w1 = jnp.zeros((C1_OUT, KH, KW, 8), f32).at[..., :cin].set(w1).reshape(C1_OUT, KIM)
    w1s = jnp.zeros((8, KIM), f32).at[:C1_OUT].set(w1)
    b1 = jnp.zeros((8, 1), f32).at[:C1_OUT, 0].set(p["conv1_b"].astype(f32))
    w2 = jnp.transpose(p["conv2_w"].astype(f32), (0, 2, 3, 1))            # (16,5,5,6)
    w2s = jnp.zeros((C2_OUT, KH, KW, 8), f32).at[..., :C1_OUT].set(w2).reshape(C2_OUT, KIM)
    b2 = p["conv2_b"].astype(f32).reshape(C2_OUT, 1)
    # selection matrix: pooled-grid lane 128*h5 + 4*w5  ->  flatten position 5*h5 + w5.
    h5, w5 = jnp.meshgrid(jnp.arange(P2_HW), jnp.arange(P2_HW), indexing="ij")
    rows = (128 * h5 + 4 * w5).reshape(-1)
    cols = (P2_HW * h5 + w5).reshape(-1)
    sel = jnp.zeros((P2_W, 32), f32).at[rows, cols].set(1.0)
    # fc1 (120, 400) in torch (c, h, w) flatten order -> per-channel (32, 120) blocks
    # (25 real rows in 5*h5+w5 order + zero padding).
    w1f = jnp.transpose(p["fc1_w"].astype(f32).reshape(120, C2_OUT, P2_HW * P2_HW), (1, 2, 0))
    w1f = jnp.zeros((C2_OUT, 32, 120), f32).at[:, :P2_HW * P2_HW, :].set(w1f)
    return {
        "w1s": w1s, "b1": b1, "w2s": w2s, "b2": b2, "sel": sel,
        "w1f": w1f, "b1f": p["fc1_b"].astype(f32).reshape(1, -1),
        "w2f": p["fc2_w"].astype(f32).T, "b2f": p["fc2_b"].astype(f32).reshape(1, -1),
        "w3f": p["fc3_w"].astype(f32).T, "b3f": p["fc3_b"].astype(f32).reshape(1, -1),
    }


def _const_index(ndim, t):
    return (0,) * ndim


# ----------------------------------------------------------------------------------
# Forward: minimal per-call glue (input layout + zero pad), then one pallas_call.
# ----------------------------------------------------------------------------------
@functools.partial(jax.jit, static_argnames=("nt",))
def cnn_maxpool_forward(x_nchw, prep, nt=2):
    n, cin, h, w = x_nchw.shape
    assert h == GRID_H and w == GRID_W, "CNNMaxPool needs 32x32 inputs (fc1 expects 16*5*5)"
    assert cin <= 8, "input channels are zero-padded onto 8 sublanes"
    assert n % nt == 0, "batch must be divisible by the per-step image tile nt"
    steps = n // nt
    wxg = nt * IMG + PAD_LANES
    wy1 = nt * IMG + S_POOL1 + S_CONV2 + S_POOL2
    wp1 = nt * IMG + S_CONV2 + S_POOL2
    wy2 = nt * IMG + S_POOL2

    # Per-call layout glue (small): channels onto sublanes, flattened (image, y, x) grid onto
    # lanes, split into per-grid-step tiles, each followed by PAD_LANES of zeros so every
    # in-kernel tap offset is a plain static lane slice.
    xg = jnp.transpose(x_nchw.astype(jnp.float32), (1, 0, 2, 3)).reshape(cin, n * IMG)
    xg = jnp.transpose(xg.reshape(cin, steps, nt * IMG), (1, 0, 2))
    xg = jnp.pad(xg, ((0, 0), (0, 8 - cin), (0, PAD_LANES)))             # (steps, 8, wxg)

    weights = (prep["w1s"], prep["b1"], prep["w2s"], prep["b2"], prep["sel"], prep["w1f"],
               prep["b1f"], prep["w2f"], prep["b2f"], prep["w3f"], prep["b3f"])
    w_specs = [pl.BlockSpec(a.shape, functools.partial(_const_index, a.ndim)) for a in weights]

    out = pl.pallas_call(
        _cnn_maxpool_kernel,
        out_shape=jax.ShapeDtypeStruct((steps, nt, 10), jnp.float32),
        grid=(steps,),
        in_specs=[pl.BlockSpec((None, 8, wxg), lambda t: (t, 0, 0))] + w_specs,
        out_specs=pl.BlockSpec((None, nt, 10), lambda t: (t, 0, 0)),
        scratch_shapes=[
            pltpu.VMEM((KIM, wy1), jnp.float32),           # shared im2col slab (conv1 & conv2)
            pltpu.VMEM((8, wy1), jnp.float32),             # conv1 output (ReLU applied)
            pltpu.VMEM((8, wp1), jnp.float32),             # pool1 output (stride-2 grid)
            pltpu.VMEM((C2_OUT, wy2), jnp.float32),        # conv2 output (ReLU applied)
            pltpu.VMEM((nt, C2_OUT, P2_W), jnp.float32),   # pool2 output, one slab per image
        ],
        compiler_params=pltpu.CompilerParams(dimension_semantics=("parallel",)),
    )(xg, *weights)
    return out.reshape(n, 10)


# ----------------------------------------------------------------------------------
# Pure-JAX reference mirroring the PyTorch forward (for verification).
# ----------------------------------------------------------------------------------
def reference_forward(x_nchw, p):
    dn = ("NCHW", "OIHW", "NCHW")
    hi = lax.Precision.HIGHEST
    y = lax.conv_general_dilated(x_nchw, p["conv1_w"], (1, 1), "VALID",
                                 dimension_numbers=dn, precision=hi)
    y = jnp.maximum(y + p["conv1_b"][None, :, None, None], 0.0)
    y = lax.reduce_window(y, -jnp.inf, lax.max, (1, 1, 2, 2), (1, 1, 2, 2), "VALID")
    y = lax.conv_general_dilated(y, p["conv2_w"], (1, 1), "VALID",
                                 dimension_numbers=dn, precision=hi)
    y = jnp.maximum(y + p["conv2_b"][None, :, None, None], 0.0)
    y = lax.reduce_window(y, -jnp.inf, lax.max, (1, 1, 2, 2), (1, 1, 2, 2), "VALID")
    y = y.reshape(y.shape[0], -1)
    y = jnp.maximum(jnp.dot(y, p["fc1_w"].T, precision=hi) + p["fc1_b"], 0.0)
    y = jnp.maximum(jnp.dot(y, p["fc2_w"].T, precision=hi) + p["fc2_b"], 0.0)
    return jnp.dot(y, p["fc3_w"].T, precision=hi) + p["fc3_b"]


def init_params(key, in_ch):
    """Deterministic synthetic parameters with PyTorch shapes (not a checkpoint load)."""
    ks = jax.random.split(key, 10)

    def w(k, shape, fan_in):
        return jax.random.normal(k, shape, jnp.float32) / jnp.sqrt(float(fan_in))

    return {
        "conv1_w": w(ks[0], (6, in_ch, 5, 5), in_ch * 25),
        "conv1_b": 0.01 * jax.random.normal(ks[1], (6,), jnp.float32),
        "conv2_w": w(ks[2], (16, 6, 5, 5), 6 * 25),
        "conv2_b": 0.01 * jax.random.normal(ks[3], (16,), jnp.float32),
        "fc1_w": w(ks[4], (120, 16 * 5 * 5), 16 * 5 * 5),
        "fc1_b": 0.01 * jax.random.normal(ks[5], (120,), jnp.float32),
        "fc2_w": w(ks[6], (84, 120), 120),
        "fc2_b": 0.01 * jax.random.normal(ks[7], (84,), jnp.float32),
        "fc3_w": w(ks[8], (10, 84), 84),
        "fc3_b": 0.01 * jax.random.normal(ks[9], (10,), jnp.float32),
    }


if __name__ == "__main__":
    key = jax.random.PRNGKey(0)
    k_params, k_x = jax.random.split(key)

    input_output = 3                      # the module's `input_output` (input channels)
    batch = 4
    # 32x32 spatial is required so 16*5*5 matches fc1 (32->28->14->10->5).
    x = jax.random.normal(k_x, (batch, input_output, 32, 32), jnp.float32)
    params = init_params(k_params, input_output)
    prep = prepare_params(params)         # one-time weight layout prep, hoisted out of the call

    out = jax.block_until_ready(cnn_maxpool_forward(x, prep, nt=2))
    ref = jax.block_until_ready(reference_forward(x, params))

    assert out.shape == (batch, 10), out.shape
    assert out.dtype == jnp.float32
    max_diff = float(jnp.max(jnp.abs(out - ref)))
    assert jnp.allclose(out, ref, rtol=2e-3, atol=2e-3), f"max abs diff {max_diff}"
    print("KERNEL_OK")
</pallas_src>

<mosaic_0001>
module attributes {stable_mosaic.version = 11 : i64} {
  func.func @_cnn_maxpool_kernel(%arg0: i32, %arg1: memref<1x8x2543xf32, #tpu.memory_space<vmem>>, %arg2: memref<8x200xf32, #tpu.memory_space<vmem>>, %arg3: memref<8x1xf32, #tpu.memory_space<vmem>>, %arg4: memref<16x200xf32, #tpu.memory_space<vmem>>, %arg5: memref<16x1xf32, #tpu.memory_space<vmem>>, %arg6: memref<640x32xf32, #tpu.memory_space<vmem>>, %arg7: memref<16x32x120xf32, #tpu.memory_space<vmem>>, %arg8: memref<1x120xf32, #tpu.memory_space<vmem>>, %arg9: memref<120x84xf32, #tpu.memory_space<vmem>>, %arg10: memref<1x84xf32, #tpu.memory_space<vmem>>, %arg11: memref<84x10xf32, #tpu.memory_space<vmem>>, %arg12: memref<1x10xf32, #tpu.memory_space<vmem>>, %arg13: memref<1x2x10xf32, #tpu.memory_space<vmem>>, %arg14: memref<200x2411xf32, #tpu.memory_space<vmem>>, %arg15: memref<8x2411xf32, #tpu.memory_space<vmem>>, %arg16: memref<8x2378xf32, #tpu.memory_space<vmem>>, %arg17: memref<16x2114xf32, #tpu.memory_space<vmem>>, %arg18: memref<2x16x640xf32, #tpu.memory_space<vmem>>) attributes {dimension_semantics = [#tpu.dimension_semantics<parallel>], iteration_bounds = array<i64: 2>, scalar_prefetch = 0 : i64, scratch_operands = 5 : i64, tpu.core_type = #tpu.core_type<tc>, window_params = [{transform_indices = @transform_0, window_bounds = array<i64: 1, 8, 2543>}, {pipeline_mode = #tpu.pipeline_mode<synchronous>, transform_indices = @transform_1, window_bounds = array<i64: 8, 200>}, {pipeline_mode = #tpu.pipeline_mode<synchronous>, transform_indices = @transform_2, window_bounds = array<i64: 8, 1>}, {pipeline_mode = #tpu.pipeline_mode<synchronous>, transform_indices = @transform_3, window_bounds = array<i64: 16, 200>}, {pipeline_mode = #tpu.pipeline_mode<synchronous>, transform_indices = @transform_4, window_bounds = array<i64: 16, 1>}, {pipeline_mode = #tpu.pipeline_mode<synchronous>, transform_indices = @transform_5, window_bounds = array<i64: 640, 32>}, {pipeline_mode = #tpu.pipeline_mode<synchronous>, transform_indices = @transform_6, window_bounds = array<i64: 16, 32, 120>}, {pipeline_mode = #tpu.pipeline_mode<synchronous>, transform_indices = @transform_7, window_bounds = array<i64: 1, 120>}, {pipeline_mode = #tpu.pipeline_mode<synchronous>, transform_indices = @transform_8, window_bounds = array<i64: 120, 84>}, {pipeline_mode = #tpu.pipeline_mode<synchronous>, transform_indices = @transform_9, window_bounds = array<i64: 1, 84>}, {pipeline_mode = #tpu.pipeline_mode<synchronous>, transform_indices = @transform_10, window_bounds = array<i64: 84, 10>}, {pipeline_mode = #tpu.pipeline_mode<synchronous>, transform_indices = @transform_11, window_bounds = array<i64: 1, 10>}, {transform_indices = @transform_12, window_bounds = array<i64: 1, 2, 10>}]} {
    %c0 = arith.constant 0 : index
    %c0_0 = arith.constant 0 : index
    %c0_1 = arith.constant 0 : index
    %0 = vector.load %arg1[%c0, %c0_0, %c0_1] : memref<1x8x2543xf32, #tpu.memory_space<vmem>>, vector<1x8x2411xf32>
    %1 = vector.shape_cast %0 : vector<1x8x2411xf32> to vector<8x2411xf32>
    %c0_2 = arith.constant 0 : index
    %c0_3 = arith.constant 0 : index
    %2 = vector.load %arg14[%c0_2, %c0_3] : memref<200x2411xf32, #tpu.memory_space<vmem>>, vector<8x2411xf32>
    tpu.vector_store %arg14[%c0_2, %c0_3], %1 {strides = array<i32>} : memref<200x2411xf32, #tpu.memory_space<vmem>>, vector<8x2411xf32>,
    %c0_4 = arith.constant 0 : index
    %c0_5 = arith.constant 0 : index
    %c1 = arith.constant 1 : index
    %3 = vector.load %arg1[%c0_4, %c0_5, %c1] : memref<1x8x2543xf32, #tpu.memory_space<vmem>>, vector<1x8x2411xf32>
    %4 = vector.shape_cast %3 : vector<1x8x2411xf32> to vector<8x2411xf32>
    %c8 = arith.constant 8 : index
    %c0_6 = arith.constant 0 : index
    %5 = vector.load %arg14[%c8, %c0_6] : memref<200x2411xf32, #tpu.memory_space<vmem>>, vector<8x2411xf32>
    tpu.vector_store %arg14[%c8, %c0_6], %4 {strides = array<i32>} : memref<200x2411xf32, #tpu.memory_space<vmem>>, vector<8x2411xf32>,
    %c0_7 = arith.constant 0 : index
    %c0_8 = arith.constant 0 : index
    %c2 = arith.constant 2 : index
    %6 = vector.load %arg1[%c0_7, %c0_8, %c2] : memref<1x8x2543xf32, #tpu.memory_space<vmem>>, vector<1x8x2411xf32>
    %7 = vector.shape_cast %6 : vector<1x8x2411xf32> to vector<8x2411xf32>
    %c16 = arith.constant 16 : index
    %c0_9 = arith.constant 0 : index
    %8 = vector.load %arg14[%c16, %c0_9] : memref<200x2411xf32, #tpu.memory_space<vmem>>, vector<8x2411xf32>
    tpu.vector_store %arg14[%c16, %c0_9], %7 {strides = array<i32>} : memref<200x2411xf32, #tpu.memory_space<vmem>>, vector<8x2411xf32>,
    %c0_10 = arith.constant 0 : index
    %c0_11 = arith.constant 0 : index
    %c3 = arith.constant 3 : index
    %9 = vector.load %arg1[%c0_10, %c0_11, %c3] : memref<1x8x2543xf32, #tpu.memory_space<vmem>>, vector<1x8x2411xf32>
    %10 = vector.shape_cast %9 : vector<1x8x2411xf32> to vector<8x2411xf32>
    %c24 = arith.constant 24 : index
    %c0_12 = arith.constant 0 : index
    %11 = vector.load %arg14[%c24, %c0_12] : memref<200x2411xf32, #tpu.memory_space<vmem>>, vector<8x2411xf32>
    tpu.vector_store %arg14[%c24, %c0_12], %10 {strides = array<i32>} : memref<200x2411xf32, #tpu.memory_space<vmem>>, vector<8x2411xf32>,
    %c0_13 = arith.constant 0 : index
    %c0_14 = arith.constant 0 : index
    %c4 = arith.constant 4 : index
    %12 = vector.load %arg1[%c0_13, %c0_14, %c4] : memref<1x8x2543xf32, #tpu.memory_space<vmem>>, vector<1x8x2411xf32>
    %13 = vector.shape_cast %12 : vector<1x8x2411xf32> to vector<8x2411xf32>
    %c32 = arith.constant 32 : index
    %c0_15 = arith.constant 0 : index
    %14 = vector.load %arg14[%c32, %c0_15] : memref<200x2411xf32, #tpu.memory_space<vmem>>, vector<8x2411xf32>
    tpu.vector_store %arg14[%c32, %c0_15], %13 {strides = array<i32>} : memref<200x2411xf32, #tpu.memory_space<vmem>>, vector<8x2411xf32>,
    %c0_16 = arith.constant 0 : index
    %c0_17 = arith.constant 0 : index
    %c32_18 = arith.constant 32 : index
    %15 = vector.load %arg1[%c0_16, %c0_17, %c32_18] : memref<1x8x2543xf32, #tpu.memory_space<vmem>>, vector<1x8x2411xf32>
    %16 = vector.shape_cast %15 : vector<1x8x2411xf32> to vector<8x2411xf32>
    %c40 = arith.constant 40 : index
    %c0_19 = arith.constant 0 : index
    %17 = vector.load %arg14[%c40, %c0_19] : memref<200x2411xf32, #tpu.memory_space<vmem>>, vector<8x2411xf32>
    tpu.vector_store %arg14[%c40, %c0_19], %16 {strides = array<i32>} : memref<200x2411xf32, #tpu.memory_space<vmem>>, vector<8x2411xf32>,
    %c0_20 = arith.constant 0 : index
    %c0_21 = arith.constant 0 : index
    %c33 = arith.constant 33 : index
    %18 = vector.load %arg1[%c0_20, %c0_21, %c33] : memref<1x8x2543xf32, #tpu.memory_space<vmem>>, vector<1x8x2411xf32>
    %19 = vector.shape_cast %18 : vector<1x8x2411xf32> to vector<8x2411xf32>
    %c48 = arith.constant 48 : index
    %c0_22 = arith.constant 0 : index
    %20 = vector.load %arg14[%c48, %c0_22] : memref<200x2411xf32, #tpu.memory_space<vmem>>, vector<8x2411xf32>
    tpu.vector_store %arg14[%c48, %c0_22], %19 {strides = array<i32>} : memref<200x2411xf32, #tpu.memory_space<vmem>>, vector<8x2411xf32>,
    %c0_23 = arith.constant 0 : index
    %c0_24 = arith.constant 0 : index
    %c34 = arith.constant 34 : index
    %21 = vector.load %arg1[%c0_23, %c0_24, %c34] : memref<1x8x2543xf32, #tpu.memory_space<vmem>>, vector<1x8x2411xf32>
    %22 = vector.shape_cast %21 : vector<1x8x2411xf32> to vector<8x2411xf32>
    %c56 = arith.constant 56 : index
    %c0_25 = arith.constant 0 : index
    %23 = vector.load %arg14[%c56, %c0_25] : memref<200x2411xf32, #tpu.memory_space<vmem>>, vector<8x2411xf32>
    tpu.vector_store %arg14[%c56, %c0_25], %22 {strides = array<i32>} : memref<200x2411xf32, #tpu.memory_space<vmem>>, vector<8x2411xf32>,
    %c0_26 = arith.constant 0 : index
    %c0_27 = arith.constant 0 : index
    %c35 = arith.constant 35 : index
    %24 = vector.load %arg1[%c0_26, %c0_27, %c35] : memref<1x8x2543xf32, #tpu.memory_space<vmem>>, vector<1x8x2411xf32>
    %25 = vector.shape_cast %24 : vector<1x8x2411xf32> to vector<8x2411xf32>
    %c64 = arith.constant 64 : index
    %c0_28 = arith.constant 0 : index
    %26 = vector.load %arg14[%c64, %c0_28] : memref<200x2411xf32, #tpu.memory_space<vmem>>, vector<8x2411xf32>
    tpu.vector_store %arg14[%c64, %c0_28], %25 {strides = array<i32>} : memref<200x2411xf32, #tpu.memory_space<vmem>>, vector<8x2411xf32>,
    %c0_29 = arith.constant 0 : index
    %c0_30 = arith.constant 0 : index
    %c36 = arith.constant 36 : index
    %27 = vector.load %arg1[%c0_29, %c0_30, %c36] : memref<1x8x2543xf32, #tpu.memory_space<vmem>>, vector<1x8x2411xf32>
    %28 = vector.shape_cast %27 : vector<1x8x2411xf32> to vector<8x2411xf32>
    %c72 = arith.constant 72 : index
    %c0_31 = arith.constant 0 : index
    %29 = vector.load %arg14[%c72, %c0_31] : memref<200x2411xf32, #tpu.memory_space<vmem>>, vector<8x2411xf32>
    tpu.vector_store %arg14[%c72, %c0_31], %28 {strides = array<i32>} : memref<200x2411xf32, #tpu.memory_space<vmem>>, vector<8x2411xf32>,
    %c0_32 = arith.constant 0 : index
    %c0_33 = arith.constant 0 : index
    %c64_34 = arith.constant 64 : index
    %30 = vector.load %arg1[%c0_32, %c0_33, %c64_34] : memref<1x8x2543xf32, #tpu.memory_space<vmem>>, vector<1x8x2411xf32>
    %31 = vector.shape_cast %30 : vector<1x8x2411xf32> to vector<8x2411xf32>
    %c80 = arith.constant 80 : index
    %c0_35 = arith.constant 0 : index
    %32 = vector.load %arg14[%c80, %c0_35] : memref<200x2411xf32, #tpu.memory_space<vmem>>, vector<8x2411xf32>
    tpu.vector_store %arg14[%c80, %c0_35], %31 {strides = array<i32>} : memref<200x2411xf32, #tpu.memory_space<vmem>>, vector<8x2411xf32>,
    %c0_36 = arith.constant 0 : index
    %c0_37 = arith.constant 0 : index
    %c65 = arith.constant 65 : index
    %33 = vector.load %arg1[%c0_36, %c0_37, %c65] : memref<1x8x2543xf32, #tpu.memory_space<vmem>>, vector<1x8x2411xf32>
    %34 = vector.shape_cast %33 : vector<1x8x2411xf32> to vector<8x2411xf32>
    %c88 = arith.constant 88 : index
    %c0_38 = arith.constant 0 : index
    %35 = vector.load %arg14[%c88, %c0_38] : memref<200x2411xf32, #tpu.memory_space<vmem>>, vector<8x2411xf32>
    tpu.vector_store %arg14[%c88, %c0_38], %34 {strides = array<i32>} : memref<200x2411xf32, #tpu.memory_space<vmem>>, vector<8x2411xf32>,
    %c0_39 = arith.constant 0 : index
    %c0_40 = arith.constant 0 : index
    %c66 = arith.constant 66 : index
    %36 = vector.load %arg1[%c0_39, %c0_40, %c66] : memref<1x8x2543xf32, #tpu.memory_space<vmem>>, vector<1x8x2411xf32>
    %37 = vector.shape_cast %36 : vector<1x8x2411xf32> to vector<8x2411xf32>
    %c96 = arith.constant 96 : index
    %c0_41 = arith.constant 0 : index
    %38 = vector.load %arg14[%c96, %c0_41] : memref<200x2411xf32, #tpu.memory_space<vmem>>, vector<8x2411xf32>
    tpu.vector_store %arg14[%c96, %c0_41], %37 {strides = array<i32>} : memref<200x2411xf32, #tpu.memory_space<vmem>>, vector<8x2411xf32>,
    %c0_42 = arith.constant 0 : index
    %c0_43 = arith.constant 0 : index
    %c67 = arith.constant 67 : index
    %39 = vector.load %arg1[%c0_42, %c0_43, %c67] : memref<1x8x2543xf32, #tpu.memory_space<vmem>>, vector<1x8x2411xf32>
    %40 = vector.shape_cast %39 : vector<1x8x2411xf32> to vector<8x2411xf32>
    %c104 = arith.constant 104 : index
    %c0_44 = arith.constant 0 : index
    %41 = vector.load %arg14[%c104, %c0_44] : memref<200x2411xf32, #tpu.memory_space<vmem>>, vector<8x2411xf32>
    tpu.vector_store %arg14[%c104, %c0_44], %40 {strides = array<i32>} : memref<200x2411xf32, #tpu.memory_space<vmem>>, vector<8x2411xf32>,
    %c0_45 = arith.constant 0 : index
    %c0_46 = arith.constant 0 : index
    %c68 = arith.constant 68 : index
    %42 = vector.load %arg1[%c0_45, %c0_46, %c68] : memref<1x8x2543xf32, #tpu.memory_space<vmem>>, vector<1x8x2411xf32>
    %43 = vector.shape_cast %42 : vector<1x8x2411xf32> to vector<8x2411xf32>
    %c112 = arith.constant 112 : index
    %c0_47 = arith.constant 0 : index
    %44 = vector.load %arg14[%c112, %c0_47] : memref<200x2411xf32, #tpu.memory_space<vmem>>, vector<8x2411xf32>
    tpu.vector_store %arg14[%c112, %c0_47], %43 {strides = array<i32>} : memref<200x2411xf32, #tpu.memory_space<vmem>>, vector<8x2411xf32>,
    %c0_48 = arith.constant 0 : index
    %c0_49 = arith.constant 0 : index
    %c96_50 = arith.constant 96 : index
    %45 = vector.load %arg1[%c0_48, %c0_49, %c96_50] : memref<1x8x2543xf32, #tpu.memory_space<vmem>>, vector<1x8x2411xf32>
    %46 = vector.shape_cast %45 : vector<1x8x2411xf32> to vector<8x2411xf32>
    %c120 = arith.constant 120 : index
    %c0_51 = arith.constant 0 : index
    %47 = vector.load %arg14[%c120, %c0_51] : memref<200x2411xf32, #tpu.memory_space<vmem>>, vector<8x2411xf32>
    tpu.vector_store %arg14[%c120, %c0_51], %46 {strides = array<i32>} : memref<200x2411xf32, #tpu.memory_space<vmem>>, vector<8x2411xf32>,
    %c0_52 = arith.constant 0 : index
    %c0_53 = arith.constant 0 : index
    %c97 = arith.constant 97 : index
    %48 = vector.load %arg1[%c0_52, %c0_53, %c97] : memref<1x8x2543xf32, #tpu.memory_space<vmem>>, vector<1x8x2411xf32>
    %49 = vector.shape_cast %48 : vector<1x8x2411xf32> to vector<8x2411xf32>
    %c128 = arith.constant 128 : index
    %c0_54 = arith.constant 0 : index
    %50 = vector.load %arg14[%c128, %c0_54] : memref<200x2411xf32, #tpu.memory_space<vmem>>, vector<8x2411xf32>
    tpu.vector_store %arg14[%c128, %c0_54], %49 {strides = array<i32>} : memref<200x2411xf32, #tpu.memory_space<vmem>>, vector<8x2411xf32>,
    %c0_55 = arith.constant 0 : index
    %c0_56 = arith.constant 0 : index
    %c98 = arith.constant 98 : index
    %51 = vector.load %arg1[%c0_55, %c0_56, %c98] : memref<1x8x2543xf32, #tpu.memory_space<vmem>>, vector<1x8x2411xf32>
    %52 = vector.shape_cast %51 : vector<1x8x2411xf32> to vector<8x2411xf32>
    %c136 = arith.constant 136 : index
    %c0_57 = arith.constant 0 : index
    %53 = vector.load %arg14[%c136, %c0_57] : memref<200x2411xf32, #tpu.memory_space<vmem>>, vector<8x2411xf32>
    tpu.vector_store %arg14[%c136, %c0_57], %52 {strides = array<i32>} : memref<200x2411xf32, #tpu.memory_space<vmem>>, vector<8x2411xf32>,
    %c0_58 = arith.constant 0 : index
    %c0_59 = arith.constant 0 : index
    %c99 = arith.constant 99 : index
    %54 = vector.load %arg1[%c0_58, %c0_59, %c99] : memref<1x8x2543xf32, #tpu.memory_space<vmem>>, vector<1x8x2411xf32>
    %55 = vector.shape_cast %54 : vector<1x8x2411xf32> to vector<8x2411xf32>
    %c144 = arith.constant 144 : index
    %c0_60 = arith.constant 0 : index
    %56 = vector.load %arg14[%c144, %c0_60] : memref<200x2411xf32, #tpu.memory_space<vmem>>, vector<8x2411xf32>
    tpu.vector_store %arg14[%c144, %c0_60], %55 {strides = array<i32>} : memref<200x2411xf32, #tpu.memory_space<vmem>>, vector<8x2411xf32>,
    %c0_61 = arith.constant 0 : index
    %c0_62 = arith.constant 0 : index
    %c100 = arith.constant 100 : index
    %57 = vector.load %arg1[%c0_61, %c0_62, %c100] : memref<1x8x2543xf32, #tpu.memory_space<vmem>>, vector<1x8x2411xf32>
    %58 = vector.shape_cast %57 : vector<1x8x2411xf32> to vector<8x2411xf32>
    %c152 = arith.constant 152 : index
    %c0_63 = arith.constant 0 : index
    %59 = vector.load %arg14[%c152, %c0_63] : memref<200x2411xf32, #tpu.memory_space<vmem>>, vector<8x2411xf32>
    tpu.vector_store %arg14[%c152, %c0_63], %58 {strides = array<i32>} : memref<200x2411xf32, #tpu.memory_space<vmem>>, vector<8x2411xf32>,
    %c0_64 = arith.constant 0 : index
    %c0_65 = arith.constant 0 : index
    %c128_66 = arith.constant 128 : index
    %60 = vector.load %arg1[%c0_64, %c0_65, %c128_66] : memref<1x8x2543xf32, #tpu.memory_space<vmem>>, vector<1x8x2411xf32>
    %61 = vector.shape_cast %60 : vector<1x8x2411xf32> to vector<8x2411xf32>
    %c160 = arith.constant 160 : index
    %c0_67 = arith.constant 0 : index
    %62 = vector.load %arg14[%c160, %c0_67] : memref<200x2411xf32, #tpu.memory_space<vmem>>, vector<8x2411xf32>
    tpu.vector_store %arg14[%c160, %c0_67], %61 {strides = array<i32>} : memref<200x2411xf32, #tpu.memory_space<vmem>>, vector<8x2411xf32>,
    %c0_68 = arith.constant 0 : index
    %c0_69 = arith.constant 0 : index
    %c129 = arith.constant 129 : index
    %63 = vector.load %arg1[%c0_68, %c0_69, %c129] : memref<1x8x2543xf32, #tpu.memory_space<vmem>>, vector<1x8x2411xf32>
    %64 = vector.shape_cast %63 : vector<1x8x2411xf32> to vector<8x2411xf32>
    %c168 = arith.constant 168 : index
    %c0_70 = arith.constant 0 : index
    %65 = vector.load %arg14[%c168, %c0_70] : memref<200x2411xf32, #tpu.memory_space<vmem>>, vector<8x2411xf32>
    tpu.vector_store %arg14[%c168, %c0_70], %64 {strides = array<i32>} : memref<200x2411xf32, #tpu.memory_space<vmem>>, vector<8x2411xf32>,
    %c0_71 = arith.constant 0 : index
    %c0_72 = arith.constant 0 : index
    %c130 = arith.constant 130 : index
    %66 = vector.load %arg1[%c0_71, %c0_72, %c130] : memref<1x8x2543xf32, #tpu.memory_space<vmem>>, vector<1x8x2411xf32>
    %67 = vector.shape_cast %66 : vector<1x8x2411xf32> to vector<8x2411xf32>
    %c176 = arith.constant 176 : index
    %c0_73 = arith.constant 0 : index
    %68 = vector.load %arg14[%c176, %c0_73] : memref<200x2411xf32, #tpu.memory_space<vmem>>, vector<8x2411xf32>
    tpu.vector_store %arg14[%c176, %c0_73], %67 {strides = array<i32>} : memref<200x2411xf32, #tpu.memory_space<vmem>>, vector<8x2411xf32>,
    %c0_74 = arith.constant 0 : index
    %c0_75 = arith.constant 0 : index
    %c131 = arith.constant 131 : index
    %69 = vector.load %arg1[%c0_74, %c0_75, %c131] : memref<1x8x2543xf32, #tpu.memory_space<vmem>>, vector<1x8x2411xf32>
    %70 = vector.shape_cast %69 : vector<1x8x2411xf32> to vector<8x2411xf32>
    %c184 = arith.constant 184 : index
    %c0_76 = arith.constant 0 : index
    %71 = vector.load %arg14[%c184, %c0_76] : memref<200x2411xf32, #tpu.memory_space<vmem>>, vector<8x2411xf32>
    tpu.vector_store %arg14[%c184, %c0_76], %70 {strides = array<i32>} : memref<200x2411xf32, #tpu.memory_space<vmem>>, vector<8x2411xf32>,
    %c0_77 = arith.constant 0 : index
    %c0_78 = arith.constant 0 : index
    %c132 = arith.constant 132 : index
    %72 = vector.load %arg1[%c0_77, %c0_78, %c132] : memref<1x8x2543xf32, #tpu.memory_space<vmem>>, vector<1x8x2411xf32>
    %73 = vector.shape_cast %72 : vector<1x8x2411xf32> to vector<8x2411xf32>
    %c192 = arith.constant 192 : index
    %c0_79 = arith.constant 0 : index
    %74 = vector.load %arg14[%c192, %c0_79] : memref<200x2411xf32, #tpu.memory_space<vmem>>, vector<8x2411xf32>
    tpu.vector_store %arg14[%c192, %c0_79], %73 {strides = array<i32>} : memref<200x2411xf32, #tpu.memory_space<vmem>>, vector<8x2411xf32>,
    %c0_80 = arith.constant 0 : index
    %c0_81 = arith.constant 0 : index
    %75 = vector.load %arg2[%c0_80, %c0_81] : memref<8x200xf32, #tpu.memory_space<vmem>>, vector<8x200xf32>
    %c0_82 = arith.constant 0 : index
    %c0_83 = arith.constant 0 : index
    %76 = vector.load %arg3[%c0_82, %c0_83] : memref<8x1xf32, #tpu.memory_space<vmem>>, vector<8x1xf32>
    %c0_84 = arith.constant 0 : index
    %c0_85 = arith.constant 0 : index
    %77 = vector.load %arg14[%c0_84, %c0_85] : memref<200x2411xf32, #tpu.memory_space<vmem>>, vector<200x256xf32>
    %cst = arith.constant dense<0.000000e+00> : vector<8x256xf32>
    %78 = tpu.matmul %75, %77, %cst {dimension_numbers = #tpu.dot_dimension_numbers<[1], [0], [0], [1], [0, 0, 1, 1], [], []>} : vector<8x200xf32>, vector<200x256xf32>, vector<8x256xf32> -> vector<8x256xf32>
    %79 = vector.broadcast %76 : vector<8x1xf32> to vector<8x256xf32>
    %80 = arith.addf %78, %79 : vector<8x256xf32>
    %cst_86 = arith.constant 0.000000e+00 : f32
    %81 = vector.broadcast %cst_86 : f32 to vector<8x256xf32>
    %82 = arith.maximumf %80, %81 : vector<8x256xf32>
    %c0_87 = arith.constant 0 : index
    %c0_88 = arith.constant 0 : index
    %83 = vector.load %arg15[%c0_87, %c0_88] : memref<8x2411xf32, #tpu.memory_space<vmem>>, vector<8x256xf32>
    tpu.vector_store %arg15[%c0_87, %c0_88], %82 {strides = array<i32>} : memref<8x2411xf32, #tpu.memory_space<vmem>>, vector<8x256xf32>,
    %c0_89 = arith.constant 0 : index
    %c256 = arith.constant 256 : index
    %84 = vector.load %arg14[%c0_89, %c256] : memref<200x2411xf32, #tpu.memory_space<vmem>>, vector<200x256xf32>
    %cst_90 = arith.constant dense<0.000000e+00> : vector<8x256xf32>
    %85 = tpu.matmul %75, %84, %cst_90 {dimension_numbers = #tpu.dot_dimension_numbers<[1], [0], [0], [1], [0, 0, 1, 1], [], []>} : vector<8x200xf32>, vector<200x256xf32>, vector<8x256xf32> -> vector<8x256xf32>
    %86 = vector.broadcast %76 : vector<8x1xf32> to vector<8x256xf32>
    %87 = arith.addf %85, %86 : vector<8x256xf32>
    %cst_91 = arith.constant 0.000000e+00 : f32
    %88 = vector.broadcast %cst_91 : f32 to vector<8x256xf32>
    %89 = arith.maximumf %87, %88 : vector<8x256xf32>
    %c0_92 = arith.constant 0 : index
    %c256_93 = arith.constant 256 : index
    %90 = vector.load %arg15[%c0_92, %c256_93] : memref<8x2411xf32, #tpu.memory_space<vmem>>, vector<8x256xf32>
    tpu.vector_store %arg15[%c0_92, %c256_93], %89 {strides = array<i32>} : memref<8x2411xf32, #tpu.memory_space<vmem>>, vector<8x256xf32>,
    %c0_94 = arith.constant 0 : index
    %c512 = arith.constant 512 : index
    %91 = vector.load %arg14[%c0_94, %c512] : memref<200x2411xf32, #tpu.memory_space<vmem>>, vector<200x256xf32>
    %cst_95 = arith.constant dense<0.000000e+00> : vector<8x256xf32>
    %92 = tpu.matmul %75, %91, %cst_95 {dimension_numbers = #tpu.dot_dimension_numbers<[1], [0], [0], [1], [0, 0, 1, 1], [], []>} : vector<8x200xf32>, vector<200x256xf32>, vector<8x256xf32> -> vector<8x256xf32>
    %93 = vector.broadcast %76 : vector<8x1xf32> to vector<8x256xf32>
    %94 = arith.addf %92, %93 : vector<8x256xf32>
    %cst_96 = arith.constant 0.000000e+00 : f32
    %95 = vector.broadcast %cst_96 : f32 to vector<8x256xf32>
    %96 = arith.maximumf %94, %95 : vector<8x256xf32>
    %c0_97 = arith.constant 0 : index
    %c512_98 = arith.constant 512 : index
    %97 = vector.load %arg15[%c0_97, %c512_98] : memref<8x2411xf32, #tpu.memory_space<vmem>>, vector<8x256xf32>
    tpu.vector_store %arg15[%c0_97, %c512_98], %96 {strides = array<i32>} : memref<8x2411xf32, #tpu.memory_space<vmem>>, vector<8x256xf32>,
    %c0_99 = arith.constant 0 : index
    %c768 = arith.constant 768 : index
    %98 = vector.load %arg14[%c0_99, %c768] : memref<200x2411xf32, #tpu.memory_space<vmem>>, vector<200x256xf32>
    %cst_100 = arith.constant dense<0.000000e+00> : vector<8x256xf32>
    %99 = tpu.matmul %75, %98, %cst_100 {dimension_numbers = #tpu.dot_dimension_numbers<[1], [0], [0], [1], [0, 0, 1, 1], [], []>} : vector<8x200xf32>, vector<200x256xf32>, vector<8x256xf32> -> vector<8x256xf32>
    %100 = vector.broadcast %76 : vector<8x1xf32> to vector<8x256xf32>
    %101 = arith.addf %99, %100 : vector<8x256xf32>
    %cst_101 = arith.constant 0.000000e+00 : f32
    %102 = vector.broadcast %cst_101 : f32 to vector<8x256xf32>
    %103 = arith.maximumf %101, %102 : vector<8x256xf32>
    %c0_102 = arith.constant 0 : index
    %c768_103 = arith.constant 768 : index
    %104 = vector.load %arg15[%c0_102, %c768_103] : memref<8x2411xf32, #tpu.memory_space<vmem>>, vector<8x256xf32>
    tpu.vector_store %arg15[%c0_102, %c768_103], %103 {strides = array<i32>} : memref<8x2411xf32, #tpu.memory_space<vmem>>, vector<8x256xf32>,
    %c0_104 = arith.constant 0 : index
    %c1024 = arith.constant 1024 : index
    %105 = vector.load %arg14[%c0_104, %c1024] : memref<200x2411xf32, #tpu.memory_space<vmem>>, vector<200x256xf32>
    %cst_105 = arith.constant dense<0.000000e+00> : vector<8x256xf32>
    %106 = tpu.matmul %75, %105, %cst_105 {dimension_numbers = #tpu.dot_dimension_numbers<[1], [0], [0], [1], [0, 0, 1, 1], [], []>} : vector<8x200xf32>, vector<200x256xf32>, vector<8x256xf32> -> vector<8x256xf32>
    %107 = vector.broadcast %76 : vector<8x1xf32> to vector<8x256xf32>
    %108 = arith.addf %106, %107 : vector<8x256xf32>
    %cst_106 = arith.constant 0.000000e+00 : f32
    %109 = vector.broadcast %cst_106 : f32 to vector<8x256xf32>
    %110 = arith.maximumf %108, %109 : vector<8x256xf32>
    %c0_107 = arith.constant 0 : index
    %c1024_108 = arith.constant 1024 : index
    %111 = vector.load %arg15[%c0_107, %c1024_108] : memref<8x2411xf32, #tpu.memory_space<vmem>>, vector<8x256xf32>
    tpu.vector_store %arg15[%c0_107, %c1024_108], %110 {strides = array<i32>} : memref<8x2411xf32, #tpu.memory_space<vmem>>, vector<8x256xf32>,
    %c0_109 = arith.constant 0 : index
    %c1280 = arith.constant 1280 : index
    %112 = vector.load %arg14[%c0_109, %c1280] : memref<200x2411xf32, #tpu.memory_space<vmem>>, vector<200x256xf32>
    %cst_110 = arith.constant dense<0.000000e+00> : vector<8x256xf32>
    %113 = tpu.matmul %75, %112, %cst_110 {dimension_numbers = #tpu.dot_dimension_numbers<[1], [0], [0], [1], [0, 0, 1, 1], [], []>} : vector<8x200xf32>, vector<200x256xf32>, vector<8x256xf32> -> vector<8x256xf32>
    %114 = vector.broadcast %76 : vector<8x1xf32> to vector<8x256xf32>
    %115 = arith.addf %113, %114 : vector<8x256xf32>
    %cst_111 = arith.constant 0.000000e+00 : f32
    %116 = vector.broadcast %cst_111 : f32 to vector<8x256xf32>
    %117 = arith.maximumf %115, %116 : vector<8x256xf32>
    %c0_112 = arith.constant 0 : index
    %c1280_113 = arith.constant 1280 : index
    %118 = vector.load %arg15[%c0_112, %c1280_113] : memref<8x2411xf32, #tpu.memory_space<vmem>>, vector<8x256xf32>
    tpu.vector_store %arg15[%c0_112, %c1280_113], %117 {strides = array<i32>} : memref<8x2411xf32, #tpu.memory_space<vmem>>, vector<8x256xf32>,
    %c0_114 = arith.constant 0 : index
    %c1536 = arith.constant 1536 : index
    %119 = vector.load %arg14[%c0_114, %c1536] : memref<200x2411xf32, #tpu.memory_space<vmem>>, vector<200x256xf32>
    %cst_115 = arith.constant dense<0.000000e+00> : vector<8x256xf32>
    %120 = tpu.matmul %75, %119, %cst_115 {dimension_numbers = #tpu.dot_dimension_numbers<[1], [0], [0], [1], [0, 0, 1, 1], [], []>} : vector<8x200xf32>, vector<200x256xf32>, vector<8x256xf32> -> vector<8x256xf32>
    %121 = vector.broadcast %76 : vector<8x1xf32> to vector<8x256xf32>
    %122 = arith.addf %120, %121 : vector<8x256xf32>
    %cst_116 = arith.constant 0.000000e+00 : f32
    %123 = vector.broadcast %cst_116 : f32 to vector<8x256xf32>
    %124 = arith.maximumf %122, %123 : vector<8x256xf32>
    %c0_117 = arith.constant 0 : index
    %c1536_118 = arith.constant 1536 : index
    %125 = vector.load %arg15[%c0_117, %c1536_118] : memref<8x2411xf32, #tpu.memory_space<vmem>>, vector<8x256xf32>
    tpu.vector_store %arg15[%c0_117, %c1536_118], %124 {strides = array<i32>} : memref<8x2411xf32, #tpu.memory_space<vmem>>, vector<8x256xf32>,
    %c0_119 = arith.constant 0 : index
    %c1792 = arith.constant 1792 : index
    %126 = vector.load %arg14[%c0_119, %c1792] : memref<200x2411xf32, #tpu.memory_space<vmem>>, vector<200x256xf32>
    %cst_120 = arith.constant dense<0.000000e+00> : vector<8x256xf32>
    %127 = tpu.matmul %75, %126, %cst_120 {dimension_numbers = #tpu.dot_dimension_numbers<[1], [0], [0], [1], [0, 0, 1, 1], [], []>} : vector<8x200xf32>, vector<200x256xf32>, vector<8x256xf32> -> vector<8x256xf32>
    %128 = vector.broadcast %76 : vector<8x1xf32> to vector<8x256xf32>
    %129 = arith.addf %127, %128 : vector<8x256xf32>
    %cst_121 = arith.constant 0.000000e+00 : f32
    %130 = vector.broadcast %cst_121 : f32 to vector<8x256xf32>
    %131 = arith.maximumf %129, %130 : vector<8x256xf32>
    %c0_122 = arith.constant 0 : index
    %c1792_123 = arith.constant 1792 : index
    %132 = vector.load %arg15[%c0_122, %c1792_123] : memref<8x2411xf32, #tpu.memory_space<vmem>>, vector<8x256xf32>
    tpu.vector_store %arg15[%c0_122, %c1792_123], %131 {strides = array<i32>} : memref<8x2411xf32, #tpu.memory_space<vmem>>, vector<8x256xf32>,
    %c0_124 = arith.constant 0 : index
    %c2048 = arith.constant 2048 : index
    %133 = vector.load %arg14[%c0_124, %c2048] : memref<200x2411xf32, #tpu.memory_space<vmem>>, vector<200x256xf32>
    %cst_125 = arith.constant dense<0.000000e+00> : vector<8x256xf32>
    %134 = tpu.matmul %75, %133, %cst_125 {dimension_numbers = #tpu.dot_dimension_numbers<[1], [0], [0], [1], [0, 0, 1, 1], [], []>} : vector<8x200xf32>, vector<200x256xf32>, vector<8x256xf32> -> vector<8x256xf32>
    %135 = vector.broadcast %76 : vector<8x1xf32> to vector<8x256xf32>
    %136 = arith.addf %134, %135 : vector<8x256xf32>
    %cst_126 = arith.constant 0.000000e+00 : f32
    %137 = vector.broadcast %cst_126 : f32 to vector<8x256xf32>
    %138 = arith.maximumf %136, %137 : vector<8x256xf32>
    %c0_127 = arith.constant 0 : index
    %c2048_128 = arith.constant 2048 : index
    %139 = vector.load %arg15[%c0_127, %c2048_128] : memref<8x2411xf32, #tpu.memory_space<vmem>>, vector<8x256xf32>
    tpu.vector_store %arg15[%c0_127, %c2048_128], %138 {strides = array<i32>} : memref<8x2411xf32, #tpu.memory_space<vmem>>, vector<8x256xf32>,
    %c0_129 = arith.constant 0 : index
    %c2304 = arith.constant 2304 : index
    %140 = vector.load %arg14[%c0_129, %c2304] : memref<200x2411xf32, #tpu.memory_space<vmem>>, vector<200x107xf32>
    %cst_130 = arith.constant dense<0.000000e+00> : vector<8x107xf32>
    %141 = tpu.matmul %75, %140, %cst_130 {dimension_numbers = #tpu.dot_dimension_numbers<[1], [0], [0], [1], [0, 0, 1, 1], [], []>} : vector<8x200xf32>, vector<200x107xf32>, vector<8x107xf32> -> vector<8x107xf32>
    %142 = vector.broadcast %76 : vector<8x1xf32> to vector<8x107xf32>
    %143 = arith.addf %141, %142 : vector<8x107xf32>
    %cst_131 = arith.constant 0.000000e+00 : f32
    %144 = vector.broadcast %cst_131 : f32 to vector<8x107xf32>
    %145 = arith.maximumf %143, %144 : vector<8x107xf32>
    %c0_132 = arith.constant 0 : index
    %c2304_133 = arith.constant 2304 : index
    %146 = vector.load %arg15[%c0_132, %c2304_133] : memref<8x2411xf32, #tpu.memory_space<vmem>>, vector<8x107xf32>
    tpu.vector_store %arg15[%c0_132, %c2304_133], %145 {strides = array<i32>} : memref<8x2411xf32, #tpu.memory_space<vmem>>, vector<8x107xf32>,
    %c0_134 = arith.constant 0 : index
    %c0_135 = arith.constant 0 : index
    %147 = vector.load %arg15[%c0_134, %c0_135] : memref<8x2411xf32, #tpu.memory_space<vmem>>, vector<8x256xf32>
    %c0_136 = arith.constant 0 : index
    %c1_137 = arith.constant 1 : index
    %148 = vector.load %arg15[%c0_136, %c1_137] : memref<8x2411xf32, #tpu.memory_space<vmem>>, vector<8x256xf32>
    %149 = arith.maximumf %147, %148 : vector<8x256xf32>
    %c0_138 = arith.constant 0 : index
    %c32_139 = arith.constant 32 : index
    %150 = vector.load %arg15[%c0_138, %c32_139] : memref<8x2411xf32, #tpu.memory_space<vmem>>, vector<8x256xf32>
    %c0_140 = arith.constant 0 : index
    %c33_141 = arith.constant 33 : index
    %151 = vector.load %arg15[%c0_140, %c33_141] : memref<8x2411xf32, #tpu.memory_space<vmem>>, vector<8x256xf32>
    %152 = arith.maximumf %150, %151 : vector<8x256xf32>
    %153 = arith.maximumf %149, %152 : vector<8x256xf32>
    %c0_142 = arith.constant 0 : index
    %c0_143 = arith.constant 0 : index
    %154 = vector.load %arg16[%c0_142, %c0_143] : memref<8x2378xf32, #tpu.memory_space<vmem>>, vector<8x256xf32>
    tpu.vector_store %arg16[%c0_142, %c0_143], %153 {strides = array<i32>} : memref<8x2378xf32, #tpu.memory_space<vmem>>, vector<8x256xf32>,
    %c0_144 = arith.constant 0 : index
    %c256_145 = arith.constant 256 : index
    %155 = vector.load %arg15[%c0_144, %c256_145] : memref<8x2411xf32, #tpu.memory_space<vmem>>, vector<8x256xf32>
    %c0_146 = arith.constant 0 : index
    %c257 = arith.constant 257 : index
    %156 = vector.load %arg15[%c0_146, %c257] : memref<8x2411xf32, #tpu.memory_space<vmem>>, vector<8x256xf32>
    %157 = arith.maximumf %155, %156 : vector<8x256xf32>
    %c0_147 = arith.constant 0 : index
    %c288 = arith.constant 288 : index
    %158 = vector.load %arg15[%c0_147, %c288] : memref<8x2411xf32, #tpu.memory_space<vmem>>, vector<8x256xf32>
    %c0_148 = arith.constant 0 : index
    %c289 = arith.constant 289 : index
    %159 = vector.load %arg15[%c0_148, %c289] : memref<8x2411xf32, #tpu.memory_space<vmem>>, vector<8x256xf32>
    %160 = arith.maximumf %158, %159 : vector<8x256xf32>
    %161 = arith.maximumf %157, %160 : vector<8x256xf32>
    %c0_149 = arith.constant 0 : index
    %c256_150 = arith.constant 256 : index
    %162 = vector.load %arg16[%c0_149, %c256_150] : memref<8x2378xf32, #tpu.memory_space<vmem>>, vector<8x256xf32>
    tpu.vector_store %arg16[%c0_149, %c256_150], %161 {strides = array<i32>} : memref<8x2378xf32, #tpu.memory_space<vmem>>, vector<8x256xf32>,
    %c0_151 = arith.constant 0 : index
    %c512_152 = arith.constant 512 : index
    %163 = vector.load %arg15[%c0_151, %c512_152] : memref<8x2411xf32, #tpu.memory_space<vmem>>, vector<8x256xf32>
    %c0_153 = arith.constant 0 : index
    %c513 = arith.constant 513 : index
    %164 = vector.load %arg15[%c0_153, %c513] : memref<8x2411xf32, #tpu.memory_space<vmem>>, vector<8x256xf32>
    %165 = arith.maximumf %163, %164 : vector<8x256xf32>
    %c0_154 = arith.constant 0 : index
    %c544 = arith.constant 544 : index
    %166 = vector.load %arg15[%c0_154, %c544] : memref<8x2411xf32, #tpu.memory_space<vmem>>, vector<8x256xf32>
    %c0_155 = arith.constant 0 : index
    %c545 = arith.constant 545 : index
    %167 = vector.load %arg15[%c0_155, %c545] : memref<8x2411xf32, #tpu.memory_space<vmem>>, vector<8x256xf32>
    %168 = arith.maximumf %166, %167 : vector<8x256xf32>
    %169 = arith.maximumf %165, %168 : vector<8x256xf32>
    %c0_156 = arith.constant 0 : index
    %c512_157 = arith.constant 512 : index
    %170 = vector.load %arg16[%c0_156, %c512_157] : memref<8x2378xf32, #tpu.memory_space<vmem>>, vector<8x256xf32>
    tpu.vector_store %arg16[%c0_156, %c512_157], %169 {strides = array<i32>} : memref<8x2378xf32, #tpu.memory_space<vmem>>, vector<8x256xf32>,
    %c0_158 = arith.constant 0 : index
    %c768_159 = arith.constant 768 : index
    %171 = vector.load %arg15[%c0_158, %c768_159] : memref<8x2411xf32, #tpu.memory_space<vmem>>, vector<8x256xf32>
    %c0_160 = arith.constant 0 : index
    %c769 = arith.constant 769 : index
    %172 = vector.load %arg15[%c0_160, %c769] : memref<8x2411xf32, #tpu.memory_space<vmem>>, vector<8x256xf32>
    %173 = arith.maximumf %171, %172 : vector<8x256xf32>
    %c0_161 = arith.constant 0 : index
    %c800 = arith.constant 800 : index
    %174 = vector.load %arg15[%c0_161, %c800] : memref<8x2411xf32, #tpu.memory_space<vmem>>, vector<8x256xf32>
    %c0_162 = arith.constant 0 : index
    %c801 = arith.constant 801 : index
    %175 = vector.load %arg15[%c0_162, %c801] : memref<8x2411xf32, #tpu.memory_space<vmem>>, vector<8x256xf32>
    %176 = arith.maximumf %174, %175 : vector<8x256xf32>
    %177 = arith.maximumf %173, %176 : vector<8x256xf32>
    %c0_163 = arith.constant 0 : index
    %c768_164 = arith.constant 768 : index
    %178 = vector.load %arg16[%c0_163, %c768_164] : memref<8x2378xf32, #tpu.memory_space<vmem>>, vector<8x256xf32>
    tpu.vector_store %arg16[%c0_163, %c768_164], %177 {strides = array<i32>} : memref<8x2378xf32, #tpu.memory_space<vmem>>, vector<8x256xf32>,
    %c0_165 = arith.constant 0 : index
    %c1024_166 = arith.constant 1024 : index
    %179 = vector.load %arg15[%c0_165, %c1024_166] : memref<8x2411xf32, #tpu.memory_space<vmem>>, vector<8x256xf32>
    %c0_167 = arith.constant 0 : index
    %c1025 = arith.constant 1025 : index
    %180 = vector.load %arg15[%c0_167, %c1025] : memref<8x2411xf32, #tpu.memory_space<vmem>>, vector<8x256xf32>
    %181 = arith.maximumf %179, %180 : vector<8x256xf32>
    %c0_168 = arith.constant 0 : index
    %c1056 = arith.constant 1056 : index
    %182 = vector.load %arg15[%c0_168, %c1056] : memref<8x2411xf32, #tpu.memory_space<vmem>>, vector<8x256xf32>
    %c0_169 = arith.constant 0 : index
    %c1057 = arith.constant 1057 : index
    %183 = vector.load %arg15[%c0_169, %c1057] : memref<8x2411xf32, #tpu.memory_space<vmem>>, vector<8x256xf32>
    %184 = arith.maximumf %182, %183 : vector<8x256xf32>
    %185 = arith.maximumf %181, %184 : vector<8x256xf32>
    %c0_170 = arith.constant 0 : index
    %c1024_171 = arith.constant 1024 : index
    %186 = vector.load %arg16[%c0_170, %c1024_171] : memref<8x2378xf32, #tpu.memory_space<vmem>>, vector<8x256xf32>
    tpu.vector_store %arg16[%c0_170, %c1024_171], %185 {strides = array<i32>} : memref<8x2378xf32, #tpu.memory_space<vmem>>, vector<8x256xf32>,
    %c0_172 = arith.constant 0 : index
    %c1280_173 = arith.constant 1280 : index
    %187 = vector.load %arg15[%c0_172, %c1280_173] : memref<8x2411xf32, #tpu.memory_space<vmem>>, vector<8x256xf32>
    %c0_174 = arith.constant 0 : index
    %c1281 = arith.constant 1281 : index
    %188 = vector.load %arg15[%c0_174, %c1281] : memref<8x2411xf32, #tpu.memory_space<vmem>>, vector<8x256xf32>
    %189 = arith.maximumf %187, %188 : vector<8x256xf32>
    %c0_175 = arith.constant 0 : index
    %c1312 = arith.constant 1312 : index
    %190 = vector.load %arg15[%c0_175, %c1312] : memref<8x2411xf32, #tpu.memory_space<vmem>>, vector<8x256xf32>
    %c0_176 = arith.constant 0 : index
    %c1313 = arith.constant 1313 : index
    %191 = vector.load %arg15[%c0_176, %c1313] : memref<8x2411xf32, #tpu.memory_space<vmem>>, vector<8x256xf32>
    %192 = arith.maximumf %190, %191 : vector<8x256xf32>
    %193 = arith.maximumf %189, %192 : vector<8x256xf32>
    %c0_177 = arith.constant 0 : index
    %c1280_178 = arith.constant 1280 : index
    %194 = vector.load %arg16[%c0_177, %c1280_178] : memref<8x2378xf32, #tpu.memory_space<vmem>>, vector<8x256xf32>
    tpu.vector_store %arg16[%c0_177, %c1280_178], %193 {strides = array<i32>} : memref<8x2378xf32, #tpu.memory_space<vmem>>, vector<8x256xf32>,
    %c0_179 = arith.constant 0 : index
    %c1536_180 = arith.constant 1536 : index
    %195 = vector.load %arg15[%c0_179, %c1536_180] : memref<8x2411xf32, #tpu.memory_space<vmem>>, vector<8x256xf32>
    %c0_181 = arith.constant 0 : index
    %c1537 = arith.constant 1537 : index
    %196 = vector.load %arg15[%c0_181, %c1537] : memref<8x2411xf32, #tpu.memory_space<vmem>>, vector<8x256xf32>
    %197 = arith.maximumf %195, %196 : vector<8x256xf32>
    %c0_182 = arith.constant 0 : index
    %c1568 = arith.constant 1568 : index
    %198 = vector.load %arg15[%c0_182, %c1568] : memref<8x2411xf32, #tpu.memory_space<vmem>>, vector<8x256xf32>
    %c0_183 = arith.constant 0 : index
    %c1569 = arith.constant 1569 : index
    %199 = vector.load %arg15[%c0_183, %c1569] : memref<8x2411xf32, #tpu.memory_space<vmem>>, vector<8x256xf32>
    %200 = arith.maximumf %198, %199 : vector<8x256xf32>
    %201 = arith.maximumf %197, %200 : vector<8x256xf32>
    %c0_184 = arith.constant 0 : index
    %c1536_185 = arith.constant 1536 : index
    %202 = vector.load %arg16[%c0_184, %c1536_185] : memref<8x2378xf32, #tpu.memory_space<vmem>>, vector<8x256xf32>
    tpu.vector_store %arg16[%c0_184, %c1536_185], %201 {strides = array<i32>} : memref<8x2378xf32, #tpu.memory_space<vmem>>, vector<8x256xf32>,
    %c0_186 = arith.constant 0 : index
    %c1792_187 = arith.constant 1792 : index
    %203 = vector.load %arg15[%c0_186, %c1792_187] : memref<8x2411xf32, #tpu.memory_space<vmem>>, vector<8x256xf32>
    %c0_188 = arith.constant 0 : index
    %c1793 = arith.constant 1793 : index
    %204 = vector.load %arg15[%c0_188, %c1793] : memref<8x2411xf32, #tpu.memory_space<vmem>>, vector<8x256xf32>
    %205 = arith.maximumf %203, %204 : vector<8x256xf32>
    %c0_189 = arith.constant 0 : index
    %c1824 = arith.constant 1824 : index
    %206 = vector.load %arg15[%c0_189, %c1824] : memref<8x2411xf32, #tpu.memory_space<vmem>>, vector<8x256xf32>
    %c0_190 = arith.constant 0 : index
    %c1825 = arith.constant 1825 : index
    %207 = vector.load %arg15[%c0_190, %c1825] : memref<8x2411xf32, #tpu.memory_space<vmem>>, vector<8x256xf32>
    %208 = arith.maximumf %206, %207 : vector<8x256xf32>
    %209 = arith.maximumf %205, %208 : vector<8x256xf32>
    %c0_191 = arith.constant 0 : index
    %c1792_192 = arith.constant 1792 : index
    %210 = vector.load %arg16[%c0_191, %c1792_192] : memref<8x2378xf32, #tpu.memory_space<vmem>>, vector<8x256xf32>
    tpu.vector_store %arg16[%c0_191, %c1792_192], %209 {strides = array<i32>} : memref<8x2378xf32, #tpu.memory_space<vmem>>, vector<8x256xf32>,
    %c0_193 = arith.constant 0 : index
    %c2048_194 = arith.constant 2048 : index
    %211 = vector.load %arg15[%c0_193, %c2048_194] : memref<8x2411xf32, #tpu.memory_space<vmem>>, vector<8x256xf32>
    %c0_195 = arith.constant 0 : index
    %c2049 = arith.constant 2049 : index
    %212 = vector.load %arg15[%c0_195, %c2049] : memref<8x2411xf32, #tpu.memory_space<vmem>>, vector<8x256xf32>
    %213 = arith.maximumf %211, %212 : vector<8x256xf32>
    %c0_196 = arith.constant 0 : index
    %c2080 = arith.constant 2080 : index
    %214 = vector.load %arg15[%c0_196, %c2080] : memref<8x2411xf32, #tpu.memory_space<vmem>>, vector<8x256xf32>
    %c0_197 = arith.constant 0 : index
    %c2081 = arith.constant 2081 : index
    %215 = vector.load %arg15[%c0_197, %c2081] : memref<8x2411xf32, #tpu.memory_space<vmem>>, vector<8x256xf32>
    %216 = arith.maximumf %214, %215 : vector<8x256xf32>
    %217 = arith.maximumf %213, %216 : vector<8x256xf32>
    %c0_198 = arith.constant 0 : index
    %c2048_199 = arith.constant 2048 : index
    %218 = vector.load %arg16[%c0_198, %c2048_199] : memref<8x2378xf32, #tpu.memory_space<vmem>>, vector<8x256xf32>
    tpu.vector_store %arg16[%c0_198, %c2048_199], %217 {strides = array<i32>} : memref<8x2378xf32, #tpu.memory_space<vmem>>, vector<8x256xf32>,
    %c0_200 = arith.constant 0 : index
    %c2304_201 = arith.constant 2304 : index
    %219 = vector.load %arg15[%c0_200, %c2304_201] : memref<8x2411xf32, #tpu.memory_space<vmem>>, vector<8x74xf32>
    %c0_202 = arith.constant 0 : index
    %c2305 = arith.constant 2305 : index
    %220 = vector.load %arg15[%c0_202, %c2305] : memref<8x2411xf32, #tpu.memory_space<vmem>>, vector<8x74xf32>
    %221 = arith.maximumf %219, %220 : vector<8x74xf32>
    %c0_203 = arith.constant 0 : index
    %c2336 = arith.constant 2336 : index
    %222 = vector.load %arg15[%c0_203, %c2336] : memref<8x2411xf32, #tpu.memory_space<vmem>>, vector<8x74xf32>
    %c0_204 = arith.constant 0 : index
    %c2337 = arith.constant 2337 : index
    %223 = vector.load %arg15[%c0_204, %c2337] : memref<8x2411xf32, #tpu.memory_space<vmem>>, vector<8x74xf32>
    %224 = arith.maximumf %222, %223 : vector<8x74xf32>
    %225 = arith.maximumf %221, %224 : vector<8x74xf32>
    %c0_205 = arith.constant 0 : index
    %c2304_206 = arith.constant 2304 : index
    %226 = vector.load %arg16[%c0_205, %c2304_206] : memref<8x2378xf32, #tpu.memory_space<vmem>>, vector<8x74xf32>
    tpu.vector_store %arg16[%c0_205, %c2304_206], %225 {strides = array<i32>} : memref<8x2378xf32, #tpu.memory_space<vmem>>, vector<8x74xf32>,
    %c0_207 = arith.constant 0 : index
    %c0_208 = arith.constant 0 : index
    %227 = vector.load %arg16[%c0_207, %c0_208] : memref<8x2378xf32, #tpu.memory_space<vmem>>, vector<8x2114xf32>
    %c0_209 = arith.constant 0 : index
    %c0_210 = arith.constant 0 : index
    %228 = vector.load %arg14[%c0_209, %c0_210] : memref<200x2411xf32, #tpu.memory_space<vmem>>, vector<8x2114xf32>
    tpu.vector_store %arg14[%c0_209, %c0_210], %227 {strides = array<i32>} : memref<200x2411xf32, #tpu.memory_space<vmem>>, vector<8x2114xf32>,
    %c0_211 = arith.constant 0 : index
    %c2_212 = arith.constant 2 : index
    %229 = vector.load %arg16[%c0_211, %c2_212] : memref<8x2378xf32, #tpu.memory_space<vmem>>, vector<8x2114xf32>
    %c8_213 = arith.constant 8 : index
    %c0_214 = arith.constant 0 : index
    %230 = vector.load %arg14[%c8_213, %c0_214] : memref<200x2411xf32, #tpu.memory_space<vmem>>, vector<8x2114xf32>
    tpu.vector_store %arg14[%c8_213, %c0_214], %229 {strides = array<i32>} : memref<200x2411xf32, #tpu.memory_space<vmem>>, vector<8x2114xf32>,
    %c0_215 = arith.constant 0 : index
    %c4_216 = arith.constant 4 : index
    %231 = vector.load %arg16[%c0_215, %c4_216] : memref<8x2378xf32, #tpu.memory_space<vmem>>, vector<8x2114xf32>
    %c16_217 = arith.constant 16 : index
    %c0_218 = arith.constant 0 : index
    %232 = vector.load %arg14[%c16_217, %c0_218] : memref<200x2411xf32, #tpu.memory_space<vmem>>, vector<8x2114xf32>
    tpu.vector_store %arg14[%c16_217, %c0_218], %231 {strides = array<i32>} : memref<200x2411xf32, #tpu.memory_space<vmem>>, vector<8x2114xf32>,
    %c0_219 = arith.constant 0 : index
    %c6 = arith.constant 6 : index
    %233 = vector.load %arg16[%c0_219, %c6] : memref<8x2378xf32, #tpu.memory_space<vmem>>, vector<8x2114xf32>
    %c24_220 = arith.constant 24 : index
    %c0_221 = arith.constant 0 : index
    %234 = vector.load %arg14[%c24_220, %c0_221] : memref<200x2411xf32, #tpu.memory_space<vmem>>, vector<8x2114xf32>
    tpu.vector_store %arg14[%c24_220, %c0_221], %233 {strides = array<i32>} : memref<200x2411xf32, #tpu.memory_space<vmem>>, vector<8x2114xf32>,
    %c0_222 = arith.constant 0 : index
    %c8_223 = arith.constant 8 : index
    %235 = vector.load %arg16[%c0_222, %c8_223] : memref<8x2378xf32, #tpu.memory_space<vmem>>, vector<8x2114xf32>
    %c32_224 = arith.constant 32 : index
    %c0_225 = arith.constant 0 : index
    %236 = vector.load %arg14[%c32_224, %c0_225] : memref<200x2411xf32, #tpu.memory_space<vmem>>, vector<8x2114xf32>
    tpu.vector_store %arg14[%c32_224, %c0_225], %235 {strides = array<i32>} : memref<200x2411xf32, #tpu.memory_space<vmem>>, vector<8x2114xf32>,
    %c0_226 = arith.constant 0 : index
    %c64_227 = arith.constant 64 : index
    %237 = vector.load %arg16[%c0_226, %c64_227] : memref<8x2378xf32, #tpu.memory_space<vmem>>, vector<8x2114xf32>
    %c40_228 = arith.constant 40 : index
    %c0_229 = arith.constant 0 : index
    %238 = vector.load %arg14[%c40_228, %c0_229] : memref<200x2411xf32, #tpu.memory_space<vmem>>, vector<8x2114xf32>
    tpu.vector_store %arg14[%c40_228, %c0_229], %237 {strides = array<i32>} : memref<200x2411xf32, #tpu.memory_space<vmem>>, vector<8x2114xf32>,
    %c0_230 = arith.constant 0 : index
    %c66_231 = arith.constant 66 : index
    %239 = vector.load %arg16[%c0_230, %c66_231] : memref<8x2378xf32, #tpu.memory_space<vmem>>, vector<8x2114xf32>
    %c48_232 = arith.constant 48 : index
    %c0_233 = arith.constant 0 : index
    %240 = vector.load %arg14[%c48_232, %c0_233] : memref<200x2411xf32, #tpu.memory_space<vmem>>, vector<8x2114xf32>
    tpu.vector_store %arg14[%c48_232, %c0_233], %239 {strides = array<i32>} : memref<200x2411xf32, #tpu.memory_space<vmem>>, vector<8x2114xf32>,
    %c0_234 = arith.constant 0 : index
    %c68_235 = arith.constant 68 : index
    %241 = vector.load %arg16[%c0_234, %c68_235] : memref<8x2378xf32, #tpu.memory_space<vmem>>, vector<8x2114xf32>
    %c56_236 = arith.constant 56 : index
    %c0_237 = arith.constant 0 : index
    %242 = vector.load %arg14[%c56_236, %c0_237] : memref<200x2411xf32, #tpu.memory_space<vmem>>, vector<8x2114xf32>
    tpu.vector_store %arg14[%c56_236, %c0_237], %241 {strides = array<i32>} : memref<200x2411xf32, #tpu.memory_space<vmem>>, vector<8x2114xf32>,
    %c0_238 = arith.constant 0 : index
    %c70 = arith.constant 70 : index
    %243 = vector.load %arg16[%c0_238, %c70] : memref<8x2378xf32, #tpu.memory_space<vmem>>, vector<8x2114xf32>
    %c64_239 = arith.constant 64 : index
    %c0_240 = arith.constant 0 : index
    %244 = vector.load %arg14[%c64_239, %c0_240] : memref<200x2411xf32, #tpu.memory_space<vmem>>, vector<8x2114xf32>
    tpu.vector_store %arg14[%c64_239, %c0_240], %243 {strides = array<i32>} : memref<200x2411xf32, #tpu.memory_space<vmem>>, vector<8x2114xf32>,
    %c0_241 = arith.constant 0 : index
    %c72_242 = arith.constant 72 : index
    %245 = vector.load %arg16[%c0_241, %c72_242] : memref<8x2378xf32, #tpu.memory_space<vmem>>, vector<8x2114xf32>
    %c72_243 = arith.constant 72 : index
    %c0_244 = arith.constant 0 : index
    %246 = vector.load %arg14[%c72_243, %c0_244] : memref<200x2411xf32, #tpu.memory_space<vmem>>, vector<8x2114xf32>
    tpu.vector_store %arg14[%c72_243, %c0_244], %245 {strides = array<i32>} : memref<200x2411xf32, #tpu.memory_space<vmem>>, vector<8x2114xf32>,
    %c0_245 = arith.constant 0 : index
    %c128_246 = arith.constant 128 : index
    %247 = vector.load %arg16[%c0_245, %c128_246] : memref<8x2378xf32, #tpu.memory_space<vmem>>, vector<8x2114xf32>
    %c80_247 = arith.constant 80 : index
    %c0_248 = arith.constant 0 : index
    %248 = vector.load %arg14[%c80_247, %c0_248] : memref<200x2411xf32, #tpu.memory_space<vmem>>, vector<8x2114xf32>
    tpu.vector_store %arg14[%c80_247, %c0_248], %247 {strides = array<i32>} : memref<200x2411xf32, #tpu.memory_space<vmem>>, vector<8x2114xf32>,
    %c0_249 = arith.constant 0 : index
    %c130_250 = arith.constant 130 : index
    %249 = vector.load %arg16[%c0_249, %c130_250] : memref<8x2378xf32, #tpu.memory_space<vmem>>, vector<8x2114xf32>
    %c88_251 = arith.constant 88 : index
    %c0_252 = arith.constant 0 : index
    %250 = vector.load %arg14[%c88_251, %c0_252] : memref<200x2411xf32, #tpu.memory_space<vmem>>, vector<8x2114xf32>
    tpu.vector_store %arg14[%c88_251, %c0_252], %249 {strides = array<i32>} : memref<200x2411xf32, #tpu.memory_space<vmem>>, vector<8x2114xf32>,
    %c0_253 = arith.constant 0 : index
    %c132_254 = arith.constant 132 : index
    %251 = vector.load %arg16[%c0_253, %c132_254] : memref<8x2378xf32, #tpu.memory_space<vmem>>, vector<8x2114xf32>
    %c96_255 = arith.constant 96 : index
    %c0_256 = arith.constant 0 : index
    %252 = vector.load %arg14[%c96_255, %c0_256] : memref<200x2411xf32, #tpu.memory_space<vmem>>, vector<8x2114xf32>
    tpu.vector_store %arg14[%c96_255, %c0_256], %251 {strides = array<i32>} : memref<200x2411xf32, #tpu.memory_space<vmem>>, vector<8x2114xf32>,
    %c0_257 = arith.constant 0 : index
    %c134 = arith.constant 134 : index
    %253 = vector.load %arg16[%c0_257, %c134] : memref<8x2378xf32, #tpu.memory_space<vmem>>, vector<8x2114xf32>
    %c104_258 = arith.constant 104 : index
    %c0_259 = arith.constant 0 : index
    %254 = vector.load %arg14[%c104_258, %c0_259] : memref<200x2411xf32, #tpu.memory_space<vmem>>, vector<8x2114xf32>
    tpu.vector_store %arg14[%c104_258, %c0_259], %253 {strides = array<i32>} : memref<200x2411xf32, #tpu.memory_space<vmem>>, vector<8x2114xf32>,
    %c0_260 = arith.constant 0 : index
    %c136_261 = arith.constant 136 : index
    %255 = vector.load %arg16[%c0_260, %c136_261] : memref<8x2378xf32, #tpu.memory_space<vmem>>, vector<8x2114xf32>
    %c112_262 = arith.constant 112 : index
    %c0_263 = arith.constant 0 : index
    %256 = vector.load %arg14[%c112_262, %c0_263] : memref<200x2411xf32, #tpu.memory_space<vmem>>, vector<8x2114xf32>
    tpu.vector_store %arg14[%c112_262, %c0_263], %255 {strides = array<i32>} : memref<200x2411xf32, #tpu.memory_space<vmem>>, vector<8x2114xf32>,
    %c0_264 = arith.constant 0 : index
    %c192_265 = arith.constant 192 : index
    %257 = vector.load %arg16[%c0_264, %c192_265] : memref<8x2378xf32, #tpu.memory_space<vmem>>, vector<8x2114xf32>
    %c120_266 = arith.constant 120 : index
    %c0_267 = arith.constant 0 : index
    %258 = vector.load %arg14[%c120_266, %c0_267] : memref<200x2411xf32, #tpu.memory_space<vmem>>, vector<8x2114xf32>
    tpu.vector_store %arg14[%c120_266, %c0_267], %257 {strides = array<i32>} : memref<200x2411xf32, #tpu.memory_space<vmem>>, vector<8x2114xf32>,
    %c0_268 = arith.constant 0 : index
    %c194 = arith.constant 194 : index
    %259 = vector.load %arg16[%c0_268, %c194] : memref<8x2378xf32, #tpu.memory_space<vmem>>, vector<8x2114xf32>
    %c128_269 = arith.constant 128 : index
    %c0_270 = arith.constant 0 : index
    %260 = vector.load %arg14[%c128_269, %c0_270] : memref<200x2411xf32, #tpu.memory_space<vmem>>, vector<8x2114xf32>
    tpu.vector_store %arg14[%c128_269, %c0_270], %259 {strides = array<i32>} : memref<200x2411xf32, #tpu.memory_space<vmem>>, vector<8x2114xf32>,
    %c0_271 = arith.constant 0 : index
    %c196 = arith.constant 196 : index
    %261 = vector.load %arg16[%c0_271, %c196] : memref<8x2378xf32, #tpu.memory_space<vmem>>, vector<8x2114xf32>
    %c136_272 = arith.constant 136 : index
    %c0_273 = arith.constant 0 : index
    %262 = vector.load %arg14[%c136_272, %c0_273] : memref<200x2411xf32, #tpu.memory_space<vmem>>, vector<8x2114xf32>
    tpu.vector_store %arg14[%c136_272, %c0_273], %261 {strides = array<i32>} : memref<200x2411xf32, #tpu.memory_space<vmem>>, vector<8x2114xf32>,
    %c0_274 = arith.constant 0 : index
    %c198 = arith.constant 198 : index
    %263 = vector.load %arg16[%c0_274, %c198] : memref<8x2378xf32, #tpu.memory_space<vmem>>, vector<8x2114xf32>
    %c144_275 = arith.constant 144 : index
    %c0_276 = arith.constant 0 : index
    %264 = vector.load %arg14[%c144_275, %c0_276] : memref<200x2411xf32, #tpu.memory_space<vmem>>, vector<8x2114xf32>
    tpu.vector_store %arg14[%c144_275, %c0_276], %263 {strides = array<i32>} : memref<200x2411xf32, #tpu.memory_space<vmem>>, vector<8x2114xf32>,
    %c0_277 = arith.constant 0 : index
    %c200 = arith.constant 200 : index
    %265 = vector.load %arg16[%c0_277, %c200] : memref<8x2378xf32, #tpu.memory_space<vmem>>, vector<8x2114xf32>
    %c152_278 = arith.constant 152 : index
    %c0_279 = arith.constant 0 : index
    %266 = vector.load %arg14[%c152_278, %c0_279] : memref<200x2411xf32, #tpu.memory_space<vmem>>, vector<8x2114xf32>
    tpu.vector_store %arg14[%c152_278, %c0_279], %265 {strides = array<i32>} : memref<200x2411xf32, #tpu.memory_space<vmem>>, vector<8x2114xf32>,
    %c0_280 = arith.constant 0 : index
    %c256_281 = arith.constant 256 : index
    %267 = vector.load %arg16[%c0_280, %c256_281] : memref<8x2378xf32, #tpu.memory_space<vmem>>, vector<8x2114xf32>
    %c160_282 = arith.constant 160 : index
    %c0_283 = arith.constant 0 : index
    %268 = vector.load %arg14[%c160_282, %c0_283] : memref<200x2411xf32, #tpu.memory_space<vmem>>, vector<8x2114xf32>
    tpu.vector_store %arg14[%c160_282, %c0_283], %267 {strides = array<i32>} : memref<200x2411xf32, #tpu.memory_space<vmem>>, vector<8x2114xf32>,
    %c0_284 = arith.constant 0 : index
    %c258 = arith.constant 258 : index
    %269 = vector.load %arg16[%c0_284, %c258] : memref<8x2378xf32, #tpu.memory_space<vmem>>, vector<8x2114xf32>
    %c168_285 = arith.constant 168 : index
    %c0_286 = arith.constant 0 : index
    %270 = vector.load %arg14[%c168_285, %c0_286] : memref<200x2411xf32, #tpu.memory_space<vmem>>, vector<8x2114xf32>
    tpu.vector_store %arg14[%c168_285, %c0_286], %269 {strides = array<i32>} : memref<200x2411xf32, #tpu.memory_space<vmem>>, vector<8x2114xf32>,
    %c0_287 = arith.constant 0 : index
    %c260 = arith.constant 260 : index
    %271 = vector.load %arg16[%c0_287, %c260] : memref<8x2378xf32, #tpu.memory_space<vmem>>, vector<8x2114xf32>
    %c176_288 = arith.constant 176 : index
    %c0_289 = arith.constant 0 : index
    %272 = vector.load %arg14[%c176_288, %c0_289] : memref<200x2411xf32, #tpu.memory_space<vmem>>, vector<8x2114xf32>
    tpu.vector_store %arg14[%c176_288, %c0_289], %271 {strides = array<i32>} : memref<200x2411xf32, #tpu.memory_space<vmem>>, vector<8x2114xf32>,
    %c0_290 = arith.constant 0 : index
    %c262 = arith.constant 262 : index
    %273 = vector.load %arg16[%c0_290, %c262] : memref<8x2378xf32, #tpu.memory_space<vmem>>, vector<8x2114xf32>
    %c184_291 = arith.constant 184 : index
    %c0_292 = arith.constant 0 : index
    %274 = vector.load %arg14[%c184_291, %c0_292] : memref<200x2411xf32, #tpu.memory_space<vmem>>, vector<8x2114xf32>
    tpu.vector_store %arg14[%c184_291, %c0_292], %273 {strides = array<i32>} : memref<200x2411xf32, #tpu.memory_space<vmem>>, vector<8x2114xf32>,
    %c0_293 = arith.constant 0 : index
    %c264 = arith.constant 264 : index
    %275 = vector.load %arg16[%c0_293, %c264] : memref<8x2378xf32, #tpu.memory_space<vmem>>, vector<8x2114xf32>
    %c192_294 = arith.constant 192 : index
    %c0_295 = arith.constant 0 : index
    %276 = vector.load %arg14[%c192_294, %c0_295] : memref<200x2411xf32, #tpu.memory_space<vmem>>, vector<8x2114xf32>
    tpu.vector_store %arg14[%c192_294, %c0_295], %275 {strides = array<i32>} : memref<200x2411xf32, #tpu.memory_space<vmem>>, vector<8x2114xf32>,
    %c0_296 = arith.constant 0 : index
    %c0_297 = arith.constant 0 : index
    %277 = vector.load %arg4[%c0_296, %c0_297] : memref<16x200xf32, #tpu.memory_space<vmem>>, vector<16x200xf32>
    %c0_298 = arith.constant 0 : index
    %c0_299 = arith.constant 0 : index
    %278 = vector.load %arg5[%c0_298, %c0_299] : memref<16x1xf32, #tpu.memory_space<vmem>>, vector<16x1xf32>
    %c0_300 = arith.constant 0 : index
    %c0_301 = arith.constant 0 : index
    %279 = vector.load %arg14[%c0_300, %c0_301] : memref<200x2411xf32, #tpu.memory_space<vmem>>, vector<200x256xf32>
    %cst_302 = arith.constant dense<0.000000e+00> : vector<16x256xf32>
    %280 = tpu.matmul %277, %279, %cst_302 {dimension_numbers = #tpu.dot_dimension_numbers<[1], [0], [0], [1], [0, 0, 1, 1], [], []>} : vector<16x200xf32>, vector<200x256xf32>, vector<16x256xf32> -> vector<16x256xf32>
    %281 = vector.broadcast %278 : vector<16x1xf32> to vector<16x256xf32>
    %282 = arith.addf %280, %281 : vector<16x256xf32>
    %cst_303 = arith.constant 0.000000e+00 : f32
    %283 = vector.broadcast %cst_303 : f32 to vector<16x256xf32>
    %284 = arith.maximumf %282, %283 : vector<16x256xf32>
    %c0_304 = arith.constant 0 : index
    %c0_305 = arith.constant 0 : index
    %285 = vector.load %arg17[%c0_304, %c0_305] : memref<16x2114xf32, #tpu.memory_space<vmem>>, vector<16x256xf32>
    tpu.vector_store %arg17[%c0_304, %c0_305], %284 {strides = array<i32>} : memref<16x2114xf32, #tpu.memory_space<vmem>>, vector<16x256xf32>,
    %c0_306 = arith.constant 0 : index
    %c256_307 = arith.constant 256 : index
    %286 = vector.load %arg14[%c0_306, %c256_307] : memref<200x2411xf32, #tpu.memory_space<vmem>>, vector<200x256xf32>
    %cst_308 = arith.constant dense<0.000000e+00> : vector<16x256xf32>
    %287 = tpu.matmul %277, %286, %cst_308 {dimension_numbers = #tpu.dot_dimension_numbers<[1], [0], [0], [1], [0, 0, 1, 1], [], []>} : vector<16x200xf32>, vector<200x256xf32>, vector<16x256xf32> -> vector<16x256xf32>
    %288 = vector.broadcast %278 : vector<16x1xf32> to vector<16x256xf32>
    %289 = arith.addf %287, %288 : vector<16x256xf32>
    %cst_309 = arith.constant 0.000000e+00 : f32
    %290 = vector.broadcast %cst_309 : f32 to vector<16x256xf32>
    %291 = arith.maximumf %289, %290 : vector<16x256xf32>
    %c0_310 = arith.constant 0 : index
    %c256_311 = arith.constant 256 : index
    %292 = vector.load %arg17[%c0_310, %c256_311] : memref<16x2114xf32, #tpu.memory_space<vmem>>, vector<16x256xf32>
    tpu.vector_store %arg17[%c0_310, %c256_311], %291 {strides = array<i32>} : memref<16x2114xf32, #tpu.memory_space<vmem>>, vector<16x256xf32>,
    %c0_312 = arith.constant 0 : index
    %c512_313 = arith.constant 512 : index
    %293 = vector.load %arg14[%c0_312, %c512_313] : memref<200x2411xf32, #tpu.memory_space<vmem>>, vector<200x256xf32>
    %cst_314 = arith.constant dense<0.000000e+00> : vector<16x256xf32>
    %294 = tpu.matmul %277, %293, %cst_314 {dimension_numbers = #tpu.dot_dimension_numbers<[1], [0], [0], [1], [0, 0, 1, 1], [], []>} : vector<16x200xf32>, vector<200x256xf32>, vector<16x256xf32> -> vector<16x256xf32>
    %295 = vector.broadcast %278 : vector<16x1xf32> to vector<16x256xf32>
    %296 = arith.addf %294, %295 : vector<16x256xf32>
    %cst_315 = arith.constant 0.000000e+00 : f32
    %297 = vector.broadcast %cst_315 : f32 to vector<16x256xf32>
    %298 = arith.maximumf %296, %297 : vector<16x256xf32>
    %c0_316 = arith.constant 0 : index
    %c512_317 = arith.constant 512 : index
    %299 = vector.load %arg17[%c0_316, %c512_317] : memref<16x2114xf32, #tpu.memory_space<vmem>>, vector<16x256xf32>
    tpu.vector_store %arg17[%c0_316, %c512_317], %298 {strides = array<i32>} : memref<16x2114xf32, #tpu.memory_space<vmem>>, vector<16x256xf32>,
    %c0_318 = arith.constant 0 : index
    %c768_319 = arith.constant 768 : index
    %300 = vector.load %arg14[%c0_318, %c768_319] : memref<200x2411xf32, #tpu.memory_space<vmem>>, vector<200x256xf32>
    %cst_320 = arith.constant dense<0.000000e+00> : vector<16x256xf32>
    %301 = tpu.matmul %277, %300, %cst_320 {dimension_numbers = #tpu.dot_dimension_numbers<[1], [0], [0], [1], [0, 0, 1, 1], [], []>} : vector<16x200xf32>, vector<200x256xf32>, vector<16x256xf32> -> vector<16x256xf32>
    %302 = vector.broadcast %278 : vector<16x1xf32> to vector<16x256xf32>
    %303 = arith.addf %301, %302 : vector<16x256xf32>
    %cst_321 = arith.constant 0.000000e+00 : f32
    %304 = vector.broadcast %cst_321 : f32 to vector<16x256xf32>
    %305 = arith.maximumf %303, %304 : vector<16x256xf32>
    %c0_322 = arith.constant 0 : index
    %c768_323 = arith.constant 768 : index
    %306 = vector.load %arg17[%c0_322, %c768_323] : memref<16x2114xf32, #tpu.memory_space<vmem>>, vector<16x256xf32>
    tpu.vector_store %arg17[%c0_322, %c768_323], %305 {strides = array<i32>} : memref<16x2114xf32, #tpu.memory_space<vmem>>, vector<16x256xf32>,
    %c0_324 = arith.constant 0 : index
    %c1024_325 = arith.constant 1024 : index
    %307 = vector.load %arg14[%c0_324, %c1024_325] : memref<200x2411xf32, #tpu.memory_space<vmem>>, vector<200x256xf32>
    %cst_326 = arith.constant dense<0.000000e+00> : vector<16x256xf32>
    %308 = tpu.matmul %277, %307, %cst_326 {dimension_numbers = #tpu.dot_dimension_numbers<[1], [0], [0], [1], [0, 0, 1, 1], [], []>} : vector<16x200xf32>, vector<200x256xf32>, vector<16x256xf32> -> vector<16x256xf32>
    %309 = vector.broadcast %278 : vector<16x1xf32> to vector<16x256xf32>
    %310 = arith.addf %308, %309 : vector<16x256xf32>
    %cst_327 = arith.constant 0.000000e+00 : f32
    %311 = vector.broadcast %cst_327 : f32 to vector<16x256xf32>
    %312 = arith.maximumf %310, %311 : vector<16x256xf32>
    %c0_328 = arith.constant 0 : index
    %c1024_329 = arith.constant 1024 : index
    %313 = vector.load %arg17[%c0_328, %c1024_329] : memref<16x2114xf32, #tpu.memory_space<vmem>>, vector<16x256xf32>
    tpu.vector_store %arg17[%c0_328, %c1024_329], %312 {strides = array<i32>} : memref<16x2114xf32, #tpu.memory_space<vmem>>, vector<16x256xf32>,
    %c0_330 = arith.constant 0 : index
    %c1280_331 = arith.constant 1280 : index
    %314 = vector.load %arg14[%c0_330, %c1280_331] : memref<200x2411xf32, #tpu.memory_space<vmem>>, vector<200x256xf32>
    %cst_332 = arith.constant dense<0.000000e+00> : vector<16x256xf32>
    %315 = tpu.matmul %277, %314, %cst_332 {dimension_numbers = #tpu.dot_dimension_numbers<[1], [0], [0], [1], [0, 0, 1, 1], [], []>} : vector<16x200xf32>, vector<200x256xf32>, vector<16x256xf32> -> vector<16x256xf32>
    %316 = vector.broadcast %278 : vector<16x1xf32> to vector<16x256xf32>
    %317 = arith.addf %315, %316 : vector<16x256xf32>
    %cst_333 = arith.constant 0.000000e+00 : f32
    %318 = vector.broadcast %cst_333 : f32 to vector<16x256xf32>
    %319 = arith.maximumf %317, %318 : vector<16x256xf32>
    %c0_334 = arith.constant 0 : index
    %c1280_335 = arith.constant 1280 : index
    %320 = vector.load %arg17[%c0_334, %c1280_335] : memref<16x2114xf32, #tpu.memory_space<vmem>>, vector<16x256xf32>
    tpu.vector_store %arg17[%c0_334, %c1280_335], %319 {strides = array<i32>} : memref<16x2114xf32, #tpu.memory_space<vmem>>, vector<16x256xf32>,
    %c0_336 = arith.constant 0 : index
    %c1536_337 = arith.constant 1536 : index
    %321 = vector.load %arg14[%c0_336, %c1536_337] : memref<200x2411xf32, #tpu.memory_space<vmem>>, vector<200x256xf32>
    %cst_338 = arith.constant dense<0.000000e+00> : vector<16x256xf32>
    %322 = tpu.matmul %277, %321, %cst_338 {dimension_numbers = #tpu.dot_dimension_numbers<[1], [0], [0], [1], [0, 0, 1, 1], [], []>} : vector<16x200xf32>, vector<200x256xf32>, vector<16x256xf32> -> vector<16x256xf32>
    %323 = vector.broadcast %278 : vector<16x1xf32> to vector<16x256xf32>
    %324 = arith.addf %322, %323 : vector<16x256xf32>
    %cst_339 = arith.constant 0.000000e+00 : f32
    %325 = vector.broadcast %cst_339 : f32 to vector<16x256xf32>
    %326 = arith.maximumf %324, %325 : vector<16x256xf32>
    %c0_340 = arith.constant 0 : index
    %c1536_341 = arith.constant 1536 : index
    %327 = vector.load %arg17[%c0_340, %c1536_341] : memref<16x2114xf32, #tpu.memory_space<vmem>>, vector<16x256xf32>
    tpu.vector_store %arg17[%c0_340, %c1536_341], %326 {strides = array<i32>} : memref<16x2114xf32, #tpu.memory_space<vmem>>, vector<16x256xf32>,
    %c0_342 = arith.constant 0 : index
    %c1792_343 = arith.constant 1792 : index
    %328 = vector.load %arg14[%c0_342, %c1792_343] : memref<200x2411xf32, #tpu.memory_space<vmem>>, vector<200x256xf32>
    %cst_344 = arith.constant dense<0.000000e+00> : vector<16x256xf32>
    %329 = tpu.matmul %277, %328, %cst_344 {dimension_numbers = #tpu.dot_dimension_numbers<[1], [0], [0], [1], [0, 0, 1, 1], [], []>} : vector<16x200xf32>, vector<200x256xf32>, vector<16x256xf32> -> vector<16x256xf32>
    %330 = vector.broadcast %278 : vector<16x1xf32> to vector<16x256xf32>
    %331 = arith.addf %329, %330 : vector<16x256xf32>
    %cst_345 = arith.constant 0.000000e+00 : f32
    %332 = vector.broadcast %cst_345 : f32 to vector<16x256xf32>
    %333 = arith.maximumf %331, %332 : vector<16x256xf32>
    %c0_346 = arith.constant 0 : index
    %c1792_347 = arith.constant 1792 : index
    %334 = vector.load %arg17[%c0_346, %c1792_347] : memref<16x2114xf32, #tpu.memory_space<vmem>>, vector<16x256xf32>
    tpu.vector_store %arg17[%c0_346, %c1792_347], %333 {strides = array<i32>} : memref<16x2114xf32, #tpu.memory_space<vmem>>, vector<16x256xf32>,
    %c0_348 = arith.constant 0 : index
    %c2048_349 = arith.constant 2048 : index
    %335 = vector.load %arg14[%c0_348, %c2048_349] : memref<200x2411xf32, #tpu.memory_space<vmem>>, vector<200x66xf32>
    %cst_350 = arith.constant dense<0.000000e+00> : vector<16x66xf32>
    %336 = tpu.matmul %277, %335, %cst_350 {dimension_numbers = #tpu.dot_dimension_numbers<[1], [0], [0], [1], [0, 0, 1, 1], [], []>} : vector<16x200xf32>, vector<200x66xf32>, vector<16x66xf32> -> vector<16x66xf32>
    %337 = vector.broadcast %278 : vector<16x1xf32> to vector<16x66xf32>
    %338 = arith.addf %336, %337 : vector<16x66xf32>
    %cst_351 = arith.constant 0.000000e+00 : f32
    %339 = vector.broadcast %cst_351 : f32 to vector<16x66xf32>
    %340 = arith.maximumf %338, %339 : vector<16x66xf32>
    %c0_352 = arith.constant 0 : index
    %c2048_353 = arith.constant 2048 : index
    %341 = vector.load %arg17[%c0_352, %c2048_353] : memref<16x2114xf32, #tpu.memory_space<vmem>>, vector<16x66xf32>
    tpu.vector_store %arg17[%c0_352, %c2048_353], %340 {strides = array<i32>} : memref<16x2114xf32, #tpu.memory_space<vmem>>, vector<16x66xf32>,
    %c0_354 = arith.constant 0 : index
    %c0_355 = arith.constant 0 : index
    %342 = vector.load %arg17[%c0_354, %c0_355] : memref<16x2114xf32, #tpu.memory_space<vmem>>, vector<16x640xf32>
    %c0_356 = arith.constant 0 : index
    %c2_357 = arith.constant 2 : index
    %343 = vector.load %arg17[%c0_356, %c2_357] : memref<16x2114xf32, #tpu.memory_space<vmem>>, vector<16x640xf32>
    %344 = arith.maximumf %342, %343 : vector<16x640xf32>
    %c0_358 = arith.constant 0 : index
    %c64_359 = arith.constant 64 : index
    %345 = vector.load %arg17[%c0_358, %c64_359] : memref<16x2114xf32, #tpu.memory_space<vmem>>, vector<16x640xf32>
    %c0_360 = arith.constant 0 : index
    %c66_361 = arith.constant 66 : index
    %346 = vector.load %arg17[%c0_360, %c66_361] : memref<16x2114xf32, #tpu.memory_space<vmem>>, vector<16x640xf32>
    %347 = arith.maximumf %345, %346 : vector<16x640xf32>
    %348 = arith.maximumf %344, %347 : vector<16x640xf32>
    %c0_362 = arith.constant 0 : index
    %c0_363 = arith.constant 0 : index
    %c0_364 = arith.constant 0 : index
    %349 = vector.load %arg18[%c0_362, %c0_363, %c0_364] : memref<2x16x640xf32, #tpu.memory_space<vmem>>, vector<1x16x640xf32>
    %350 = vector.shape_cast %349 : vector<1x16x640xf32> to vector<16x640xf32>
    %351 = vector.shape_cast %348 : vector<16x640xf32> to vector<1x16x640xf32>
    tpu.vector_store %arg18[%c0_362, %c0_363, %c0_364], %351 {strides = array<i32>} : memref<2x16x640xf32, #tpu.memory_space<vmem>>, vector<1x16x640xf32>,
    %c0_365 = arith.constant 0 : index
    %c1024_366 = arith.constant 1024 : index
    %352 = vector.load %arg17[%c0_365, %c1024_366] : memref<16x2114xf32, #tpu.memory_space<vmem>>, vector<16x640xf32>
    %c0_367 = arith.constant 0 : index
    %c1026 = arith.constant 1026 : index
    %353 = vector.load %arg17[%c0_367, %c1026] : memref<16x2114xf32, #tpu.memory_space<vmem>>, vector<16x640xf32>
    %354 = arith.maximumf %352, %353 : vector<16x640xf32>
    %c0_368 = arith.constant 0 : index
    %c1088 = arith.constant 1088 : index
    %355 = vector.load %arg17[%c0_368, %c1088] : memref<16x2114xf32, #tpu.memory_space<vmem>>, vector<16x640xf32>
    %c0_369 = arith.constant 0 : index
    %c1090 = arith.constant 1090 : index
    %356 = vector.load %arg17[%c0_369, %c1090] : memref<16x2114xf32, #tpu.memory_space<vmem>>, vector<16x640xf32>
    %357 = arith.maximumf %355, %356 : vector<16x640xf32>
    %358 = arith.maximumf %354, %357 : vector<16x640xf32>
    %c1_370 = arith.constant 1 : index
    %c0_371 = arith.constant 0 : index
    %c0_372 = arith.constant 0 : index
    %359 = vector.load %arg18[%c1_370, %c0_371, %c0_372] : memref<2x16x640xf32, #tpu.memory_space<vmem>>, vector<1x16x640xf32>
    %360 = vector.shape_cast %359 : vector<1x16x640xf32> to vector<16x640xf32>
    %361 = vector.shape_cast %358 : vector<16x640xf32> to vector<1x16x640xf32>
    tpu.vector_store %arg18[%c1_370, %c0_371, %c0_372], %361 {strides = array<i32>} : memref<2x16x640xf32, #tpu.memory_space<vmem>>, vector<1x16x640xf32>,
    %c0_373 = arith.constant 0 : index
    %c0_374 = arith.constant 0 : index
    %c0_375 = arith.constant 0 : index
    %362 = vector.load %arg18[%c0_373, %c0_374, %c0_375] : memref<2x16x640xf32, #tpu.memory_space<vmem>>, vector<2x16x640xf32>
    %363 = vector.shape_cast %362 : vector<2x16x640xf32> to vector<32x640xf32>
    %c0_376 = arith.constant 0 : index
    %c0_377 = arith.constant 0 : index
    %364 = vector.load %arg6[%c0_376, %c0_377] : memref<640x32xf32, #tpu.memory_space<vmem>>, vector<640x32xf32>
    %cst_378 = arith.constant dense<0.000000e+00> : vector<32x32xf32>
    %365 = tpu.matmul %363, %364, %cst_378 {dimension_numbers = #tpu.dot_dimension_numbers<[1], [0], [0], [1], [0, 0, 1, 1], [], []>} : vector<32x640xf32>, vector<640x32xf32>, vector<32x32xf32> -> vector<32x32xf32>
    %366 = vector.shape_cast %365 : vector<32x32xf32> to vector<2x16x32xf32>
    %c0_379 = arith.constant 0 : index
    %c0_380 = arith.constant 0 : index
    %367 = vector.load %arg8[%c0_379, %c0_380] : memref<1x120xf32, #tpu.memory_space<vmem>>, vector<1x120xf32>
    %368 = vector.extract_strided_slice %366 {offsets = [0, 0, 0], sizes = [2, 1, 32], strides = [1, 1, 1]} : vector<2x16x32xf32> to vector<2x1x32xf32>
    %369 = vector.shape_cast %368 : vector<2x1x32xf32> to vector<2x32xf32>
    %c0_381 = arith.constant 0 : index
    %c0_382 = arith.constant 0 : index
    %c0_383 = arith.constant 0 : index
    %370 = vector.load %arg7[%c0_381, %c0_382, %c0_383] : memref<16x32x120xf32, #tpu.memory_space<vmem>>, vector<1x32x120xf32>
    %371 = vector.shape_cast %370 : vector<1x32x120xf32> to vector<32x120xf32>
    %cst_384 = arith.constant dense<0.000000e+00> : vector<2x120xf32>
    %372 = tpu.matmul %369, %371, %cst_384 {dimension_numbers = #tpu.dot_dimension_numbers<[1], [0], [0], [1], [0, 0, 1, 1], [], []>} : vector<2x32xf32>, vector<32x120xf32>, vector<2x120xf32> -> vector<2x120xf32>
    %373 = vector.broadcast %367 : vector<1x120xf32> to vector<2x120xf32>
    %374 = arith.addf %373, %372 : vector<2x120xf32>
    %375 = vector.extract_strided_slice %366 {offsets = [0, 1, 0], sizes = [2, 1, 32], strides = [1, 1, 1]} : vector<2x16x32xf32> to vector<2x1x32xf32>
    %376 = vector.shape_cast %375 : vector<2x1x32xf32> to vector<2x32xf32>
    %c1_385 = arith.constant 1 : index
    %c0_386 = arith.constant 0 : index
    %c0_387 = arith.constant 0 : index
    %377 = vector.load %arg7[%c1_385, %c0_386, %c0_387] : memref<16x32x120xf32, #tpu.memory_space<vmem>>, vector<1x32x120xf32>
    %378 = vector.shape_cast %377 : vector<1x32x120xf32> to vector<32x120xf32>
    %cst_388 = arith.constant dense<0.000000e+00> : vector<2x120xf32>
    %379 = tpu.matmul %376, %378, %cst_388 {dimension_numbers = #tpu.dot_dimension_numbers<[1], [0], [0], [1], [0, 0, 1, 1], [], []>} : vector<2x32xf32>, vector<32x120xf32>, vector<2x120xf32> -> vector<2x120xf32>
    %380 = arith.addf %374, %379 : vector<2x120xf32>
    %381 = vector.extract_strided_slice %366 {offsets = [0, 2, 0], sizes = [2, 1, 32], strides = [1, 1, 1]} : vector<2x16x32xf32> to vector<2x1x32xf32>
    %382 = vector.shape_cast %381 : vector<2x1x32xf32> to vector<2x32xf32>
    %c2_389 = arith.constant 2 : index
    %c0_390 = arith.constant 0 : index
    %c0_391 = arith.constant 0 : index
    %383 = vector.load %arg7[%c2_389, %c0_390, %c0_391] : memref<16x32x120xf32, #tpu.memory_space<vmem>>, vector<1x32x120xf32>
    %384 = vector.shape_cast %383 : vector<1x32x120xf32> to vector<32x120xf32>
    %cst_392 = arith.constant dense<0.000000e+00> : vector<2x120xf32>
    %385 = tpu.matmul %382, %384, %cst_392 {dimension_numbers = #tpu.dot_dimension_numbers<[1], [0], [0], [1], [0, 0, 1, 1], [], []>} : vector<2x32xf32>, vector<32x120xf32>, vector<2x120xf32> -> vector<2x120xf32>
    %386 = arith.addf %380, %385 : vector<2x120xf32>
    %387 = vector.extract_strided_slice %366 {offsets = [0, 3, 0], sizes = [2, 1, 32], strides = [1, 1, 1]} : vector<2x16x32xf32> to vector<2x1x32xf32>
    %388 = vector.shape_cast %387 : vector<2x1x32xf32> to vector<2x32xf32>
    %c3_393 = arith.constant 3 : index
    %c0_394 = arith.constant 0 : index
    %c0_395 = arith.constant 0 : index
    %389 = vector.load %arg7[%c3_393, %c0_394, %c0_395] : memref<16x32x120xf32, #tpu.memory_space<vmem>>, vector<1x32x120xf32>
    %390 = vector.shape_cast %389 : vector<1x32x120xf32> to vector<32x120xf32>
    %cst_396 = arith.constant dense<0.000000e+00> : vector<2x120xf32>
    %391 = tpu.matmul %388, %390, %cst_396 {dimension_numbers = #tpu.dot_dimension_numbers<[1], [0], [0], [1], [0, 0, 1, 1], [], []>} : vector<2x32xf32>, vector<32x120xf32>, vector<2x120xf32> -> vector<2x120xf32>
    %392 = arith.addf %386, %391 : vector<2x120xf32>
    %393 = vector.extract_strided_slice %366 {offsets = [0, 4, 0], sizes = [2, 1, 32], strides = [1, 1, 1]} : vector<2x16x32xf32> to vector<2x1x32xf32>
    %394 = vector.shape_cast %393 : vector<2x1x32xf32> to vector<2x32xf32>
    %c4_397 = arith.constant 4 : index
    %c0_398 = arith.constant 0 : index
    %c0_399 = arith.constant 0 : index
    %395 = vector.load %arg7[%c4_397, %c0_398, %c0_399] : memref<16x32x120xf32, #tpu.memory_space<vmem>>, vector<1x32x120xf32>
    %396 = vector.shape_cast %395 : vector<1x32x120xf32> to vector<32x120xf32>
    %cst_400 = arith.constant dense<0.000000e+00> : vector<2x120xf32>
    %397 = tpu.matmul %394, %396, %cst_400 {dimension_numbers = #tpu.dot_dimension_numbers<[1], [0], [0], [1], [0, 0, 1, 1], [], []>} : vector<2x32xf32>, vector<32x120xf32>, vector<2x120xf32> -> vector<2x120xf32>
    %398 = arith.addf %392, %397 : vector<2x120xf32>
    %399 = vector.extract_strided_slice %366 {offsets = [0, 5, 0], sizes = [2, 1, 32], strides = [1, 1, 1]} : vector<2x16x32xf32> to vector<2x1x32xf32>
    %400 = vector.shape_cast %399 : vector<2x1x32xf32> to vector<2x32xf32>
    %c5 = arith.constant 5 : index
    %c0_401 = arith.constant 0 : index
    %c0_402 = arith.constant 0 : index
    %401 = vector.load %arg7[%c5, %c0_401, %c0_402] : memref<16x32x120xf32, #tpu.memory_space<vmem>>, vector<1x32x120xf32>
    %402 = vector.shape_cast %401 : vector<1x32x120xf32> to vector<32x120xf32>
    %cst_403 = arith.constant dense<0.000000e+00> : vector<2x120xf32>
    %403 = tpu.matmul %400, %402, %cst_403 {dimension_numbers = #tpu.dot_dimension_numbers<[1], [0], [0], [1], [0, 0, 1, 1], [], []>} : vector<2x32xf32>, vector<32x120xf32>, vector<2x120xf32> -> vector<2x120xf32>
    %404 = arith.addf %398, %403 : vector<2x120xf32>
    %405 = vector.extract_strided_slice %366 {offsets = [0, 6, 0], sizes = [2, 1, 32], strides = [1, 1, 1]} : vector<2x16x32xf32> to vector<2x1x32xf32>
    %406 = vector.shape_cast %405 : vector<2x1x32xf32> to vector<2x32xf32>
    %c6_404 = arith.constant 6 : index
    %c0_405 = arith.constant 0 : index
    %c0_406 = arith.constant 0 : index
    %407 = vector.load %arg7[%c6_404, %c0_405, %c0_406] : memref<16x32x120xf32, #tpu.memory_space<vmem>>, vector<1x32x120xf32>
    %408 = vector.shape_cast %407 : vector<1x32x120xf32> to vector<32x120xf32>
    %cst_407 = arith.constant dense<0.000000e+00> : vector<2x120xf32>
    %409 = tpu.matmul %406, %408, %cst_407 {dimension_numbers = #tpu.dot_dimension_numbers<[1], [0], [0], [1], [0, 0, 1, 1], [], []>} : vector<2x32xf32>, vector<32x120xf32>, vector<2x120xf32> -> vector<2x120xf32>
    %410 = arith.addf %404, %409 : vector<2x120xf32>
    %411 = vector.extract_strided_slice %366 {offsets = [0, 7, 0], sizes = [2, 1, 32], strides = [1, 1, 1]} : vector<2x16x32xf32> to vector<2x1x32xf32>
    %412 = vector.shape_cast %411 : vector<2x1x32xf32> to vector<2x32xf32>
    %c7 = arith.constant 7 : index
    %c0_408 = arith.constant 0 : index
    %c0_409 = arith.constant 0 : index
    %413 = vector.load %arg7[%c7, %c0_408, %c0_409] : memref<16x32x120xf32, #tpu.memory_space<vmem>>, vector<1x32x120xf32>
    %414 = vector.shape_cast %413 : vector<1x32x120xf32> to vector<32x120xf32>
    %cst_410 = arith.constant dense<0.000000e+00> : vector<2x120xf32>
    %415 = tpu.matmul %412, %414, %cst_410 {dimension_numbers = #tpu.dot_dimension_numbers<[1], [0], [0], [1], [0, 0, 1, 1], [], []>} : vector<2x32xf32>, vector<32x120xf32>, vector<2x120xf32> -> vector<2x120xf32>
    %416 = arith.addf %410, %415 : vector<2x120xf32>
    %417 = vector.extract_strided_slice %366 {offsets = [0, 8, 0], sizes = [2, 1, 32], strides = [1, 1, 1]} : vector<2x16x32xf32> to vector<2x1x32xf32>
    %418 = vector.shape_cast %417 : vector<2x1x32xf32> to vector<2x32xf32>
    %c8_411 = arith.constant 8 : index
    %c0_412 = arith.constant 0 : index
    %c0_413 = arith.constant 0 : index
    %419 = vector.load %arg7[%c8_411, %c0_412, %c0_413] : memref<16x32x120xf32, #tpu.memory_space<vmem>>, vector<1x32x120xf32>
    %420 = vector.shape_cast %419 : vector<1x32x120xf32> to vector<32x120xf32>
    %cst_414 = arith.constant dense<0.000000e+00> : vector<2x120xf32>
    %421 = tpu.matmul %418, %420, %cst_414 {dimension_numbers = #tpu.dot_dimension_numbers<[1], [0], [0], [1], [0, 0, 1, 1], [], []>} : vector<2x32xf32>, vector<32x120xf32>, vector<2x120xf32> -> vector<2x120xf32>
    %422 = arith.addf %416, %421 : vector<2x120xf32>
    %423 = vector.extract_strided_slice %366 {offsets = [0, 9, 0], sizes = [2, 1, 32], strides = [1, 1, 1]} : vector<2x16x32xf32> to vector<2x1x32xf32>
    %424 = vector.shape_cast %423 : vector<2x1x32xf32> to vector<2x32xf32>
    %c9 = arith.constant 9 : index
    %c0_415 = arith.constant 0 : index
    %c0_416 = arith.constant 0 : index
    %425 = vector.load %arg7[%c9, %c0_415, %c0_416] : memref<16x32x120xf32, #tpu.memory_space<vmem>>, vector<1x32x120xf32>
    %426 = vector.shape_cast %425 : vector<1x32x120xf32> to vector<32x120xf32>
    %cst_417 = arith.constant dense<0.000000e+00> : vector<2x120xf32>
    %427 = tpu.matmul %424, %426, %cst_417 {dimension_numbers = #tpu.dot_dimension_numbers<[1], [0], [0], [1], [0, 0, 1, 1], [], []>} : vector<2x32xf32>, vector<32x120xf32>, vector<2x120xf32> -> vector<2x120xf32>
    %428 = arith.addf %422, %427 : vector<2x120xf32>
    %429 = vector.extract_strided_slice %366 {offsets = [0, 10, 0], sizes = [2, 1, 32], strides = [1, 1, 1]} : vector<2x16x32xf32> to vector<2x1x32xf32>
    %430 = vector.shape_cast %429 : vector<2x1x32xf32> to vector<2x32xf32>
    %c10 = arith.constant 10 : index
    %c0_418 = arith.constant 0 : index
    %c0_419 = arith.constant 0 : index
    %431 = vector.load %arg7[%c10, %c0_418, %c0_419] : memref<16x32x120xf32, #tpu.memory_space<vmem>>, vector<1x32x120xf32>
    %432 = vector.shape_cast %431 : vector<1x32x120xf32> to vector<32x120xf32>
    %cst_420 = arith.constant dense<0.000000e+00> : vector<2x120xf32>
    %433 = tpu.matmul %430, %432, %cst_420 {dimension_numbers = #tpu.dot_dimension_numbers<[1], [0], [0], [1], [0, 0, 1, 1], [], []>} : vector<2x32xf32>, vector<32x120xf32>, vector<2x120xf32> -> vector<2x120xf32>
    %434 = arith.addf %428, %433 : vector<2x120xf32>
    %435 = vector.extract_strided_slice %366 {offsets = [0, 11, 0], sizes = [2, 1, 32], strides = [1, 1, 1]} : vector<2x16x32xf32> to vector<2x1x32xf32>
    %436 = vector.shape_cast %435 : vector<2x1x32xf32> to vector<2x32xf32>
    %c11 = arith.constant 11 : index
    %c0_421 = arith.constant 0 : index
    %c0_422 = arith.constant 0 : index
    %437 = vector.load %arg7[%c11, %c0_421, %c0_422] : memref<16x32x120xf32, #tpu.memory_space<vmem>>, vector<1x32x120xf32>
    %438 = vector.shape_cast %437 : vector<1x32x120xf32> to vector<32x120xf32>
    %cst_423 = arith.constant dense<0.000000e+00> : vector<2x120xf32>
    %439 = tpu.matmul %436, %438, %cst_423 {dimension_numbers = #tpu.dot_dimension_numbers<[1], [0], [0], [1], [0, 0, 1, 1], [], []>} : vector<2x32xf32>, vector<32x120xf32>, vector<2x120xf32> -> vector<2x120xf32>
    %440 = arith.addf %434, %439 : vector<2x120xf32>
    %441 = vector.extract_strided_slice %366 {offsets = [0, 12, 0], sizes = [2, 1, 32], strides = [1, 1, 1]} : vector<2x16x32xf32> to vector<2x1x32xf32>
    %442 = vector.shape_cast %441 : vector<2x1x32xf32> to vector<2x32xf32>
    %c12 = arith.constant 12 : index
    %c0_424 = arith.constant 0 : index
    %c0_425 = arith.constant 0 : index
    %443 = vector.load %arg7[%c12, %c0_424, %c0_425] : memref<16x32x120xf32, #tpu.memory_space<vmem>>, vector<1x32x120xf32>
    %444 = vector.shape_cast %443 : vector<1x32x120xf32> to vector<32x120xf32>
    %cst_426 = arith.constant dense<0.000000e+00> : vector<2x120xf32>
    %445 = tpu.matmul %442, %444, %cst_426 {dimension_numbers = #tpu.dot_dimension_numbers<[1], [0], [0], [1], [0, 0, 1, 1], [], []>} : vector<2x32xf32>, vector<32x120xf32>, vector<2x120xf32> -> vector<2x120xf32>
    %446 = arith.addf %440, %445 : vector<2x120xf32>
    %447 = vector.extract_strided_slice %366 {offsets = [0, 13, 0], sizes = [2, 1, 32], strides = [1, 1, 1]} : vector<2x16x32xf32> to vector<2x1x32xf32>
    %448 = vector.shape_cast %447 : vector<2x1x32xf32> to vector<2x32xf32>
    %c13 = arith.constant 13 : index
    %c0_427 = arith.constant 0 : index
    %c0_428 = arith.constant 0 : index
    %449 = vector.load %arg7[%c13, %c0_427, %c0_428] : memref<16x32x120xf32, #tpu.memory_space<vmem>>, vector<1x32x120xf32>
    %450 = vector.shape_cast %449 : vector<1x32x120xf32> to vector<32x120xf32>
    %cst_429 = arith.constant dense<0.000000e+00> : vector<2x120xf32>
    %451 = tpu.matmul %448, %450, %cst_429 {dimension_numbers = #tpu.dot_dimension_numbers<[1], [0], [0], [1], [0, 0, 1, 1], [], []>} : vector<2x32xf32>, vector<32x120xf32>, vector<2x120xf32> -> vector<2x120xf32>
    %452 = arith.addf %446, %451 : vector<2x120xf32>
    %453 = vector.extract_strided_slice %366 {offsets = [0, 14, 0], sizes = [2, 1, 32], strides = [1, 1, 1]} : vector<2x16x32xf32> to vector<2x1x32xf32>
    %454 = vector.shape_cast %453 : vector<2x1x32xf32> to vector<2x32xf32>
    %c14 = arith.constant 14 : index
    %c0_430 = arith.constant 0 : index
    %c0_431 = arith.constant 0 : index
    %455 = vector.load %arg7[%c14, %c0_430, %c0_431] : memref<16x32x120xf32, #tpu.memory_space<vmem>>, vector<1x32x120xf32>
    %456 = vector.shape_cast %455 : vector<1x32x120xf32> to vector<32x120xf32>
    %cst_432 = arith.constant dense<0.000000e+00> : vector<2x120xf32>
    %457 = tpu.matmul %454, %456, %cst_432 {dimension_numbers = #tpu.dot_dimension_numbers<[1], [0], [0], [1], [0, 0, 1, 1], [], []>} : vector<2x32xf32>, vector<32x120xf32>, vector<2x120xf32> -> vector<2x120xf32>
    %458 = arith.addf %452, %457 : vector<2x120xf32>
    %459 = vector.extract_strided_slice %366 {offsets = [0, 15, 0], sizes = [2, 1, 32], strides = [1, 1, 1]} : vector<2x16x32xf32> to vector<2x1x32xf32>
    %460 = vector.shape_cast %459 : vector<2x1x32xf32> to vector<2x32xf32>
    %c15 = arith.constant 15 : index
    %c0_433 = arith.constant 0 : index
    %c0_434 = arith.constant 0 : index
    %461 = vector.load %arg7[%c15, %c0_433, %c0_434] : memref<16x32x120xf32, #tpu.memory_space<vmem>>, vector<1x32x120xf32>
    %462 = vector.shape_cast %461 : vector<1x32x120xf32> to vector<32x120xf32>
    %cst_435 = arith.constant dense<0.000000e+00> : vector<2x120xf32>
    %463 = tpu.matmul %460, %462, %cst_435 {dimension_numbers = #tpu.dot_dimension_numbers<[1], [0], [0], [1], [0, 0, 1, 1], [], []>} : vector<2x32xf32>, vector<32x120xf32>, vector<2x120xf32> -> vector<2x120xf32>
    %464 = arith.addf %458, %463 : vector<2x120xf32>
    %cst_436 = arith.constant 0.000000e+00 : f32
    %465 = vector.broadcast %cst_436 : f32 to vector<2x120xf32>
    %466 = arith.maximumf %464, %465 : vector<2x120xf32>
    %c0_437 = arith.constant 0 : index
    %c0_438 = arith.constant 0 : index
    %467 = vector.load %arg9[%c0_437, %c0_438] : memref<120x84xf32, #tpu.memory_space<vmem>>, vector<120x84xf32>
    %cst_439 = arith.constant dense<0.000000e+00> : vector<2x84xf32>
    %468 = tpu.matmul %466, %467, %cst_439 {dimension_numbers = #tpu.dot_dimension_numbers<[1], [0], [0], [1], [0, 0, 1, 1], [], []>} : vector<2x120xf32>, vector<120x84xf32>, vector<2x84xf32> -> vector<2x84xf32>
    %c0_440 = arith.constant 0 : index
    %c0_441 = arith.constant 0 : index
    %469 = vector.load %arg10[%c0_440, %c0_441] : memref<1x84xf32, #tpu.memory_space<vmem>>, vector<1x84xf32>
    %470 = vector.broadcast %469 : vector<1x84xf32> to vector<2x84xf32>
    %471 = arith.addf %468, %470 : vector<2x84xf32>
    %cst_442 = arith.constant 0.000000e+00 : f32
    %472 = vector.broadcast %cst_442 : f32 to vector<2x84xf32>
    %473 = arith.maximumf %471, %472 : vector<2x84xf32>
    %c0_443 = arith.constant 0 : index
    %c0_444 = arith.constant 0 : index
    %474 = vector.load %arg11[%c0_443, %c0_444] : memref<84x10xf32, #tpu.memory_space<vmem>>, vector<84x10xf32>
    %cst_445 = arith.constant dense<0.000000e+00> : vector<2x10xf32>
    %475 = tpu.matmul %473, %474, %cst_445 {dimension_numbers = #tpu.dot_dimension_numbers<[1], [0], [0], [1], [0, 0, 1, 1], [], []>} : vector<2x84xf32>, vector<84x10xf32>, vector<2x10xf32> -> vector<2x10xf32>
    %c0_446 = arith.constant 0 : index
    %c0_447 = arith.constant 0 : index
    %476 = vector.load %arg12[%c0_446, %c0_447] : memref<1x10xf32, #tpu.memory_space<vmem>>, vector<1x10xf32>
    %477 = vector.broadcast %476 : vector<1x10xf32> to vector<2x10xf32>
    %478 = arith.addf %475, %477 : vector<2x10xf32>
    %c0_448 = arith.constant 0 : index
    %c0_449 = arith.constant 0 : index
    %c0_450 = arith.constant 0 : index
    %479 = vector.load %arg13[%c0_448, %c0_449, %c0_450] : memref<1x2x10xf32, #tpu.memory_space<vmem>>, vector<1x2x10xf32>
    %480 = vector.shape_cast %479 : vector<1x2x10xf32> to vector<2x10xf32>
    %481 = vector.shape_cast %478 : vector<2x10xf32> to vector<1x2x10xf32>
    tpu.vector_store %arg13[%c0_448, %c0_449, %c0_450], %481 {strides = array<i32>} : memref<1x2x10xf32, #tpu.memory_space<vmem>>, vector<1x2x10xf32>,
    return
  }
  func.func @transform_0(%arg0: i32) -> (i32, i32, i32) {
    %c0_i32 = arith.constant 0 : i32
    %c0_i32_0 = arith.constant 0 : i32
    %c0_i32_1 = arith.constant 0 : i32
    return %arg0, %c0_i32, %c0_i32_0 : i32, i32, i32
  }
  func.func @transform_1(%arg0: i32) -> (i32, i32) {
    %c0_i32 = arith.constant 0 : i32
    %c0_i32_0 = arith.constant 0 : i32
    %c0_i32_1 = arith.constant 0 : i32
    return %c0_i32, %c0_i32_0 : i32, i32
  }
  func.func @transform_2(%arg0: i32) -> (i32, i32) {
    %c0_i32 = arith.constant 0 : i32
    %c0_i32_0 = arith.constant 0 : i32
    %c0_i32_1 = arith.constant 0 : i32
    return %c0_i32, %c0_i32_0 : i32, i32
  }
  func.func @transform_3(%arg0: i32) -> (i32, i32) {
    %c0_i32 = arith.constant 0 : i32
    %c0_i32_0 = arith.constant 0 : i32
    %c0_i32_1 = arith.constant 0 : i32
    return %c0_i32, %c0_i32_0 : i32, i32
  }
  func.func @transform_4(%arg0: i32) -> (i32, i32) {
    %c0_i32 = arith.constant 0 : i32
    %c0_i32_0 = arith.constant 0 : i32
    %c0_i32_1 = arith.constant 0 : i32
    return %c0_i32, %c0_i32_0 : i32, i32
  }
  func.func @transform_5(%arg0: i32) -> (i32, i32) {
    %c0_i32 = arith.constant 0 : i32
    %c0_i32_0 = arith.constant 0 : i32
    %c0_i32_1 = arith.constant 0 : i32
    return %c0_i32, %c0_i32_0 : i32, i32
  }
  func.func @transform_6(%arg0: i32) -> (i32, i32, i32) {
    %c0_i32 = arith.constant 0 : i32
    %c0_i32_0 = arith.constant 0 : i32
    %c0_i32_1 = arith.constant 0 : i32
    %c0_i32_2 = arith.constant 0 : i32
    return %c0_i32, %c0_i32_0, %c0_i32_1 : i32, i32, i32
  }
  func.func @transform_7(%arg0: i32) -> (i32, i32) {
    %c0_i32 = arith.constant 0 : i32
    %c0_i32_0 = arith.constant 0 : i32
    %c0_i32_1 = arith.constant 0 : i32
    return %c0_i32, %c0_i32_0 : i32, i32
  }
  func.func @transform_8(%arg0: i32) -> (i32, i32) {
    %c0_i32 = arith.constant 0 : i32
    %c0_i32_0 = arith.constant 0 : i32
    %c0_i32_1 = arith.constant 0 : i32
    return %c0_i32, %c0_i32_0 : i32, i32
  }
  func.func @transform_9(%arg0: i32) -> (i32, i32) {
    %c0_i32 = arith.constant 0 : i32
    %c0_i32_0 = arith.constant 0 : i32
    %c0_i32_1 = arith.constant 0 : i32
    return %c0_i32, %c0_i32_0 : i32, i32
  }
  func.func @transform_10(%arg0: i32) -> (i32, i32) {
    %c0_i32 = arith.constant 0 : i32
    %c0_i32_0 = arith.constant 0 : i32
    %c0_i32_1 = arith.constant 0 : i32
    return %c0_i32, %c0_i32_0 : i32, i32
  }
  func.func @transform_11(%arg0: i32) -> (i32, i32) {
    %c0_i32 = arith.constant 0 : i32
    %c0_i32_0 = arith.constant 0 : i32
    %c0_i32_1 = arith.constant 0 : i32
    return %c0_i32, %c0_i32_0 : i32, i32
  }
  func.func @transform_12(%arg0: i32) -> (i32, i32, i32) {
    %c0_i32 = arith.constant 0 : i32
    %c0_i32_0 = arith.constant 0 : i32
    %c0_i32_1 = arith.constant 0 : i32
    return %arg0, %c0_i32, %c0_i32_0 : i32, i32, i32
  }
}

</mosaic_0001>

<bundles_post_ra>
// kernel: cnn_maxpool_forward.1
= control target key start
LH: loop header
LB: loop body
LE: loop exit
PB: predicated region body
PF: predicated region fallthrough
CT: control target
= control target key end

     0   :  { %s19355_s0 = inlined_call_operand.vmem [shape: f32[2,8,2543], index: 0, kind: input, shape index: {}]   ;;  %s19356_s1 = inlined_call_operand.vmem [shape: f32[8,200], index: 1, kind: input, shape index: {}]   ;;  %s19357_s2 = inlined_call_operand.vmem [shape: f32[8,1], index: 2, kind: input, shape index: {}]   ;;  %s19358_s3 = inlined_call_operand.vmem [shape: f32[16,200], index: 3, kind: input, shape index: {}]   ;;  %s19359_s4 = inlined_call_operand.vmem [shape: f32[16,1], index: 4, kind: input, shape index: {}]   ;;  %s19360_s5 = inlined_call_operand.vmem [shape: f32[640,32], index: 5, kind: input, shape index: {}]   ;;  %s19361_s6 = inlined_call_operand.vmem [shape: f32[16,32,120], index: 6, kind: input, shape index: {}]   ;;  %s19362_s7 = inlined_call_operand.vmem [shape: f32[1,120], index: 7, kind: input, shape index: {}]   ;;  %s19363_s8 = inlined_call_operand.vmem [shape: f32[120,84], index: 8, kind: input, shape index: {}]   ;;  %s19364_s9 = inlined_call_operand.vmem [shape: f32[1,84], index: 9, kind: input, shape index: {}]   ;;  %s19365_s10 = inlined_call_operand.vmem [shape: f32[84,10], index: 10, kind: input, shape index: {}]   ;;  %s19366_s11 = inlined_call_operand.vmem [shape: f32[1,10], index: 11, kind: input, shape index: {}]   ;;  %s19367_s12 = inlined_call_operand.hbm [shape: f32[2,2,10], index: 12, kind: output, shape index: {}]  }
   0x1   :  { %19453 = sst [smem:[#allocation24_spill]] %s19355_s0 }
   0x2   :  { %19454 = sst [smem:[#allocation25_spill]] %s19364_s9 }
   0x3   :  { %19455 = sst [smem:[#allocation26_spill]] %s19366_s11 }
   0x4   :  { %19456 = sst [smem:[#allocation27_spill]] %s19367_s12 }
   0x5   :  { %17 = vsyncpa [#allocation8], 0 }
   0x6   :  { %19 = vsyncpa [#allocation8 + $0x1], 0  ;;  %s13525_s21 = smov 0   ;;  %s13527_s22 = smov 0  }
   0x7   :  { %s13529_s23 = smov 0   ;;  %s13531_s24 = smov 0  }
   0x8 LB: > { %19457 = sst [smem:[#allocation10_spill]] %s13418_s21  ;;  %s13546_s25 = sadd.s32 4294967295, %s13430_s24   ;;  %s13430_s24 = sphi %s13531_s24, %s19778_s24   ;;  %s13426_s23 = sphi %s13529_s23, %s19781_s23   ;;  %s13422_s22 = sphi %s13527_s22, %s19780_s22   ;;  %s13418_s21 = sphi %s13525_s21, %s19779_s21  }
   0x9   : > { %19458 = sst [smem:[#allocation11_spill]] %s13422_s22  ;;  %s11401_s26 = sadd.s32 4294967294, %s13430_s24  }
   0xa   : > { %19459 = sst [smem:[#allocation12_spill]] %s13426_s23  ;;  %s13550_s27 = sadd.s32 1, %s13430_s24  }
   0xb   : > { %19460 = sst [smem:[#allocation13_spill]] %s13430_s24  ;;  %s289_s28 = sadd.s32 1, %s13426_s23 }
   0xc   : > { %19461 = sst [smem:[#allocation14_spill]] %s13546_s25  ;;  %s286_s29 = ssub.s32 %s13430_s24, %s13550_s27 }
   0xd   : > { %19462 = sst [smem:[#allocation15_spill]] %s13550_s27  ;;  %p299_p0 = scmp.ne.s32.totalorder %s13426_s23, %s13422_s22 }
   0xe   : > { %p287_p1 = scmp.eq.s32.totalorder %s286_s29, 0  ;;  %p300_p2 = scmp.eq.s32.totalorder %s13546_s25, 1 }
   0xf   : > { %p305_p3 = scmp.ne.s32.totalorder %s13422_s22, %s13418_s21  ;;  %p306_p4 = scmp.eq.s32.totalorder %s11401_s26, 1 }
  0x10   : > { %s13561_s30 = scalar_select %p287_p1, %s13426_s23, %s289_s28  }
  0x11   : > { %p13563_p5 = por %p300_p2, %p299_p0  ;;  %p13567_p6 = por %p306_p4, %p305_p3 }
  0x12   : > { %19463 = sst [smem:[#allocation16_spill]] %s13561_s30  ;;  %p11404_p7 = scmp.ge.s32.totalorder %s13430_s24, 1 }
  0x13   : > { %s19464_s13 = scalar_select %p13563_p5, 1, 0 }
  0x14   : > { %s19466_s14 = scalar_select %p13567_p6, 1, 0 }
  0x15   : > { %19465 = sst [smem:[#allocation17_spill]] %s19464_s13  ;;  %p365_p8 = scmp.lt.s32.totalorder %s13430_s24, 3 }
  0x16   : > { %19467 = sst [smem:[#allocation18_spill]] %s19466_s14 }
  0x17   : > { %p366_p9 = pnand %p11404_p7, %p365_p8 }
  0x19   : > { %369 = sbr.rel (%p366_p9) target bundleno = 3612 (0xe1c), region = 68 }
  0x20   : > { %p407_p10 = scmp.lt.s32.totalorder %s13546_s25, 1  ;;  %s19468_s0 = sld [smem:[#allocation24_spill]]  ;;  %vm527_vm0 = vcmask 1039360   ;;  %vm660_vm1 = vcmask 1031168   ;;  %vm793_vm2 = vcmask 1022976   ;;  %vm926_vm3 = vcmask 1014784  }
  0x21   : > { %s19396_s20 = smov 127   ;;  %s19398_s26 = smov 126   ;;  %vm1063_vm4 = vcmask 785408   ;;  %vm19419_vm5 = vcmask 777216   ;;  %vm19420_vm6 = vcmask 769024   ;;  %v13785_v41 = vld [vmem:[%s19356_s1 + $0x8] sm:$0xff] }
  0x22   : > { %s408_s15 = scalar_select %p407_p10, %s13546_s25, 1  ;;  %vm19426_vm7 = vcmask 588800   ;;  %vm19421_vm8 = vcmask 760832   ;;  %vm19422_vm9 = vcmask 752640   ;;  %vm1753_vm10 = vcmask 523264  }
  0x23   : > { %s19400_s28 = smov 125   ;;  %s19402_s29 = smov 124   ;;  %11407 = vmatprep.mubr.msk.f32.mxu0 %vm19426_vm7, %v13785_v41  ;;  %11408 = vmatprep.mubr.msk.f32.mxu1 %vm19426_vm7, %v13785_v41  ;;  %vm1891_vm11 = vcmask 515072   ;;  %vm19404_vm12 = vcmask 506880   ;;  %vm2167_vm13 = vcmask 498688   ;;  %vm19407_vm14 = vcmask 490496  }
  0x24   : > { %s13156_s16 = smul.u32 160, %s408_s15  ;;  %s19368_s15 = smov 96   ;;  %vm19408_vm15 = vcmask 261120  }
  0x25   : > { %s19370_s17 = smov 94   ;;  %s19376_s18 = smov 93  }
  0x26   : > { %s13578_s19 = scalar_lea.vmem %s19468_s0, %s13156_s16  ;;  %s19372_s16 = smov 95  }
  0x27   : > { %v13581_v0 = vld [vmem:[%s13578_s19 + $0x8] sm:$0xff]  ;;  %v13584_v1 = vld [vmem:[%s13578_s19] sm:$0xff]  ;;  %v13591_v2 = vld [vmem:[%s13578_s19 + $0x10] sm:$0xff]  ;;  %s19477_s0 = smov 61   ;;  %s19478_s30 = smov 60  }
  0x28   : > { %491 = vrot.lane.b32.xlu0 %v13581_v0, %s19396_s20  ;;  %489 = vrot.lane.b32.xlu1 %v13584_v1, %s19396_s20  ;;  %v13702_v3 = vld [vmem:[%s13578_s19 + $0x18] sm:$0xff]  ;;  %v13709_v4 = vld [vmem:[%s13578_s19 + $0x20] sm:$0xff]  ;;  %s19479_s23 = smov 32   ;;  %s19480_s27 = smov 31  }
  0x29   : > { %v13777_v39 = vld [vmem:[%s13578_s19 + $0x28] sm:$0xff]  ;;  %v13780_v40 = vld [vmem:[%s13578_s19 + $0x30] sm:$0xff]  ;;  %s19481_s14 = smov 30   ;;  %s19482_s21 = smov 29  }
  0x2a   : > { %s19483_s24 = smov 28   ;;  %s19484_s12 = smov 127  }
  0x2b   : > { %s19485_s11 = smov 126   ;;  %s19486_s13 = smov 125  }
  0x2c   : > { %493 = vrot.lane.b32.xlu0 %v13591_v2, %s19396_s20  ;;  %624 = vrot.lane.b32.xlu1 %v13581_v0, %s19398_s26  ;;  %s19487_s9 = smov 124  }
  0x30   : > { %626 = vrot.lane.b32.xlu0 %v13591_v2, %s19398_s26  ;;  %757 = vrot.lane.b32.xlu1 %v13581_v0, %s19400_s28 }
  0x34   : > { %759 = vrot.lane.b32.xlu0 %v13591_v2, %s19400_s28  ;;  %622 = vrot.lane.b32.xlu1 %v13584_v1, %s19398_s26 }
  0x38   : > { %755 = vrot.lane.b32.xlu0 %v13584_v1, %s19400_s28  ;;  %890 = vrot.lane.b32.xlu1 %v13581_v0, %s19402_s29 }
  0x3c   : > { %892 = vrot.lane.b32.xlu0 %v13591_v2, %s19402_s29  ;;  %1025 = vrot.lane.b32.xlu1 %v13581_v0, %s19368_s15 }
  0x40   : > { %1027 = vrot.lane.b32.xlu0 %v13591_v2, %s19368_s15  ;;  %888 = vrot.lane.b32.xlu1 %v13584_v1, %s19402_s29 }
  0x44   : > { %1023 = vrot.lane.b32.xlu0 %v13584_v1, %s19368_s15  ;;  %1163 = vrot.lane.b32.xlu1 %v13581_v0, %s19372_s16  ;;  %s19374_s15 = smov 92  }
  0x48   : > { %1165 = vrot.lane.b32.xlu0 %v13591_v2, %s19372_s16  ;;  %1301 = vrot.lane.b32.xlu1 %v13581_v0, %s19370_s17 }
  0x4c   : > { %1303 = vrot.lane.b32.xlu0 %v13591_v2, %s19370_s17  ;;  %1161 = vrot.lane.b32.xlu1 %v13584_v1, %s19372_s16  ;;  %s19378_s16 = smov 63  }
  0x50   : > { %1299 = vrot.lane.b32.xlu0 %v13584_v1, %s19370_s17  ;;  %1439 = vrot.lane.b32.xlu1 %v13581_v0, %s19376_s18  ;;  %s19380_s17 = smov 64  }
  0x54   : > { %1441 = vrot.lane.b32.xlu0 %v13591_v2, %s19376_s18  ;;  %1577 = vrot.lane.b32.xlu1 %v13581_v0, %s19374_s15 }
  0x58   : > { %1579 = vrot.lane.b32.xlu0 %v13591_v2, %s19374_s15  ;;  %1437 = vrot.lane.b32.xlu1 %v13584_v1, %s19376_s18  ;;  %s19382_s18 = smov 61  }
  0x5c   : > { %1575 = vrot.lane.b32.xlu0 %v13584_v1, %s19374_s15  ;;  %1715 = vrot.lane.b32.xlu1 %v13581_v0, %s19380_s17  ;;  %s19384_s15 = smov 62  }
  0x60   : > { %1717 = vrot.lane.b32.xlu0 %v13591_v2, %s19380_s17  ;;  %1853 = vrot.lane.b32.xlu1 %v13581_v0, %s19378_s16 }
  0x64   : > { %1855 = vrot.lane.b32.xlu0 %v13591_v2, %s19378_s16  ;;  %1713 = vrot.lane.b32.xlu1 %v13584_v1, %s19380_s17  ;;  %s19386_s17 = smov 32  }
  0x68   : > { %1851 = vrot.lane.b32.xlu0 %v13584_v1, %s19378_s16  ;;  %1991 = vrot.lane.b32.xlu1 %v13581_v0, %s19384_s15  ;;  %s19388_s16 = smov 60  }
  0x6c   : > { %1993 = vrot.lane.b32.xlu0 %v13591_v2, %s19384_s15  ;;  %2129 = vrot.lane.b32.xlu1 %v13581_v0, %s19382_s18 }
  0x70   : > { %2131 = vrot.lane.b32.xlu0 %v13591_v2, %s19382_s18  ;;  %1989 = vrot.lane.b32.xlu1 %v13584_v1, %s19384_s15  ;;  %s19394_s15 = smov 30  }
  0x74   : > { %2127 = vrot.lane.b32.xlu0 %v13584_v1, %s19382_s18  ;;  %2267 = vrot.lane.b32.xlu1 %v13581_v0, %s19388_s16  ;;  %s19405_s18 = smov 31  }
  0x78   : > { %2269 = vrot.lane.b32.xlu0 %v13591_v2, %s19388_s16  ;;  %2405 = vrot.lane.b32.xlu1 %v13581_v0, %s19386_s17 }
  0x7c   : > { %2407 = vrot.lane.b32.xlu0 %v13591_v2, %s19386_s17  ;;  %2265 = vrot.lane.b32.xlu1 %v13584_v1, %s19388_s16  ;;  %s19390_s16 = smov 28  }
  0x80   : > { %2403 = vrot.lane.b32.xlu0 %v13584_v1, %s19386_s17  ;;  %2543 = vrot.lane.b32.xlu1 %v13581_v0, %s19405_s18  ;;  %s19392_s17 = smov 29  }
  0x84   : > { %2545 = vrot.lane.b32.xlu0 %v13591_v2, %s19405_s18  ;;  %2681 = vrot.lane.b32.xlu1 %v13581_v0, %s19394_s15 }
  0x88   : > { %2683 = vrot.lane.b32.xlu0 %v13591_v2, %s19394_s15  ;;  %2541 = vrot.lane.b32.xlu1 %v13584_v1, %s19405_s18  ;;  %s19476_s18 = smov 62  }
  0x8c   : > { %2679 = vrot.lane.b32.xlu0 %v13584_v1, %s19394_s15  ;;  %2819 = vrot.lane.b32.xlu1 %v13581_v0, %s19392_s17  ;;  %s19470_s15 = smov 95  }
  0x90   : > { %2821 = vrot.lane.b32.xlu0 %v13591_v2, %s19392_s17  ;;  %2957 = vrot.lane.b32.xlu1 %v13581_v0, %s19390_s16 }
  0x94   : > { %2959 = vrot.lane.b32.xlu0 %v13591_v2, %s19390_s16  ;;  %2817 = vrot.lane.b32.xlu1 %v13584_v1, %s19392_s17  ;;  %s19471_s17 = smov 94  }
  0x98   : > { %2955 = vrot.lane.b32.xlu0 %v13584_v1, %s19390_s16  ;;  %495 = vrot.lane.b32.xlu1 %v13702_v3, %s19396_s20  ;;  %s19469_s16 = smov 96  }
  0x9a   : > { %v492_v5 = vpop.permute.xlu0 %491  ;;  %v490_v6 = vpop.permute.xlu1 %489 }
  0x9b   : > { %v528_v7 = vsel %vm527_vm0, %v490_v6, %v492_v5 }
  0x9c   : > { %497 = vrot.lane.b32.xlu0 %v13709_v4, %s19396_s20  ;;  %3131 = vrot.lane.b32.xlu1 %v13591_v2, %s19396_s20  ;;  %v12011_v12 = vpack.c.bf16 %v528_v7, %v13584_v1 }
  0x9e   : > { %v13716_v8 = vpop.permute.xlu0 %493  ;;  %v625_v9 = vpop.permute.xlu1 %624 }
  0x9f   : > { %v529_v10 = vsel %vm527_vm0, %v492_v5, %v13716_v8 }
  0xa0   : > { %3133 = vrot.lane.b32.xlu0 %v13702_v3, %s19396_s20  ;;  %3129 = vrot.lane.b32.xlu1 %v13581_v0, %s19396_s20  ;;  %v12009_v11 = vpack.c.bf16 %v529_v10, %v13581_v0 }
  0xa2   : > { %v13726_v13 = vpop.permute.xlu0 %626  ;;  %v758_v14 = vpop.permute.xlu1 %757  ;;  %12010 = vmatprep.subr.bf16.mxu0 %v12009_v11 }
  0xa3   : > { %12012 = vmatpush1.bf16.msra.mxu0 %v12011_v12  ;;  %v662_v17 = vsel %vm660_vm1, %v625_v9, %v13726_v13 }
  0xa4   : > { %628 = vrot.lane.b32.xlu0 %v13702_v3, %s19398_s26  ;;  %630 = vrot.lane.b32.xlu1 %v13709_v4, %s19398_s26 }
  0xa6   : > { %v13732_v15 = vpop.permute.xlu0 %759  ;;  %v623_v16 = vpop.permute.xlu1 %622 }
  0xa7   : > { %v795_v18 = vsel %vm793_vm2, %v758_v14, %v13732_v15  ;;  %v661_v20 = vsel %vm660_vm1, %v623_v16, %v625_v9 }
  0xa8   : > { %761 = vrot.lane.b32.xlu0 %v13702_v3, %s19400_s28  ;;  %763 = vrot.lane.b32.xlu1 %v13709_v4, %s19400_s28  ;;  %v12013_v19 = vpack.c.bf16 %v795_v18, %v662_v17 }
  0xaa   : > { %v756_v21 = vpop.permute.xlu0 %755  ;;  %v891_v22 = vpop.permute.xlu1 %890  ;;  %12014 = vmatprep.subr.bf16.mxu0 %v12013_v19 }
  0xab   : > { %v794_v23 = vsel %vm793_vm2, %v756_v21, %v758_v14 }
  0xac   : > { %3263 = vrot.lane.b32.xlu0 %v13591_v2, %s19398_s26  ;;  %3265 = vrot.lane.b32.xlu1 %v13702_v3, %s19398_s26  ;;  %v12015_v24 = vpack.c.bf16 %v794_v23, %v661_v20 }
  0xae   : > { %v13748_v25 = vpop.permute.xlu0 %892  ;;  %v1026_v26 = vpop.permute.xlu1 %1025  ;;  %12016 = vmatpush1.bf16.msra.mxu0 %v12015_v24 }
  0xaf   : > { %v928_v29 = vsel %vm926_vm3, %v891_v22, %v13748_v25 }
  0xb0   : > { %3395 = vrot.lane.b32.xlu0 %v13591_v2, %s19400_s28  ;;  %3397 = vrot.lane.b32.xlu1 %v13702_v3, %s19400_s28 }
  0xb2   : > { %v13754_v27 = vpop.permute.xlu0 %1027  ;;  %v889_v28 = vpop.permute.xlu1 %888 }
  0xb3   : > { %v1065_v30 = vsel %vm1063_vm4, %v1026_v26, %v13754_v27  ;;  %v927_v32 = vsel %vm926_vm3, %v889_v28, %v891_v22 }
  0xb4   : > { %3261 = vrot.lane.b32.xlu0 %v13581_v0, %s19398_s26  ;;  %3393 = vrot.lane.b32.xlu1 %v13581_v0, %s19400_s28  ;;  %v12017_v31 = vpack.c.bf16 %v1065_v30, %v928_v29 }
  0xb6   : > { %v1024_v33 = vpop.permute.xlu0 %1023  ;;  %v1164_v34 = vpop.permute.xlu1 %1163  ;;  %12018 = vmatprep.subr.bf16.mxu0 %v12017_v31 }
  0xb7   : > { %v1064_v35 = vsel %vm1063_vm4, %v1024_v33, %v1026_v26 }
  0xb8   : > { %894 = vrot.lane.b32.xlu0 %v13702_v3, %s19402_s29  ;;  %896 = vrot.lane.b32.xlu1 %v13709_v4, %s19402_s29  ;;  %v12019_v36 = vpack.c.bf16 %v1064_v35, %v927_v32 }
  0xba   : > { %v13770_v37 = vpop.permute.xlu0 %1165  ;;  %v1302_v38 = vpop.permute.xlu1 %1301  ;;  %12020 = vmatpush1.bf16.msra.mxu0 %v12019_v36 }
  0xbb   : > { %v1203_v44 = vsel %vm19419_vm5, %v1164_v34, %v13770_v37 }
  0xbc   : > { %1029 = vrot.lane.b32.xlu0 %v13702_v3, %s19469_s16  ;;  %1031 = vrot.lane.b32.xlu1 %v13709_v4, %s19469_s16 }
  0xbe   : > { %v13787_v42 = vpop.permute.xlu0 %1303  ;;  %v1162_v43 = vpop.permute.xlu1 %1161 }
  0xbf   : > { %v1341_v45 = vsel %vm19420_vm6, %v1302_v38, %v13787_v42  ;;  %v1202_v47 = vsel %vm19419_vm5, %v1162_v43, %v1164_v34 }
  0xc0   : > { %499 = vrot.lane.b32.xlu0 %v13777_v39, %s19396_s20  ;;  %501 = vrot.lane.b32.xlu1 %v13780_v40, %s19396_s20  ;;  %v12021_v46 = vpack.c.bf16 %v1341_v45, %v1203_v44  ;;  %s19472_s20 = smov 93  }
  0xc2   : > { %v1300_v48 = vpop.permute.xlu0 %1299  ;;  %v1440_v49 = vpop.permute.xlu1 %1439  ;;  %12022 = vmatprep.subr.bf16.mxu0 %v12021_v46 }
  0xc3   : > { %v1340_v50 = vsel %vm19420_vm6, %v1300_v48, %v1302_v38 }
  0xc4   : > { %3527 = vrot.lane.b32.xlu0 %v13591_v2, %s19402_s29  ;;  %3529 = vrot.lane.b32.xlu1 %v13702_v3, %s19402_s29  ;;  %v12023_v51 = vpack.c.bf16 %v1340_v50, %v1202_v47 }
  0xc6   : > { %v13807_v52 = vpop.permute.xlu0 %1441  ;;  %v1578_v53 = vpop.permute.xlu1 %1577  ;;  %12024 = vmatpush1.bf16.msra.mxu0 %v12023_v51 }
  0xc7   : > { %v1479_v56 = vsel %vm19421_vm8, %v1440_v49, %v13807_v52 }
  0xc8   : > { %3525 = vrot.lane.b32.xlu0 %v13581_v0, %s19402_s29  ;;  %1167 = vrot.lane.b32.xlu1 %v13702_v3, %s19470_s15 }
  0xca   : > { %v13813_v54 = vpop.permute.xlu0 %1579  ;;  %v1438_v55 = vpop.permute.xlu1 %1437 }
  0xcb   : > { %v1617_v57 = vsel %vm19422_vm9, %v1578_v53, %v13813_v54  ;;  %v1478_v59 = vsel %vm19421_vm8, %v1438_v55, %v1440_v49 }
  0xcc   : > { %1169 = vrot.lane.b32.xlu0 %v13709_v4, %s19470_s15  ;;  %1305 = vrot.lane.b32.xlu1 %v13702_v3, %s19471_s17  ;;  %v12025_v58 = vpack.c.bf16 %v1617_v57, %v1479_v56 }
  0xce   : > { %v1576_v60 = vpop.permute.xlu0 %1575  ;;  %v1716_v61 = vpop.permute.xlu1 %1715  ;;  %12026 = vmatprep.subr.bf16.mxu0 %v12025_v58 }
  0xcf   : > { %v1616_v62 = vsel %vm19422_vm9, %v1576_v60, %v1578_v53 }
  0xd0   : > { %1307 = vrot.lane.b32.xlu0 %v13709_v4, %s19471_s17  ;;  %632 = vrot.lane.b32.xlu1 %v13777_v39, %s19398_s26  ;;  %v12027_v63 = vpack.c.bf16 %v1616_v62, %v1478_v59 }
  0xd2   : > { %v13829_v0 = vpop.permute.xlu0 %1717  ;;  %v1854_v1 = vpop.permute.xlu1 %1853  ;;  %12028 = vmatpush1.bf16.msra.mxu0 %v12027_v63 }
  0xd3   : > { %v1755_v6 = vsel %vm1753_vm10, %v1716_v61, %v13829_v0 }
  0xd4   : > { %634 = vrot.lane.b32.xlu0 %v13780_v40, %s19398_s26  ;;  %765 = vrot.lane.b32.xlu1 %v13777_v39, %s19400_s28  ;;  %s19473_s26 = smov 92  }
  0xd6   : > { %v13835_v2 = vpop.permute.xlu0 %1855  ;;  %v1714_v5 = vpop.permute.xlu1 %1713 }
  0xd7   : > { %v1893_v7 = vsel %vm1891_vm11, %v1854_v1, %v13835_v2  ;;  %v1754_v10 = vsel %vm1753_vm10, %v1714_v5, %v1716_v61 }
  0xd8   : > { %767 = vrot.lane.b32.xlu0 %v13780_v40, %s19400_s28  ;;  %1443 = vrot.lane.b32.xlu1 %v13702_v3, %s19472_s20  ;;  %v12029_v9 = vpack.c.bf16 %v1893_v7, %v1755_v6  ;;  %s19474_s28 = smov 64  }
  0xda   : > { %v1852_v11 = vpop.permute.xlu0 %1851  ;;  %v1992_v12 = vpop.permute.xlu1 %1991  ;;  %12030 = vmatprep.subr.bf16.mxu0 %v12029_v9 }
  0xdb   : > { %v1892_v14 = vsel %vm1891_vm11, %v1852_v11, %v1854_v1 }
  0xdc   : > { %1445 = vrot.lane.b32.xlu0 %v13709_v4, %s19472_s20  ;;  %1581 = vrot.lane.b32.xlu1 %v13702_v3, %s19473_s26  ;;  %v12031_v16 = vpack.c.bf16 %v1892_v14, %v1754_v10 }
  0xde   : > { %v13851_v17 = vpop.permute.xlu0 %1993  ;;  %v2130_v18 = vpop.permute.xlu1 %2129  ;;  %12032 = vmatpush1.bf16.msra.mxu0 %v12031_v16 }
  0xdf   : > { %v2031_v21 = vsel %vm19404_vm12, %v1992_v12, %v13851_v17 }
  0xe0   : > { %1583 = vrot.lane.b32.xlu0 %v13709_v4, %s19473_s26  ;;  %898 = vrot.lane.b32.xlu1 %v13777_v39, %s19402_s29 }
  0xe2   : > { %v13857_v19 = vpop.permute.xlu0 %2131  ;;  %v1990_v20 = vpop.permute.xlu1 %1989 }
  0xe3   : > { %v2169_v22 = vsel %vm2167_vm13, %v2130_v18, %v13857_v19  ;;  %v2030_v24 = vsel %vm19404_vm12, %v1990_v20, %v1992_v12  ;;  %vm19409_vm12 = vcmask 252928  }
  0xe4   : > { %900 = vrot.lane.b32.xlu0 %v13780_v40, %s19402_s29  ;;  %1033 = vrot.lane.b32.xlu1 %v13777_v39, %s19469_s16  ;;  %v12033_v23 = vpack.c.bf16 %v2169_v22, %v2031_v21  ;;  %s19475_s29 = smov 63   ;;  %v414_v22 = vld [vmem:[%s13578_s19 + $0x10] sm:$0xff] }
  0xe6   : > { %v2128_v26 = vpop.permute.xlu0 %2127  ;;  %v2268_v28 = vpop.permute.xlu1 %2267  ;;  %12034 = vmatprep.subr.bf16.mxu0 %v12033_v23 }
  0xe7   : > { %v2168_v29 = vsel %vm2167_vm13, %v2128_v26, %v2130_v18 }
  0xe8   : > { %1035 = vrot.lane.b32.xlu0 %v13780_v40, %s19469_s16  ;;  %1719 = vrot.lane.b32.xlu1 %v13702_v3, %s19474_s28  ;;  %v12035_v30 = vpack.c.bf16 %v2168_v29, %v2030_v24 }
  0xea   : > { %v13873_v31 = vpop.permute.xlu0 %2269  ;;  %v2406_v32 = vpop.permute.xlu1 %2405  ;;  %12036 = vmatpush1.bf16.msra.mxu0 %v12035_v30 }
  0xeb   : > { %v2307_v35 = vsel %vm19407_vm14, %v2268_v28, %v13873_v31 }
  0xec   : > { %1721 = vrot.lane.b32.xlu0 %v13709_v4, %s19474_s28  ;;  %1857 = vrot.lane.b32.xlu1 %v13702_v3, %s19475_s29 }
  0xee   : > { %v13879_v33 = vpop.permute.xlu0 %2407  ;;  %v2266_v34 = vpop.permute.xlu1 %2265 }
  0xef   : > { %v2445_v36 = vsel %vm19408_vm15, %v2406_v32, %v13879_v33  ;;  %v2306_v43 = vsel %vm19407_vm14, %v2266_v34, %v2268_v28  ;;  %vm2719_vm14 = vcmask 244736   ;;  %v3053_v28 = vld [vmem:[%s13578_s19 + $0x8] sm:$0xff] }
  0xf0   : > { %1859 = vrot.lane.b32.xlu0 %v13709_v4, %s19475_s29  ;;  %1171 = vrot.lane.b32.xlu1 %v13777_v39, %s19470_s15  ;;  %v12037_v38 = vpack.c.bf16 %v2445_v36, %v2307_v35 }
  0xf2   : > { %v2404_v44 = vpop.permute.xlu0 %2403  ;;  %v2544_v45 = vpop.permute.xlu1 %2543  ;;  %12038 = vmatprep.subr.bf16.mxu0 %v12037_v38 }
  0xf3   : > { %v2444_v46 = vsel %vm19408_vm15, %v2404_v44, %v2406_v32  ;;  %vm2857_vm15 = vcmask 236544  }
  0xf4   : > { %1173 = vrot.lane.b32.xlu0 %v13780_v40, %s19470_s15  ;;  %1309 = vrot.lane.b32.xlu1 %v13777_v39, %s19471_s17  ;;  %v12039_v47 = vpack.c.bf16 %v2444_v46, %v2306_v43 }
  0xf6   : > { %v13895_v48 = vpop.permute.xlu0 %2545  ;;  %v2682_v49 = vpop.permute.xlu1 %2681  ;;  %12040 = vmatpush1.bf16.msra.mxu0 %v12039_v47 }
  0xf7   : > { %v2583_v53 = vsel %vm19409_vm12, %v2544_v45, %v13895_v48 }
  0xf8   : > { %1311 = vrot.lane.b32.xlu0 %v13780_v40, %s19471_s17  ;;  %1995 = vrot.lane.b32.xlu1 %v13702_v3, %s19476_s18 }
  0xfa   : > { %v13901_v50 = vpop.permute.xlu0 %2683  ;;  %v2542_v51 = vpop.permute.xlu1 %2541 }
  0xfb   : > { %v2721_v55 = vsel %vm2719_vm14, %v2682_v49, %v13901_v50  ;;  %v2582_v57 = vsel %vm19409_vm12, %v2542_v51, %v2544_v45  ;;  %vm2995_vm12 = vcmask 228352  }
  0xfc   : > { %1997 = vrot.lane.b32.xlu0 %v13709_v4, %s19476_s18  ;;  %2133 = vrot.lane.b32.xlu1 %v13702_v3, %s19477_s0  ;;  %v12041_v56 = vpack.c.bf16 %v2721_v55, %v2583_v53 }
  0xfe   : > { %v2680_v58 = vpop.permute.xlu0 %2679  ;;  %v2820_v59 = vpop.permute.xlu1 %2819  ;;  %12042 = vmatprep.subr.bf16.mxu0 %v12041_v56 }
  0xff   : > { %v2720_v60 = vsel %vm2719_vm14, %v2680_v58, %v2682_v49 }
 0x100   : > { %2135 = vrot.lane.b32.xlu0 %v13709_v4, %s19477_s0  ;;  %1447 = vrot.lane.b32.xlu1 %v13777_v39, %s19472_s20  ;;  %v12043_v61 = vpack.c.bf16 %v2720_v60, %v2582_v57 }
 0x102   : > { %v13917_v62 = vpop.permute.xlu0 %2821  ;;  %v2958_v63 = vpop.permute.xlu1 %2957  ;;  %12044 = vmatpush1.bf16.msra.mxu0 %v12043_v61 }
 0x103   : > { %v2859_v6 = vsel %vm2857_vm15, %v2820_v59, %v13917_v62 }
 0x104   : > { %1449 = vrot.lane.b32.xlu0 %v13780_v40, %s19472_s20  ;;  %1585 = vrot.lane.b32.xlu1 %v13777_v39, %s19473_s26 }
 0x106   : > { %v13923_v1 = vpop.permute.xlu0 %2959  ;;  %v2818_v5 = vpop.permute.xlu1 %2817 }
 0x107   : > { %v2997_v7 = vsel %vm2995_vm12, %v2958_v63, %v13923_v1  ;;  %v2858_v10 = vsel %vm2857_vm15, %v2818_v5, %v2820_v59 }
 0x108   : > { %1587 = vrot.lane.b32.xlu0 %v13780_v40, %s19473_s26  ;;  %2271 = vrot.lane.b32.xlu1 %v13702_v3, %s19478_s30  ;;  %v12045_v9 = vpack.c.bf16 %v2997_v7, %v2859_v6 }
 0x10a   : > { %v2956_v11 = vpop.permute.xlu0 %2955  ;;  %v496_v12 = vpop.permute.xlu1 %495  ;;  %12046 = vmatprep.subr.bf16.mxu0 %v12045_v9 }
 0x10b   : > { %v2996_v14 = vsel %vm2995_vm12, %v2956_v11, %v2958_v63  ;;  %v530_v18 = vsel %vm527_vm0, %v13716_v8, %v496_v12 }
 0x10c   : > { %2273 = vrot.lane.b32.xlu0 %v13709_v4, %s19478_s30  ;;  %2409 = vrot.lane.b32.xlu1 %v13702_v3, %s19479_s23  ;;  %v12047_v16 = vpack.c.bf16 %v2996_v14, %v2858_v10  ;;  %v12059_v26 = vpack.c.bf16 %v530_v18, %v414_v22 }
 0x10e   : > { %v13941_v20 = vpop.permute.xlu0 %497  ;;  %v3132_v21 = vpop.permute.xlu1 %3131  ;;  %12048 = vmatpush1.bf16.msra.mxu0 %v12047_v16 }
 0x10f   : > { %v531_v23 = vsel %vm527_vm0, %v496_v12, %v13941_v20 }
 0x110   : > { %2411 = vrot.lane.b32.xlu0 %v13709_v4, %s19479_s23  ;;  %1723 = vrot.lane.b32.xlu1 %v13777_v39, %s19474_s28  ;;  %v12057_v24 = vpack.c.bf16 %v531_v23, %v13702_v3 }
 0x112   : > { %v13952_v29 = vpop.permute.xlu0 %3133  ;;  %v3130_v8 = vpop.permute.xlu1 %3129  ;;  %12058 = vmatprep.subr.bf16.mxu1 %v12057_v24 }
 0x113   : > { %v3168_v30 = vsel %vm527_vm0, %v3132_v21, %v13952_v29  ;;  %v3167_v32 = vsel %vm527_vm0, %v3130_v8, %v3132_v21  ;;  %12060 = vmatpush1.bf16.msra.mxu1 %v12059_v26 }
 0x114   : > { %1725 = vrot.lane.b32.xlu0 %v13780_v40, %s19474_s28  ;;  %1861 = vrot.lane.b32.xlu1 %v13777_v39, %s19475_s29  ;;  %v12049_v34 = vpack.c.bf16 %v3168_v30, %v414_v22  ;;  %v12051_v35 = vpack.c.bf16 %v3167_v32, %v3053_v28  ;;  %v14042_v32 = vld [vmem:[%s13578_s19 + $0x20] sm:$0xff] }
 0x116   : > { %v629_v36 = vpop.permute.xlu0 %628  ;;  %v13961_v38 = vpop.permute.xlu1 %630  ;;  %12050 = vmatprep.subr.bf16.mxu0 %v12049_v34 }
 0x117   : > { %12052 = vmatpush1.bf16.msra.mxu0 %v12051_v35  ;;  %v663_v45 = vsel %vm660_vm1, %v13726_v13, %v629_v36  ;;  %v664_v46 = vsel %vm660_vm1, %v629_v36, %v13961_v38  ;;  %v14048_v35 = vld [vmem:[%s19356_s1] sm:$0xff] }
 0x118   : > { %1863 = vrot.lane.b32.xlu0 %v13780_v40, %s19475_s29  ;;  %2547 = vrot.lane.b32.xlu1 %v13702_v3, %s19480_s27 }
 0x11a   : > { %v762_v43 = vpop.permute.xlu0 %761  ;;  %v13967_v44 = vpop.permute.xlu1 %763 }
 0x11b   : > { %v796_v47 = vsel %vm793_vm2, %v13732_v15, %v762_v43  ;;  %v797_v49 = vsel %vm793_vm2, %v762_v43, %v13967_v44 }
 0x11c   : > { %2549 = vrot.lane.b32.xlu0 %v13709_v4, %s19480_s27  ;;  %2685 = vrot.lane.b32.xlu1 %v13702_v3, %s19481_s14  ;;  %v12061_v51 = vpack.c.bf16 %v797_v49, %v664_v46  ;;  %v12063_v53 = vpack.c.bf16 %v796_v47, %v663_v45 }
 0x11e   : > { %v3264_v55 = vpop.permute.xlu0 %3263  ;;  %v13981_v56 = vpop.permute.xlu1 %3265  ;;  %12062 = vmatprep.subr.bf16.mxu1 %v12061_v51 }
 0x11f   : > { %12064 = vmatpush1.bf16.msra.mxu1 %v12063_v53  ;;  %v3300_v57 = vsel %vm660_vm1, %v3264_v55, %v13981_v56 }
 0x120   : > { %2687 = vrot.lane.b32.xlu0 %v13709_v4, %s19481_s14  ;;  %1999 = vrot.lane.b32.xlu1 %v13777_v39, %s19476_s18 }
 0x122   : > { %v3396_v13 = vpop.permute.xlu0 %3395  ;;  %v13987_v15 = vpop.permute.xlu1 %3397 }
 0x123   : > { %v3432_v58 = vsel %vm793_vm2, %v3396_v13, %v13987_v15 }
 0x124   : > { %2001 = vrot.lane.b32.xlu0 %v13780_v40, %s19476_s18  ;;  %2137 = vrot.lane.b32.xlu1 %v13777_v39, %s19477_s0  ;;  %v12053_v59 = vpack.c.bf16 %v3432_v58, %v3300_v57 }
 0x126   : > { %v3262_v60 = vpop.permute.xlu0 %3261  ;;  %v3394_v61 = vpop.permute.xlu1 %3393  ;;  %12054 = vmatprep.subr.bf16.mxu0 %v12053_v59 }
 0x127   : > { %v3299_v63 = vsel %vm660_vm1, %v3262_v60, %v3264_v55  ;;  %v3431_v5 = vsel %vm793_vm2, %v3394_v61, %v3396_v13 }
 0x128   : > { %2139 = vrot.lane.b32.xlu0 %v13780_v40, %s19477_s0  ;;  %2823 = vrot.lane.b32.xlu1 %v13702_v3, %s19482_s21  ;;  %v12055_v6 = vpack.c.bf16 %v3431_v5, %v3299_v63 }
 0x12a   : > { %v895_v7 = vpop.permute.xlu0 %894  ;;  %v14003_v9 = vpop.permute.xlu1 %896  ;;  %12056 = vmatpush1.bf16.msra.mxu0 %v12055_v6  ;;  %v14106_v6 = vld [vmem:[%s13578_s19 + $0x38] sm:$0xff] }
 0x12b   : > { %v929_v12 = vsel %vm926_vm3, %v13748_v25, %v895_v7  ;;  %v930_v14 = vsel %vm926_vm3, %v895_v7, %v14003_v9 }
 0x12c   : > { %2825 = vrot.lane.b32.xlu0 %v13709_v4, %s19482_s21  ;;  %2961 = vrot.lane.b32.xlu1 %v13702_v3, %s19483_s24 }
 0x12e   : > { %v1030_v10 = vpop.permute.xlu0 %1029  ;;  %v14009_v11 = vpop.permute.xlu1 %1031 }
 0x12f   : > { %v1066_v16 = vsel %vm1063_vm4, %v13754_v27, %v1030_v10  ;;  %v1067_v18 = vsel %vm1063_vm4, %v1030_v10, %v14009_v11 }
 0x130   : > { %2963 = vrot.lane.b32.xlu0 %v13709_v4, %s19483_s24  ;;  %2275 = vrot.lane.b32.xlu1 %v13777_v39, %s19478_s30  ;;  %v12065_v3 = vpack.c.bf16 %v1067_v18, %v930_v14  ;;  %v12067_v21 = vpack.c.bf16 %v1066_v16, %v929_v12 }
 0x132   : > { %v500_v22 = vpop.permute.xlu0 %499  ;;  %v14023_v25 = vpop.permute.xlu1 %501  ;;  %12066 = vmatprep.subr.bf16.mxu1 %v12065_v3 }
 0x133   : > { %12068 = vmatpush1.bf16.msra.mxu1 %v12067_v21  ;;  %v533_v26 = vsel %vm527_vm0, %v500_v22, %v14023_v25  ;;  %v532_v28 = vsel %vm527_vm0, %v13941_v20, %v500_v22 }
 0x134   : > { %2277 = vrot.lane.b32.xlu0 %v13780_v40, %s19478_s30  ;;  %2413 = vrot.lane.b32.xlu1 %v13777_v39, %s19479_s23  ;;  %v12107_v20 = vpack.c.bf16 %v532_v28, %v14042_v32 }
 0x136   : > { %v3528_v27 = vpop.permute.xlu0 %3527  ;;  %v14029_v23 = vpop.permute.xlu1 %3529 }
 0x137   : > { %v3564_v24 = vsel %vm926_vm3, %v3528_v27, %v14029_v23 }
 0x138   : > { %2415 = vrot.lane.b32.xlu0 %v13780_v40, %s19479_s23  ;;  %3135 = vrot.lane.b32.xlu1 %v13709_v4, %s19484_s12  ;;  %v12105_v4 = vpack.c.bf16 %v533_v26, %v13777_v39 }
 0x139   : > { %3729 = vmatprep.subr.mxu0 %v3564_v24 }
 0x13a   : > { %v3526_v8 = vpop.permute.xlu0 %3525  ;;  %v1168_v30 = vpop.permute.xlu1 %1167 }
 0x13b   : > { %v3563_v34 = vsel %vm926_vm3, %v3526_v8, %v3528_v27 }
 0x13c   : > { %3137 = vrot.lane.b32.xlu0 %v13777_v39, %s19484_s12  ;;  %2551 = vrot.lane.b32.xlu1 %v13777_v39, %s19480_s27 }
 0x13d   : > { %3730 = vmatpush1.msra.mxu0 %v3563_v34 }
 0x13e   : > { %v14056_v36 = vpop.permute.xlu0 %1169  ;;  %v1306_v43 = vpop.permute.xlu1 %1305  ;;  %12106 = vmatprep.subr.bf16.mxu0 %v12105_v4  ;;  %3746 = vmatmul.mubr.f32.vlgmr.msra.gmra.mrb[0].mxu0 %v14048_v35 }
 0x13f   : > { %12108 = vmatpush1.bf16.msra.mxu0 %v12107_v20  ;;  %11409 = vmatprep.mubr.msk.f32.mxu0 %vm19426_vm7, %v13785_v41  ;;  %v1342_v45 = vsel %vm19420_vm6, %v13787_v42, %v1306_v43  ;;  %v1205_v49 = vsel %vm19419_vm5, %v1168_v30, %v14056_v36  ;;  %v1204_v41 = vsel %vm19419_vm5, %v13770_v37, %v1168_v30 }
 0x140   : > { %2553 = vrot.lane.b32.xlu0 %v13780_v40, %s19480_s27  ;;  %2689 = vrot.lane.b32.xlu1 %v13777_v39, %s19481_s14  ;;  %v12071_v42 = vpack.c.bf16 %v1342_v45, %v1204_v41 }
 0x142   : > { %v14067_v46 = vpop.permute.xlu0 %1307  ;;  %v633_v47 = vpop.permute.xlu1 %632 }
 0x143   : > { %v1343_v51 = vsel %vm19420_vm6, %v1306_v43, %v14067_v46  ;;  %v665_v57 = vsel %vm660_vm1, %v13961_v38, %v633_v47 }
 0x144   : > { %2691 = vrot.lane.b32.xlu0 %v13780_v40, %s19481_s14  ;;  %3267 = vrot.lane.b32.xlu1 %v14042_v32, %s19485_s11  ;;  %v12069_v53 = vpack.c.bf16 %v1343_v51, %v1205_v49 }
 0x146   : > { %v14079_v55 = vpop.permute.xlu0 %634  ;;  %v766_v13 = vpop.permute.xlu1 %765  ;;  %12070 = vmatprep.subr.bf16.mxu1 %v12069_v53 }
 0x147   : > { %12072 = vmatpush1.bf16.msra.mxu1 %v12071_v42  ;;  %v798_v58 = vsel %vm793_vm2, %v13967_v44, %v766_v13  ;;  %v666_v60 = vsel %vm660_vm1, %v633_v47, %v14079_v55 }
 0x148   : > { %3269 = vrot.lane.b32.xlu0 %v13777_v39, %s19485_s11  ;;  %3399 = vrot.lane.b32.xlu1 %v14042_v32, %s19486_s13  ;;  %v12111_v38 = vpack.c.bf16 %v798_v58, %v665_v57 }
 0x14a   : > { %v14089_v37 = vpop.permute.xlu0 %767  ;;  %v1444_v59 = vpop.permute.xlu1 %1443 }
 0x14b   : > { %v799_v61 = vsel %vm793_vm2, %v766_v13, %v14089_v37  ;;  %v1480_v18 = vsel %vm19421_vm8, %v13807_v52, %v1444_v59 }
 0x14c   : > { %3401 = vrot.lane.b32.xlu0 %v13777_v39, %s19486_s13  ;;  %2827 = vrot.lane.b32.xlu1 %v13777_v39, %s19482_s21  ;;  %v12109_v44 = vpack.c.bf16 %v799_v61, %v666_v60 }
 0x14e   : > { %v14099_v63 = vpop.permute.xlu0 %1445  ;;  %v1582_v5 = vpop.permute.xlu1 %1581  ;;  %12110 = vmatprep.subr.bf16.mxu0 %v12109_v44 }
 0x14f   : > { %12112 = vmatpush1.bf16.msra.mxu0 %v12111_v38  ;;  %v1618_v7 = vsel %vm19422_vm9, %v13813_v54, %v1582_v5  ;;  %v1481_v14 = vsel %vm19421_vm8, %v1444_v59, %v14099_v63  ;;  %v14123_v54 = vld [vmem:[%s13578_s19 + $0x40] sm:$0xff] }
 0x150   : > { %2829 = vrot.lane.b32.xlu0 %v13780_v40, %s19482_s21  ;;  %2965 = vrot.lane.b32.xlu1 %v13777_v39, %s19483_s24  ;;  %v12075_v3 = vpack.c.bf16 %v1618_v7, %v1480_v18  ;;  %v14212_v18 = vld [vmem:[%s13578_s19 + $0x48] sm:$0xff] }
 0x152   : > { %v14110_v10 = vpop.permute.xlu0 %1583  ;;  %v899_v12 = vpop.permute.xlu1 %898 }
 0x153   : > { %v1619_v16 = vsel %vm19422_vm9, %v1582_v5, %v14110_v10  ;;  %v931_v27 = vsel %vm926_vm3, %v14003_v9, %v899_v12 }
 0x154   : > { %2967 = vrot.lane.b32.xlu0 %v13780_v40, %s19483_s24  ;;  %503 = vrot.lane.b32.xlu1 %v14106_v6, %s19484_s12  ;;  %v12073_v39 = vpack.c.bf16 %v1619_v16, %v1481_v14 }
 0x156   : > { %v14125_v21 = vpop.permute.xlu0 %900  ;;  %v1034_v22 = vpop.permute.xlu1 %1033  ;;  %12074 = vmatprep.subr.bf16.mxu1 %v12073_v39 }
 0x157   : > { %12076 = vmatpush1.bf16.msra.mxu1 %v12075_v3  ;;  %v1068_v52 = vsel %vm1063_vm4, %v14009_v11, %v1034_v22  ;;  %v932_v28 = vsel %vm926_vm3, %v899_v12, %v14125_v21  ;;  %v14146_v11 = vld [vmem:[%s13578_s19 + $0x28] sm:$0xff] }
 0x158   : > { %505 = vrot.lane.b32.xlu0 %v14123_v54, %s19484_s12  ;;  %3139 = vrot.lane.b32.xlu1 %v13780_v40, %s19484_s12  ;;  %v12115_v30 = vpack.c.bf16 %v1068_v52, %v931_v27 }
 0x15a   : > { %v14135_v24 = vpop.permute.xlu0 %1035  ;;  %v1720_v26 = vpop.permute.xlu1 %1719 }
 0x15b   : > { %v1069_v8 = vsel %vm1063_vm4, %v1034_v22, %v14135_v24  ;;  %v1756_v49 = vsel %vm1753_vm10, %v13829_v0, %v1720_v26 }
 0x15c   : > { %3141 = vrot.lane.b32.xlu0 %v14106_v6, %s19484_s12  ;;  %3531 = vrot.lane.b32.xlu1 %v14042_v32, %s19487_s9  ;;  %v12113_v9 = vpack.c.bf16 %v1069_v8, %v932_v28 }
 0x15e   : > { %v14148_v40 = vpop.permute.xlu0 %1721  ;;  %v1858_v34 = vpop.permute.xlu1 %1857  ;;  %12114 = vmatprep.subr.bf16.mxu0 %v12113_v9 }
 0x15f   : > { %12116 = vmatpush1.bf16.msra.mxu0 %v12115_v30  ;;  %v1894_v4 = vsel %vm1891_vm11, %v13835_v2, %v1858_v34  ;;  %v1757_v45 = vsel %vm1753_vm10, %v1720_v26, %v14148_v40  ;;  %v14169_v2 = vld [vmem:[%s13578_s19 + $0x30] sm:$0xff] }
 0x160   : > { %3533 = vrot.lane.b32.xlu0 %v14146_v11, %s19487_s9  ;;  %636 = vrot.lane.b32.xlu1 %v14106_v6, %s19485_s11  ;;  %v12079_v41 = vpack.c.bf16 %v1894_v4, %v1756_v49 }
 0x162   : > { %v14156_v20 = vpop.permute.xlu0 %1859  ;;  %v1172_v43 = vpop.permute.xlu1 %1171 }
 0x163   : > { %v1895_v47 = vsel %vm1891_vm11, %v1858_v34, %v14156_v20  ;;  %v1206_v60 = vsel %vm19419_vm5, %v14056_v36, %v1172_v43 }
 0x164   : > { %638 = vrot.lane.b32.xlu0 %v14123_v54, %s19485_s11  ;;  %769 = vrot.lane.b32.xlu1 %v14106_v6, %s19486_s13  ;;  %v12077_v51 = vpack.c.bf16 %v1895_v47, %v1757_v45 }
 0x166   : > { %v14171_v53 = vpop.permute.xlu0 %1173  ;;  %v1310_v42 = vpop.permute.xlu1 %1309  ;;  %12078 = vmatprep.subr.bf16.mxu1 %v12077_v51 }
 0x167   : > { %12080 = vmatpush1.bf16.msra.mxu1 %v12079_v41  ;;  %v1344_v0 = vsel %vm19420_vm6, %v14067_v46, %v1310_v42  ;;  %v1207_v58 = vsel %vm19419_vm5, %v1172_v43, %v14171_v53  ;;  %vm19488_vm5 = vcmask 506880  }
 0x168   : > { %771 = vrot.lane.b32.xlu0 %v14123_v54, %s19486_s13  ;;  %3271 = vrot.lane.b32.xlu1 %v14169_v2, %s19485_s11  ;;  %v12119_v46 = vpack.c.bf16 %v1344_v0, %v1206_v60 }
 0x16a   : > { %v14179_v13 = vpop.permute.xlu0 %1311  ;;  %v1996_v57 = vpop.permute.xlu1 %1995 }
 0x16b   : > { %v1345_v59 = vsel %vm19420_vm6, %v1310_v42, %v14179_v13  ;;  %vm19489_vm6 = vmmov %vm19488_vm5 }
 0x16c   : > { %3273 = vrot.lane.b32.xlu0 %v14106_v6, %s19485_s11  ;;  %3403 = vrot.lane.b32.xlu1 %v14169_v2, %s19486_s13  ;;  %v12117_v61 = vpack.c.bf16 %v1345_v59, %v1207_v58  ;;  %v2032_v16 = vsel %vm19489_vm6, %v13851_v17, %v1996_v57  ;;  %v14221_v17 = vld [vmem:[%s13578_s19 + $0x50] sm:$0xff]  ;;  %vm19491_vm6 = vcmask 490496  }
 0x16e   : > { %v14191_v38 = vpop.permute.xlu0 %1997  ;;  %v2134_v44 = vpop.permute.xlu1 %2133  ;;  %12118 = vmatprep.subr.bf16.mxu0 %v12117_v61 }
 0x16f   : > { %12120 = vmatpush1.bf16.msra.mxu0 %v12119_v46  ;;  %v2170_v36 = vsel %vm2167_vm13, %v13857_v19, %v2134_v44  ;;  %v2033_v12 = vsel %vm19488_vm5, %v1996_v57, %v14191_v38  ;;  %vm19490_vm5 = vcmask 261120  }
 0x170   : > { %3405 = vrot.lane.b32.xlu0 %v14106_v6, %s19486_s13  ;;  %902 = vrot.lane.b32.xlu1 %v14106_v6, %s19487_s9  ;;  %v12083_v39 = vpack.c.bf16 %v2170_v36, %v2032_v16 }
 0x172   : > { %v14199_v5 = vpop.permute.xlu0 %2135  ;;  %v1448_v7 = vpop.permute.xlu1 %1447 }
 0x173   : > { %v2171_v14 = vsel %vm2167_vm13, %v2134_v44, %v14199_v5  ;;  %v1482_v30 = vsel %vm19421_vm8, %v14099_v63, %v1448_v7 }
 0x174   : > { %904 = vrot.lane.b32.xlu0 %v14123_v54, %s19487_s9  ;;  %1037 = vrot.lane.b32.xlu1 %v14106_v6, %s19469_s16  ;;  %v12081_v19 = vpack.c.bf16 %v2171_v14, %v2033_v12 }
 0x176   : > { %v14214_v3 = vpop.permute.xlu0 %1449  ;;  %v1586_v22 = vpop.permute.xlu1 %1585  ;;  %12082 = vmatprep.subr.bf16.mxu1 %v12081_v19 }
 0x177   : > { %12084 = vmatpush1.bf16.msra.mxu1 %v12083_v39  ;;  %v1620_v27 = vsel %vm19422_vm9, %v14110_v10, %v1586_v22  ;;  %v1483_v28 = vsel %vm19421_vm8, %v1448_v7, %v14214_v3  ;;  %vm19492_vm8 = vmmov %vm19490_vm5 }
 0x178   : > { %1039 = vrot.lane.b32.xlu0 %v14123_v54, %s19469_s16  ;;  %507 = vrot.lane.b32.xlu1 %v14212_v18, %s19484_s12  ;;  %v12123_v10 = vpack.c.bf16 %v1620_v27, %v1482_v30 }
 0x17a   : > { %v14225_v52 = vpop.permute.xlu0 %1587  ;;  %v2272_v26 = vpop.permute.xlu1 %2271 }
 0x17b   : > { %v1621_v8 = vsel %vm19422_vm9, %v1586_v22, %v14225_v52  ;;  %vm19493_vm9 = vmmov %vm19491_vm6 }
 0x17c   : > { %509 = vrot.lane.b32.xlu0 %v14221_v17, %s19484_s12  ;;  %3535 = vrot.lane.b32.xlu1 %v14169_v2, %s19487_s9  ;;  %v12121_v9 = vpack.c.bf16 %v1621_v8, %v1483_v28  ;;  %v2308_v51 = vsel %vm19493_vm9, %v13873_v31, %v2272_v26 }
 0x17e   : > { %v14237_v34 = vpop.permute.xlu0 %2273  ;;  %v2410_v4 = vpop.permute.xlu1 %2409  ;;  %12122 = vmatprep.subr.bf16.mxu0 %v12121_v9 }
 0x17f   : > { %12124 = vmatpush1.bf16.msra.mxu0 %v12123_v10  ;;  %v2446_v63 = vsel %vm19490_vm5, %v13879_v33, %v2410_v4  ;;  %v2309_v47 = vsel %vm19491_vm6, %v2272_v26, %v14237_v34  ;;  %vm19496_vm5 = vcmask 506880  }
 0x180   : > { %3537 = vrot.lane.b32.xlu0 %v14106_v6, %s19487_s9  ;;  %1175 = vrot.lane.b32.xlu1 %v14106_v6, %s19470_s15  ;;  %v12087_v33 = vpack.c.bf16 %v2446_v63, %v2308_v51  ;;  %vm19497_vm6 = vmmov %vm19496_vm5 }
 0x182   : > { %v14245_v43 = vpop.permute.xlu0 %2411  ;;  %v1724_v45 = vpop.permute.xlu1 %1723 }
 0x183   : > { %v2447_v49 = vsel %vm19492_vm8, %v2410_v4, %v14245_v43  ;;  %v1758_v61 = vsel %vm1753_vm10, %v14148_v40, %v1724_v45  ;;  %vm19494_vm8 = vcmask 252928  }
 0x184   : > { %1177 = vrot.lane.b32.xlu0 %v14123_v54, %s19470_s15  ;;  %1313 = vrot.lane.b32.xlu1 %v14106_v6, %s19471_s17  ;;  %v12085_v41 = vpack.c.bf16 %v2447_v49, %v2309_v47  ;;  %vm19495_vm9 = vmmov %vm19494_vm8 }
 0x186   : > { %v14257_v42 = vpop.permute.xlu0 %1725  ;;  %v1862_v0 = vpop.permute.xlu1 %1861  ;;  %12086 = vmatprep.subr.bf16.mxu1 %v12085_v41 }
 0x187   : > { %12088 = vmatpush1.bf16.msra.mxu1 %v12087_v33  ;;  %v1896_v31 = vsel %vm1891_vm11, %v14156_v20, %v1862_v0  ;;  %v1759_v59 = vsel %vm1753_vm10, %v1724_v45, %v14257_v42 }
 0x188   : > { %1315 = vrot.lane.b32.xlu0 %v14123_v54, %s19471_s17  ;;  %640 = vrot.lane.b32.xlu1 %v14212_v18, %s19485_s11  ;;  %v12127_v20 = vpack.c.bf16 %v1896_v31, %v1758_v61 }
 0x18a   : > { %v14265_v57 = vpop.permute.xlu0 %1863  ;;  %v2548_v58 = vpop.permute.xlu1 %2547 }
 0x18b   : > { %v1897_v60 = vsel %vm1891_vm11, %v1862_v0, %v14265_v57  ;;  %v2584_v19 = vsel %vm19495_vm9, %v13895_v48, %v2548_v58  ;;  %vm19499_vm9 = vcmask 490496  }
 0x18c   : > { %642 = vrot.lane.b32.xlu0 %v14221_v17, %s19485_s11  ;;  %773 = vrot.lane.b32.xlu1 %v14212_v18, %s19486_s13  ;;  %v12125_v46 = vpack.c.bf16 %v1897_v60, %v1759_v59 }
 0x18e   : > { %v14277_v44 = vpop.permute.xlu0 %2549  ;;  %v2686_v36 = vpop.permute.xlu1 %2685  ;;  %12126 = vmatprep.subr.bf16.mxu0 %v12125_v46 }
 0x18f   : > { %12128 = vmatpush1.bf16.msra.mxu0 %v12127_v20  ;;  %v2722_v40 = vsel %vm2719_vm14, %v13901_v50, %v2686_v36  ;;  %v2585_v14 = vsel %vm19494_vm8, %v2548_v58, %v14277_v44  ;;  %vm19498_vm8 = vcmask 261120  }
 0x190   : > { %775 = vrot.lane.b32.xlu0 %v14221_v17, %s19486_s13  ;;  %1451 = vrot.lane.b32.xlu1 %v14106_v6, %s19472_s20  ;;  %v12091_v50 = vpack.c.bf16 %v2722_v40, %v2584_v19 }
 0x192   : > { %v14285_v7 = vpop.permute.xlu0 %2687  ;;  %v2000_v12 = vpop.permute.xlu1 %1999 }
 0x193   : > { %v2723_v16 = vsel %vm2719_vm14, %v2686_v36, %v14285_v7  ;;  %v2034_v9 = vsel %vm19497_vm6, %v14191_v38, %v2000_v12  ;;  %vm19501_vm6 = vmmov %vm19499_vm9 }
 0x194   : > { %1453 = vrot.lane.b32.xlu0 %v14123_v54, %s19472_s20  ;;  %1589 = vrot.lane.b32.xlu1 %v14106_v6, %s19473_s26  ;;  %v12089_v39 = vpack.c.bf16 %v2723_v16, %v2585_v14  ;;  %v3055_v14 = vld [vmem:[%s13578_s19 + $0x18] sm:$0xff] }
 0x196   : > { %v14297_v22 = vpop.permute.xlu0 %2001  ;;  %v2138_v27 = vpop.permute.xlu1 %2137  ;;  %12090 = vmatprep.subr.bf16.mxu1 %v12089_v39 }
 0x197   : > { %12092 = vmatpush1.bf16.msra.mxu1 %v12091_v50  ;;  %v2172_v48 = vsel %vm2167_vm13, %v14199_v5, %v2138_v27  ;;  %v2035_v8 = vsel %vm19496_vm5, %v2000_v12, %v14297_v22  ;;  %vm19500_vm5 = vmmov %vm19498_vm8 }
 0x198   : > { %1591 = vrot.lane.b32.xlu0 %v14123_v54, %s19473_s26  ;;  %906 = vrot.lane.b32.xlu1 %v14212_v18, %s19487_s9  ;;  %v12131_v5 = vpack.c.bf16 %v2172_v48, %v2034_v9 }
 0x19a   : > { %v14305_v26 = vpop.permute.xlu0 %2139  ;;  %v2824_v28 = vpop.permute.xlu1 %2823 }
 0x19b   : > { %v2173_v30 = vsel %vm2167_vm13, %v2138_v27, %v14305_v26  ;;  %v2860_v41 = vsel %vm2857_vm15, %v13917_v62, %v2824_v28 }
 0x19c   : > { %908 = vrot.lane.b32.xlu0 %v14221_v17, %s19487_s9  ;;  %1041 = vrot.lane.b32.xlu1 %v14212_v18, %s19469_s16  ;;  %v12129_v10 = vpack.c.bf16 %v2173_v30, %v2035_v8 }
 0x19e   : > { %v14317_v4 = vpop.permute.xlu0 %2825  ;;  %v2962_v63 = vpop.permute.xlu1 %2961  ;;  %12130 = vmatprep.subr.bf16.mxu0 %v12129_v10 }
 0x19f   : > { %12132 = vmatpush1.bf16.msra.mxu0 %v12131_v5  ;;  %v2998_v38 = vsel %vm2995_vm12, %v13923_v1, %v2962_v63  ;;  %v2861_v49 = vsel %vm2857_vm15, %v2824_v28, %v14317_v4 }
 0x1a0   : > { %1043 = vrot.lane.b32.xlu0 %v14221_v17, %s19469_s16  ;;  %1727 = vrot.lane.b32.xlu1 %v14106_v6, %s19474_s28  ;;  %v12095_v1 = vpack.c.bf16 %v2998_v38, %v2860_v41 }
 0x1a2   : > { %v14325_v45 = vpop.permute.xlu0 %2963  ;;  %v2276_v47 = vpop.permute.xlu1 %2275 }
 0x1a3   : > { %v2999_v51 = vsel %vm2995_vm12, %v2962_v63, %v14325_v45  ;;  %v2310_v46 = vsel %vm19501_vm6, %v14237_v34, %v2276_v47  ;;  %vm19505_vm6 = vcmask 777216  }
 0x1a4   : > { %1729 = vrot.lane.b32.xlu0 %v14123_v54, %s19474_s28  ;;  %1865 = vrot.lane.b32.xlu1 %v14106_v6, %s19475_s29  ;;  %v12093_v33 = vpack.c.bf16 %v2999_v51, %v2861_v49 }
 0x1a6   : > { %v14337_v0 = vpop.permute.xlu0 %2277  ;;  %v2414_v31 = vpop.permute.xlu1 %2413  ;;  %12094 = vmatprep.subr.bf16.mxu1 %v12093_v33 }
 0x1a7   : > { %12096 = vmatpush1.bf16.msra.mxu1 %v12095_v1  ;;  %v2448_v62 = vsel %vm19498_vm8, %v14245_v43, %v2414_v31  ;;  %v2311_v60 = vsel %vm19499_vm9, %v2276_v47, %v14337_v0  ;;  %vm19502_vm8 = vcmask 252928  }
 0x1a8   : > { %1867 = vrot.lane.b32.xlu0 %v14123_v54, %s19475_s29  ;;  %1179 = vrot.lane.b32.xlu1 %v14212_v18, %s19470_s15  ;;  %v12135_v43 = vpack.c.bf16 %v2448_v62, %v2310_v46  ;;  %vm19503_vm9 = vmmov %vm19502_vm8 }
 0x1aa   : > { %v14345_v58 = vpop.permute.xlu0 %2415  ;;  %v3136_v59 = vpop.permute.xlu1 %3135 }
 0x1ab   : > { %v2449_v61 = vsel %vm19500_vm5, %v2414_v31, %v14345_v58  ;;  %v3169_v36 = vsel %vm527_vm0, %v13952_v29, %v3136_v59  ;;  %vm19504_vm5 = vcmask 769024  }
 0x1ac   : > { %1181 = vrot.lane.b32.xlu0 %v14221_v17, %s19470_s15  ;;  %1317 = vrot.lane.b32.xlu1 %v14212_v18, %s19471_s17  ;;  %v12133_v20 = vpack.c.bf16 %v2449_v61, %v2311_v60  ;;  %v12099_v19 = vpack.c.bf16 %v3169_v36, %v3055_v14 }
 0x1ae   : > { %v14359_v40 = vpop.permute.xlu0 %3137  ;;  %v2552_v12 = vpop.permute.xlu1 %2551  ;;  %12134 = vmatprep.subr.bf16.mxu0 %v12133_v20 }
 0x1af   : > { %v3170_v16 = vsel %vm527_vm0, %v3136_v59, %v14359_v40  ;;  %12136 = vmatpush1.bf16.msra.mxu0 %v12135_v43  ;;  %v2586_v8 = vsel %vm19503_vm9, %v14277_v44, %v2552_v12  ;;  %vm19507_vm9 = vmmov %vm19505_vm6 }
 0x1b0   : > { %1319 = vrot.lane.b32.xlu0 %v14221_v17, %s19471_s17  ;;  %2003 = vrot.lane.b32.xlu1 %v14106_v6, %s19476_s18  ;;  %v12097_v34 = vpack.c.bf16 %v3170_v16, %v14042_v32 }
 0x1b2   : > { %v14369_v39 = vpop.permute.xlu0 %2553  ;;  %v2690_v29 = vpop.permute.xlu1 %2689  ;;  %12098 = vmatprep.subr.bf16.mxu1 %v12097_v34 }
 0x1b3   : > { %12100 = vmatpush1.bf16.msra.mxu1 %v12099_v19  ;;  %v2724_v50 = vsel %vm2719_vm14, %v14285_v7, %v2690_v29  ;;  %v2587_v32 = vsel %vm19502_vm8, %v2552_v12, %v14369_v39  ;;  %vm19506_vm8 = vmmov %vm19504_vm5 }
 0x1b4   : > { %2005 = vrot.lane.b32.xlu0 %v14123_v54, %s19476_s18  ;;  %2141 = vrot.lane.b32.xlu1 %v14106_v6, %s19477_s0  ;;  %v12139_v7 = vpack.c.bf16 %v2724_v50, %v2586_v8 }
 0x1b6   : > { %v14377_v27 = vpop.permute.xlu0 %2691  ;;  %v3268_v48 = vpop.permute.xlu1 %3267 }
 0x1b7   : > { %v2725_v28 = vsel %vm2719_vm14, %v2690_v29, %v14377_v27  ;;  %v3301_v49 = vsel %vm660_vm1, %v13981_v56, %v3268_v48 }
 0x1b8   : > { %2143 = vrot.lane.b32.xlu0 %v14123_v54, %s19477_s0  ;;  %1455 = vrot.lane.b32.xlu1 %v14212_v18, %s19472_s20  ;;  %v12137_v30 = vpack.c.bf16 %v2725_v28, %v2587_v32 }
 0x1ba   : > { %v14389_v9 = vpop.permute.xlu0 %3269  ;;  %v3400_v10 = vpop.permute.xlu1 %3399  ;;  %12138 = vmatprep.subr.bf16.mxu0 %v12137_v30 }
 0x1bb   : > { %12140 = vmatpush1.bf16.msra.mxu0 %v12139_v7  ;;  %v3433_v44 = vsel %vm793_vm2, %v13987_v15, %v3400_v10  ;;  %v3302_v38 = vsel %vm660_vm1, %v3268_v48, %v14389_v9 }
 0x1bc   : > { %1457 = vrot.lane.b32.xlu0 %v14221_v17, %s19472_s20  ;;  %1593 = vrot.lane.b32.xlu1 %v14212_v18, %s19473_s26  ;;  %v12103_v15 = vpack.c.bf16 %v3433_v44, %v3301_v49 }
 0x1be   : > { %v14397_v5 = vpop.permute.xlu0 %3401  ;;  %v2828_v63 = vpop.permute.xlu1 %2827 }
 0x1bf   : > { %v3434_v47 = vsel %vm793_vm2, %v3400_v10, %v14397_v5  ;;  %v2862_v60 = vsel %vm2857_vm15, %v14317_v4, %v2828_v63  ;;  %v2784_v10 = vld [vmem:[%s13578_s19 + $0x38] sm:$0xff] }
 0x1c0   : > { %1595 = vrot.lane.b32.xlu0 %v14221_v17, %s19473_s26  ;;  %2279 = vrot.lane.b32.xlu1 %v14106_v6, %s19478_s30  ;;  %v12101_v51 = vpack.c.bf16 %v3434_v47, %v3302_v38 }
 0x1c2   : > { %v14409_v41 = vpop.permute.xlu0 %2829  ;;  %v2966_v33 = vpop.permute.xlu1 %2965  ;;  %12102 = vmatprep.subr.bf16.mxu1 %v12101_v51 }
 0x1c3   : > { %12104 = vmatpush1.bf16.msra.mxu1 %v12103_v15  ;;  %v3000_v56 = vsel %vm2995_vm12, %v14325_v45, %v2966_v33  ;;  %v2863_v62 = vsel %vm2857_vm15, %v2828_v63, %v14409_v41 }
 0x1c4   : > { %2281 = vrot.lane.b32.xlu0 %v14123_v54, %s19478_s30  ;;  %2417 = vrot.lane.b32.xlu1 %v14106_v6, %s19479_s23  ;;  %v12143_v45 = vpack.c.bf16 %v3000_v56, %v2862_v60 }
 0x1c6   : > { %v14417_v1 = vpop.permute.xlu0 %2967  ;;  %v504_v31 = vpop.permute.xlu1 %503 }
 0x1c7   : > { %v3001_v59 = vsel %vm2995_vm12, %v2966_v33, %v14417_v1  ;;  %v534_v50 = vsel %vm527_vm0, %v14023_v25, %v504_v31 }
 0x1c8   : > { %2419 = vrot.lane.b32.xlu0 %v14123_v54, %s19479_s23  ;;  %1731 = vrot.lane.b32.xlu1 %v14212_v18, %s19474_s28  ;;  %v12141_v61 = vpack.c.bf16 %v3001_v59, %v2863_v62  ;;  %v12155_v25 = vpack.c.bf16 %v534_v50, %v14169_v2 }
 0x1ca   : > { %v14429_v46 = vpop.permute.xlu0 %505  ;;  %v3140_v20 = vpop.permute.xlu1 %3139  ;;  %12142 = vmatprep.subr.bf16.mxu0 %v12141_v61 }
 0x1cb   : > { %12144 = vmatpush1.bf16.msra.mxu0 %v12143_v45  ;;  %v3171_v4 = vsel %vm527_vm0, %v14359_v40, %v3140_v20  ;;  %v535_v34 = vsel %vm527_vm0, %v504_v31, %v14429_v46 }
 0x1cc   : > { %1733 = vrot.lane.b32.xlu0 %v14221_v17, %s19474_s28  ;;  %1869 = vrot.lane.b32.xlu1 %v14212_v18, %s19475_s29  ;;  %v12147_v16 = vpack.c.bf16 %v3171_v4, %v14146_v11  ;;  %v12153_v48 = vpack.c.bf16 %v535_v34, %v14106_v6 }
 0x1ce   : > { %v14437_v43 = vpop.permute.xlu0 %3141  ;;  %v3532_v36 = vpop.permute.xlu1 %3531 }
 0x1cf   : > { %v3172_v12 = vsel %vm527_vm0, %v3140_v20, %v14437_v43  ;;  %v3565_v11 = vsel %vm926_vm3, %v14029_v23, %v3532_v36  ;;  %v14473_v23 = vld [vmem:[%s19356_s1 + $0x8] sm:$0xff] }
 0x1d0   : > { %1871 = vrot.lane.b32.xlu0 %v14221_v17, %s19475_s29  ;;  %2555 = vrot.lane.b32.xlu1 %v14106_v6, %s19480_s27  ;;  %v12145_v14 = vpack.c.bf16 %v3172_v12, %v14169_v2 }
 0x1d2   : > { %v14449_v40 = vpop.permute.xlu0 %3533  ;;  %v637_v19 = vpop.permute.xlu1 %636  ;;  %12146 = vmatprep.subr.bf16.mxu0 %v12145_v14 }
 0x1d3   : > { %v3566_v29 = vsel %vm926_vm3, %v3532_v36, %v14449_v40  ;;  %12148 = vmatpush1.bf16.msra.mxu0 %v12147_v16  ;;  %v667_v7 = vsel %vm660_vm1, %v14079_v55, %v637_v19  ;;  %v14498_v55 = vld [vmem:[%s13578_s19 + $0x40] sm:$0xff] }
 0x1d4   : > { %2557 = vrot.lane.b32.xlu0 %v14123_v54, %s19480_s27  ;;  %2693 = vrot.lane.b32.xlu1 %v14106_v6, %s19481_s14 }
 0x1d5   : > { %3854 = vmatprep.subr.mxu1 %v3566_v29 }
 0x1d6   : > { %v14462_v32 = vpop.permute.xlu0 %638  ;;  %v770_v28 = vpop.permute.xlu1 %769  ;;  %3855 = vmatpush1.msra.mxu1 %v3565_v11 }
 0x1d7   : > { %12154 = vmatprep.subr.bf16.mxu1 %v12153_v48  ;;  %3871 = vmatmul.mubr.f32.vlgmr.msra.gmra.mrb[0].mxu1 %v14048_v35  ;;  %v800_v6 = vsel %vm793_vm2, %v14089_v37, %v770_v28 }
 0x1d8   : > { %2695 = vrot.lane.b32.xlu0 %v14123_v54, %s19481_s14  ;;  %2007 = vrot.lane.b32.xlu1 %v14212_v18, %s19476_s18  ;;  %v668_v54 = vsel %vm660_vm1, %v637_v19, %v14462_v32  ;;  %v12159_v44 = vpack.c.bf16 %v800_v6, %v667_v7 }
 0x1d9   : > { %12156 = vmatpush1.bf16.msra.mxu1 %v12155_v25  ;;  %11410 = vmatprep.mubr.msk.f32.mxu1 %vm19426_vm7, %v14473_v23 }
 0x1da   : > { %v14479_v8 = vpop.permute.xlu0 %771  ;;  %v3272_v2 = vpop.permute.xlu1 %3271 }
 0x1db   : > { %v801_v30 = vsel %vm793_vm2, %v770_v28, %v14479_v8  ;;  %v3303_v56 = vsel %vm660_vm1, %v14389_v9, %v3272_v2 }
 0x1dc   : > { %2009 = vrot.lane.b32.xlu0 %v14221_v17, %s19476_s18  ;;  %2145 = vrot.lane.b32.xlu1 %v14212_v18, %s19477_s0  ;;  %v12157_v37 = vpack.c.bf16 %v801_v30, %v668_v54 }
 0x1de   : > { %v14492_v63 = vpop.permute.xlu0 %3273  ;;  %v3404_v38 = vpop.permute.xlu1 %3403  ;;  %12158 = vmatprep.subr.bf16.mxu1 %v12157_v37 }
 0x1df   : > { %12160 = vmatpush1.bf16.msra.mxu1 %v12159_v44  ;;  %v3435_v47 = vsel %vm793_vm2, %v14397_v5, %v3404_v38  ;;  %v3304_v15 = vsel %vm660_vm1, %v3272_v2, %v14492_v63 }
 0x1e0   : > { %2147 = vrot.lane.b32.xlu0 %v14221_v17, %s19477_s0  ;;  %2831 = vrot.lane.b32.xlu1 %v2784_v10, %s19482_s21  ;;  %v12151_v62 = vpack.c.bf16 %v3435_v47, %v3303_v56 }
 0x1e2   : > { %v14502_v49 = vpop.permute.xlu0 %3405  ;;  %v903_v51 = vpop.permute.xlu1 %902 }
 0x1e3   : > { %v3436_v33 = vsel %vm793_vm2, %v3404_v38, %v14502_v49  ;;  %v933_v4 = vsel %vm926_vm3, %v14125_v21, %v903_v51 }
 0x1e4   : > { %2833 = vrot.lane.b32.xlu0 %v14498_v55, %s19482_s21  ;;  %2969 = vrot.lane.b32.xlu1 %v2784_v10, %s19483_s24  ;;  %v12149_v31 = vpack.c.bf16 %v3436_v33, %v3304_v15  ;;  %v14598_v15 = vld [vmem:[%s13578_s19 + $0x50] sm:$0xff] }
 0x1e6   : > { %v14513_v5 = vpop.permute.xlu0 %904  ;;  %v1038_v59 = vpop.permute.xlu1 %1037  ;;  %12150 = vmatprep.subr.bf16.mxu0 %v12149_v31 }
 0x1e7   : > { %12152 = vmatpush1.bf16.msra.mxu0 %v12151_v62  ;;  %v1070_v9 = vsel %vm1063_vm4, %v14135_v24, %v1038_v59  ;;  %v934_v45 = vsel %vm926_vm3, %v903_v51, %v14513_v5 }
 0x1e8   : > { %2971 = vrot.lane.b32.xlu0 %v14498_v55, %s19483_s24  ;;  %2283 = vrot.lane.b32.xlu1 %v14212_v18, %s19478_s30  ;;  %v12163_v24 = vpack.c.bf16 %v1070_v9, %v933_v4 }
 0x1ea   : > { %v14521_v60 = vpop.permute.xlu0 %1039  ;;  %v508_v61 = vpop.permute.xlu1 %507 }
 0x1eb   : > { %v1071_v20 = vsel %vm1063_vm4, %v1038_v59, %v14521_v60  ;;  %v536_v29 = vsel %vm527_vm0, %v14429_v46, %v508_v61 }
 0x1ec   : > { %2285 = vrot.lane.b32.xlu0 %v14221_v17, %s19478_s30  ;;  %2421 = vrot.lane.b32.xlu1 %v14212_v18, %s19479_s23  ;;  %v12161_v36 = vpack.c.bf16 %v1071_v20, %v934_v45  ;;  %v12203_v46 = vpack.c.bf16 %v536_v29, %v14498_v55 }
 0x1ee   : > { %v14533_v12 = vpop.permute.xlu0 %509  ;;  %v3536_v14 = vpop.permute.xlu1 %3535  ;;  %12162 = vmatprep.subr.bf16.mxu1 %v12161_v36 }
 0x1ef   : > { %12164 = vmatpush1.bf16.msra.mxu1 %v12163_v24  ;;  %v537_v21 = vsel %vm527_vm0, %v508_v61, %v14533_v12  ;;  %v3567_v50 = vsel %vm926_vm3, %v14449_v40, %v3536_v14 }
 0x1f0   : > { %2423 = vrot.lane.b32.xlu0 %v14221_v17, %s19479_s23  ;;  %3143 = vrot.lane.b32.xlu1 %v14498_v55, %s19484_s12  ;;  %v12201_v11 = vpack.c.bf16 %v537_v21, %v14212_v18 }
 0x1f2   : > { %v14541_v16 = vpop.permute.xlu0 %3537  ;;  %v1176_v34 = vpop.permute.xlu1 %1175 }
 0x1f3   : > { %v3568_v19 = vsel %vm926_vm3, %v3536_v14, %v14541_v16  ;;  %v1208_v54 = vsel %vm19507_vm9, %v14171_v53, %v1176_v34  ;;  %v3363_v53 = vld [vmem:[%s13578_s19 + $0x48] sm:$0xff] }
 0x1f4   : > { %3145 = vrot.lane.b32.xlu0 %v14212_v18, %s19484_s12  ;;  %2559 = vrot.lane.b32.xlu1 %v14212_v18, %s19480_s27 }
 0x1f5   : > { %3979 = vmatprep.subr.mxu0 %v3568_v19 }
 0x1f6   : > { %v14554_v48 = vpop.permute.xlu0 %1177  ;;  %v1314_v28 = vpop.permute.xlu1 %1313  ;;  %3980 = vmatpush1.msra.mxu0 %v3567_v50 }
 0x1f7   : > { %12202 = vmatprep.subr.bf16.mxu0 %v12201_v11  ;;  %3996 = vmatmul.mubr.f32.vlgmr.msra.gmra.mrb[2].mxu0 %v14048_v35  ;;  %v1346_v40 = vsel %vm19504_vm5, %v14179_v13, %v1314_v28  ;;  %v1209_v35 = vsel %vm19505_vm6, %v1176_v34, %v14554_v48  ;;  %vm19508_vm5 = vcmask 752640   ;;  %vm19509_vm6 = vcmask 760832  }
 0x1f8   : > { %2561 = vrot.lane.b32.xlu0 %v14221_v17, %s19480_s27  ;;  %2697 = vrot.lane.b32.xlu1 %v14212_v18, %s19481_s14  ;;  %v12167_v30 = vpack.c.bf16 %v1346_v40, %v1208_v54  ;;  %vm19511_vm9 = vmmov %vm19509_vm6 }
 0x1f9   : > { %12204 = vmatpush1.bf16.msra.mxu0 %v12203_v46  ;;  %11411 = vmatprep.mubr.msk.f32.mxu0 %vm19426_vm7, %v14473_v23 }
 0x1fa   : > { %v14566_v25 = vpop.permute.xlu0 %1315  ;;  %v641_v6 = vpop.permute.xlu1 %640 }
 0x1fb   : > { %v1347_v2 = vsel %vm19506_vm8, %v1314_v28, %v14566_v25  ;;  %vm19510_vm8 = vmmov %vm19508_vm5 }
 0x1fc   : > { %2699 = vrot.lane.b32.xlu0 %v14221_v17, %s19481_s14  ;;  %3275 = vrot.lane.b32.xlu1 %v14498_v55, %s19485_s11  ;;  %v12165_v13 = vpack.c.bf16 %v1347_v2, %v1209_v35 }
 0x1fe   : > { %v14578_v7 = vpop.permute.xlu0 %642  ;;  %v774_v37 = vpop.permute.xlu1 %773  ;;  %12166 = vmatprep.subr.bf16.mxu1 %v12165_v13 }
 0x1ff   : > { %12168 = vmatpush1.bf16.msra.mxu1 %v12167_v30  ;;  %v802_v17 = vsel %vm793_vm2, %v14479_v8, %v774_v37  ;;  %v670_v38 = vsel %vm660_vm1, %v641_v6, %v14578_v7 }
 0x200   : > { %3277 = vrot.lane.b32.xlu0 %v14212_v18, %s19485_s11  ;;  %3407 = vrot.lane.b32.xlu1 %v14498_v55, %s19486_s13  ;;  %v669_v18 = vsel %vm660_vm1, %v14462_v32, %v641_v6  ;;  %v14606_v32 = vld [vmem:[%s13578_s19 + $0x58] sm:$0xff] }
 0x201   : > { %v12207_v8 = vpack.c.bf16 %v802_v17, %v669_v18 }
 0x202   : > { %v14587_v10 = vpop.permute.xlu0 %775  ;;  %v1452_v44 = vpop.permute.xlu1 %1451 }
 0x203   : > { %v803_v47 = vsel %vm793_vm2, %v774_v37, %v14587_v10  ;;  %v1484_v45 = vsel %vm19511_vm9, %v14214_v3, %v1452_v44 }
 0x204   : > { %3409 = vrot.lane.b32.xlu0 %v3363_v53, %s19486_s13  ;;  %2835 = vrot.lane.b32.xlu1 %v3363_v53, %s19482_s21  ;;  %v12205_v51 = vpack.c.bf16 %v803_v47, %v670_v38 }
 0x206   : > { %v14600_v33 = vpop.permute.xlu0 %1453  ;;  %v1590_v56 = vpop.permute.xlu1 %1589  ;;  %12206 = vmatprep.subr.bf16.mxu0 %v12205_v51 }
 0x207   : > { %12208 = vmatpush1.bf16.msra.mxu0 %v12207_v8  ;;  %v1622_v31 = vsel %vm19508_vm5, %v14225_v52, %v1590_v56  ;;  %v1485_v9 = vsel %vm19509_vm6, %v1452_v44, %v14600_v33  ;;  %v14623_v52 = vld [vmem:[%s13578_s19 + $0x60] sm:$0xff]  ;;  %vm19512_vm5 = vcmask 769024   ;;  %vm19513_vm6 = vcmask 777216  }
 0x208   : > { %2837 = vrot.lane.b32.xlu0 %v14598_v15, %s19482_s21  ;;  %2973 = vrot.lane.b32.xlu1 %v3363_v53, %s19483_s24  ;;  %v12171_v4 = vpack.c.bf16 %v1622_v31, %v1484_v45  ;;  %vm19515_vm9 = vmmov %vm19513_vm6 }
 0x20a   : > { %v14610_v62 = vpop.permute.xlu0 %1591  ;;  %v907_v59 = vpop.permute.xlu1 %906 }
 0x20b   : > { %v1623_v61 = vsel %vm19510_vm8, %v1590_v56, %v14610_v62  ;;  %v935_v29 = vsel %vm926_vm3, %v14513_v5, %v907_v59  ;;  %vm19514_vm8 = vmmov %vm19512_vm5 }
 0x20c   : > { %2975 = vrot.lane.b32.xlu0 %v14598_v15, %s19483_s24  ;;  %511 = vrot.lane.b32.xlu1 %v14606_v32, %s19484_s12  ;;  %v12169_v20 = vpack.c.bf16 %v1623_v61, %v1485_v9  ;;  %v14705_v9 = vld [vmem:[%s13578_s19 + $0x68] sm:$0xff] }
 0x20e   : > { %v14625_v36 = vpop.permute.xlu0 %908  ;;  %v1042_v24 = vpop.permute.xlu1 %1041  ;;  %12170 = vmatprep.subr.bf16.mxu1 %v12169_v20 }
 0x20f   : > { %12172 = vmatpush1.bf16.msra.mxu1 %v12171_v4  ;;  %v1072_v3 = vsel %vm1063_vm4, %v14521_v60, %v1042_v24  ;;  %v936_v34 = vsel %vm926_vm3, %v907_v59, %v14625_v36 }
 0x210   : > { %513 = vrot.lane.b32.xlu0 %v14623_v52, %s19484_s12  ;;  %3147 = vrot.lane.b32.xlu1 %v14598_v15, %s19484_s12  ;;  %v12211_v60 = vpack.c.bf16 %v1072_v3, %v935_v29 }
 0x212   : > { %v14633_v14 = vpop.permute.xlu0 %1043  ;;  %v1728_v21 = vpop.permute.xlu1 %1727 }
 0x213   : > { %v1073_v19 = vsel %vm1063_vm4, %v1042_v24, %v14633_v14  ;;  %v1760_v35 = vsel %vm1753_vm10, %v14257_v42, %v1728_v21 }
 0x214   : > { %3149 = vrot.lane.b32.xlu0 %v14606_v32, %s19484_s12  ;;  %3539 = vrot.lane.b32.xlu1 %v14498_v55, %s19487_s9  ;;  %v12209_v50 = vpack.c.bf16 %v1073_v19, %v936_v34 }
 0x216   : > { %v14645_v11 = vpop.permute.xlu0 %1729  ;;  %v1866_v28 = vpop.permute.xlu1 %1865  ;;  %12210 = vmatprep.subr.bf16.mxu0 %v12209_v50 }
 0x217   : > { %12212 = vmatpush1.bf16.msra.mxu0 %v12211_v60  ;;  %v1898_v5 = vsel %vm1891_vm11, %v14265_v57, %v1866_v28  ;;  %v1761_v55 = vsel %vm1753_vm10, %v1728_v21, %v14645_v11 }
 0x218   : > { %3541 = vrot.lane.b32.xlu0 %v3363_v53, %s19487_s9  ;;  %644 = vrot.lane.b32.xlu1 %v14606_v32, %s19485_s11  ;;  %v12175_v57 = vpack.c.bf16 %v1898_v5, %v1760_v35 }
 0x21a   : > { %v14652_v46 = vpop.permute.xlu0 %1867  ;;  %v1180_v40 = vpop.permute.xlu1 %1179 }
 0x21b   : > { %v1899_v6 = vsel %vm1891_vm11, %v1866_v28, %v14652_v46  ;;  %v1210_v44 = vsel %vm19515_vm9, %v14554_v48, %v1180_v40  ;;  %vm19519_vm9 = vcmask 760832  }
 0x21c   : > { %646 = vrot.lane.b32.xlu0 %v14623_v52, %s19485_s11  ;;  %777 = vrot.lane.b32.xlu1 %v14606_v32, %s19486_s13  ;;  %v12173_v2 = vpack.c.bf16 %v1899_v6, %v1761_v55 }
 0x21e   : > { %v14664_v54 = vpop.permute.xlu0 %1181  ;;  %v1318_v13 = vpop.permute.xlu1 %1317  ;;  %12174 = vmatprep.subr.bf16.mxu1 %v12173_v2 }
 0x21f   : > { %12176 = vmatpush1.bf16.msra.mxu1 %v12175_v57  ;;  %v1348_v42 = vsel %vm19512_vm5, %v14566_v25, %v1318_v13  ;;  %v1211_v53 = vsel %vm19513_vm6, %v1180_v40, %v14664_v54  ;;  %vm19516_vm5 = vcmask 506880  }
 0x220   : > { %779 = vrot.lane.b32.xlu0 %v14623_v52, %s19486_s13  ;;  %3279 = vrot.lane.b32.xlu1 %v14598_v15, %s19485_s11  ;;  %v12215_v25 = vpack.c.bf16 %v1348_v42, %v1210_v44  ;;  %vm19517_vm6 = vmmov %vm19516_vm5 }
 0x222   : > { %v14672_v30 = vpop.permute.xlu0 %1319  ;;  %v2004_v37 = vpop.permute.xlu1 %2003 }
 0x223   : > { %v1349_v17 = vsel %vm19514_vm8, %v1318_v13, %v14672_v30  ;;  %v2036_v59 = vsel %vm19517_vm6, %v14297_v22, %v2004_v37  ;;  %v14714_v22 = vld [vmem:[%s13578_s19 + $0x70] sm:$0xff]  ;;  %vm19518_vm8 = vcmask 752640   ;;  %vm19521_vm6 = vmmov %vm19519_vm9 }
 0x224   : > { %3281 = vrot.lane.b32.xlu0 %v14606_v32, %s19485_s11  ;;  %3411 = vrot.lane.b32.xlu1 %v14598_v15, %s19486_s13  ;;  %v12213_v38 = vpack.c.bf16 %v1349_v17, %v1211_v53 }
 0x226   : > { %v14684_v47 = vpop.permute.xlu0 %2005  ;;  %v2142_v18 = vpop.permute.xlu1 %2141  ;;  %12214 = vmatprep.subr.bf16.mxu0 %v12213_v38 }
 0x227   : > { %12216 = vmatpush1.bf16.msra.mxu0 %v12215_v25  ;;  %v2174_v48 = vsel %vm2167_vm13, %v14305_v26, %v2142_v18  ;;  %v2037_v56 = vsel %vm19516_vm5, %v2004_v37, %v14684_v47  ;;  %vm19520_vm5 = vmmov %vm19518_vm8 }
 0x228   : > { %3413 = vrot.lane.b32.xlu0 %v14606_v32, %s19486_s13  ;;  %910 = vrot.lane.b32.xlu1 %v14606_v32, %s19487_s9  ;;  %v12179_v61 = vpack.c.bf16 %v2174_v48, %v2036_v59 }
 0x22a   : > { %v14692_v51 = vpop.permute.xlu0 %2143  ;;  %v1456_v8 = vpop.permute.xlu1 %1455 }
 0x22b   : > { %v2175_v31 = vsel %vm2167_vm13, %v2142_v18, %v14692_v51  ;;  %v1486_v19 = vsel %vm19521_vm6, %v14600_v33, %v1456_v8 }
 0x22c   : > { %912 = vrot.lane.b32.xlu0 %v14623_v52, %s19487_s9  ;;  %1045 = vrot.lane.b32.xlu1 %v14606_v32, %s19469_s16  ;;  %v12177_v26 = vpack.c.bf16 %v2175_v31, %v2037_v56 }
 0x22e   : > { %v14707_v45 = vpop.permute.xlu0 %1457  ;;  %v1594_v20 = vpop.permute.xlu1 %1593  ;;  %12178 = vmatprep.subr.bf16.mxu1 %v12177_v26 }
 0x22f   : > { %12180 = vmatpush1.bf16.msra.mxu1 %v12179_v61  ;;  %v1624_v4 = vsel %vm19518_vm8, %v14610_v62, %v1594_v20  ;;  %v1487_v21 = vsel %vm19519_vm9, %v1456_v8, %v14707_v45  ;;  %vm19522_vm8 = vcmask 261120   ;;  %vm19523_vm9 = vcmask 490496  }
 0x230   : > { %1047 = vrot.lane.b32.xlu0 %v14623_v52, %s19469_s16  ;;  %515 = vrot.lane.b32.xlu1 %v14705_v9, %s19484_s12  ;;  %v12219_v62 = vpack.c.bf16 %v1624_v4, %v1486_v19  ;;  %vm19525_vm6 = vmmov %vm19523_vm9 }
 0x232   : > { %v14718_v24 = vpop.permute.xlu0 %1595  ;;  %v2280_v3 = vpop.permute.xlu1 %2279 }
 0x233   : > { %v1625_v34 = vsel %vm19520_vm5, %v1594_v20, %v14718_v24  ;;  %vm19524_vm5 = vmmov %vm19522_vm8  ;;  %v2312_v6 = vsel %vm19525_vm6, %v14337_v0, %v2280_v3 }
 0x234   : > { %517 = vrot.lane.b32.xlu0 %v14714_v22, %s19484_s12  ;;  %3543 = vrot.lane.b32.xlu1 %v14598_v15, %s19487_s9  ;;  %v12217_v29 = vpack.c.bf16 %v1625_v34, %v1487_v21 }
 0x236   : > { %v14730_v50 = vpop.permute.xlu0 %2281  ;;  %v2418_v60 = vpop.permute.xlu1 %2417  ;;  %12218 = vmatprep.subr.bf16.mxu0 %v12217_v29 }
 0x237   : > { %12220 = vmatpush1.bf16.msra.mxu0 %v12219_v62  ;;  %v2450_v33 = vsel %vm19522_vm8, %v14345_v58, %v2418_v60  ;;  %v2313_v40 = vsel %vm19523_vm9, %v2280_v3, %v14730_v50  ;;  %vm19526_vm8 = vcmask 252928  }
 0x238   : > { %3545 = vrot.lane.b32.xlu0 %v14606_v32, %s19487_s9  ;;  %1183 = vrot.lane.b32.xlu1 %v14606_v32, %s19470_s15  ;;  %v12183_v58 = vpack.c.bf16 %v2450_v33, %v2312_v6  ;;  %vm19527_vm9 = vmmov %vm19526_vm8 }
 0x23a   : > { %v14738_v28 = vpop.permute.xlu0 %2419  ;;  %v1732_v5 = vpop.permute.xlu1 %1731 }
 0x23b   : > { %v2451_v55 = vsel %vm19524_vm5, %v2418_v60, %v14738_v28  ;;  %v1762_v17 = vsel %vm1753_vm10, %v14645_v11, %v1732_v5  ;;  %vm19528_vm5 = vcmask 506880  }
 0x23c   : > { %1185 = vrot.lane.b32.xlu0 %v14623_v52, %s19470_s15  ;;  %1321 = vrot.lane.b32.xlu1 %v14606_v32, %s19471_s17  ;;  %v12181_v35 = vpack.c.bf16 %v2451_v55, %v2313_v40  ;;  %vm19529_vm6 = vmmov %vm19528_vm5 }
 0x23e   : > { %v14750_v2 = vpop.permute.xlu0 %1733  ;;  %v1870_v57 = vpop.permute.xlu1 %1869  ;;  %12182 = vmatprep.subr.bf16.mxu1 %v12181_v35 }
 0x23f   : > { %12184 = vmatpush1.bf16.msra.mxu1 %v12183_v58  ;;  %v1900_v0 = vsel %vm1891_vm11, %v14652_v46, %v1870_v57  ;;  %v1763_v37 = vsel %vm1753_vm10, %v1732_v5, %v14750_v2 }
 0x240   : > { %1323 = vrot.lane.b32.xlu0 %v14623_v52, %s19471_s17  ;;  %648 = vrot.lane.b32.xlu1 %v14705_v9, %s19485_s11  ;;  %v12223_v46 = vpack.c.bf16 %v1900_v0, %v1762_v17 }
 0x242   : > { %v14758_v13 = vpop.permute.xlu0 %1871  ;;  %v2556_v42 = vpop.permute.xlu1 %2555 }
 0x243   : > { %v1901_v53 = vsel %vm1891_vm11, %v1870_v57, %v14758_v13  ;;  %v2588_v31 = vsel %vm19527_vm9, %v14369_v39, %v2556_v42  ;;  %vm19531_vm9 = vcmask 490496  }
 0x244   : > { %650 = vrot.lane.b32.xlu0 %v14714_v22, %s19485_s11  ;;  %781 = vrot.lane.b32.xlu1 %v14705_v9, %s19486_s13  ;;  %v12221_v44 = vpack.c.bf16 %v1901_v53, %v1763_v37 }
 0x246   : > { %v14770_v38 = vpop.permute.xlu0 %2557  ;;  %v2694_v25 = vpop.permute.xlu1 %2693  ;;  %12222 = vmatprep.subr.bf16.mxu0 %v12221_v44  ;;  %v3060_v44 = vld [vmem:[%s13578_s19 + $0x40] sm:$0xff] }
 0x247   : > { %12224 = vmatpush1.bf16.msra.mxu0 %v12223_v46  ;;  %v2726_v11 = vsel %vm2719_vm14, %v14377_v27, %v2694_v25  ;;  %v2589_v8 = vsel %vm19526_vm8, %v2556_v42, %v14770_v38  ;;  %vm19530_vm8 = vcmask 261120  }
 0x248   : > { %783 = vrot.lane.b32.xlu0 %v14714_v22, %s19486_s13  ;;  %1459 = vrot.lane.b32.xlu1 %v14606_v32, %s19472_s20  ;;  %v12187_v27 = vpack.c.bf16 %v2726_v11, %v2588_v31 }
 0x24a   : > { %v14778_v18 = vpop.permute.xlu0 %2695  ;;  %v2008_v48 = vpop.permute.xlu1 %2007 }
 0x24b   : > { %v2727_v56 = vsel %vm2719_vm14, %v2694_v25, %v14778_v18  ;;  %v2038_v34 = vsel %vm19529_vm6, %v14684_v47, %v2008_v48  ;;  %vm19533_vm6 = vmmov %vm19531_vm9 }
 0x24c   : > { %1461 = vrot.lane.b32.xlu0 %v14623_v52, %s19472_s20  ;;  %1597 = vrot.lane.b32.xlu1 %v14606_v32, %s19473_s26  ;;  %v12185_v59 = vpack.c.bf16 %v2727_v56, %v2589_v8  ;;  %v14863_v56 = vld [vmem:[%s13578_s19 + $0x88] sm:$0xff] }
 0x24d   : > { %448 = vst [vmem:[#allocation2 + $0x88] sm:$0xff] %v14863_v56 }
 0x24e   : > { %v14790_v26 = vpop.permute.xlu0 %2009  ;;  %v2146_v61 = vpop.permute.xlu1 %2145  ;;  %12186 = vmatprep.subr.bf16.mxu1 %v12185_v59 }
 0x24f   : > { %12188 = vmatpush1.bf16.msra.mxu1 %v12187_v27  ;;  %v2176_v39 = vsel %vm2167_vm13, %v14692_v51, %v2146_v61  ;;  %v2039_v3 = vsel %vm19528_vm5, %v2008_v48, %v14790_v26  ;;  %vm19532_vm5 = vmmov %vm19530_vm8  ;;  %v3059_v48 = vld [vmem:[%s13578_s19 + $0x38] sm:$0xff] }
 0x250   : > { %1599 = vrot.lane.b32.xlu0 %v14623_v52, %s19473_s26  ;;  %914 = vrot.lane.b32.xlu1 %v14705_v9, %s19487_s9  ;;  %v12227_v51 = vpack.c.bf16 %v2176_v39, %v2038_v34 }
 0x252   : > { %v14798_v20 = vpop.permute.xlu0 %2147  ;;  %v2832_v4 = vpop.permute.xlu1 %2831 }
 0x253   : > { %v2177_v21 = vsel %vm2167_vm13, %v2146_v61, %v14798_v20  ;;  %v2864_v55 = vsel %vm2857_vm15, %v14409_v41, %v2832_v4 }
 0x254   : > { %916 = vrot.lane.b32.xlu0 %v14714_v22, %s19487_s9  ;;  %1049 = vrot.lane.b32.xlu1 %v14705_v9, %s19469_s16  ;;  %v12225_v19 = vpack.c.bf16 %v2177_v21, %v2039_v3 }
 0x256   : > { %v14810_v29 = vpop.permute.xlu0 %2833  ;;  %v2970_v62 = vpop.permute.xlu1 %2969  ;;  %12226 = vmatprep.subr.bf16.mxu0 %v12225_v19 }
 0x257   : > { %12228 = vmatpush1.bf16.msra.mxu0 %v12227_v51  ;;  %v3002_v47 = vsel %vm2995_vm12, %v14417_v1, %v2970_v62  ;;  %v2865_v5 = vsel %vm2857_vm15, %v2832_v4, %v14810_v29 }
 0x258   : > { %1051 = vrot.lane.b32.xlu0 %v14714_v22, %s19469_s16  ;;  %1735 = vrot.lane.b32.xlu1 %v14606_v32, %s19474_s28  ;;  %v12191_v1 = vpack.c.bf16 %v3002_v47, %v2864_v55 }
 0x25a   : > { %v14818_v60 = vpop.permute.xlu0 %2971  ;;  %v2284_v33 = vpop.permute.xlu1 %2283 }
 0x25b   : > { %v3003_v40 = vsel %vm2995_vm12, %v2970_v62, %v14818_v60  ;;  %v2314_v53 = vsel %vm19533_vm6, %v14730_v50, %v2284_v33  ;;  %vm19537_vm6 = vcmask 777216  }
 0x25c   : > { %1737 = vrot.lane.b32.xlu0 %v14623_v52, %s19474_s28  ;;  %1873 = vrot.lane.b32.xlu1 %v14606_v32, %s19475_s29  ;;  %v12189_v6 = vpack.c.bf16 %v3003_v40, %v2865_v5 }
 0x25e   : > { %v14830_v35 = vpop.permute.xlu0 %2285  ;;  %v2422_v58 = vpop.permute.xlu1 %2421  ;;  %12190 = vmatprep.subr.bf16.mxu1 %v12189_v6 }
 0x25f   : > { %12192 = vmatpush1.bf16.msra.mxu1 %v12191_v1  ;;  %v2452_v41 = vsel %vm19530_vm8, %v14738_v28, %v2422_v58  ;;  %v2315_v42 = vsel %vm19531_vm9, %v2284_v33, %v14830_v35  ;;  %vm19534_vm8 = vcmask 252928  }
 0x260   : > { %1875 = vrot.lane.b32.xlu0 %v14623_v52, %s19475_s29  ;;  %1187 = vrot.lane.b32.xlu1 %v14705_v9, %s19470_s15  ;;  %v12231_v17 = vpack.c.bf16 %v2452_v41, %v2314_v53  ;;  %vm19535_vm9 = vmmov %vm19534_vm8 }
 0x262   : > { %v14838_v57 = vpop.permute.xlu0 %2423  ;;  %v3144_v0 = vpop.permute.xlu1 %3143 }
 0x263   : > { %v2453_v37 = vsel %vm19532_vm5, %v2422_v58, %v14838_v57  ;;  %v3173_v46 = vsel %vm527_vm0, %v14437_v43, %v3144_v0  ;;  %vm19536_vm5 = vcmask 769024  }
 0x264   : > { %1189 = vrot.lane.b32.xlu0 %v14714_v22, %s19470_s15  ;;  %1325 = vrot.lane.b32.xlu1 %v14705_v9, %s19471_s17  ;;  %v12229_v28 = vpack.c.bf16 %v2453_v37, %v2315_v42  ;;  %v12195_v31 = vpack.c.bf16 %v3173_v46, %v3059_v48 }
 0x266   : > { %v14853_v25 = vpop.permute.xlu0 %3145  ;;  %v2560_v11 = vpop.permute.xlu1 %2559  ;;  %12230 = vmatprep.subr.bf16.mxu0 %v12229_v28 }
 0x267   : > { %v3174_v50 = vsel %vm527_vm0, %v3144_v0, %v14853_v25  ;;  %12232 = vmatpush1.bf16.msra.mxu0 %v12231_v17  ;;  %v2590_v21 = vsel %vm19535_vm9, %v14770_v38, %v2560_v11  ;;  %vm19539_vm9 = vmmov %vm19537_vm6 }
 0x268   : > { %1327 = vrot.lane.b32.xlu0 %v14714_v22, %s19471_s17  ;;  %2011 = vrot.lane.b32.xlu1 %v14606_v32, %s19476_s18  ;;  %v12193_v8 = vpack.c.bf16 %v3174_v50, %v3060_v44 }
 0x26a   : > { %v14866_v43 = vpop.permute.xlu0 %2561  ;;  %v2698_v59 = vpop.permute.xlu1 %2697  ;;  %12194 = vmatprep.subr.bf16.mxu1 %v12193_v8 }
 0x26b   : > { %12196 = vmatpush1.bf16.msra.mxu1 %v12195_v31  ;;  %v2728_v27 = vsel %vm2719_vm14, %v14778_v18, %v2698_v59  ;;  %v2591_v4 = vsel %vm19534_vm8, %v2560_v11, %v14866_v43  ;;  %v3061_v11 = vld [vmem:[%s13578_s19 + $0x48] sm:$0xff]  ;;  %vm19538_vm8 = vmmov %vm19536_vm5 }
 0x26c   : > { %2013 = vrot.lane.b32.xlu0 %v14623_v52, %s19476_s18  ;;  %2149 = vrot.lane.b32.xlu1 %v14606_v32, %s19477_s0  ;;  %v12235_v18 = vpack.c.bf16 %v2728_v27, %v2590_v21 }
 0x26e   : > { %v14874_v61 = vpop.permute.xlu0 %2699  ;;  %v3276_v39 = vpop.permute.xlu1 %3275 }
 0x26f   : > { %v2729_v3 = vsel %vm2719_vm14, %v2698_v59, %v14874_v61  ;;  %v3305_v40 = vsel %vm660_vm1, %v14492_v63, %v3276_v39 }
 0x270   : > { %2151 = vrot.lane.b32.xlu0 %v14623_v52, %s19477_s0  ;;  %1463 = vrot.lane.b32.xlu1 %v14705_v9, %s19472_s20  ;;  %v12233_v34 = vpack.c.bf16 %v2729_v3, %v2591_v4 }
 0x272   : > { %v14886_v19 = vpop.permute.xlu0 %3277  ;;  %v3408_v51 = vpop.permute.xlu1 %3407  ;;  %12234 = vmatprep.subr.bf16.mxu0 %v12233_v34 }
 0x273   : > { %12236 = vmatpush1.bf16.msra.mxu0 %v12235_v18  ;;  %v3437_v38 = vsel %vm793_vm2, %v14502_v49, %v3408_v51  ;;  %v3306_v33 = vsel %vm660_vm1, %v3276_v39, %v14886_v19 }
 0x274   : > { %1465 = vrot.lane.b32.xlu0 %v14714_v22, %s19472_s20  ;;  %1601 = vrot.lane.b32.xlu1 %v14705_v9, %s19473_s26  ;;  %v12199_v49 = vpack.c.bf16 %v3437_v38, %v3305_v40 }
 0x276   : > { %v14894_v62 = vpop.permute.xlu0 %3409  ;;  %v2836_v47 = vpop.permute.xlu1 %2835 }
 0x277   : > { %v3438_v5 = vsel %vm793_vm2, %v3408_v51, %v14894_v62  ;;  %v2866_v37 = vsel %vm2857_vm15, %v14810_v29, %v2836_v47 }
 0x278   : > { %1603 = vrot.lane.b32.xlu0 %v14714_v22, %s19473_s26  ;;  %2287 = vrot.lane.b32.xlu1 %v14606_v32, %s19478_s30  ;;  %v12197_v55 = vpack.c.bf16 %v3438_v5, %v3306_v33 }
 0x27a   : > { %v14906_v6 = vpop.permute.xlu0 %2837  ;;  %v2974_v1 = vpop.permute.xlu1 %2973  ;;  %12198 = vmatprep.subr.bf16.mxu1 %v12197_v55 }
 0x27b   : > { %12200 = vmatpush1.bf16.msra.mxu1 %v12199_v49  ;;  %v3004_v63 = vsel %vm2995_vm12, %v14818_v60, %v2974_v1  ;;  %v2867_v0 = vsel %vm2857_vm15, %v2836_v47, %v14906_v6 }
 0x27c   : > { %2289 = vrot.lane.b32.xlu0 %v14623_v52, %s19478_s30  ;;  %2425 = vrot.lane.b32.xlu1 %v14606_v32, %s19479_s23  ;;  %v12239_v53 = vpack.c.bf16 %v3004_v63, %v2866_v37 }
 0x27e   : > { %v14914_v58 = vpop.permute.xlu0 %2975  ;;  %v512_v41 = vpop.permute.xlu1 %511 }
 0x27f   : > { %v3005_v42 = vsel %vm2995_vm12, %v2974_v1, %v14914_v58  ;;  %v538_v39 = vsel %vm527_vm0, %v14533_v12, %v512_v41  ;;  %v14965_v12 = vld [vmem:[%s19356_s1] sm:$0xff] }
 0x280   : > { %2427 = vrot.lane.b32.xlu0 %v14623_v52, %s19479_s23  ;;  %1739 = vrot.lane.b32.xlu1 %v14705_v9, %s19474_s28  ;;  %v12237_v60 = vpack.c.bf16 %v3005_v42, %v2867_v0 }
 0x282   : > { %v14926_v28 = vpop.permute.xlu0 %513  ;;  %v3148_v17 = vpop.permute.xlu1 %3147  ;;  %12238 = vmatprep.subr.bf16.mxu0 %v12237_v60  ;;  %v15008_v60 = vld [vmem:[%s13578_s19 + $0x60] sm:$0xff] }
 0x283   : > { %12240 = vmatpush1.bf16.msra.mxu0 %v12239_v53  ;;  %v3175_v29 = vsel %vm527_vm0, %v14853_v25, %v3148_v17  ;;  %v539_v25 = vsel %vm527_vm0, %v512_v41, %v14926_v28 }
 0x284   : > { %1741 = vrot.lane.b32.xlu0 %v14714_v22, %s19474_s28  ;;  %1877 = vrot.lane.b32.xlu1 %v14705_v9, %s19475_s29  ;;  %v12243_v8 = vpack.c.bf16 %v3175_v29, %v3061_v11  ;;  %v12249_v3 = vpack.c.bf16 %v539_v25, %v14606_v32 }
 0x286   : > { %v14934_v44 = vpop.permute.xlu0 %3149  ;;  %v3540_v46 = vpop.permute.xlu1 %3539 }
 0x287   : > { %v3176_v48 = vsel %vm527_vm0, %v3148_v17, %v14934_v44  ;;  %v3569_v4 = vsel %vm926_vm3, %v14541_v16, %v3540_v46 }
 0x288   : > { %1879 = vrot.lane.b32.xlu0 %v14714_v22, %s19475_s29  ;;  %2563 = vrot.lane.b32.xlu1 %v14606_v32, %s19480_s27  ;;  %v12241_v50 = vpack.c.bf16 %v3176_v48, %v14598_v15  ;;  %v422_v15 = vld [vmem:[%s13578_s19 + $0x50] sm:$0xff] }
 0x289   : > { %v12251_v18 = vpack.c.bf16 %v538_v39, %v422_v15 }
 0x28a   : > { %v14946_v31 = vpop.permute.xlu0 %3541  ;;  %v645_v59 = vpop.permute.xlu1 %644  ;;  %12242 = vmatprep.subr.bf16.mxu0 %v12241_v50 }
 0x28b   : > { %v3570_v27 = vsel %vm926_vm3, %v3540_v46, %v14946_v31  ;;  %12244 = vmatpush1.bf16.msra.mxu0 %v12243_v8  ;;  %v671_v33 = vsel %vm660_vm1, %v14578_v7, %v645_v59 }
 0x28c   : > { %2565 = vrot.lane.b32.xlu0 %v14623_v52, %s19480_s27  ;;  %2701 = vrot.lane.b32.xlu1 %v14606_v32, %s19481_s14 }
 0x28d   : > { %4104 = vmatprep.subr.mxu1 %v3570_v27 }
 0x28e   : > { %v14960_v21 = vpop.permute.xlu0 %646  ;;  %v778_v34 = vpop.permute.xlu1 %777  ;;  %4105 = vmatpush1.msra.mxu1 %v3569_v4 }
 0x28f   : > { %12250 = vmatprep.subr.bf16.mxu1 %v12249_v3  ;;  %4121 = vmatmul.mubr.f32.vlgmr.msra.gmra.mrb[2].mxu1 %v14965_v12  ;;  %v804_v16 = vsel %vm793_vm2, %v14587_v10, %v778_v34  ;;  %v672_v38 = vsel %vm660_vm1, %v645_v59, %v14960_v21  ;;  %v2788_v10 = vld [vmem:[%s13578_s19 + $0x58] sm:$0xff] }
 0x290   : > { %2703 = vrot.lane.b32.xlu0 %v14623_v52, %s19481_s14  ;;  %2015 = vrot.lane.b32.xlu1 %v14705_v9, %s19476_s18  ;;  %v12255_v40 = vpack.c.bf16 %v804_v16, %v671_v33 }
 0x291   : > { %12252 = vmatpush1.bf16.msra.mxu1 %v12251_v18  ;;  %11412 = vmatprep.mubr.msk.f32.mxu1 %vm19426_vm7, %v14473_v23 }
 0x292   : > { %v14976_v32 = vpop.permute.xlu0 %779  ;;  %v3280_v51 = vpop.permute.xlu1 %3279 }
 0x293   : > { %v805_v47 = vsel %vm793_vm2, %v778_v34, %v14976_v32  ;;  %v3307_v42 = vsel %vm660_vm1, %v14886_v19, %v3280_v51 }
 0x294   : > { %2017 = vrot.lane.b32.xlu0 %v14714_v22, %s19476_s18  ;;  %2153 = vrot.lane.b32.xlu1 %v14705_v9, %s19477_s0  ;;  %v12253_v5 = vpack.c.bf16 %v805_v47, %v672_v38 }
 0x296   : > { %v14989_v55 = vpop.permute.xlu0 %3281  ;;  %v3412_v49 = vpop.permute.xlu1 %3411  ;;  %12254 = vmatprep.subr.bf16.mxu1 %v12253_v5 }
 0x297   : > { %12256 = vmatpush1.bf16.msra.mxu1 %v12255_v40  ;;  %v3439_v7 = vsel %vm793_vm2, %v14894_v62, %v3412_v49  ;;  %v3308_v41 = vsel %vm660_vm1, %v3280_v51, %v14989_v55 }
 0x298   : > { %2155 = vrot.lane.b32.xlu0 %v14714_v22, %s19477_s0  ;;  %2839 = vrot.lane.b32.xlu1 %v2788_v10, %s19482_s21  ;;  %v12247_v62 = vpack.c.bf16 %v3439_v7, %v3307_v42 }
 0x29a   : > { %v14996_v1 = vpop.permute.xlu0 %3413  ;;  %v911_v63 = vpop.permute.xlu1 %910 }
 0x29b   : > { %v3440_v0 = vsel %vm793_vm2, %v3412_v49, %v14996_v1  ;;  %v937_v48 = vsel %vm926_vm3, %v14625_v36, %v911_v63 }
 0x29c   : > { %2841 = vrot.lane.b32.xlu0 %v14623_v52, %s19482_s21  ;;  %2977 = vrot.lane.b32.xlu1 %v2788_v10, %s19483_s24  ;;  %v12245_v37 = vpack.c.bf16 %v3440_v0, %v3308_v41  ;;  %v15095_v0 = vld [vmem:[%s13578_s19 + $0x70] sm:$0xff] }
 0x29e   : > { %v15010_v53 = vpop.permute.xlu0 %912  ;;  %v1046_v17 = vpop.permute.xlu1 %1045  ;;  %12246 = vmatprep.subr.bf16.mxu0 %v12245_v37 }
 0x29f   : > { %12248 = vmatpush1.bf16.msra.mxu0 %v12247_v62  ;;  %v1074_v52 = vsel %vm1063_vm4, %v14633_v14, %v1046_v17  ;;  %v938_v46 = vsel %vm926_vm3, %v911_v63, %v15010_v53 }
 0x2a0   : > { %2979 = vrot.lane.b32.xlu0 %v15008_v60, %s19483_s24  ;;  %2291 = vrot.lane.b32.xlu1 %v14705_v9, %s19478_s30  ;;  %v12259_v14 = vpack.c.bf16 %v1074_v52, %v937_v48 }
 0x2a2   : > { %v15018_v19 = vpop.permute.xlu0 %1047  ;;  %v516_v29 = vpop.permute.xlu1 %515 }
 0x2a3   : > { %v1075_v11 = vsel %vm1063_vm4, %v1046_v17, %v15018_v19  ;;  %v540_v15 = vsel %vm527_vm0, %v14926_v28, %v516_v29 }
 0x2a4   : > { %2293 = vrot.lane.b32.xlu0 %v14714_v22, %s19478_s30  ;;  %2429 = vrot.lane.b32.xlu1 %v14705_v9, %s19479_s23  ;;  %v12257_v50 = vpack.c.bf16 %v1075_v11, %v938_v46  ;;  %v12299_v28 = vpack.c.bf16 %v540_v15, %v15008_v60 }
 0x2a6   : > { %v15030_v8 = vpop.permute.xlu0 %517  ;;  %v3544_v25 = vpop.permute.xlu1 %3543  ;;  %12258 = vmatprep.subr.bf16.mxu1 %v12257_v50 }
 0x2a7   : > { %12260 = vmatpush1.bf16.msra.mxu1 %v12259_v14  ;;  %v541_v36 = vsel %vm527_vm0, %v516_v29, %v15030_v8  ;;  %v3571_v4 = vsel %vm926_vm3, %v14946_v31, %v3544_v25 }
 0x2a8   : > { %2431 = vrot.lane.b32.xlu0 %v14714_v22, %s19479_s23  ;;  %3151 = vrot.lane.b32.xlu1 %v15008_v60, %s19484_s12  ;;  %v12297_v3 = vpack.c.bf16 %v541_v36, %v14705_v9 }
 0x2aa   : > { %v15038_v59 = vpop.permute.xlu0 %3545  ;;  %v1184_v27 = vpop.permute.xlu1 %1183 }
 0x2ab   : > { %v3572_v39 = vsel %vm926_vm3, %v3544_v25, %v15038_v59  ;;  %v1212_v33 = vsel %vm19539_vm9, %v14664_v54, %v1184_v27  ;;  %v3367_v54 = vld [vmem:[%s13578_s19 + $0x68] sm:$0xff] }
 0x2ac   : > { %3153 = vrot.lane.b32.xlu0 %v14705_v9, %s19484_s12  ;;  %2567 = vrot.lane.b32.xlu1 %v14705_v9, %s19480_s27 }
 0x2ad   : > { %4229 = vmatprep.subr.mxu0 %v3572_v39 }
 0x2ae   : > { %v15051_v34 = vpop.permute.xlu0 %1185  ;;  %v1322_v18 = vpop.permute.xlu1 %1321  ;;  %4230 = vmatpush1.msra.mxu0 %v3571_v4 }
 0x2af   : > { %12298 = vmatprep.subr.bf16.mxu0 %v12297_v3  ;;  %4246 = vmatmul.mubr.f32.vlgmr.msra.gmra.mrb[4].mxu0 %v14965_v12  ;;  %v1350_v31 = vsel %vm19536_vm5, %v14672_v30, %v1322_v18  ;;  %v1213_v38 = vsel %vm19537_vm6, %v1184_v27, %v15051_v34  ;;  %vm19540_vm5 = vcmask 752640   ;;  %vm19541_vm6 = vcmask 760832  }
 0x2b0   : > { %2569 = vrot.lane.b32.xlu0 %v14714_v22, %s19480_s27  ;;  %2705 = vrot.lane.b32.xlu1 %v14705_v9, %s19481_s14  ;;  %v12263_v30 = vpack.c.bf16 %v1350_v31, %v1212_v33  ;;  %vm19543_vm9 = vmmov %vm19541_vm6 }
 0x2b1   : > { %12300 = vmatpush1.bf16.msra.mxu0 %v12299_v28  ;;  %11413 = vmatprep.mubr.msk.f32.mxu0 %vm19426_vm7, %v14473_v23 }
 0x2b2   : > { %v15063_v16 = vpop.permute.xlu0 %1323  ;;  %v649_v51 = vpop.permute.xlu1 %648 }
 0x2b3   : > { %v1351_v47 = vsel %vm19538_vm8, %v1322_v18, %v15063_v16  ;;  %vm19542_vm8 = vmmov %vm19540_vm5 }
 0x2b4   : > { %2707 = vrot.lane.b32.xlu0 %v14714_v22, %s19481_s14  ;;  %3283 = vrot.lane.b32.xlu1 %v15008_v60, %s19485_s11  ;;  %v12261_v23 = vpack.c.bf16 %v1351_v47, %v1213_v38 }
 0x2b6   : > { %v15075_v5 = vpop.permute.xlu0 %650  ;;  %v782_v10 = vpop.permute.xlu1 %781  ;;  %12262 = vmatprep.subr.bf16.mxu1 %v12261_v23 }
 0x2b7   : > { %12264 = vmatpush1.bf16.msra.mxu1 %v12263_v30  ;;  %v806_v22 = vsel %vm793_vm2, %v14976_v32, %v782_v10  ;;  %v674_v7 = vsel %vm660_vm1, %v649_v51, %v15075_v5 }
 0x2b8   : > { %3285 = vrot.lane.b32.xlu0 %v14705_v9, %s19485_s11  ;;  %3415 = vrot.lane.b32.xlu1 %v15008_v60, %s19486_s13  ;;  %v673_v9 = vsel %vm660_vm1, %v14960_v21, %v649_v51  ;;  %v15103_v21 = vld [vmem:[%s13578_s19 + $0x78] sm:$0xff] }
 0x2b9   : > { %v12303_v32 = vpack.c.bf16 %v806_v22, %v673_v9 }
 0x2ba   : > { %v15084_v40 = vpop.permute.xlu0 %783  ;;  %v1460_v49 = vpop.permute.xlu1 %1459 }
 0x2bb   : > { %v807_v63 = vsel %vm793_vm2, %v782_v10, %v15084_v40  ;;  %v1488_v11 = vsel %vm19543_vm9, %v14707_v45, %v1460_v49 }
 0x2bc   : > { %3417 = vrot.lane.b32.xlu0 %v3367_v54, %s19486_s13  ;;  %2843 = vrot.lane.b32.xlu1 %v3367_v54, %s19482_s21  ;;  %v12301_v41 = vpack.c.bf16 %v807_v63, %v674_v7 }
 0x2be   : > { %v15097_v42 = vpop.permute.xlu0 %1461  ;;  %v1598_v37 = vpop.permute.xlu1 %1597  ;;  %12302 = vmatprep.subr.bf16.mxu0 %v12301_v41 }
 0x2bf   : > { %12304 = vmatpush1.bf16.msra.mxu0 %v12303_v32  ;;  %v1626_v62 = vsel %vm19540_vm5, %v14718_v24, %v1598_v37  ;;  %v1489_v29 = vsel %vm19541_vm6, %v1460_v49, %v15097_v42  ;;  %v15120_v24 = vld [vmem:[%s13578_s19 + $0x80] sm:$0xff]  ;;  %vm19544_vm5 = vcmask 769024   ;;  %vm19545_vm6 = vcmask 777216  }
 0x2c0   : > { %2845 = vrot.lane.b32.xlu0 %v15095_v0, %s19482_s21  ;;  %2981 = vrot.lane.b32.xlu1 %v3367_v54, %s19483_s24  ;;  %v12267_v50 = vpack.c.bf16 %v1626_v62, %v1488_v11  ;;  %vm19547_vm9 = vmmov %vm19545_vm6 }
 0x2c2   : > { %v15107_v17 = vpop.permute.xlu0 %1599  ;;  %v915_v52 = vpop.permute.xlu1 %914 }
 0x2c3   : > { %v1627_v46 = vsel %vm19542_vm8, %v1598_v37, %v15107_v17  ;;  %v939_v4 = vsel %vm926_vm3, %v15010_v53, %v915_v52  ;;  %vm19546_vm8 = vmmov %vm19544_vm5 }
 0x2c4   : > { %2983 = vrot.lane.b32.xlu0 %v15095_v0, %s19483_s24  ;;  %519 = vrot.lane.b32.xlu1 %v15103_v21, %s19484_s12  ;;  %v12265_v48 = vpack.c.bf16 %v1627_v46, %v1489_v29 }
 0x2c6   : > { %v15122_v14 = vpop.permute.xlu0 %916  ;;  %v1050_v25 = vpop.permute.xlu1 %1049  ;;  %12266 = vmatprep.subr.bf16.mxu1 %v12265_v48 }
 0x2c7   : > { %12268 = vmatpush1.bf16.msra.mxu1 %v12267_v50  ;;  %v1076_v45 = vsel %vm1063_vm4, %v15018_v19, %v1050_v25  ;;  %v940_v39 = vsel %vm926_vm3, %v915_v52, %v15122_v14 }
 0x2c8   : > { %521 = vrot.lane.b32.xlu0 %v15120_v24, %s19484_s12  ;;  %3155 = vrot.lane.b32.xlu1 %v15095_v0, %s19484_s12  ;;  %v12307_v19 = vpack.c.bf16 %v1076_v45, %v939_v4 }
 0x2ca   : > { %v15130_v36 = vpop.permute.xlu0 %1051  ;;  %v1736_v27 = vpop.permute.xlu1 %1735 }
 0x2cb   : > { %v1077_v15 = vsel %vm1063_vm4, %v1050_v25, %v15130_v36  ;;  %v1764_v33 = vsel %vm1753_vm10, %v14750_v2, %v1736_v27 }
 0x2cc   : > { %3157 = vrot.lane.b32.xlu0 %v15103_v21, %s19484_s12  ;;  %3547 = vrot.lane.b32.xlu1 %v15008_v60, %s19487_s9  ;;  %v12305_v3 = vpack.c.bf16 %v1077_v15, %v940_v39 }
 0x2ce   : > { %v15142_v18 = vpop.permute.xlu0 %1737  ;;  %v1874_v28 = vpop.permute.xlu1 %1873  ;;  %12306 = vmatprep.subr.bf16.mxu0 %v12305_v3 }
 0x2cf   : > { %12308 = vmatpush1.bf16.msra.mxu0 %v12307_v19  ;;  %v1902_v53 = vsel %vm1891_vm11, %v14758_v13, %v1874_v28  ;;  %v1765_v38 = vsel %vm1753_vm10, %v1736_v27, %v15142_v18 }
 0x2d0   : > { %3549 = vrot.lane.b32.xlu0 %v3367_v54, %s19487_s9  ;;  %652 = vrot.lane.b32.xlu1 %v15103_v21, %s19485_s11  ;;  %v12271_v13 = vpack.c.bf16 %v1902_v53, %v1764_v33  ;;  %v15164_v54 = vld [vmem:[%s13578_s19 + $0x80] sm:$0xff] }
 0x2d1   : > { %447 = vst [vmem:[#allocation2 + $0x80] sm:$0xff] %v15164_v54 }
 0x2d2   : > { %v15149_v31 = vpop.permute.xlu0 %1875  ;;  %v1188_v51 = vpop.permute.xlu1 %1187 }
 0x2d3   : > { %v1903_v47 = vsel %vm1891_vm11, %v1874_v28, %v15149_v31  ;;  %v1214_v9 = vsel %vm19547_vm9, %v15051_v34, %v1188_v51  ;;  %v15192_v34 = vld [vmem:[%s13578_s19 + $0x90] sm:$0xff]  ;;  %vm19550_vm9 = vcmask 752640  }
 0x2d4   : > { %654 = vrot.lane.b32.xlu0 %v15120_v24, %s19485_s11  ;;  %785 = vrot.lane.b32.xlu1 %v15103_v21, %s19486_s13  ;;  %v12269_v23 = vpack.c.bf16 %v1903_v47, %v1765_v38  ;;  %3089 = vst [vmem:[#allocation2 + $0xc68] sm:$0xff] %v15192_v34 }
 0x2d6   : > { %v15161_v30 = vpop.permute.xlu0 %1189  ;;  %v1326_v10 = vpop.permute.xlu1 %1325  ;;  %12270 = vmatprep.subr.bf16.mxu1 %v12269_v23 }
 0x2d7   : > { %12272 = vmatpush1.bf16.msra.mxu1 %v12271_v13  ;;  %v1352_v2 = vsel %vm19544_vm5, %v15063_v16, %v1326_v10  ;;  %v1215_v7 = vsel %vm19545_vm6, %v1188_v51, %v15161_v30  ;;  %vm19425_vm5 = vcmask 875520   ;;  %vm19548_vm6 = vcmask 506880  }
 0x2d8   : > { %787 = vrot.lane.b32.xlu0 %v15120_v24, %s19486_s13  ;;  %3287 = vrot.lane.b32.xlu1 %v15095_v0, %s19485_s11  ;;  %v12311_v41 = vpack.c.bf16 %v1352_v2, %v1214_v9  ;;  %450 = vst.msk [vmem:[#allocation2 + $0x90] sm:$0xff] %vm19425_vm5, %v15192_v34 }
 0x2da   : > { %v15173_v22 = vpop.permute.xlu0 %1327  ;;  %v2012_v49 = vpop.permute.xlu1 %2011 }
 0x2db   : > { %v1353_v63 = vsel %vm19546_vm8, %v1326_v10, %v15173_v22  ;;  %vm19549_vm8 = vmmov %vm19548_vm6 }
 0x2dc   : > { %3289 = vrot.lane.b32.xlu0 %v15103_v21, %s19485_s11  ;;  %3419 = vrot.lane.b32.xlu1 %v15095_v0, %s19486_s13  ;;  %v12309_v16 = vpack.c.bf16 %v1353_v63, %v1215_v7  ;;  %v2040_v48 = vsel %vm19549_vm8, %v14790_v26, %v2012_v49  ;;  %v15218_v26 = vld [vmem:[%s13578_s19 + $0x90] sm:$0xff]  ;;  %vm19552_vm8 = vmmov %vm19550_vm9 }
 0x2de   : > { %v15185_v32 = vpop.permute.xlu0 %2013  ;;  %v2150_v37 = vpop.permute.xlu1 %2149  ;;  %12310 = vmatprep.subr.bf16.mxu0 %v12309_v16 }
 0x2df   : > { %12312 = vmatpush1.bf16.msra.mxu0 %v12311_v41  ;;  %v2178_v62 = vsel %vm2167_vm13, %v14798_v20, %v2150_v37  ;;  %v2041_v46 = vsel %vm19548_vm6, %v2012_v49, %v15185_v32  ;;  %vm19551_vm6 = vcmask 760832  }
 0x2e0   : > { %3421 = vrot.lane.b32.xlu0 %v15103_v21, %s19486_s13  ;;  %918 = vrot.lane.b32.xlu1 %v15103_v21, %s19487_s9  ;;  %v12275_v50 = vpack.c.bf16 %v2178_v62, %v2040_v48  ;;  %vm19553_vm5 = vmmov %vm19551_vm6 }
 0x2e2   : > { %v15199_v52 = vpop.permute.xlu0 %2151  ;;  %v1464_v29 = vpop.permute.xlu1 %1463 }
 0x2e3   : > { %v2179_v11 = vsel %vm2167_vm13, %v2150_v37, %v15199_v52  ;;  %v1490_v19 = vsel %vm19553_vm5, %v15097_v42, %v1464_v29  ;;  %v15241_v42 = vld [vmem:[%s13578_s19 + $0x88] sm:$0xff]  ;;  %vm19554_vm5 = vcmask 261120  }
 0x2e4   : > { %920 = vrot.lane.b32.xlu0 %v15120_v24, %s19487_s9  ;;  %1053 = vrot.lane.b32.xlu1 %v15103_v21, %s19469_s16  ;;  %v12273_v20 = vpack.c.bf16 %v2179_v11, %v2041_v46  ;;  %3088 = vst [vmem:[#allocation2 + $0xc60] sm:$0xff] %v15241_v42 }
 0x2e6   : > { %v15211_v25 = vpop.permute.xlu0 %1465  ;;  %v1602_v45 = vpop.permute.xlu1 %1601  ;;  %12274 = vmatprep.subr.bf16.mxu1 %v12273_v20 }
 0x2e7   : > { %12276 = vmatpush1.bf16.msra.mxu1 %v12275_v50  ;;  %v1628_v27 = vsel %vm19550_vm9, %v15107_v17, %v1602_v45  ;;  %v1491_v4 = vsel %vm19551_vm6, %v1464_v29, %v15211_v25  ;;  %vm19555_vm9 = vcmask 490496   ;;  %vm19556_vm6 = vmmov %vm19554_vm5 }
 0x2e8   : > { %1055 = vrot.lane.b32.xlu0 %v15120_v24, %s19469_s16  ;;  %523 = vrot.lane.b32.xlu1 %v14863_v56, %s19484_s12  ;;  %v12315_v28 = vpack.c.bf16 %v1628_v27, %v1490_v19 }
 0x2ea   : > { %v15222_v39 = vpop.permute.xlu0 %1603  ;;  %v2288_v15 = vpop.permute.xlu1 %2287 }
 0x2eb   : > { %v1629_v3 = vsel %vm19552_vm8, %v1602_v45, %v15222_v39  ;;  %vm19557_vm8 = vmmov %vm19555_vm9 }
 0x2ec   : > { %525 = vrot.lane.b32.xlu0 %v15218_v26, %s19484_s12  ;;  %3551 = vrot.lane.b32.xlu1 %v15095_v0, %s19487_s9  ;;  %v12313_v17 = vpack.c.bf16 %v1629_v3, %v1491_v4  ;;  %v2316_v10 = vsel %vm19557_vm8, %v14830_v35, %v2288_v15 }
 0x2ee   : > { %v15234_v53 = vpop.permute.xlu0 %2289  ;;  %v2426_v51 = vpop.permute.xlu1 %2425  ;;  %12314 = vmatprep.subr.bf16.mxu0 %v12313_v17 }
 0x2ef   : > { %12316 = vmatpush1.bf16.msra.mxu0 %v12315_v28  ;;  %v2454_v38 = vsel %vm19554_vm5, %v14838_v57, %v2426_v51  ;;  %v2317_v23 = vsel %vm19555_vm9, %v2288_v15, %v15234_v53  ;;  %vm19558_vm5 = vcmask 252928  }
 0x2f0   : > { %3553 = vrot.lane.b32.xlu0 %v15103_v21, %s19487_s9  ;;  %1191 = vrot.lane.b32.xlu1 %v15103_v21, %s19470_s15  ;;  %v12279_v57 = vpack.c.bf16 %v2454_v38, %v2316_v10  ;;  %vm19559_vm9 = vmmov %vm19558_vm5 }
 0x2f2   : > { %v15246_v47 = vpop.permute.xlu0 %2427  ;;  %v1740_v33 = vpop.permute.xlu1 %1739 }
 0x2f3   : > { %v2455_v13 = vsel %vm19556_vm6, %v2426_v51, %v15246_v47  ;;  %v1766_v37 = vsel %vm1753_vm10, %v15142_v18, %v1740_v33  ;;  %vm19560_vm6 = vcmask 506880  }
 0x2f4   : > { %1193 = vrot.lane.b32.xlu0 %v15120_v24, %s19470_s15  ;;  %1329 = vrot.lane.b32.xlu1 %v15103_v21, %s19471_s17  ;;  %v12277_v2 = vpack.c.bf16 %v2455_v13, %v2317_v23  ;;  %vm19561_vm8 = vmmov %vm19560_vm6 }
 0x2f6   : > { %v15258_v49 = vpop.permute.xlu0 %1741  ;;  %v1878_v7 = vpop.permute.xlu1 %1877  ;;  %12278 = vmatprep.subr.bf16.mxu1 %v12277_v2 }
 0x2f7   : > { %12280 = vmatpush1.bf16.msra.mxu1 %v12279_v57  ;;  %v1904_v35 = vsel %vm1891_vm11, %v15149_v31, %v1878_v7  ;;  %v1767_v16 = vsel %vm1753_vm10, %v1740_v33, %v15258_v49 }
 0x2f8   : > { %1331 = vrot.lane.b32.xlu0 %v15120_v24, %s19471_s17  ;;  %656 = vrot.lane.b32.xlu1 %v14863_v56, %s19485_s11  ;;  %v12319_v31 = vpack.c.bf16 %v1904_v35, %v1766_v37 }
 0x2fa   : > { %v15266_v63 = vpop.permute.xlu0 %1879  ;;  %v2564_v9 = vpop.permute.xlu1 %2563 }
 0x2fb   : > { %v1905_v41 = vsel %vm1891_vm11, %v1878_v7, %v15266_v63  ;;  %v2592_v45 = vsel %vm19559_vm9, %v14866_v43, %v2564_v9  ;;  %vm19563_vm9 = vcmask 490496  }
 0x2fc   : > { %658 = vrot.lane.b32.xlu0 %v15218_v26, %s19485_s11  ;;  %789 = vrot.lane.b32.xlu1 %v14863_v56, %s19486_s13  ;;  %v12317_v62 = vpack.c.bf16 %v1905_v41, %v1767_v16 }
 0x2fe   : > { %v15278_v29 = vpop.permute.xlu0 %2565  ;;  %v2702_v46 = vpop.permute.xlu1 %2701  ;;  %12318 = vmatprep.subr.bf16.mxu0 %v12317_v62 }
 0x2ff   : > { %12320 = vmatpush1.bf16.msra.mxu0 %v12319_v31  ;;  %v2730_v18 = vsel %vm2719_vm14, %v14874_v61, %v2702_v46  ;;  %v2593_v20 = vsel %vm19558_vm5, %v2564_v9, %v15278_v29  ;;  %vm19562_vm5 = vcmask 261120  }
 0x300   : > { %791 = vrot.lane.b32.xlu0 %v15218_v26, %s19486_s13  ;;  %1467 = vrot.lane.b32.xlu1 %v15103_v21, %s19472_s20  ;;  %v12283_v61 = vpack.c.bf16 %v2730_v18, %v2592_v45  ;;  %v3063_v45 = vld [vmem:[%s13578_s19 + $0x58] sm:$0xff] }
 0x302   : > { %v15286_v11 = vpop.permute.xlu0 %2703  ;;  %v2016_v48 = vpop.permute.xlu1 %2015 }
 0x303   : > { %v2731_v50 = vsel %vm2719_vm14, %v2702_v46, %v15286_v11  ;;  %v2042_v51 = vsel %vm19561_vm8, %v15185_v32, %v2016_v48  ;;  %vm19565_vm8 = vmmov %vm19563_vm9 }
 0x304   : > { %1469 = vrot.lane.b32.xlu0 %v15120_v24, %s19472_s20  ;;  %1605 = vrot.lane.b32.xlu1 %v15103_v21, %s19473_s26  ;;  %v12281_v27 = vpack.c.bf16 %v2731_v50, %v2593_v20 }
 0x306   : > { %v15298_v15 = vpop.permute.xlu0 %2017  ;;  %v2154_v4 = vpop.permute.xlu1 %2153  ;;  %12282 = vmatprep.subr.bf16.mxu1 %v12281_v27 }
 0x307   : > { %12284 = vmatpush1.bf16.msra.mxu1 %v12283_v61  ;;  %v2180_v43 = vsel %vm2167_vm13, %v15199_v52, %v2154_v4  ;;  %v2043_v17 = vsel %vm19560_vm6, %v2016_v48, %v15298_v15  ;;  %vm19564_vm6 = vmmov %vm19562_vm5 }
 0x308   : > { %1607 = vrot.lane.b32.xlu0 %v15120_v24, %s19473_s26  ;;  %922 = vrot.lane.b32.xlu1 %v14863_v56, %s19487_s9  ;;  %v12323_v52 = vpack.c.bf16 %v2180_v43, %v2042_v51 }
 0x30a   : > { %v15306_v3 = vpop.permute.xlu0 %2155  ;;  %v2840_v19 = vpop.permute.xlu1 %2839 }
 0x30b   : > { %v2181_v28 = vsel %vm2167_vm13, %v2154_v4, %v15306_v3  ;;  %v2868_v7 = vsel %vm2857_vm15, %v14906_v6, %v2840_v19 }
 0x30c   : > { %924 = vrot.lane.b32.xlu0 %v15218_v26, %s19487_s9  ;;  %1057 = vrot.lane.b32.xlu1 %v14863_v56, %s19469_s16  ;;  %v12321_v38 = vpack.c.bf16 %v2181_v28, %v2043_v17 }
 0x30e   : > { %v15318_v33 = vpop.permute.xlu0 %2841  ;;  %v2978_v23 = vpop.permute.xlu1 %2977  ;;  %12322 = vmatprep.subr.bf16.mxu0 %v12321_v38 }
 0x30f   : > { %12324 = vmatpush1.bf16.msra.mxu0 %v12323_v52  ;;  %v3006_v32 = vsel %vm2995_vm12, %v14914_v58, %v2978_v23  ;;  %v2869_v2 = vsel %vm2857_vm15, %v2840_v19, %v15318_v33 }
 0x310   : > { %1059 = vrot.lane.b32.xlu0 %v15218_v26, %s19469_s16  ;;  %1743 = vrot.lane.b32.xlu1 %v15103_v21, %s19474_s28  ;;  %v12287_v58 = vpack.c.bf16 %v3006_v32, %v2868_v7 }
 0x312   : > { %v15326_v13 = vpop.permute.xlu0 %2979  ;;  %v2292_v10 = vpop.permute.xlu1 %2291 }
 0x313   : > { %v3007_v57 = vsel %vm2995_vm12, %v2978_v23, %v15326_v13  ;;  %v2318_v46 = vsel %vm19565_vm8, %v15234_v53, %v2292_v10  ;;  %vm19569_vm8 = vcmask 769024  }
 0x314   : > { %1745 = vrot.lane.b32.xlu0 %v15120_v24, %s19474_s28  ;;  %1881 = vrot.lane.b32.xlu1 %v15103_v21, %s19475_s29  ;;  %v12285_v35 = vpack.c.bf16 %v3007_v57, %v2869_v2 }
 0x316   : > { %v15338_v9 = vpop.permute.xlu0 %2293  ;;  %v2430_v16 = vpop.permute.xlu1 %2429  ;;  %12286 = vmatprep.subr.bf16.mxu1 %v12285_v35 }
 0x317   : > { %12288 = vmatpush1.bf16.msra.mxu1 %v12287_v58  ;;  %v2456_v6 = vsel %vm19562_vm5, %v15246_v47, %v2430_v16  ;;  %v2319_v62 = vsel %vm19563_vm9, %v2292_v10, %v15338_v9  ;;  %vm19566_vm5 = vcmask 252928   ;;  %v13451_v58 = vmov 0  }
 0x318   : > { %1883 = vrot.lane.b32.xlu0 %v15120_v24, %s19475_s29  ;;  %1195 = vrot.lane.b32.xlu1 %v14863_v56, %s19470_s15  ;;  %v12327_v47 = vpack.c.bf16 %v2456_v6, %v2318_v46  ;;  %vm19567_vm9 = vmmov %vm19566_vm5 }
 0x319   : > { %13223 = vset.pattern.permute.xlu0 %v13451_v58  ;;  %13224 = vset.pattern.permute.xlu1 %v13451_v58 }
 0x31a   : > { %v15346_v41 = vpop.permute.xlu0 %2431  ;;  %v3152_v37 = vpop.permute.xlu1 %3151 }
 0x31b   : > { %v2457_v31 = vsel %vm19564_vm6, %v2430_v16, %v15346_v41  ;;  %v3177_v48 = vsel %vm527_vm0, %v14934_v44, %v3152_v37  ;;  %vm19568_vm6 = vcmask 875520  }
 0x31c   : > { %1197 = vrot.lane.b32.xlu0 %v15218_v26, %s19470_s15  ;;  %1333 = vrot.lane.b32.xlu1 %v14863_v56, %s19471_s17  ;;  %v12325_v18 = vpack.c.bf16 %v2457_v31, %v2319_v62  ;;  %v12291_v61 = vpack.c.bf16 %v3177_v48, %v3063_v45 }
 0x31e   : > { %v15360_v20 = vpop.permute.xlu0 %3153  ;;  %v2568_v50 = vpop.permute.xlu1 %2567  ;;  %12326 = vmatprep.subr.bf16.mxu0 %v12325_v18 }
 0x31f   : > { %v3178_v27 = vsel %vm527_vm0, %v3152_v37, %v15360_v20  ;;  %12328 = vmatpush1.bf16.msra.mxu0 %v12327_v47  ;;  %v2594_v51 = vsel %vm19567_vm9, %v15278_v29, %v2568_v50  ;;  %vm19571_vm9 = vmmov %vm19569_vm8 }
 0x320   : > { %1335 = vrot.lane.b32.xlu0 %v15218_v26, %s19471_s17  ;;  %2019 = vrot.lane.b32.xlu1 %v15103_v21, %s19476_s18  ;;  %v12289_v53 = vpack.c.bf16 %v3178_v27, %v15008_v60 }
 0x322   : > { %v15370_v4 = vpop.permute.xlu0 %2569  ;;  %v2706_v44 = vpop.permute.xlu1 %2705  ;;  %12290 = vmatprep.subr.bf16.mxu1 %v12289_v53  ;;  %v3065_v53 = vld [vmem:[%s13578_s19 + $0x68] sm:$0xff] }
 0x323   : > { %12292 = vmatpush1.bf16.msra.mxu1 %v12291_v61  ;;  %v2732_v43 = vsel %vm2719_vm14, %v15286_v11, %v2706_v44  ;;  %v2595_v60 = vsel %vm19566_vm5, %v2568_v50, %v15370_v4  ;;  %vm19570_vm5 = vcmask 777216  }
 0x324   : > { %2021 = vrot.lane.b32.xlu0 %v15120_v24, %s19476_s18  ;;  %2157 = vrot.lane.b32.xlu1 %v15103_v21, %s19477_s0  ;;  %v12331_v11 = vpack.c.bf16 %v2732_v43, %v2594_v51 }
 0x326   : > { %v15378_v19 = vpop.permute.xlu0 %2707  ;;  %v3284_v17 = vpop.permute.xlu1 %3283 }
 0x327   : > { %v2733_v28 = vsel %vm2719_vm14, %v2706_v44, %v15378_v19  ;;  %v3309_v7 = vsel %vm660_vm1, %v14989_v55, %v3284_v17 }
 0x328   : > { %2159 = vrot.lane.b32.xlu0 %v15120_v24, %s19477_s0  ;;  %1471 = vrot.lane.b32.xlu1 %v14863_v56, %s19472_s20  ;;  %v12329_v38 = vpack.c.bf16 %v2733_v28, %v2595_v60 }
 0x32a   : > { %v15390_v52 = vpop.permute.xlu0 %3285  ;;  %v3416_v23 = vpop.permute.xlu1 %3415  ;;  %12330 = vmatprep.subr.bf16.mxu0 %v12329_v38 }
 0x32b   : > { %12332 = vmatpush1.bf16.msra.mxu0 %v12331_v11  ;;  %v3441_v29 = vsel %vm793_vm2, %v14996_v1, %v3416_v23  ;;  %v3310_v2 = vsel %vm660_vm1, %v3284_v17, %v15390_v52 }
 0x32c   : > { %1473 = vrot.lane.b32.xlu0 %v15218_v26, %s19472_s20  ;;  %1609 = vrot.lane.b32.xlu1 %v14863_v56, %s19473_s26  ;;  %v12295_v1 = vpack.c.bf16 %v3441_v29, %v3309_v7 }
 0x32e   : > { %v15398_v32 = vpop.permute.xlu0 %3417  ;;  %v2844_v10 = vpop.permute.xlu1 %2843 }
 0x32f   : > { %v3442_v57 = vsel %vm793_vm2, %v3416_v23, %v15398_v32  ;;  %v2870_v18 = vsel %vm2857_vm15, %v15318_v33, %v2844_v10 }
 0x330   : > { %1611 = vrot.lane.b32.xlu0 %v15218_v26, %s19473_s26  ;;  %2295 = vrot.lane.b32.xlu1 %v15103_v21, %s19478_s30  ;;  %v12293_v35 = vpack.c.bf16 %v3442_v57, %v3310_v2 }
 0x332   : > { %v15410_v16 = vpop.permute.xlu0 %2845  ;;  %v2982_v6 = vpop.permute.xlu1 %2981  ;;  %12294 = vmatprep.subr.bf16.mxu1 %v12293_v35 }
 0x333   : > { %12296 = vmatpush1.bf16.msra.mxu1 %v12295_v1  ;;  %v3008_v55 = vsel %vm2995_vm12, %v15326_v13, %v2982_v6  ;;  %v2871_v31 = vsel %vm2857_vm15, %v2844_v10, %v15410_v16 }
 0x334   : > { %2297 = vrot.lane.b32.xlu0 %v15120_v24, %s19478_s30  ;;  %2433 = vrot.lane.b32.xlu1 %v15103_v21, %s19479_s23  ;;  %v12335_v47 = vpack.c.bf16 %v3008_v55, %v2870_v18 }
 0x336   : > { %v15418_v37 = vpop.permute.xlu0 %2983  ;;  %v520_v62 = vpop.permute.xlu1 %519 }
 0x337   : > { %v3009_v46 = vsel %vm2995_vm12, %v2982_v6, %v15418_v37  ;;  %v542_v51 = vsel %vm527_vm0, %v15030_v8, %v520_v62 }
 0x338   : > { %2435 = vrot.lane.b32.xlu0 %v15120_v24, %s19479_s23  ;;  %1747 = vrot.lane.b32.xlu1 %v14863_v56, %s19474_s28  ;;  %v12333_v13 = vpack.c.bf16 %v3009_v46, %v2871_v31 }
 0x33a   : > { %v15430_v48 = vpop.permute.xlu0 %521  ;;  %v3156_v50 = vpop.permute.xlu1 %3155  ;;  %12334 = vmatprep.subr.bf16.mxu0 %v12333_v13 }
 0x33b   : > { %12336 = vmatpush1.bf16.msra.mxu0 %v12335_v47  ;;  %v3179_v33 = vsel %vm527_vm0, %v15360_v20, %v3156_v50  ;;  %v543_v20 = vsel %vm527_vm0, %v520_v62, %v15430_v48 }
 0x33c   : > { %1749 = vrot.lane.b32.xlu0 %v15218_v26, %s19474_s28  ;;  %1885 = vrot.lane.b32.xlu1 %v14863_v56, %s19475_s29  ;;  %v12339_v43 = vpack.c.bf16 %v3179_v33, %v3065_v53  ;;  %v12345_v11 = vpack.c.bf16 %v543_v20, %v15103_v21  ;;  %v13343_v33 = vld [vmem:[#allocation2 + $0x88] sm:$0xff] }
 0x33e   : > { %v15438_v45 = vpop.permute.xlu0 %3157  ;;  %v3548_v27 = vpop.permute.xlu1 %3547 }
 0x33f   : > { %v3180_v61 = vsel %vm527_vm0, %v3156_v50, %v15438_v45  ;;  %v3573_v38 = vsel %vm926_vm3, %v15038_v59, %v3548_v27  ;;  %v15474_v59 = vld [vmem:[%s19356_s1 + $0x8] sm:$0xff] }
 0x340   : > { %1887 = vrot.lane.b32.xlu0 %v15218_v26, %s19475_s29  ;;  %2571 = vrot.lane.b32.xlu1 %v15103_v21, %s19480_s27  ;;  %v12337_v44 = vpack.c.bf16 %v3180_v61, %v15095_v0  ;;  %v426_v0 = vld [vmem:[%s13578_s19 + $0x70] sm:$0xff] }
 0x341   : > { %v12347_v8 = vpack.c.bf16 %v542_v51, %v426_v0 }
 0x342   : > { %v15450_v17 = vpop.permute.xlu0 %3549  ;;  %v653_v60 = vpop.permute.xlu1 %652  ;;  %12338 = vmatprep.subr.bf16.mxu0 %v12337_v44 }
 0x343   : > { %v3574_v28 = vsel %vm926_vm3, %v3548_v27, %v15450_v17  ;;  %12340 = vmatpush1.bf16.msra.mxu0 %v12339_v43  ;;  %v675_v35 = vsel %vm660_vm1, %v15075_v5, %v653_v60 }
 0x344   : > { %2573 = vrot.lane.b32.xlu0 %v15120_v24, %s19480_s27  ;;  %2709 = vrot.lane.b32.xlu1 %v15103_v21, %s19481_s14 }
 0x345   : > { %4354 = vmatprep.subr.mxu1 %v3574_v28 }
 0x346   : > { %v15464_v23 = vpop.permute.xlu0 %654  ;;  %v786_v29 = vpop.permute.xlu1 %785  ;;  %4355 = vmatpush1.msra.mxu1 %v3573_v38 }
 0x347   : > { %12346 = vmatprep.subr.bf16.mxu1 %v12345_v11  ;;  %4371 = vmatmul.mubr.f32.vlgmr.msra.gmra.mrb[4].mxu1 %v14965_v12  ;;  %v808_v21 = vsel %vm793_vm2, %v15084_v40, %v786_v29  ;;  %v676_v57 = vsel %vm660_vm1, %v653_v60, %v15464_v23  ;;  %v15493_v40 = vld [vmem:[%s13578_s19 + $0x78] sm:$0xff] }
 0x348   : > { %2711 = vrot.lane.b32.xlu0 %v15120_v24, %s19481_s14  ;;  %2023 = vrot.lane.b32.xlu1 %v14863_v56, %s19476_s18  ;;  %v12351_v58 = vpack.c.bf16 %v808_v21, %v675_v35 }
 0x349   : > { %12348 = vmatpush1.bf16.msra.mxu1 %v12347_v8  ;;  %11414 = vmatprep.mubr.msk.f32.mxu1 %vm19426_vm7, %v15474_v59 }
 0x34a   : > { %v15480_v10 = vpop.permute.xlu0 %787  ;;  %v3288_v2 = vpop.permute.xlu1 %3287 }
 0x34b   : > { %v809_v7 = vsel %vm793_vm2, %v786_v29, %v15480_v10  ;;  %v3311_v18 = vsel %vm660_vm1, %v15390_v52, %v3288_v2 }
 0x34c   : > { %2025 = vrot.lane.b32.xlu0 %v15218_v26, %s19476_s18  ;;  %2161 = vrot.lane.b32.xlu1 %v14863_v56, %s19477_s0  ;;  %v12349_v1 = vpack.c.bf16 %v809_v7, %v676_v57 }
 0x34e   : > { %v15495_v6 = vpop.permute.xlu0 %3289  ;;  %v3420_v55 = vpop.permute.xlu1 %3419  ;;  %12350 = vmatprep.subr.bf16.mxu1 %v12349_v1 }
 0x34f   : > { %12352 = vmatpush1.bf16.msra.mxu1 %v12351_v58  ;;  %v3443_v5 = vsel %vm793_vm2, %v15398_v32, %v3420_v55  ;;  %v3312_v31 = vsel %vm660_vm1, %v3288_v2, %v15495_v6 }
 0x350   : > { %2163 = vrot.lane.b32.xlu0 %v15218_v26, %s19477_s0  ;;  %2847 = vrot.lane.b32.xlu1 %v15493_v40, %s19482_s21  ;;  %v12343_v32 = vpack.c.bf16 %v3443_v5, %v3311_v18 }
 0x352   : > { %v15503_v62 = vpop.permute.xlu0 %3421  ;;  %v919_v56 = vpop.permute.xlu1 %918 }
 0x353   : > { %v3444_v46 = vsel %vm793_vm2, %v3420_v55, %v15503_v62  ;;  %v941_v43 = vsel %vm926_vm3, %v15122_v14, %v919_v56 }
 0x354   : > { %2849 = vrot.lane.b32.xlu0 %v15120_v24, %s19482_s21  ;;  %2985 = vrot.lane.b32.xlu1 %v15493_v40, %s19483_s24  ;;  %v12341_v13 = vpack.c.bf16 %v3444_v46, %v3312_v31  ;;  %v3071_v46 = vld [vmem:[%s13578_s19 + $0x98] sm:$0xff] }
 0x356   : > { %v15515_v47 = vpop.permute.xlu0 %920  ;;  %v1054_v50 = vpop.permute.xlu1 %1053  ;;  %12342 = vmatprep.subr.bf16.mxu0 %v12341_v13 }
 0x357   : > { %12344 = vmatpush1.bf16.msra.mxu0 %v12343_v32  ;;  %v1078_v52 = vsel %vm1063_vm4, %v15130_v36, %v1054_v50  ;;  %v942_v53 = vsel %vm926_vm3, %v919_v56, %v15515_v47 }
 0x358   : > { %2987 = vrot.lane.b32.xlu0 %v15164_v54, %s19483_s24  ;;  %2299 = vrot.lane.b32.xlu1 %v13343_v33, %s19478_s30  ;;  %v12355_v20 = vpack.c.bf16 %v1078_v52, %v941_v43  ;;  %v15613_v43 = vld [vmem:[%s13578_s19 + $0x98] sm:$0xff]  ;;  %s13456_s19 = smov 58  }
 0x35a   : > { %v15522_v24 = vpop.permute.xlu0 %1055  ;;  %v524_v27 = vpop.permute.xlu1 %523 }
 0x35b   : > { %v1079_v61 = vsel %vm1063_vm4, %v1054_v50, %v15522_v24  ;;  %v544_v44 = vsel %vm527_vm0, %v15430_v48, %v524_v27 }
 0x35c   : > { %581 = vst [vmem:[#allocation2 + $0x118] sm:$0xff] %v544_v44  ;;  %2301 = vrot.lane.b32.xlu0 %v15218_v26, %s19478_s30  ;;  %2437 = vrot.lane.b32.xlu1 %v13343_v33, %s19479_s23  ;;  %v12353_v36 = vpack.c.bf16 %v1079_v61, %v942_v53  ;;  %v12395_v21 = vpack.c.bf16 %v544_v44, %v15164_v54 }
 0x35e   : > { %v526_v60 = vpop.permute.xlu0 %525  ;;  %v3552_v28 = vpop.permute.xlu1 %3551  ;;  %12354 = vmatprep.subr.bf16.mxu1 %v12353_v36 }
 0x35f   : > { %v545_v51 = vsel %vm527_vm0, %v524_v27, %v526_v60  ;;  %583 = vst.msk [vmem:[#allocation2 + $0x128] sm:$0xff] %vm19568_vm6, %v526_v60  ;;  %12356 = vmatpush1.bf16.msra.mxu1 %v12355_v20  ;;  %v3575_v38 = vsel %vm926_vm3, %v15450_v17, %v3552_v28  ;;  %vm19572_vm6 = vmmov %vm19570_vm5 }
 0x360   : > { %2439 = vrot.lane.b32.xlu0 %v15218_v26, %s19479_s23  ;;  %3159 = vrot.lane.b32.xlu1 %v15164_v54, %s19484_s12  ;;  %v12393_v11 = vpack.c.bf16 %v545_v51, %v13343_v33 }
 0x362   : > { %v15541_v14 = vpop.permute.xlu0 %3553  ;;  %v1192_v48 = vpop.permute.xlu1 %1191 }
 0x363   : > { %v3576_v0 = vsel %vm926_vm3, %v3552_v28, %v15541_v14  ;;  %v1216_v1 = vsel %vm19572_vm6, %v15161_v30, %v1192_v48  ;;  %vm19576_vm6 = vcmask 752640  }
 0x364   : > { %3161 = vrot.lane.b32.xlu0 %v13343_v33, %s19484_s12  ;;  %2575 = vrot.lane.b32.xlu1 %v13343_v33, %s19480_s27 }
 0x365   : > { %4479 = vmatprep.subr.mxu0 %v3576_v0  ;;  %v15631_v0 = vpop.f32.mrb[0].mxu0 }
 0x366   : > { %v15549_v29 = vpop.permute.xlu0 %1193  ;;  %v1330_v8 = vpop.permute.xlu1 %1329  ;;  %4480 = vmatpush1.msra.mxu0 %v3575_v38 }
 0x367   : > { %4496 = vmatmul.mubr.f32.vlgmr.msra.gmra.mrb[6].mxu0 %v14965_v12  ;;  %12394 = vmatprep.subr.bf16.mxu0 %v12393_v11  ;;  %v1354_v17 = vsel %vm19569_vm8, %v15173_v22, %v1330_v8  ;;  %v1217_v12 = vsel %vm19570_vm5, %v1192_v48, %v15549_v29  ;;  %vm19573_vm8 = vcmask 875520  }
 0x368   : > { %2577 = vrot.lane.b32.xlu0 %v15218_v26, %s19480_s27  ;;  %2713 = vrot.lane.b32.xlu1 %v13343_v33, %s19481_s14  ;;  %v12359_v58 = vpack.c.bf16 %v1354_v17, %v1216_v1  ;;  %vm19574_vm5 = vmmov %vm19573_vm8 }
 0x369   : > { %12396 = vmatpush1.bf16.msra.mxu0 %v12395_v21  ;;  %11415 = vmatprep.mubr.msk.f32.mxu0 %vm19426_vm7, %v15474_v59 }
 0x36a   : > { %v15560_v2 = vpop.permute.xlu0 %1331  ;;  %v657_v57 = vpop.permute.xlu1 %656 }
 0x36b   : > { %v1355_v7 = vsel %vm19571_vm9, %v1330_v8, %v15560_v2  ;;  %v677_v35 = vsel %vm660_vm1, %v15464_v23, %v657_v57  ;;  %vm19575_vm9 = vmmov %vm19574_vm5 }
 0x36c   : > { %714 = vst [vmem:[#allocation2 + $0x1b0] sm:$0xff] %v677_v35  ;;  %2715 = vrot.lane.b32.xlu0 %v15218_v26, %s19481_s14  ;;  %3291 = vrot.lane.b32.xlu1 %v15164_v54, %s19485_s11  ;;  %v12357_v22 = vpack.c.bf16 %v1355_v7, %v1217_v12  ;;  %3090 = vst.msk [vmem:[#allocation2 + $0xc70] sm:$0xff] %vm19575_vm9, %v3071_v46 }
 0x36e   : > { %v659_v55 = vpop.permute.xlu0 %658  ;;  %v790_v5 = vpop.permute.xlu1 %789  ;;  %12358 = vmatprep.subr.bf16.mxu1 %v12357_v22 }
 0x36f   : > { %v678_v56 = vsel %vm660_vm1, %v657_v57, %v659_v55  ;;  %716 = vst.msk [vmem:[#allocation2 + $0x1c0] sm:$0xff] %vm19573_vm8, %v659_v55  ;;  %v810_v30 = vsel %vm793_vm2, %v15480_v10, %v790_v5  ;;  %12360 = vmatpush1.bf16.msra.mxu1 %v12359_v58  ;;  %vm19577_vm8 = vcmask 760832  }
 0x370   : > { %847 = vst [vmem:[#allocation2 + $0x248] sm:$0xff] %v810_v30  ;;  %3293 = vrot.lane.b32.xlu0 %v15241_v42, %s19485_s11  ;;  %3423 = vrot.lane.b32.xlu1 %v15164_v54, %s19486_s13  ;;  %v12399_v18 = vpack.c.bf16 %v810_v30, %v677_v35  ;;  %vm19579_vm9 = vmmov %vm19577_vm8 }
 0x372   : > { %v792_v26 = vpop.permute.xlu0 %791  ;;  %v1468_v23 = vpop.permute.xlu1 %1467 }
 0x373   : > { %v811_v31 = vsel %vm793_vm2, %v790_v5, %v792_v26  ;;  %849 = vst.msk [vmem:[#allocation2 + $0x258] sm:$0xff] %vm19574_vm5, %v792_v26  ;;  %vm19578_vm5 = vmmov %vm19576_vm6  ;;  %v1492_v44 = vsel %vm19579_vm9, %v15211_v25, %v1468_v23  ;;  %vm19583_vm9 = vcmask 769024  }
 0x374   : > { %3425 = vrot.lane.b32.xlu0 %v15241_v42, %s19486_s13  ;;  %2851 = vrot.lane.b32.xlu1 %v15241_v42, %s19482_s21  ;;  %v12397_v10 = vpack.c.bf16 %v811_v31, %v678_v56 }
 0x376   : > { %v15590_v13 = vpop.permute.xlu0 %1469  ;;  %v1606_v32 = vpop.permute.xlu1 %1605  ;;  %12398 = vmatprep.subr.bf16.mxu0 %v12397_v10 }
 0x377   : > { %12400 = vmatpush1.bf16.msra.mxu0 %v12399_v18  ;;  %v1630_v50 = vsel %vm19576_vm6, %v15222_v39, %v1606_v32  ;;  %v1493_v27 = vsel %vm19577_vm8, %v1468_v23, %v15590_v13  ;;  %vm19580_vm6 = vcmask 875520   ;;  %vm19581_vm8 = vcmask 777216  }
 0x378   : > { %2853 = vrot.lane.b32.xlu0 %v15192_v34, %s19482_s21  ;;  %2989 = vrot.lane.b32.xlu1 %v15241_v42, %s19483_s24  ;;  %v12363_v36 = vpack.c.bf16 %v1630_v50, %v1492_v44 }
 0x37a   : > { %v15598_v33 = vpop.permute.xlu0 %1607  ;;  %v923_v52 = vpop.permute.xlu1 %922 }
 0x37b   : > { %v1631_v53 = vsel %vm19578_vm5, %v1606_v32, %v15598_v33  ;;  %v943_v61 = vsel %vm926_vm3, %v15515_v47, %v923_v52  ;;  %vm19582_vm5 = vmmov %vm19581_vm8 }
 0x37c   : > { %980 = vst [vmem:[#allocation2 + $0x2e0] sm:$0xff] %v943_v61  ;;  %2991 = vrot.lane.b32.xlu0 %v15192_v34, %s19483_s24  ;;  %3163 = vrot.lane.b32.xlu1 %v15192_v34, %s19484_s12  ;;  %v12361_v39 = vpack.c.bf16 %v1631_v53, %v1493_v27 }
 0x37e   : > { %v925_v20 = vpop.permute.xlu0 %924  ;;  %v1058_v60 = vpop.permute.xlu1 %1057  ;;  %12362 = vmatprep.subr.bf16.mxu1 %v12361_v39 }
 0x37f   : > { %v944_v28 = vsel %vm926_vm3, %v923_v52, %v925_v20  ;;  %982 = vst.msk [vmem:[#allocation2 + $0x2f0] sm:$0xff] %vm19580_vm6, %v925_v20  ;;  %v1080_v25 = vsel %vm1063_vm4, %v15522_v24, %v1058_v60  ;;  %12364 = vmatpush1.bf16.msra.mxu1 %v12363_v36  ;;  %vm19584_vm6 = vmmov %vm19583_vm9 }
 0x380   : > { %1118 = vst [vmem:[#allocation2 + $0x378] sm:$0xff] %v1080_v25  ;;  %3165 = vrot.lane.b32.xlu0 %v15613_v43, %s19484_s12  ;;  %3555 = vrot.lane.b32.xlu1 %v15164_v54, %s19487_s9  ;;  %v12403_v38 = vpack.c.bf16 %v1080_v25, %v943_v61  ;;  %v15639_v54 = vpop.f32.mrb[1].mxu0 }
 0x382   : > { %v15623_v47 = vpop.permute.xlu0 %1059  ;;  %v1744_v51 = vpop.permute.xlu1 %1743 }
 0x383   : > { %v1081_v48 = vsel %vm1063_vm4, %v1058_v60, %v15623_v47  ;;  %v1768_v35 = vsel %vm1753_vm10, %v15258_v49, %v1744_v51 }
 0x384   : > { %3557 = vrot.lane.b32.xlu0 %v15241_v42, %s19487_s9  ;;  %3295 = vrot.lane.b32.xlu1 %v15192_v34, %s19485_s11  ;;  %v12401_v24 = vpack.c.bf16 %v1081_v48, %v944_v28  ;;  %v15717_v28 = vpop.f32.mrb[0].mxu1 }
 0x386   : > { %v15633_v11 = vpop.permute.xlu0 %1745  ;;  %v1882_v8 = vpop.permute.xlu1 %1881  ;;  %12402 = vmatprep.subr.bf16.mxu0 %v12401_v24 }
 0x387   : > { %12404 = vmatpush1.bf16.msra.mxu0 %v12403_v38  ;;  %v1906_v42 = vsel %vm1891_vm11, %v15266_v63, %v1882_v8  ;;  %v1769_v57 = vsel %vm1753_vm10, %v1744_v51, %v15633_v11 }
 0x388   : > { %3297 = vrot.lane.b32.xlu0 %v15613_v43, %s19485_s11  ;;  %3427 = vrot.lane.b32.xlu1 %v15192_v34, %s19486_s13  ;;  %v12367_v1 = vpack.c.bf16 %v1906_v42, %v1768_v35  ;;  %v15733_v42 = vpop.f32.mrb[1].mxu1 }
 0x38a   : > { %v15643_v21 = vpop.permute.xlu0 %1883  ;;  %v1196_v17 = vpop.permute.xlu1 %1195 }
 0x38b   : > { %v1907_v12 = vsel %vm1891_vm11, %v1882_v8, %v15643_v21  ;;  %v1218_v7 = vsel %vm19581_vm8, %v15549_v29, %v1196_v17  ;;  %vm19585_vm8 = vcmask 506880  }
 0x38c   : > { %1256 = vst [vmem:[#allocation2 + $0x410] sm:$0xff] %v1218_v7  ;;  %3429 = vrot.lane.b32.xlu0 %v15613_v43, %s19486_s13  ;;  %1061 = vrot.lane.b32.xlu1 %v15613_v43, %s19469_s16  ;;  %v12365_v63 = vpack.c.bf16 %v1907_v12, %v1769_v57  ;;  %v15743_v12 = vpop.f32.mrb[2].mxu1 }
 0x38e   : > { %v15657_v22 = vpop.permute.xlu0 %1197  ;;  %v1334_v58 = vpop.permute.xlu1 %1333  ;;  %12366 = vmatprep.subr.bf16.mxu1 %v12365_v63 }
 0x38f   : > { %v1219_v55 = vsel %vm19582_vm5, %v1196_v17, %v15657_v22  ;;  %v1356_v29 = vsel %vm19583_vm9, %v15560_v2, %v1334_v58  ;;  %12368 = vmatpush1.bf16.msra.mxu1 %v12367_v1  ;;  %vm19586_vm5 = vcmask 760832   ;;  %vm19587_vm9 = vmmov %vm19585_vm8  ;;  %v15735_v17 = vpop.f32.mrb[2].mxu0  ;;  %v15750_v63 = vpop.f32.mrb[3].mxu1 }
 0x390   : > { %1394 = vst [vmem:[#allocation2 + $0x4a8] sm:$0xff] %v1356_v29  ;;  %3559 = vrot.lane.b32.xlu0 %v15192_v34, %s19487_s9  ;;  %3561 = vrot.lane.b32.xlu1 %v15613_v43, %s19487_s9  ;;  %v12407_v30 = vpack.c.bf16 %v1356_v29, %v1218_v7  ;;  %v15745_v7 = vpop.f32.mrb[3].mxu0 }
 0x392   : > { %v15667_v49 = vpop.permute.xlu0 %1335  ;;  %v2020_v5 = vpop.permute.xlu1 %2019 }
 0x393   : > { %v1357_v56 = vsel %vm19584_vm6, %v1334_v58, %v15667_v49  ;;  %v2044_v50 = vsel %vm19587_vm9, %v15298_v15, %v2020_v5  ;;  %vm19588_vm6 = vmmov %vm19586_vm5  ;;  %vm19591_vm9 = vcmask 261120  }
 0x394   : > { %1199 = vrot.lane.b32.xlu0 %v15613_v43, %s19470_s15  ;;  %1337 = vrot.lane.b32.xlu1 %v15613_v43, %s19471_s17  ;;  %v12405_v2 = vpack.c.bf16 %v1357_v56, %v1219_v55 }
 0x396   : > { %v15675_v26 = vpop.permute.xlu0 %2021  ;;  %v2158_v34 = vpop.permute.xlu1 %2157  ;;  %12406 = vmatprep.subr.bf16.mxu0 %v12405_v2 }
 0x397   : > { %12408 = vmatpush1.bf16.msra.mxu0 %v12407_v30  ;;  %v2182_v23 = vsel %vm2167_vm13, %v15306_v3, %v2158_v34  ;;  %v2045_v46 = vsel %vm19585_vm8, %v2020_v5, %v15675_v26  ;;  %vm19589_vm8 = vcmask 752640  }
 0x398   : > { %1475 = vrot.lane.b32.xlu0 %v15613_v43, %s19472_s20  ;;  %1613 = vrot.lane.b32.xlu1 %v15613_v43, %s19473_s26  ;;  %v12371_v52 = vpack.c.bf16 %v2182_v23, %v2044_v50  ;;  %s13457_s20 = smov 56   ;;  %s19770_s26 = sld [smem:[#allocation14_spill]] }
 0x39a   : > { %v15683_v31 = vpop.permute.xlu0 %2159  ;;  %v1472_v10 = vpop.permute.xlu1 %1471 }
 0x39b   : > { %v2183_v18 = vsel %vm2167_vm13, %v2158_v34, %v15683_v31  ;;  %v1494_v32 = vsel %vm19586_vm5, %v15590_v13, %v1472_v10  ;;  %vm19590_vm5 = vmmov %vm19589_vm8 }
 0x39c   : > { %1532 = vst [vmem:[#allocation2 + $0x540] sm:$0xff] %v1494_v32  ;;  %1751 = vrot.lane.b32.xlu0 %v15613_v43, %s19474_s28  ;;  %1889 = vrot.lane.b32.xlu1 %v15613_v43, %s19475_s29  ;;  %v12369_v3 = vpack.c.bf16 %v2183_v18, %v2045_v46 }
 0x39e   : > { %v15697_v27 = vpop.permute.xlu0 %1473  ;;  %v1610_v53 = vpop.permute.xlu1 %1609  ;;  %12370 = vmatprep.subr.bf16.mxu1 %v12369_v3  ;;  %s11518_s15 = sshll.u32 %s19770_s26, 5 }
 0x39f   : > { %v1495_v61 = vsel %vm19588_vm6, %v1472_v10, %v15697_v27  ;;  %v1632_v13 = vsel %vm19589_vm8, %v15598_v33, %v1610_v53  ;;  %12372 = vmatpush1.bf16.msra.mxu1 %v12371_v52  ;;  %vm19592_vm6 = vcmask 490496   ;;  %vm19593_vm8 = vmmov %vm19591_vm9 }
 0x3a0   : > { %1670 = vst [vmem:[#allocation2 + $0x5d8] sm:$0xff] %v1632_v13  ;;  %2027 = vrot.lane.b32.xlu0 %v15613_v43, %s19476_s18  ;;  %2165 = vrot.lane.b32.xlu1 %v15613_v43, %s19477_s0  ;;  %v12411_v36 = vpack.c.bf16 %v1632_v13, %v1494_v32  ;;  %s19774_s0 = sld [smem:[#allocation27_spill]] }
 0x3a2   : > { %v15707_v15 = vpop.permute.xlu0 %1611  ;;  %v2296_v44 = vpop.permute.xlu1 %2295 }
 0x3a3   : > { %v1633_v39 = vsel %vm19590_vm5, %v1610_v53, %v15707_v15  ;;  %vm19594_vm5 = vmmov %vm19592_vm6 }
 0x3a4   : > { %2303 = vrot.lane.b32.xlu0 %v15613_v43, %s19478_s30  ;;  %2441 = vrot.lane.b32.xlu1 %v15613_v43, %s19479_s23  ;;  %v12409_v33 = vpack.c.bf16 %v1633_v39, %v1495_v61  ;;  %v2320_v57 = vsel %vm19594_vm5, %v15338_v9, %v2296_v44  ;;  %v15752_v9 = vpop.f32.mrb[4].mxu0 }
 0x3a5   : > { %v15760_v29 = vpop.f32.mrb[5].mxu0 }
 0x3a6   : > { %v15715_v20 = vpop.permute.xlu0 %2297  ;;  %v2434_v60 = vpop.permute.xlu1 %2433  ;;  %12410 = vmatprep.subr.bf16.mxu0 %v12409_v33  ;;  %s19313_s23 = scalar_lea.hbm %s19774_s0, %s11518_s15 }
 0x3a7   : > { %12412 = vmatpush1.bf16.msra.mxu0 %v12411_v36  ;;  %v2458_v25 = vsel %vm19591_vm9, %v15346_v41, %v2434_v60  ;;  %v2321_v24 = vsel %vm19592_vm6, %v2296_v44, %v15715_v20  ;;  %vm19595_vm9 = vcmask 252928   ;;  %vm19596_vm6 = vcmask 506880  }
 0x3a8   : > { %2579 = vrot.lane.b32.xlu0 %v15613_v43, %s19480_s27  ;;  %2717 = vrot.lane.b32.xlu1 %v15613_v43, %s19481_s14  ;;  %v12375_v35 = vpack.c.bf16 %v2458_v25, %v2320_v57  ;;  %vm19598_vm5 = vmmov %vm19596_vm6  ;;  %s13454_s27 = smov 122   ;;  %s13455_s14 = smov 120  }
 0x3aa   : > { %v15725_v51 = vpop.permute.xlu0 %2435  ;;  %v1748_v48 = vpop.permute.xlu1 %1747 }
 0x3ab   : > { %v2459_v38 = vsel %vm19593_vm8, %v2434_v60, %v15725_v51  ;;  %v1770_v8 = vsel %vm1753_vm10, %v15633_v11, %v1748_v48  ;;  %v3621_v11 = vld [vmem:[%s19357_s2] sm:$0xff]  ;;  %vm19597_vm8 = vmmov %vm19595_vm9 }
 0x3ac   : > { %1808 = vst [vmem:[#allocation2 + $0x670] sm:$0xff] %v1770_v8  ;;  %2855 = vrot.lane.b32.xlu0 %v15613_v43, %s19482_s21  ;;  %2993 = vrot.lane.b32.xlu1 %v15613_v43, %s19483_s24  ;;  %v12373_v41 = vpack.c.bf16 %v2459_v38, %v2321_v24  ;;  %s13459_s24 = smov [#allocation7]  }
 0x3ad   : > { %s13372_s26 = sshll.u32 %s13459_s24, 4  ;;  %s13373_s26 = int_to_ptr.vmem [resolvable:$false] %s13372_s26 }
 0x3ae   : > { %v15754_v1 = vpop.permute.xlu0 %1749  ;;  %v1886_v58 = vpop.permute.xlu1 %1885  ;;  %12374 = vmatprep.subr.bf16.mxu1 %v12373_v41 }
 0x3af   : > { %v1771_v43 = vsel %vm1753_vm10, %v1748_v48, %v15754_v1  ;;  %v1908_v55 = vsel %vm1891_vm11, %v15643_v21, %v1886_v58  ;;  %12376 = vmatpush1.bf16.msra.mxu1 %v12375_v35 }
 0x3b0   : > { %1946 = vst [vmem:[#allocation2 + $0x708] sm:$0xff] %v1908_v55  ;;  %3674 = vperm.xlu0 %13223, %v3621_v11   ;;  %v12415_v34 = vpack.c.bf16 %v1908_v55, %v1770_v8 }
 0x3b2   : > { %v15762_v5 = vpop.permute.xlu0 %1887  ;;  %v2572_v56 = vpop.permute.xlu1 %2571 }
 0x3b3   : > { %v1909_v2 = vsel %vm1891_vm11, %v1886_v58, %v15762_v5  ;;  %v2596_v52 = vsel %vm19597_vm8, %v15370_v4, %v2572_v56  ;;  %vm19601_vm8 = vcmask 261120  }
 0x3b4   : > { %v12413_v30 = vpack.c.bf16 %v1909_v2, %v1771_v43 }
 0x3b6   : > { %v2574_v23 = vpop.permute.xlu0 %2573  ;;  %v2710_v10 = vpop.permute.xlu1 %2709  ;;  %12414 = vmatprep.subr.bf16.mxu0 %v12413_v30 }
 0x3b7   : > { %12416 = vmatpush1.bf16.msra.mxu0 %v12415_v34  ;;  %v2734_v21 = vsel %vm2719_vm14, %v15378_v19, %v2710_v10  ;;  %v2597_v32 = vsel %vm19595_vm9, %v2572_v56, %v2574_v23  ;;  %vm19599_vm9 = vcmask 490496  }
 0x3b8   : > { %v12379_v61 = vpack.c.bf16 %v2734_v21, %v2596_v52 }
 0x3ba   : > { %v15768_v46 = vpop.permute.xlu0 %2711  ;;  %v2024_v18 = vpop.permute.xlu1 %2023 }
 0x3bb   : > { %v2735_v50 = vsel %vm2719_vm14, %v2710_v10, %v15768_v46  ;;  %v2046_v3 = vsel %vm19596_vm6, %v15675_v26, %v2024_v18  ;;  %vm19600_vm6 = vmmov %vm19599_vm9 }
 0x3bc   : > { %2084 = vst [vmem:[#allocation2 + $0x7a0] sm:$0xff] %v2046_v3  ;;  %v12377_v53 = vpack.c.bf16 %v2735_v50, %v2597_v32  ;;  %v13344_v50 = vld [vmem:[#allocation2 + $0x80] sm:$0xff] }
 0x3be   : > { %v15777_v13 = vpop.permute.xlu0 %2025  ;;  %v2162_v19 = vpop.permute.xlu1 %2161  ;;  %12378 = vmatprep.subr.bf16.mxu1 %v12377_v53 }
 0x3bf   : > { %v2047_v44 = vsel %vm19598_vm5, %v2024_v18, %v15777_v13  ;;  %v2184_v39 = vsel %vm2167_vm13, %v15683_v31, %v2162_v19  ;;  %12380 = vmatpush1.bf16.msra.mxu1 %v12379_v61  ;;  %vm19602_vm5 = vmmov %vm19601_vm8 }
 0x3c0   : > { %2222 = vst [vmem:[#allocation2 + $0x838] sm:$0xff] %v2184_v39  ;;  %v12419_v60 = vpack.c.bf16 %v2184_v39, %v2046_v3 }
 0x3c2   : > { %v15783_v33 = vpop.permute.xlu0 %2163  ;;  %v2848_v26 = vpop.permute.xlu1 %2847 }
 0x3c3   : > { %v2185_v4 = vsel %vm2167_vm13, %v2162_v19, %v15783_v33  ;;  %v2872_v11 = vsel %vm2857_vm15, %v15410_v16, %v2848_v26 }
 0x3c4   : > { %v12417_v36 = vpack.c.bf16 %v2185_v4, %v2047_v44 }
 0x3c6   : > { %v2850_v25 = vpop.permute.xlu0 %2849  ;;  %v2986_v48 = vpop.permute.xlu1 %2985  ;;  %12418 = vmatprep.subr.bf16.mxu0 %v12417_v36 }
 0x3c7   : > { %12420 = vmatpush1.bf16.msra.mxu0 %v12419_v60  ;;  %v3010_v24 = vsel %vm2995_vm12, %v15418_v37, %v2986_v48  ;;  %v2873_v8 = vsel %vm2857_vm15, %v2848_v26, %v2850_v25 }
 0x3c8   : > { %v12383_v58 = vpack.c.bf16 %v3010_v24, %v2872_v11 }
 0x3ca   : > { %v15789_v38 = vpop.permute.xlu0 %2987  ;;  %v2300_v31 = vpop.permute.xlu1 %2299 }
 0x3cb   : > { %v3011_v57 = vsel %vm2995_vm12, %v2986_v48, %v15789_v38  ;;  %v2322_v41 = vsel %vm19599_vm9, %v15715_v20, %v2300_v31  ;;  %vm19603_vm9 = vcmask 252928  }
 0x3cc   : > { %2360 = vst [vmem:[#allocation2 + $0x8d0] sm:$0xff] %v2322_v41  ;;  %v12381_v35 = vpack.c.bf16 %v3011_v57, %v2873_v8 }
 0x3ce   : > { %v15798_v43 = vpop.permute.xlu0 %2301  ;;  %v2438_v37 = vpop.permute.xlu1 %2437  ;;  %12382 = vmatprep.subr.bf16.mxu1 %v12381_v35 }
 0x3cf   : > { %v2323_v55 = vsel %vm19600_vm6, %v2300_v31, %v15798_v43  ;;  %v2460_v56 = vsel %vm19601_vm8, %v15725_v51, %v2438_v37  ;;  %12384 = vmatpush1.bf16.msra.mxu1 %v12383_v58  ;;  %vm19604_vm6 = vmmov %vm19603_vm9  ;;  %vm19605_vm8 = vcmask 875520  }
 0x3d0   : > { %2498 = vst [vmem:[#allocation2 + $0x968] sm:$0xff] %v2460_v56  ;;  %v12423_v34 = vpack.c.bf16 %v2460_v56, %v2322_v41 }
 0x3d2   : > { %v15804_v2 = vpop.permute.xlu0 %2439  ;;  %v3160_v20 = vpop.permute.xlu1 %3159 }
 0x3d3   : > { %v2461_v16 = vsel %vm19602_vm5, %v2438_v37, %v15804_v2  ;;  %v3181_v10 = vsel %vm527_vm0, %v15438_v45, %v3160_v20  ;;  %vm19606_vm5 = vmmov %vm19605_vm8 }
 0x3d4   : > { %v12421_v30 = vpack.c.bf16 %v2461_v16, %v2323_v55  ;;  %v12387_v52 = vpack.c.bf16 %v3181_v10, %v15493_v40 }
 0x3d6   : > { %v3162_v21 = vpop.permute.xlu0 %3161  ;;  %v2576_v18 = vpop.permute.xlu1 %2575  ;;  %12422 = vmatprep.subr.bf16.mxu0 %v12421_v30 }
 0x3d7   : > { %v3182_v32 = vsel %vm527_vm0, %v3160_v20, %v3162_v21  ;;  %v2598_v51 = vsel %vm19603_vm9, %v2574_v23, %v2576_v18  ;;  %12424 = vmatpush1.bf16.msra.mxu0 %v12423_v34  ;;  %vm19607_vm9 = vmmov %vm19606_vm5 }
 0x3d8   : > { %2636 = vst [vmem:[#allocation2 + $0xa00] sm:$0xff] %v2598_v51  ;;  %v12385_v3 = vpack.c.bf16 %v3182_v32, %v13344_v50  ;;  %v13346_v32 = vld [vmem:[#allocation2 + $0xc60] sm:$0xff] }
 0x3da   : > { %v15813_v53 = vpop.permute.xlu0 %2577  ;;  %v2714_v61 = vpop.permute.xlu1 %2713  ;;  %12386 = vmatprep.subr.bf16.mxu1 %v12385_v3 }
 0x3db   : > { %v2599_v45 = vsel %vm19604_vm6, %v2576_v18, %v15813_v53  ;;  %v2736_v19 = vsel %vm2719_vm14, %v15768_v46, %v2714_v61  ;;  %12388 = vmatpush1.bf16.msra.mxu1 %v12387_v52  ;;  %v4756_v52 = vld [vmem:[#allocation2 + $0x90] sm:$0xff]  ;;  %vm19608_vm6 = vmmov %vm19606_vm5 }
 0x3dc   : > { %2774 = vst [vmem:[#allocation2 + $0xa98] sm:$0xff] %v2736_v19  ;;  %v12427_v40 = vpack.c.bf16 %v2736_v19, %v2598_v51 }
 0x3de   : > { %v15819_v44 = vpop.permute.xlu0 %2715  ;;  %v3292_v23 = vpop.permute.xlu1 %3291 }
 0x3df   : > { %v2737_v39 = vsel %vm2719_vm14, %v2714_v61, %v15819_v44  ;;  %v3313_v57 = vsel %vm660_vm1, %v15495_v6, %v3292_v23 }
 0x3e0   : > { %v12425_v26 = vpack.c.bf16 %v2737_v39, %v2599_v45 }
 0x3e2   : > { %v3294_v4 = vpop.permute.xlu0 %3293  ;;  %v3424_v36 = vpop.permute.xlu1 %3423  ;;  %12426 = vmatprep.subr.bf16.mxu0 %v12425_v26 }
 0x3e3   : > { %12428 = vmatpush1.bf16.msra.mxu0 %v12427_v40  ;;  %v3445_v60 = vsel %vm793_vm2, %v15503_v62, %v3424_v36  ;;  %v3314_v46 = vsel %vm660_vm1, %v3292_v23, %v3294_v4  ;;  %v15850_v40 = vld [vmem:[%s19356_s1] sm:$0xff] }
 0x3e4   : > { %v12391_v11 = vpack.c.bf16 %v3445_v60, %v3313_v57 }
 0x3e6   : > { %v3426_v48 = vpop.permute.xlu0 %3425  ;;  %v2852_v24 = vpop.permute.xlu1 %2851 }
 0x3e7   : > { %v3446_v31 = vsel %vm793_vm2, %v3424_v36, %v3426_v48  ;;  %v2874_v8 = vsel %vm2857_vm15, %v2850_v25, %v2852_v24  ;;  %v19437_v36 = vmov 0.0|0.0  }
 0x3e8   : > { %2912 = vst [vmem:[#allocation2 + $0xb30] sm:$0xff] %v2874_v8  ;;  %v12389_v41 = vpack.c.bf16 %v3446_v31, %v3314_v46 }
 0x3ea   : > { %v15830_v35 = vpop.permute.xlu0 %2853  ;;  %v2990_v58 = vpop.permute.xlu1 %2989  ;;  %12390 = vmatprep.subr.bf16.mxu1 %v12389_v41 }
 0x3eb   : > { %v2875_v62 = vsel %vm2857_vm15, %v2852_v24, %v15830_v35  ;;  %v3012_v37 = vsel %vm2995_vm12, %v15789_v38, %v2990_v58  ;;  %12392 = vmatpush1.bf16.msra.mxu1 %v12391_v11  ;;  %v13345_v38 = vld [vmem:[#allocation2 + $0xc68] sm:$0xff]  ;;  %v4758_v24 = vld [vmem:[#allocation2 + $0x1c0] sm:$0xff] }
 0x3ec   : > { %3050 = vst [vmem:[#allocation2 + $0xbc8] sm:$0xff] %v3012_v37  ;;  %v12431_v16 = vpack.c.bf16 %v3012_v37, %v2874_v8 }
 0x3ee   : > { %v15836_v55 = vpop.permute.xlu0 %2991  ;;  %v3164_v25 = vpop.permute.xlu1 %3163 }
 0x3ef   : > { %v3013_v6 = vsel %vm2995_vm12, %v2990_v58, %v15836_v55  ;;  %v3183_v56 = vsel %vm527_vm0, %v3162_v21, %v3164_v25  ;;  %v4757_v21 = vld [vmem:[#allocation2 + $0x128] sm:$0xff] }
 0x3f0   : > { %3220 = vst [vmem:[#allocation2 + $0xcf8] sm:$0xff] %v3183_v56  ;;  %v12429_v20 = vpack.c.bf16 %v3013_v6, %v2875_v62  ;;  %v12435_v51 = vpack.c.bf16 %v3183_v56, %v13346_v32  ;;  %v12442_v23 = vpack.c.bf16 %v4757_v21, %v4756_v52 }
 0x3f2   : > { %v3166_v30 = vpop.permute.xlu0 %3165  ;;  %v3556_v34 = vpop.permute.xlu1 %3555  ;;  %12430 = vmatprep.subr.bf16.mxu0 %v12429_v20  ;;  %v4760_v20 = vld [vmem:[#allocation2 + $0x2f0] sm:$0xff] }
 0x3f3   : > { %v3184_v10 = vsel %vm527_vm0, %v3164_v25, %v3166_v30  ;;  %3222 = vst.msk [vmem:[#allocation2 + $0xd08] sm:$0xff] %vm19605_vm8, %v3166_v30  ;;  %12432 = vmatpush1.bf16.msra.mxu0 %v12431_v16  ;;  %v3577_v19 = vsel %vm926_vm3, %v15541_v14, %v3556_v34  ;;  %vm19610_vm8 = vcmask 777216  }
 0x3f4   : > { %v12433_v18 = vpack.c.bf16 %v3184_v10, %v13345_v38 }
 0x3f6   : > { %v3558_v50 = vpop.permute.xlu0 %3557  ;;  %v3296_v3 = vpop.permute.xlu1 %3295  ;;  %12434 = vmatprep.subr.bf16.mxu0 %v12433_v18 }
 0x3f7   : > { %v3578_v61 = vsel %vm926_vm3, %v3556_v34, %v3558_v50  ;;  %v3315_v45 = vsel %vm660_vm1, %v3294_v4, %v3296_v3  ;;  %12436 = vmatpush1.bf16.msra.mxu0 %v12435_v51  ;;  %v4759_v4 = vld [vmem:[#allocation2 + $0x258] sm:$0xff] }
 0x3f8   : > { %3352 = vst [vmem:[#allocation2 + $0xd90] sm:$0xff] %v3315_v45  ;;  %4604 = vmatprep.subr.mxu1 %v3578_v61  ;;  %v12445_v46 = vpack.c.bf16 %v4759_v4, %v4758_v24 }
 0x3f9   : > { %4605 = vmatpush1.msra.mxu1 %v3577_v19 }
 0x3fa   : > { %v3298_v39 = vpop.permute.xlu0 %3297  ;;  %v3428_v26 = vpop.permute.xlu1 %3427  ;;  %4621 = vmatmul.mubr.f32.vlgmr.msra.gmra.mrb[6].mxu1 %v15850_v40  ;;  %12441 = vmatprep.subr.bf16.mxu1 %v19437_v36 }
 0x3fb   : > { %v3316_v60 = vsel %vm660_vm1, %v3296_v3, %v3298_v39  ;;  %3354 = vst.msk [vmem:[#allocation2 + $0xda0] sm:$0xff] %vm19606_vm5, %v3298_v39  ;;  %v3447_v14 = vsel %vm793_vm2, %v3426_v48, %v3428_v26  ;;  %12443 = vmatpush1.bf16.msra.mxu1 %v12442_v23  ;;  %11416 = vmatprep.mubr.msk.f32.mxu1 %vm19426_vm7, %v15474_v59 }
 0x3fc   : > { %3484 = vst [vmem:[#allocation2 + $0xe28] sm:$0xff] %v3447_v14  ;;  %12444 = vmatprep.subr.bf16.mxu1 %v19437_v36  ;;  %v12439_v59 = vpack.c.bf16 %v3447_v14, %v3315_v45 }
 0x3fe   : > { %v3430_v31 = vpop.permute.xlu0 %3429  ;;  %v1062_v8 = vpop.permute.xlu1 %1061 }
 0x3ff   : > { %v3448_v57 = vsel %vm793_vm2, %v3428_v26, %v3430_v31  ;;  %3486 = vst.msk [vmem:[#allocation2 + $0xe38] sm:$0xff] %vm19607_vm9, %v3430_v31  ;;  %v1082_v41 = vsel %vm1063_vm4, %v15623_v47, %v1062_v8  ;;  %12446 = vmatpush1.bf16.msra.mxu1 %v12445_v46  ;;  %vm19609_vm2 = vmmov %vm19606_vm5  ;;  %vm19611_vm5 = vcmask 769024  }
 0x400   : > { %1120 = vst.msk [vmem:[#allocation2 + $0x388] sm:$0xff] %vm19608_vm6, %v1082_v41  ;;  %v12437_v48 = vpack.c.bf16 %v3448_v57, %v3316_v60  ;;  %12447 = vmatprep.subr.bf16.mxu1 %v19437_v36  ;;  %vm19612_vm9 = vmmov %vm19609_vm2 }
 0x401   : > { %vm19613_vm6 = vmmov %vm19609_vm2 }
 0x402   : > { %v3560_v11 = vpop.permute.xlu0 %3559  ;;  %v3562_v58 = vpop.permute.xlu1 %3561  ;;  %12438 = vmatprep.subr.bf16.mxu0 %v12437_v48 }
 0x403   : > { %v3579_v62 = vsel %vm926_vm3, %v3558_v50, %v3560_v11  ;;  %v3580_v37 = vsel %vm926_vm3, %v3560_v11, %v3562_v58  ;;  %3618 = vst.msk [vmem:[#allocation2 + $0xed0] sm:$0xff] %vm19609_vm2, %v3562_v58  ;;  %12440 = vmatpush1.bf16.msra.mxu0 %v12439_v59  ;;  %vm19614_vm2 = vcmask 760832  }
 0x404   : > { %3616 = vst [vmem:[#allocation2 + $0xec0] sm:$0xff] %v3579_v62  ;;  %4729 = vmatprep.subr.mxu0 %v3580_v37 }
 0x406   : > { %v1200_v47 = vpop.permute.xlu0 %1199  ;;  %v1338_v25 = vpop.permute.xlu1 %1337 }
 0x407   : > { %v1220_v6 = vsel %vm19610_vm8, %v15657_v22, %v1200_v47  ;;  %v1358_v56 = vsel %vm19611_vm5, %v15667_v49, %v1338_v25  ;;  %v4761_v16 = vld [vmem:[#allocation2 + $0x388] sm:$0xff]  ;;  %4730 = vmatpush1.msra.mxu0 %v3579_v62  ;;  %vm19615_vm8 = vcmask 752640   ;;  %vm19616_vm5 = vmmov %vm19613_vm6 }
 0x408   : > { %1258 = vst.msk [vmem:[#allocation2 + $0x420] sm:$0xff] %vm19612_vm9, %v1220_v6  ;;  %v12448_v30 = vpack.c.bf16 %v4761_v16, %v4760_v20  ;;  %4746 = vmatmul.mubr.f32.vlgmr.msra.gmra.mrb[8].mxu0 %v15850_v40  ;;  %vm19617_vm7 = vmmov %vm19616_vm5  ;;  %v4776_v6 = vld [vmem:[#allocation2 + $0xc70] sm:$0xff]  ;;  %v4779_v16 = vld [vmem:[#allocation2 + $0xe38] sm:$0xff] }
 0x409   : > { %1396 = vst.msk [vmem:[#allocation2 + $0x4b8] sm:$0xff] %vm19613_vm6, %v1358_v56  ;;  %vm19618_vm9 = vmmov %vm19616_vm5  ;;  %v4777_v56 = vld [vmem:[#allocation2 + $0xd08] sm:$0xff] }
 0x40a   : > { %v1476_v34 = vpop.permute.xlu0 %1475  ;;  %v1614_v10 = vpop.permute.xlu1 %1613  ;;  %12449 = vmatpush1.bf16.msra.mxu1 %v12448_v30  ;;  %vm19619_vm6 = vmmov %vm19616_vm5  ;;  %v12472_v20 = vpack.c.bf16 %v4777_v56, %v4776_v6  ;;  %v4778_v30 = vld [vmem:[#allocation2 + $0xda0] sm:$0xff] }
 0x40b   : > { %v1496_v38 = vsel %vm19614_vm2, %v15697_v27, %v1476_v34  ;;  %v1634_v22 = vsel %vm19615_vm8, %v15707_v15, %v1614_v10  ;;  %12450 = vmatprep.subr.bf16.mxu1 %v19437_v36  ;;  %vm19622_vm2 = vmmov %vm19616_vm5  ;;  %vm19623_vm8 = vcmask 490496   ;;  %v12475_v10 = vpack.c.bf16 %v4779_v16, %v4778_v30 }
 0x40c   : > { %1534 = vst.msk [vmem:[#allocation2 + $0x550] sm:$0xff] %vm19616_vm5, %v1496_v38 }
 0x40d   : > { %1672 = vst.msk [vmem:[#allocation2 + $0x5e8] sm:$0xff] %vm19617_vm7, %v1634_v22  ;;  %vm19620_vm7 = vcmask 506880  }
 0x40e   : > { %v1752_v49 = vpop.permute.xlu0 %1751  ;;  %v1890_v18 = vpop.permute.xlu1 %1889 }
 0x40f   : > { %v1772_v32 = vsel %vm1753_vm10, %v15754_v1, %v1752_v49  ;;  %v1910_v51 = vsel %vm1891_vm11, %v15762_v5, %v1890_v18  ;;  %v4762_v50 = vld [vmem:[#allocation2 + $0x420] sm:$0xff]  ;;  %vm19621_vm11 = vmmov %vm19616_vm5  ;;  %vm19624_vm5 = vcmask 261120  }
 0x410   : > { %v4763_v3 = vld [vmem:[#allocation2 + $0x4b8] sm:$0xff]  ;;  %1810 = vst.msk [vmem:[#allocation2 + $0x680] sm:$0xff] %vm19618_vm9, %v1772_v32  ;;  %vm19626_vm9 = vmmov %vm19622_vm2 }
 0x411   : > { %1948 = vst.msk [vmem:[#allocation2 + $0x718] sm:$0xff] %vm19619_vm6, %v1910_v51  ;;  %v12451_v27 = vpack.c.bf16 %v4763_v3, %v4762_v50  ;;  %vm19627_vm6 = vcmask 252928  }
 0x412   : > { %v2028_v15 = vpop.permute.xlu0 %2027  ;;  %v2166_v52 = vpop.permute.xlu1 %2165 }
 0x413   : > { %12452 = vmatpush1.bf16.msra.mxu1 %v12451_v27  ;;  %v2048_v21 = vsel %vm19620_vm7, %v15777_v13, %v2028_v15  ;;  %v2186_v61 = vsel %vm2167_vm13, %v15783_v33, %v2166_v52  ;;  %v4764_v1 = vld [vmem:[#allocation2 + $0x550] sm:$0xff]  ;;  %vm19625_vm13 = vmmov %vm19622_vm2  ;;  %v19427_v15 = vmov 0.0  }
 0x414   : > { %12453 = vmatprep.subr.bf16.mxu1 %v19437_v36  ;;  %v4765_v5 = vld [vmem:[#allocation2 + $0x5e8] sm:$0xff]  ;;  %2086 = vst.msk [vmem:[#allocation2 + $0x7b0] sm:$0xff] %vm19621_vm11, %v2048_v21  ;;  %vm19628_vm7 = vmmov %vm19622_vm2 }
 0x415   : > { %2224 = vst.msk [vmem:[#allocation2 + $0x848] sm:$0xff] %vm19622_vm2, %v2186_v61  ;;  %v12454_v45 = vpack.c.bf16 %v4765_v5, %v4764_v1  ;;  %vm19629_vm11 = vmmov %vm19622_vm2 }
 0x416   : > { %v2304_v19 = vpop.permute.xlu0 %2303  ;;  %v2442_v23 = vpop.permute.xlu1 %2441 }
 0x417   : > { %12455 = vmatpush1.bf16.msra.mxu1 %v12454_v45  ;;  %v2324_v39 = vsel %vm19623_vm8, %v15798_v43, %v2304_v19  ;;  %v2462_v13 = vsel %vm19624_vm5, %v15804_v2, %v2442_v23  ;;  %v4766_v33 = vld [vmem:[#allocation2 + $0x680] sm:$0xff]  ;;  %vm5657_vm8 = vcmask 982016   ;;  %vm19632_vm5 = vcmask 506880  }
 0x418   : > { %12456 = vmatprep.subr.bf16.mxu1 %v19437_v36  ;;  %v4767_v26 = vld [vmem:[#allocation2 + $0x718] sm:$0xff]  ;;  %2362 = vst.msk [vmem:[#allocation2 + $0x8e0] sm:$0xff] %vm19625_vm13, %v2324_v39  ;;  %vm19633_vm13 = vcmask 490496  }
 0x419   : > { %2500 = vst.msk [vmem:[#allocation2 + $0x978] sm:$0xff] %vm19626_vm9, %v2462_v13  ;;  %v12457_v4 = vpack.c.bf16 %v4767_v26, %v4766_v33  ;;  %vm19634_vm9 = vmmov %vm19632_vm5 }
 0x41a   : > { %v2580_v60 = vpop.permute.xlu0 %2579  ;;  %v2718_v14 = vpop.permute.xlu1 %2717 }
 0x41b   : > { %12458 = vmatpush1.bf16.msra.mxu1 %v12457_v4  ;;  %v2600_v24 = vsel %vm19627_vm6, %v15813_v53, %v2580_v60  ;;  %v2738_v43 = vsel %vm2719_vm14, %v15819_v44, %v2718_v14  ;;  %v4768_v2 = vld [vmem:[#allocation2 + $0x7b0] sm:$0xff]  ;;  %v4372_v31 = vpop.f32.mrb[4].mxu1  ;;  %vm19630_vm14 = vmmov %vm19622_vm2 }
 0x41c   : > { %12459 = vmatprep.subr.bf16.mxu1 %v19437_v36  ;;  %v4769_v46 = vld [vmem:[#allocation2 + $0x848] sm:$0xff]  ;;  %2638 = vst.msk [vmem:[#allocation2 + $0xa10] sm:$0xff] %vm19628_vm7, %v2600_v24  ;;  %v4374_v57 = vpop.f32.mrb[5].mxu1  ;;  %vm19635_vm6 = vmmov %vm19633_vm13  ;;  %vm6149_vm7 = vcmask 474112  }
 0x41d   : > { %2776 = vst.msk [vmem:[#allocation2 + $0xaa8] sm:$0xff] %vm19629_vm11, %v2738_v43  ;;  %v12460_v8 = vpack.c.bf16 %v4769_v46, %v4768_v2  ;;  %vm6273_vm11 = vcmask 457728  }
 0x41e   : > { %v2856_v41 = vpop.permute.xlu0 %2855  ;;  %v2994_v48 = vpop.permute.xlu1 %2993 }
 0x41f   : > { %12461 = vmatpush1.bf16.msra.mxu1 %v12460_v8  ;;  %v2876_v53 = vsel %vm2857_vm15, %v15830_v35, %v2856_v41  ;;  %v3014_v44 = vsel %vm2995_vm12, %v15836_v55, %v2994_v48  ;;  %v4770_v59 = vld [vmem:[#allocation2 + $0x8e0] sm:$0xff]  ;;  %vm19631_vm12 = vmmov %vm19622_vm2  ;;  %vm5538_vm15 = vcmask 998400  }
 0x420   : > { %12462 = vmatprep.subr.bf16.mxu1 %v19437_v36  ;;  %v4771_v11 = vld [vmem:[#allocation2 + $0x978] sm:$0xff]  ;;  %2914 = vst.msk [vmem:[#allocation2 + $0xb40] sm:$0xff] %vm19630_vm14, %v2876_v53  ;;  %vm19636_vm14 = vcmask 588800  }
 0x421   : > { %3052 = vst.msk [vmem:[#allocation2 + $0xbd8] sm:$0xff] %vm19622_vm2, %v3014_v44  ;;  %v12463_v58 = vpack.c.bf16 %v4771_v11, %v4770_v59  ;;  %vm19637_vm2 = vmmov %vm19636_vm14 }
 0x423   : > { %12464 = vmatpush1.bf16.msra.mxu1 %v12463_v58  ;;  %v4772_v62 = vld [vmem:[#allocation2 + $0xa10] sm:$0xff] }
 0x424   : > { %12465 = vmatprep.subr.bf16.mxu1 %v19437_v36  ;;  %v4773_v37 = vld [vmem:[#allocation2 + $0xaa8] sm:$0xff] }
 0x425   : > { %v12466_v47 = vpack.c.bf16 %v4773_v37, %v4772_v62 }
 0x427   : > { %12467 = vmatpush1.bf16.msra.mxu1 %v12466_v47  ;;  %v4774_v35 = vld [vmem:[#allocation2 + $0xb40] sm:$0xff] }
 0x428   : > { %12468 = vmatprep.subr.bf16.mxu1 %v19437_v36  ;;  %v4775_v55 = vld [vmem:[#allocation2 + $0xbd8] sm:$0xff] }
 0x429   : > { %v12469_v25 = vpack.c.bf16 %v4775_v55, %v4774_v35 }
 0x42b   : > { %12470 = vmatpush1.bf16.msra.mxu1 %v12469_v25 }
 0x42c   : > { %12471 = vmatprep.subr.bf16.mxu1 %v19437_v36 }
 0x42f   : > { %12473 = vmatpush1.bf16.msra.mxu1 %v12472_v20  ;;  %v15920_v34 = vpop.permute.xlu0 %3674 }
 0x430   : > { %12474 = vmatprep.subr.bf16.mxu1 %v19437_v36  ;;  %v15925_v38 = vadd.f32 %v15760_v29, %v15920_v34  ;;  %v15928_v22 = vadd.f32 %v4374_v57, %v15920_v34  ;;  %v3873_v49 = vadd.f32 %v15717_v28, %v15920_v34  ;;  %v3750_v18 = vadd.f32 %v15639_v54, %v15920_v34 }
 0x431   : > { %v3998_v32 = vadd.f32 %v15735_v17, %v15920_v34  ;;  %v3875_v51 = vadd.f32 %v15733_v42, %v15920_v34  ;;  %v4123_v50 = vadd.f32 %v15743_v12, %v15920_v34  ;;  %v15942_v29 = vadd.f32 %v15631_v0, %v15920_v34  ;;  %v4780_v17 = vld [vmem:[#allocation2 + $0xed0] sm:$0xff] }
 0x432   : > { %v4253_v3 = vmax.f32 %v15925_v38, 0.0  ;;  %v4378_v28 = vmax.f32 %v15928_v22, 0.0  ;;  %v3877_v27 = vmax.f32 %v3873_v49, 0.0  ;;  %v3753_v54 = vmax.f32 %v3750_v18, 0.0 }
 0x433   : > { %12476 = vmatpush1.bf16.msra.mxu1 %v12475_v10  ;;  %v15947_v52 = vmax.f32 %v3998_v32, 0.0  ;;  %v3878_v42 = vmax.f32 %v3875_v51, 0.0  ;;  %v15949_v21 = vmax.f32 %v4123_v50, 0.0  ;;  %v3752_v12 = vmax.f32 %v15942_v29, 0.0 }
 0x434   : > { %4829 = vmatprep.subr.mxu1 %v19427_v15  ;;  %4896 = vrot.lane.b32.xlu0 %v3877_v27, %s19484_s12  ;;  %v15956_v0 = vadd.f32 %v15750_v63, %v15920_v34  ;;  %v15960_v61 = vadd.f32 %v15745_v7, %v15920_v34  ;;  %v4248_v1 = vadd.f32 %v15752_v9, %v15920_v34 }
 0x435   : > { %4861 = vrot.lane.b32.xlu1 %v3753_v54, %s19484_s12  ;;  %v4373_v5 = vadd.f32 %v4372_v31, %v15920_v34 }
 0x436   : > { %v4128_v45 = vmax.f32 %v15956_v0, 0.0  ;;  %v4003_v19 = vmax.f32 %v15960_v61, 0.0  ;;  %v15967_v23 = vmax.f32 %v4248_v1, 0.0 }
 0x437   : > { %4830 = vmatpush1.msra.mxu1 %v4780_v17  ;;  %v15970_v63 = vmax.f32 %v4373_v5, 0.0 }
 0x438   : > { %4846 = vmatmul.mubr.f32.vlgmr.msra.gmra.mrb[8].mxu1 %v15850_v40  ;;  %4900 = vrot.lane.b32.xlu0 %v15947_v52, %s19484_s12 }
 0x439   : > { %4863 = vrot.lane.b32.xlu1 %v3877_v27, %s19484_s12 }
 0x43a   : > { %v4497_v7 = vpop.f32.mrb[6].mxu0 }
 0x43b   : > { %v4498_v9 = vadd.f32 %v4497_v7, %v15920_v34  ;;  %v4499_v39 = vpop.f32.mrb[7].mxu0 }
 0x43c   : > { %v15977_v13 = vadd.f32 %v4499_v39, %v15920_v34  ;;  %4933 = vrot.lane.b32.xlu0 %v15947_v52, %s19484_s12 }
 0x43d   : > { %4898 = vrot.lane.b32.xlu1 %v3878_v42, %s19484_s12  ;;  %v15982_v40 = vmax.f32 %v4498_v9, 0.0 }
 0x43e   : > { %v4503_v33 = vmax.f32 %v15977_v13, 0.0 }
 0x43f   : > { %4504 = vst [vmem:[#allocation3 + $0x60] sm:$0xff] %v15982_v40 }
 0x440   : > { %4505 = vst [vmem:[#allocation3 + $0x68] sm:$0xff] %v4503_v33  ;;  %4937 = vrot.lane.b32.xlu0 %v15949_v21, %s19484_s12 }
 0x441   : > { %4859 = vrot.lane.b32.xlu1 %v3752_v12, %s19484_s12 }
 0x444   : > { %4972 = vrot.lane.b32.xlu0 %v4128_v45, %s19484_s12 }
 0x445   : > { %4935 = vrot.lane.b32.xlu1 %v4003_v19, %s19484_s12 }
 0x449   : > { %4970 = vrot.lane.b32.xlu1 %v15949_v21, %s19484_s12 }
 0x44d   : > { %4974 = vrot.lane.b32.xlu1 %v15967_v23, %s19484_s12 }
 0x4a6   : > { %v4897_v4 = vpop.permute.xlu0 %4896 }
 0x4a7   : > { %v4862_v26 = vpop.permute.xlu1 %4861 }
 0x4aa   : > { %v4901_v2 = vpop.permute.xlu0 %4900 }
 0x4ab   : > { %v4864_v60 = vpop.permute.xlu1 %4863  ;;  %v4909_v44 = vmax.f32 %v15947_v52, %v4901_v2 }
 0x4ac   : > { %v4866_v14 = vsel %vm527_vm0, %v4862_v26, %v4864_v60  ;;  %v4872_v24 = vmax.f32 %v3877_v27, %v4864_v60 }
 0x4ad   : > { %v16000_v43 = vmax.f32 %v3753_v54, %v4866_v14 }
 0x4ae   : > { %4880 = vrot.lane.b32.xlu1 %v4872_v24, %s19469_s16  ;;  %v4934_v11 = vpop.permute.xlu0 %4933 }
 0x4af   : > { %4878 = vrot.lane.b32.xlu0 %v16000_v43, %s19469_s16  ;;  %v4899_v46 = vpop.permute.xlu1 %4898 }
 0x4b0   : > { %v4902_v31 = vsel %vm527_vm0, %v4897_v4, %v4899_v46  ;;  %v4903_v8 = vsel %vm527_vm0, %v4899_v46, %v4901_v2 }
 0x4b1   : > { %v16007_v57 = vmax.f32 %v3877_v27, %v4902_v31  ;;  %v16009_v41 = vmax.f32 %v3878_v42, %v4903_v8 }
 0x4b2   : > { %v4938_v62 = vpop.permute.xlu0 %4937 }
 0x4b3   : > { %4913 = vrot.lane.b32.xlu0 %v16007_v57, %s19469_s16  ;;  %4915 = vrot.lane.b32.xlu1 %v16009_v41, %s19469_s16  ;;  %v4860_v48 = vpop.permute.xlu1 %4859  ;;  %v4946_v16 = vmax.f32 %v15949_v21, %v4938_v62 }
 0x4b4   : > { %v4865_v53 = vsel %vm527_vm0, %v4860_v48, %v4862_v26 }
 0x4b5   : > { %v16017_v59 = vmax.f32 %v3752_v12, %v4865_v53 }
 0x4b6   : > { %v4973_v55 = vpop.permute.xlu0 %4972 }
 0x4b7   : > { %4917 = vrot.lane.b32.xlu1 %v4909_v44, %s19469_s16  ;;  %4876 = vrot.lane.b32.xlu0 %v16017_v59, %s19469_s16  ;;  %v4936_v58 = vpop.permute.xlu1 %4935 }
 0x4b8   : > { %v4939_v47 = vsel %vm527_vm0, %v4934_v11, %v4936_v58  ;;  %v4940_v35 = vsel %vm527_vm0, %v4936_v58, %v4938_v62 }
 0x4b9   : > { %v16039_v25 = vmax.f32 %v15947_v52, %v4939_v47  ;;  %v16041_v6 = vmax.f32 %v4003_v19, %v4940_v35 }
 0x4bb   : > { %5009 = vrot.lane.b32.xlu1 %v4253_v3, %s19484_s12  ;;  %5007 = vrot.lane.b32.xlu0 %v15967_v23, %s19484_s12  ;;  %v4971_v37 = vpop.permute.xlu1 %4970 }
 0x4bc   : > { %v4976_v56 = vsel %vm527_vm0, %v4971_v37, %v4973_v55 }
 0x4bd   : > { %v16050_v30 = vmax.f32 %v15949_v21, %v4976_v56 }
 0x4bf   : > { %5044 = vrot.lane.b32.xlu1 %v15970_v63, %s19484_s12  ;;  %5011 = vrot.lane.b32.xlu0 %v15970_v63, %s19484_s12  ;;  %v4975_v20 = vpop.permute.xlu1 %4974 }
 0x4c0   : > { %v4977_v10 = vsel %vm527_vm0, %v4973_v55, %v4975_v20 }
 0x4c1   : > { %v16058_v49 = vmax.f32 %v4128_v45, %v4977_v10 }
 0x4c3   : > { %5048 = vrot.lane.b32.xlu1 %v15982_v40, %s19484_s12  ;;  %5046 = vrot.lane.b32.xlu0 %v4378_v28, %s19484_s12 }
 0x4c7   : > { %4952 = vrot.lane.b32.xlu1 %v16041_v6, %s19469_s16  ;;  %4950 = vrot.lane.b32.xlu0 %v16039_v25, %s19469_s16 }
 0x4cb   : > { %4954 = vrot.lane.b32.xlu0 %v4946_v16, %s19469_s16  ;;  %4987 = vrot.lane.b32.xlu1 %v16050_v30, %s19469_s16 }
 0x4cd   : > { %v4622_v18 = vpop.f32.mrb[6].mxu1 }
 0x4ce   : > { %v4623_v32 = vadd.f32 %v4622_v18, %v15920_v34  ;;  %v4624_v51 = vpop.f32.mrb[7].mxu1 }
 0x4cf   : > { %4989 = vrot.lane.b32.xlu0 %v16058_v49, %s19469_s16  ;;  %v16064_v50 = vadd.f32 %v4624_v51, %v15920_v34 }
 0x4d0   : > { %v16066_v29 = vmax.f32 %v4623_v32, 0.0 }
 0x4d1   : > { %v4628_v27 = vmax.f32 %v16064_v50, 0.0 }
 0x4d2   : > { %4629 = vst [vmem:[#allocation3 + $0x70] sm:$0xff] %v16066_v29 }
 0x4d3   : > { %4630 = vst [vmem:[#allocation3 + $0x78] sm:$0xff] %v4628_v27 }
 0x4db   : > { %v4747_v54 = vpop.f32.mrb[8].mxu0 }
 0x4dc   : > { %v4748_v17 = vadd.f32 %v4747_v54, %v15920_v34  ;;  %v4749_v52 = vpop.f32.mrb[9].mxu0 }
 0x4dd   : > { %v16074_v42 = vadd.f32 %v4749_v52, %v15920_v34 }
 0x4de   : > { %v16076_v21 = vmax.f32 %v4748_v17, 0.0 }
 0x4df   : > { %v4753_v12 = vmax.f32 %v16074_v42, 0.0 }
 0x4e0   : > { %4754 = vst [vmem:[#allocation3 + $0x80] sm:$0xff] %v16076_v21 }
 0x4e1   : > { %4755 = vst [vmem:[#allocation3 + $0x88] sm:$0xff] %v4753_v12 }
 0x50b   : > { %v4847_v0 = vpop.f32.mrb[8].mxu1 }
 0x50c   : > { %v4848_v61 = vadd.f32 %v4847_v0, %v15920_v34  ;;  %v4849_v1 = vpop.f32.mrb[9].mxu1  ;;  %v4983_v34 = vmax.f32 %v15967_v23, %v4975_v20 }
 0x50e   : > { %v4851_v5 = vmax.f32 %v4848_v61, 0.0 }
 0x510   : > { %4852 = vst.msk [vmem:[#allocation3 + $0x90] sm:$0xff] %vm19631_vm12, %v4851_v5  ;;  %vm19638_vm12 = vmmov %vm19632_vm5 }
 0x520   : > { %v4881_v45 = vpop.permute.xlu1 %4880 }
 0x521   : > { %v4879_v19 = vpop.permute.xlu0 %4878 }
 0x522   : > { %v4883_v7 = vsel %vm1063_vm4, %v4879_v19, %v4881_v45 }
 0x523   : > { %v16086_v9 = vmax.f32 %v16000_v43, %v4883_v7 }
 0x525   : > { %v4914_v39 = vpop.permute.xlu0 %4913  ;;  %v4916_v26 = vpop.permute.xlu1 %4915  ;;  %5270 = vrot.lane.b32.xlu1 %v16086_v9, %s19485_s11 }
 0x526   : > { %v4919_v4 = vsel %vm1063_vm4, %v4914_v39, %v4916_v26 }
 0x527   : > { %v16093_v60 = vmax.f32 %v16007_v57, %v4919_v4 }
 0x529   : > { %5218 = vst [vmem:[#allocation2 + $0x10] sm:$0xff] %v16093_v60  ;;  %7463 = vst [vmem:[#allocation2 + $0xbe0] sm:$0xff] %v16093_v60  ;;  %v4877_v14 = vpop.permute.xlu0 %4876  ;;  %v4918_v24 = vpop.permute.xlu1 %4917  ;;  %4991 = vrot.lane.b32.xlu1 %v4983_v34, %s19469_s16  ;;  %5272 = vrot.lane.b32.xlu0 %v16093_v60, %s19485_s11 }
 0x52a   : > { %v4882_v43 = vsel %vm1063_vm4, %v4877_v14, %v4879_v19  ;;  %v4920_v2 = vsel %vm1063_vm4, %v4916_v26, %v4918_v24 }
 0x52b   : > { %v16103_v46 = vmax.f32 %v16017_v59, %v4882_v43  ;;  %v16106_v31 = vmax.f32 %v16009_v41, %v4920_v2 }
 0x52d   : > { %6344 = vst [vmem:[#allocation2 + $0x600] sm:$0xff] %v16106_v31  ;;  %5219 = vst [vmem:[#allocation2 + $0x18] sm:$0xff] %v16106_v31  ;;  %v16111_v8 = vpop.permute.xlu0 %5007  ;;  %v16113_v57 = vpop.permute.xlu1 %5009  ;;  %5388 = vrot.lane.b32.xlu1 %v16086_v9, %s19487_s9  ;;  %5268 = vrot.lane.b32.xlu0 %v16103_v46, %s19485_s11 }
 0x52e   : > { %7464 = vst [vmem:[#allocation2 + $0xbe8] sm:$0xff] %v16106_v31  ;;  %v5013_v13 = vsel %vm527_vm0, %v16111_v8, %v16113_v57 }
 0x531   : > { %v16119_v48 = vpop.permute.xlu0 %5011  ;;  %v16121_v41 = vpop.permute.xlu1 %5044  ;;  %5506 = vrot.lane.b32.xlu1 %v16086_v9, %s13454_s27  ;;  %5390 = vrot.lane.b32.xlu0 %v16093_v60, %s19487_s9 }
 0x532   : > { %v5014_v20 = vsel %vm527_vm0, %v16113_v57, %v16119_v48 }
 0x533   : > { %v16231_v16 = vmax.f32 %v4253_v3, %v5014_v20  ;;  %v5020_v3 = vmax.f32 %v15970_v63, %v16119_v48 }
 0x535   : > { %v16127_v53 = vpop.permute.xlu0 %5046  ;;  %v16129_v44 = vpop.permute.xlu1 %5048  ;;  %5386 = vrot.lane.b32.xlu1 %v16103_v46, %s19487_s9  ;;  %5508 = vrot.lane.b32.xlu0 %v16093_v60, %s13454_s27 }
 0x536   : > { %v5050_v38 = vsel %vm527_vm0, %v16121_v41, %v16127_v53 }
 0x539   : > { %v4951_v59 = vpop.permute.xlu0 %4950  ;;  %v4953_v11 = vpop.permute.xlu1 %4952  ;;  %5625 = vrot.lane.b32.xlu1 %v16086_v9, %s13455_s14  ;;  %5504 = vrot.lane.b32.xlu0 %v16103_v46, %s13454_s27 }
 0x53a   : > { %v4956_v58 = vsel %vm1063_vm4, %v4951_v59, %v4953_v11 }
 0x53b   : > { %v16141_v62 = vmax.f32 %v16039_v25, %v4956_v58 }
 0x53d   : > { %4962 = vst [vmem:[#allocation4 + $0x20] sm:$0xff] %v16141_v62  ;;  %5220 = vst [vmem:[#allocation2 + $0x20] sm:$0xff] %v16141_v62  ;;  %v4955_v37 = vpop.permute.xlu0 %4954  ;;  %5746 = vrot.lane.b32.xlu1 %v16086_v9, %s19474_s28  ;;  %5627 = vrot.lane.b32.xlu0 %v16093_v60, %s13455_s14  ;;  %v4988_v55 = vpop.permute.xlu1 %4987 }
 0x53e   : > { %7465 = vst [vmem:[#allocation2 + $0xbf0] sm:$0xff] %v16141_v62  ;;  %6345 = vst [vmem:[#allocation2 + $0x608] sm:$0xff] %v16141_v62  ;;  %v4957_v47 = vsel %vm1063_vm4, %v4953_v11, %v4955_v37 }
 0x53f   : > { %v16153_v35 = vmax.f32 %v16041_v6, %v4957_v47 }
 0x541   : > { %4963 = vst [vmem:[#allocation4 + $0x28] sm:$0xff] %v16153_v35  ;;  %6346 = vst [vmem:[#allocation2 + $0x610] sm:$0xff] %v16153_v35  ;;  %v16159_v25 = vpop.permute.xlu0 %4989  ;;  %5623 = vrot.lane.b32.xlu1 %v16103_v46, %s13455_s14  ;;  %5748 = vrot.lane.b32.xlu0 %v16093_v60, %s19474_s28 }
 0x542   : > { %5221 = vst [vmem:[#allocation2 + $0x28] sm:$0xff] %v16153_v35  ;;  %7466 = vst [vmem:[#allocation2 + $0xbf8] sm:$0xff] %v16153_v35  ;;  %v4993_v6 = vsel %vm1063_vm4, %v4988_v55, %v16159_v25 }
 0x543   : > { %v16168_v56 = vmax.f32 %v16050_v30, %v4993_v6  ;;  %v5051_v30 = vsel %vm527_vm0, %v16127_v53, %v16129_v44 }
 0x544   : > { %v16277_v10 = vmax.f32 %v4378_v28, %v5051_v30 }
 0x545   : > { %4999 = vst [vmem:[#allocation4 + $0x30] sm:$0xff] %v16168_v56  ;;  %5222 = vst [vmem:[#allocation2 + $0x30] sm:$0xff] %v16168_v56  ;;  %5081 = vrot.lane.b32.xlu1 %v15982_v40, %s19484_s12  ;;  %5744 = vrot.lane.b32.xlu0 %v16103_v46, %s19474_s28 }
 0x546   : > { %7467 = vst [vmem:[#allocation2 + $0xc00] sm:$0xff] %v16168_v56  ;;  %6347 = vst [vmem:[#allocation2 + $0x618] sm:$0xff] %v16168_v56 }
 0x549   : > { %5085 = vrot.lane.b32.xlu1 %v16066_v29, %s19484_s12  ;;  %5083 = vrot.lane.b32.xlu0 %v4503_v33, %s19484_s12  ;;  %v16220_v33 = vmax.f32 %v15967_v23, %v5013_v13  ;;  %v16267_v23 = vmax.f32 %v15970_v63, %v5050_v38 }
 0x54d   : > { %5871 = vrot.lane.b32.xlu1 %v16093_v60, %s19476_s18  ;;  %5869 = vrot.lane.b32.xlu0 %v16086_v9, %s19476_s18 }
 0x551   : > { %5994 = vrot.lane.b32.xlu1 %v16093_v60, %s19478_s30  ;;  %5992 = vrot.lane.b32.xlu0 %v16086_v9, %s19478_s30 }
 0x555   : > { %5990 = vrot.lane.b32.xlu1 %v16103_v46, %s19478_s30  ;;  %5867 = vrot.lane.b32.xlu0 %v16103_v46, %s19476_s18 }
 0x559   : > { %6117 = vrot.lane.b32.xlu1 %v16093_v60, %s13456_s19  ;;  %6115 = vrot.lane.b32.xlu0 %v16086_v9, %s13456_s19 }
 0x55d   : > { %6241 = vrot.lane.b32.xlu1 %v16093_v60, %s13457_s20  ;;  %6239 = vrot.lane.b32.xlu0 %v16086_v9, %s13457_s20 }
 0x561   : > { %6237 = vrot.lane.b32.xlu1 %v16103_v46, %s13457_s20  ;;  %6113 = vrot.lane.b32.xlu0 %v16103_v46, %s13456_s19 }
 0x565   : > { %5120 = vrot.lane.b32.xlu1 %v4628_v27, %s19484_s12  ;;  %5118 = vrot.lane.b32.xlu0 %v16066_v29, %s19484_s12 }
 0x569   : > { %6395 = vrot.lane.b32.xlu1 %v16093_v60, %s19485_s11  ;;  %5122 = vrot.lane.b32.xlu0 %v16076_v21, %s19484_s12 }
 0x56d   : > { %6397 = vrot.lane.b32.xlu0 %v16106_v31, %s19485_s11  ;;  %5024 = vrot.lane.b32.xlu1 %v16220_v33, %s19469_s16 }
 0x571   : > { %5026 = vrot.lane.b32.xlu0 %v16231_v16, %s19469_s16  ;;  %6393 = vrot.lane.b32.xlu1 %v16086_v9, %s19485_s11 }
 0x575   : > { %6513 = vrot.lane.b32.xlu0 %v16093_v60, %s19487_s9  ;;  %6515 = vrot.lane.b32.xlu1 %v16106_v31, %s19487_s9 }
 0x579   : > { %6631 = vrot.lane.b32.xlu0 %v16093_v60, %s13454_s27  ;;  %6633 = vrot.lane.b32.xlu1 %v16106_v31, %s13454_s27 }
 0x57d   : > { %6511 = vrot.lane.b32.xlu0 %v16086_v9, %s19487_s9  ;;  %6629 = vrot.lane.b32.xlu1 %v16086_v9, %s13454_s27 }
 0x581   : > { %6749 = vrot.lane.b32.xlu0 %v16093_v60, %s13455_s14  ;;  %6751 = vrot.lane.b32.xlu1 %v16106_v31, %s13455_s14 }
 0x585   : > { %6869 = vrot.lane.b32.xlu0 %v16093_v60, %s19474_s28  ;;  %6871 = vrot.lane.b32.xlu1 %v16106_v31, %s19474_s28 }
 0x589   : > { %6747 = vrot.lane.b32.xlu0 %v16086_v9, %s13455_s14  ;;  %6867 = vrot.lane.b32.xlu1 %v16086_v9, %s19474_s28 }
 0x58d   : > { %5028 = vrot.lane.b32.xlu0 %v5020_v3, %s19469_s16  ;;  %5061 = vrot.lane.b32.xlu1 %v16267_v23, %s19469_s16 }
 0x591   : > { %6992 = vrot.lane.b32.xlu1 %v16093_v60, %s19476_s18  ;;  %5063 = vrot.lane.b32.xlu0 %v16277_v10, %s19469_s16 }
 0x595   : > { %7115 = vrot.lane.b32.xlu1 %v16093_v60, %s19478_s30  ;;  %6994 = vrot.lane.b32.xlu0 %v16106_v31, %s19476_s18 }
 0x597   : > { %v5271_v63 = vpop.permute.xlu1 %5270 }
 0x599   : > { %6990 = vrot.lane.b32.xlu1 %v16086_v9, %s19476_s18  ;;  %7117 = vrot.lane.b32.xlu0 %v16106_v31, %s19478_s30 }
 0x59b   : > { %v16291_v22 = vpop.permute.xlu0 %5272  ;;  %v4992_v28 = vpop.permute.xlu1 %4991 }
 0x59c   : > { %v5303_v18 = vsel %vm660_vm1, %v5271_v63, %v16291_v22  ;;  %v4994_v32 = vsel %vm1063_vm4, %v16159_v25, %v4992_v28 }
 0x59d   : > { %v16298_v51 = vmax.f32 %v16058_v49, %v4994_v32  ;;  %7238 = vrot.lane.b32.xlu1 %v16093_v60, %s13456_s19  ;;  %7113 = vrot.lane.b32.xlu0 %v16086_v9, %s19478_s30  ;;  %v12477_v50 = vpack.c.bf16 %v5303_v18, %v16086_v9 }
 0x59f   : > { %5000 = vst [vmem:[#allocation4 + $0x38] sm:$0xff] %v16298_v51  ;;  %6348 = vst [vmem:[#allocation2 + $0x620] sm:$0xff] %v16298_v51  ;;  %v5269_v29 = vpop.permute.xlu0 %5268  ;;  %v5389_v27 = vpop.permute.xlu1 %5388  ;;  %12478 = vmatprep.subr.bf16.mxu0 %v12477_v50 }
 0x5a0   : > { %5223 = vst [vmem:[#allocation2 + $0x38] sm:$0xff] %v16298_v51  ;;  %7468 = vst [vmem:[#allocation2 + $0xc08] sm:$0xff] %v16298_v51  ;;  %v5302_v49 = vsel %vm660_vm1, %v5269_v29, %v5271_v63 }
 0x5a1   : > { %7361 = vrot.lane.b32.xlu1 %v16093_v60, %s13457_s20  ;;  %7240 = vrot.lane.b32.xlu0 %v16106_v31, %s13456_s19  ;;  %v12479_v54 = vpack.c.bf16 %v5302_v49, %v16103_v46 }
 0x5a3   : > { %v16315_v17 = vpop.permute.xlu0 %5390  ;;  %v5507_v52 = vpop.permute.xlu1 %5506  ;;  %12480 = vmatpush1.bf16.msra.mxu0 %v12479_v54 }
 0x5a4   : > { %v5421_v0 = vsel %vm926_vm3, %v5389_v27, %v16315_v17 }
 0x5a5   : > { %7236 = vrot.lane.b32.xlu1 %v16086_v9, %s13456_s19  ;;  %7363 = vrot.lane.b32.xlu0 %v16106_v31, %s13457_s20 }
 0x5a7   : > { %v16323_v61 = vpop.permute.xlu0 %5508  ;;  %v5387_v1 = vpop.permute.xlu1 %5386 }
 0x5a8   : > { %v5540_v5 = vsel %vm5538_vm15, %v5507_v52, %v16323_v61  ;;  %v5420_v45 = vsel %vm926_vm3, %v5387_v1, %v5389_v27 }
 0x5a9   : > { %7516 = vrot.lane.b32.xlu1 %v16106_v31, %s19485_s11  ;;  %7359 = vrot.lane.b32.xlu0 %v16086_v9, %s13457_s20  ;;  %v12481_v19 = vpack.c.bf16 %v5540_v5, %v5421_v0 }
 0x5ab   : > { %v5505_v7 = vpop.permute.xlu0 %5504  ;;  %v5626_v39 = vpop.permute.xlu1 %5625  ;;  %12482 = vmatprep.subr.bf16.mxu0 %v12481_v19 }
 0x5ac   : > { %v5539_v26 = vsel %vm5538_vm15, %v5505_v7, %v5507_v52  ;;  %v16410_v52 = vld [vmem:[%s19358_s3 + $0x8] sm:$0xff]  ;;  %v5057_v7 = vmax.f32 %v15982_v40, %v16129_v44 }
 0x5ad   : > { %7514 = vrot.lane.b32.xlu1 %v16093_v60, %s19485_s11  ;;  %7518 = vrot.lane.b32.xlu0 %v16141_v62, %s19485_s11  ;;  %v12483_v4 = vpack.c.bf16 %v5539_v26, %v5420_v45 }
 0x5ae   : > { %11417 = vmatprep.mubr.msk.f32.mxu0 %vm19636_vm14, %v16410_v52  ;;  %11419 = vmatprep.mubr.msk.f32.mxu1 %vm19637_vm2, %v16410_v52 }
 0x5af   : > { %v16337_v34 = vpop.permute.xlu0 %5627  ;;  %v5747_v14 = vpop.permute.xlu1 %5746  ;;  %12484 = vmatpush1.bf16.msra.mxu0 %v12483_v4 }
 0x5b0   : > { %v5659_v24 = vsel %vm5657_vm8, %v5626_v39, %v16337_v34 }
 0x5b1   : > { %5274 = vrot.lane.b32.xlu0 %v16106_v31, %s19485_s11  ;;  %5276 = vrot.lane.b32.xlu1 %v16141_v62, %s19485_s11 }
 0x5b3   : > { %v16345_v43 = vpop.permute.xlu0 %5748  ;;  %v5624_v2 = vpop.permute.xlu1 %5623 }
 0x5b4   : > { %v5781_v46 = vsel %vm1753_vm10, %v5747_v14, %v16345_v43  ;;  %v5658_v8 = vsel %vm5657_vm8, %v5624_v2, %v5626_v39 }
 0x5b5   : > { %7634 = vrot.lane.b32.xlu0 %v16106_v31, %s19487_s9  ;;  %7636 = vrot.lane.b32.xlu1 %v16141_v62, %s19487_s9  ;;  %v12485_v57 = vpack.c.bf16 %v5781_v46, %v5659_v24 }
 0x5b7   : > { %v5745_v48 = vpop.permute.xlu0 %5744  ;;  %v16354_v41 = vpop.permute.xlu1 %5081  ;;  %12486 = vmatprep.subr.bf16.mxu0 %v12485_v57 }
 0x5b8   : > { %v5780_v53 = vsel %vm1753_vm10, %v5745_v48, %v5747_v14 }
 0x5b9   : > { %7752 = vrot.lane.b32.xlu0 %v16106_v31, %s13454_s27  ;;  %7754 = vrot.lane.b32.xlu1 %v16141_v62, %s13454_s27  ;;  %v12487_v59 = vpack.c.bf16 %v5780_v53, %v5658_v8 }
 0x5bb   : > { %v16361_v11 = vpop.permute.xlu0 %5083  ;;  %v16363_v58 = vpop.permute.xlu1 %5085  ;;  %12488 = vmatpush1.bf16.msra.mxu0 %v12487_v59 }
 0x5bd   : > { %7632 = vrot.lane.b32.xlu0 %v16093_v60, %s19487_s9  ;;  %7750 = vrot.lane.b32.xlu1 %v16093_v60, %s13454_s27 }
 0x5bf   : > { %v5870_v37 = vpop.permute.xlu0 %5869  ;;  %v16369_v47 = vpop.permute.xlu1 %5871 }
 0x5c0   : > { %v5904_v55 = vsel %vm19632_vm5, %v5870_v37, %v16369_v47  ;;  %vm19639_vm5 = vmmov %vm19635_vm6 }
 0x5c1   : > { %5392 = vrot.lane.b32.xlu0 %v16106_v31, %s19487_s9  ;;  %5394 = vrot.lane.b32.xlu1 %v16141_v62, %s19487_s9  ;;  %vm19644_vm2 = vmmov %vm19639_vm5 }
 0x5c3   : > { %v5993_v25 = vpop.permute.xlu0 %5992  ;;  %v16377_v6 = vpop.permute.xlu1 %5994 }
 0x5c4   : > { %v6027_v13 = vsel %vm19633_vm13, %v5993_v25, %v16377_v6  ;;  %vm19640_vm13 = vmmov %vm19634_vm9 }
 0x5c5   : > { %5510 = vrot.lane.b32.xlu0 %v16106_v31, %s13454_s27  ;;  %5512 = vrot.lane.b32.xlu1 %v16141_v62, %s13454_s27  ;;  %v12489_v20 = vpack.c.bf16 %v6027_v13, %v5904_v55 }
 0x5c7   : > { %v5868_v38 = vpop.permute.xlu0 %5867  ;;  %v5991_v3 = vpop.permute.xlu1 %5990  ;;  %12490 = vmatprep.subr.bf16.mxu0 %v12489_v20 }
 0x5c8   : > { %v5903_v30 = vsel %vm19634_vm9, %v5868_v38, %v5870_v37  ;;  %v6026_v63 = vsel %vm19635_vm6, %v5991_v3, %v5993_v25  ;;  %vm19641_vm9 = vmmov %vm19639_vm5 }
 0x5c9   : > { %5278 = vrot.lane.b32.xlu0 %v16153_v35, %s19485_s11  ;;  %5280 = vrot.lane.b32.xlu1 %v16168_v56, %s19485_s11  ;;  %v12491_v28 = vpack.c.bf16 %v6026_v63, %v5903_v30  ;;  %vm19642_vm6 = vmmov %vm19638_vm12 }
 0x5ca   : > { %vm19643_vm14 = vmmov %vm19642_vm6 }
 0x5cb   : > { %v6116_v18 = vpop.permute.xlu0 %6115  ;;  %v16391_v32 = vpop.permute.xlu1 %6117  ;;  %12492 = vmatpush1.bf16.msra.mxu0 %v12491_v28 }
 0x5cc   : > { %v6151_v50 = vsel %vm6149_vm7, %v6116_v18, %v16391_v32 }
 0x5cd   : > { %5629 = vrot.lane.b32.xlu0 %v16106_v31, %s13455_s14  ;;  %5631 = vrot.lane.b32.xlu1 %v16141_v62, %s13455_s14 }
 0x5cf   : > { %v6240_v29 = vpop.permute.xlu0 %6239  ;;  %v16399_v27 = vpop.permute.xlu1 %6241 }
 0x5d0   : > { %v6275_v49 = vsel %vm6273_vm11, %v6240_v29, %v16399_v27 }
 0x5d1   : > { %5750 = vrot.lane.b32.xlu0 %v16106_v31, %s19474_s28  ;;  %5752 = vrot.lane.b32.xlu1 %v16141_v62, %s19474_s28  ;;  %v12493_v54 = vpack.c.bf16 %v6275_v49, %v6151_v50 }
 0x5d3   : > { %v6114_v0 = vpop.permute.xlu0 %6113  ;;  %v6238_v1 = vpop.permute.xlu1 %6237  ;;  %12494 = vmatprep.subr.bf16.mxu0 %v12493_v54 }
 0x5d4   : > { %v6150_v5 = vsel %vm6149_vm7, %v6114_v0, %v6116_v18  ;;  %v6274_v45 = vsel %vm6273_vm11, %v6238_v1, %v6240_v29 }
 0x5d5   : > { %7870 = vrot.lane.b32.xlu0 %v16106_v31, %s13455_s14  ;;  %7872 = vrot.lane.b32.xlu1 %v16141_v62, %s13455_s14  ;;  %v12495_v19 = vpack.c.bf16 %v6274_v45, %v6150_v5 }
 0x5d7   : > { %v16424_v39 = vpop.permute.xlu0 %5118  ;;  %v16426_v26 = vpop.permute.xlu1 %5120  ;;  %12496 = vmatpush1.bf16.msra.mxu0 %v12495_v19 }
 0x5d9   : > { %5065 = vrot.lane.b32.xlu0 %v5057_v7, %s19469_s16  ;;  %7868 = vrot.lane.b32.xlu1 %v16093_v60, %s13455_s14 }
 0x5db   : > { %v16431_v4 = vpop.permute.xlu0 %5122  ;;  %v6396_v14 = vpop.permute.xlu1 %6395 }
 0x5dd   : > { %5396 = vrot.lane.b32.xlu0 %v16153_v35, %s19487_s9  ;;  %5398 = vrot.lane.b32.xlu1 %v16168_v56, %s19487_s9 }
 0x5df   : > { %v16437_v40 = vpop.permute.xlu0 %6397  ;;  %v5025_v44 = vpop.permute.xlu1 %5024 }
 0x5e0   : > { %v6428_v24 = vsel %vm660_vm1, %v6396_v14, %v16437_v40 }
 0x5e1   : > { %5514 = vrot.lane.b32.xlu0 %v16153_v35, %s13454_s27  ;;  %5516 = vrot.lane.b32.xlu1 %v16168_v56, %s13454_s27  ;;  %v12497_v2 = vpack.c.bf16 %v6428_v24, %v16093_v60  ;;  %v5151_v24 = vld [vmem:[#allocation3 + $0x90] sm:$0xff] }
 0x5e3   : > { %v5027_v46 = vpop.permute.xlu0 %5026  ;;  %v6394_v8 = vpop.permute.xlu1 %6393  ;;  %12498 = vmatprep.subr.bf16.mxu0 %v12497_v2 }
 0x5e4   : > { %v5030_v57 = vsel %vm1063_vm4, %v5025_v44, %v5027_v46  ;;  %v6427_v48 = vsel %vm660_vm1, %v6394_v8, %v6396_v14 }
 0x5e5   : > { %v16449_v53 = vmax.f32 %v16220_v33, %v5030_v57  ;;  %5873 = vrot.lane.b32.xlu0 %v16106_v31, %s19476_s18  ;;  %5875 = vrot.lane.b32.xlu1 %v16141_v62, %s19476_s18  ;;  %v12499_v59 = vpack.c.bf16 %v6427_v48, %v16086_v9 }
 0x5e7   : > { %5036 = vst [vmem:[#allocation4 + $0x40] sm:$0xff] %v16449_v53  ;;  %5224 = vst [vmem:[#allocation2 + $0x40] sm:$0xff] %v16449_v53  ;;  %v6514_v60 = vpop.permute.xlu0 %6513  ;;  %v16460_v37 = vpop.permute.xlu1 %6515  ;;  %12500 = vmatpush1.bf16.msra.mxu0 %v12499_v59 }
 0x5e8   : > { %7469 = vst [vmem:[#allocation2 + $0xc10] sm:$0xff] %v16449_v53  ;;  %6349 = vst [vmem:[#allocation2 + $0x628] sm:$0xff] %v16449_v53  ;;  %v6546_v33 = vsel %vm926_vm3, %v6514_v60, %v16460_v37 }
 0x5e9   : > { %5996 = vrot.lane.b32.xlu0 %v16106_v31, %s19478_s30  ;;  %5998 = vrot.lane.b32.xlu1 %v16141_v62, %s19478_s30 }
 0x5eb   : > { %v6632_v9 = vpop.permute.xlu0 %6631  ;;  %v16468_v55 = vpop.permute.xlu1 %6633 }
 0x5ec   : > { %v6664_v25 = vsel %vm5538_vm15, %v6632_v9, %v16468_v55 }
 0x5ed   : > { %5633 = vrot.lane.b32.xlu0 %v16153_v35, %s13455_s14  ;;  %5635 = vrot.lane.b32.xlu1 %v16168_v56, %s13455_s14  ;;  %v12501_v13 = vpack.c.bf16 %v6664_v25, %v6546_v33 }
 0x5ef   : > { %v6512_v20 = vpop.permute.xlu0 %6511  ;;  %v6630_v38 = vpop.permute.xlu1 %6629  ;;  %12502 = vmatprep.subr.bf16.mxu0 %v12501_v13 }
 0x5f0   : > { %v6545_v3 = vsel %vm926_vm3, %v6512_v20, %v6514_v60  ;;  %v6663_v30 = vsel %vm5538_vm15, %v6630_v38, %v6632_v9 }
 0x5f1   : > { %5754 = vrot.lane.b32.xlu0 %v16153_v35, %s19474_s28  ;;  %5756 = vrot.lane.b32.xlu1 %v16168_v56, %s19474_s28  ;;  %v12503_v63 = vpack.c.bf16 %v6663_v30, %v6545_v3 }
 0x5f3   : > { %v6750_v28 = vpop.permute.xlu0 %6749  ;;  %v16482_v18 = vpop.permute.xlu1 %6751  ;;  %12504 = vmatpush1.bf16.msra.mxu0 %v12503_v63 }
 0x5f4   : > { %v6782_v50 = vsel %vm5657_vm8, %v6750_v28, %v16482_v18 }
 0x5f5   : > { %6119 = vrot.lane.b32.xlu0 %v16106_v31, %s13456_s19  ;;  %6121 = vrot.lane.b32.xlu1 %v16141_v62, %s13456_s19 }
 0x5f7   : > { %v6870_v29 = vpop.permute.xlu0 %6869  ;;  %v16490_v49 = vpop.permute.xlu1 %6871 }
 0x5f8   : > { %v6904_v54 = vsel %vm1753_vm10, %v6870_v29, %v16490_v49 }
 0x5f9   : > { %6243 = vrot.lane.b32.xlu0 %v16106_v31, %s13457_s20  ;;  %6245 = vrot.lane.b32.xlu1 %v16141_v62, %s13457_s20  ;;  %v12505_v0 = vpack.c.bf16 %v6904_v54, %v6782_v50 }
 0x5fb   : > { %v6748_v1 = vpop.permute.xlu0 %6747  ;;  %v6868_v5 = vpop.permute.xlu1 %6867  ;;  %12506 = vmatprep.subr.bf16.mxu0 %v12505_v0 }
 0x5fc   : > { %v6781_v45 = vsel %vm5657_vm8, %v6748_v1, %v6750_v28  ;;  %v6903_v19 = vsel %vm1753_vm10, %v6868_v5, %v6870_v29 }
 0x5fd   : > { %5155 = vrot.lane.b32.xlu0 %v16076_v21, %s19484_s12  ;;  %5157 = vrot.lane.b32.xlu1 %v4753_v12, %s19484_s12  ;;  %v12507_v7 = vpack.c.bf16 %v6903_v19, %v6781_v45 }
 0x5ff   : > { %v5029_v31 = vpop.permute.xlu0 %5028  ;;  %v5062_v14 = vpop.permute.xlu1 %5061  ;;  %12508 = vmatpush1.bf16.msra.mxu0 %v12507_v7 }
 0x600   : > { %v5031_v44 = vsel %vm1063_vm4, %v5027_v46, %v5029_v31 }
 0x601   : > { %v16507_v2 = vmax.f32 %v16231_v16, %v5031_v44  ;;  %5159 = vrot.lane.b32.xlu0 %v5151_v24, %s19484_s12  ;;  %5877 = vrot.lane.b32.xlu1 %v16153_v35, %s19476_s18  ;;  %v7999_v44 = vld [vmem:[#allocation2 + $0xbe8] sm:$0xff]  ;;  %v7998_v24 = vld [vmem:[#allocation2 + $0xbe0] sm:$0xff] }
 0x603   : > { %5037 = vst [vmem:[#allocation4 + $0x48] sm:$0xff] %v16507_v2  ;;  %6350 = vst [vmem:[#allocation2 + $0x630] sm:$0xff] %v16507_v2  ;;  %v16516_v42 = vpop.permute.xlu0 %5063  ;;  %v6993_v21 = vpop.permute.xlu1 %6992 }
 0x604   : > { %5225 = vst [vmem:[#allocation2 + $0x48] sm:$0xff] %v16507_v2  ;;  %7470 = vst [vmem:[#allocation2 + $0xc18] sm:$0xff] %v16507_v2  ;;  %v5067_v12 = vsel %vm1063_vm4, %v5062_v14, %v16516_v42  ;;  %v16580_v14 = vld [vmem:[#allocation4 + $0x20] sm:$0xff] }
 0x605   : > { %v16521_v16 = vmax.f32 %v16267_v23, %v5067_v12  ;;  %5879 = vrot.lane.b32.xlu0 %v16168_v56, %s19476_s18  ;;  %6000 = vrot.lane.b32.xlu1 %v16153_v35, %s19478_s30 }
 0x607   : > { %5073 = vst [vmem:[#allocation4 + $0x50] sm:$0xff] %v16521_v16  ;;  %5226 = vst [vmem:[#allocation2 + $0x50] sm:$0xff] %v16521_v16  ;;  %v16531_v46 = vpop.permute.xlu0 %6994  ;;  %v7116_v8 = vpop.permute.xlu1 %7115 }
 0x608   : > { %7471 = vst [vmem:[#allocation2 + $0xc20] sm:$0xff] %v16521_v16  ;;  %6351 = vst [vmem:[#allocation2 + $0x638] sm:$0xff] %v16521_v16  ;;  %v7027_v23 = vsel %vm19638_vm12, %v6993_v21, %v16531_v46 }
 0x609   : > { %6002 = vrot.lane.b32.xlu0 %v16168_v56, %s19478_s30  ;;  %6399 = vrot.lane.b32.xlu1 %v16141_v62, %s19485_s11  ;;  %vm19645_vm12 = vmmov %vm19644_vm2 }
 0x60b   : > { %v16539_v57 = vpop.permute.xlu0 %7117  ;;  %v6991_v48 = vpop.permute.xlu1 %6990 }
 0x60c   : > { %v7150_v59 = vsel %vm19639_vm5, %v7116_v8, %v16539_v57  ;;  %v7026_v60 = vsel %vm19640_vm13, %v6991_v48, %v6993_v21  ;;  %vm19646_vm5 = vmmov %vm19642_vm6 }
 0x60d   : > { %6401 = vrot.lane.b32.xlu0 %v16153_v35, %s19485_s11  ;;  %6123 = vrot.lane.b32.xlu1 %v16153_v35, %s13456_s19  ;;  %v12509_v33 = vpack.c.bf16 %v7150_v59, %v7027_v23  ;;  %v16592_v59 = vld [vmem:[#allocation4 + $0x28] sm:$0xff]  ;;  %vm19647_vm13 = vmmov %vm19646_vm5 }
 0x60f   : > { %v7114_v9 = vpop.permute.xlu0 %7113  ;;  %v7239_v25 = vpop.permute.xlu1 %7238  ;;  %12510 = vmatprep.subr.bf16.mxu0 %v12509_v33  ;;  %v8109_v33 = vld [vmem:[#allocation2 + $0x10] sm:$0xff] }
 0x610   : > { %v7149_v13 = vsel %vm19641_vm9, %v7114_v9, %v7116_v8  ;;  %v5087_v8 = vsel %vm527_vm0, %v16354_v41, %v16361_v11  ;;  %vm19648_vm9 = vmmov %vm19644_vm2 }
 0x611   : > { %6125 = vrot.lane.b32.xlu0 %v16168_v56, %s13456_s19  ;;  %6247 = vrot.lane.b32.xlu1 %v16153_v35, %s13457_s20  ;;  %v12511_v20 = vpack.c.bf16 %v7149_v13, %v7026_v60  ;;  %v8110_v60 = vld [vmem:[#allocation2 + $0x18] sm:$0xff] }
 0x612   : > { %v13348_v13 = vld [vmem:[#allocation3 + $0x60] sm:$0xff] }
 0x613   : > { %v16553_v38 = vpop.permute.xlu0 %7240  ;;  %v7362_v3 = vpop.permute.xlu1 %7361  ;;  %12512 = vmatpush1.bf16.msra.mxu0 %v12511_v20  ;;  %v16598_v41 = vmax.f32 %v13348_v13, %v5087_v8 }
 0x614   : > { %v7273_v30 = vsel %vm6149_vm7, %v7239_v25, %v16553_v38 }
 0x615   : > { %6249 = vrot.lane.b32.xlu0 %v16168_v56, %s13457_s20  ;;  %6517 = vrot.lane.b32.xlu1 %v16141_v62, %s19487_s9 }
 0x617   : > { %v16561_v63 = vpop.permute.xlu0 %7363  ;;  %v7237_v28 = vpop.permute.xlu1 %7236 }
 0x618   : > { %v7396_v50 = vsel %vm6273_vm11, %v7362_v3, %v16561_v63  ;;  %v7272_v29 = vsel %vm6149_vm7, %v7237_v28, %v7239_v25  ;;  %v13349_v28 = vld [vmem:[#allocation3 + $0x68] sm:$0xff] }
 0x619   : > { %6519 = vrot.lane.b32.xlu0 %v16153_v35, %s19487_s9  ;;  %6635 = vrot.lane.b32.xlu1 %v16141_v62, %s13454_s27  ;;  %v12513_v54 = vpack.c.bf16 %v7396_v50, %v7273_v30 }
 0x61b   : > { %v7360_v0 = vpop.permute.xlu0 %7359  ;;  %v7517_v1 = vpop.permute.xlu1 %7516  ;;  %12514 = vmatprep.subr.bf16.mxu0 %v12513_v54 }
 0x61c   : > { %v7395_v5 = vsel %vm6273_vm11, %v7360_v0, %v7362_v3  ;;  %v5088_v3 = vsel %vm527_vm0, %v16361_v11, %v16363_v58  ;;  %v16617_v11 = vld [vmem:[#allocation4 + $0x30] sm:$0xff] }
 0x61d   : > { %6637 = vrot.lane.b32.xlu0 %v16153_v35, %s13454_s27  ;;  %6403 = vrot.lane.b32.xlu1 %v16168_v56, %s19485_s11  ;;  %v12515_v45 = vpack.c.bf16 %v7395_v5, %v7272_v29  ;;  %v16611_v50 = vmax.f32 %v13349_v28, %v5088_v3 }
 0x61f   : > { %v16575_v19 = vpop.permute.xlu0 %7518  ;;  %v7515_v7 = vpop.permute.xlu1 %7514  ;;  %12516 = vmatpush1.bf16.msra.mxu0 %v12515_v45 }
 0x620   : > { %v7549_v62 = vsel %vm660_vm1, %v7517_v1, %v16575_v19  ;;  %v7548_v31 = vsel %vm660_vm1, %v7515_v7, %v7517_v1 }
 0x621   : > { %6405 = vrot.lane.b32.xlu0 %v16298_v51, %s19485_s11  ;;  %6753 = vrot.lane.b32.xlu1 %v16580_v14, %s13455_s14  ;;  %v12517_v35 = vpack.c.bf16 %v7549_v62, %v7999_v44  ;;  %v12519_v56 = vpack.c.bf16 %v7548_v31, %v7998_v24 }
 0x623   : > { %v5275_v21 = vpop.permute.xlu0 %5274  ;;  %v5277_v12 = vpop.permute.xlu1 %5276  ;;  %12518 = vmatprep.subr.bf16.mxu0 %v12517_v35 }
 0x624   : > { %v5304_v23 = vsel %vm660_vm1, %v16291_v22, %v5275_v21  ;;  %v5305_v48 = vsel %vm660_vm1, %v5275_v21, %v5277_v12  ;;  %12520 = vmatpush1.bf16.msra.mxu0 %v12519_v56 }
 0x625   : > { %6755 = vrot.lane.b32.xlu0 %v16592_v59, %s13455_s14  ;;  %6873 = vrot.lane.b32.xlu1 %v16580_v14, %s19474_s28  ;;  %v12525_v9 = vpack.c.bf16 %v5305_v48, %v8110_v60  ;;  %v12527_v25 = vpack.c.bf16 %v5304_v23, %v8109_v33 }
 0x627   : > { %v7635_v20 = vpop.permute.xlu0 %7634  ;;  %v16600_v22 = vpop.permute.xlu1 %7636  ;;  %12526 = vmatprep.subr.bf16.mxu1 %v12525_v9 }
 0x628   : > { %v7667_v30 = vsel %vm926_vm3, %v7635_v20, %v16600_v22  ;;  %12528 = vmatpush1.bf16.msra.mxu1 %v12527_v25 }
 0x629   : > { %6875 = vrot.lane.b32.xlu0 %v16592_v59, %s19474_s28  ;;  %5098 = vrot.lane.b32.xlu1 %v16598_v41, %s19469_s16 }
 0x62b   : > { %v7753_v29 = vpop.permute.xlu0 %7752  ;;  %v16613_v54 = vpop.permute.xlu1 %7754 }
 0x62c   : > { %v7785_v0 = vsel %vm5538_vm15, %v7753_v29, %v16613_v54 }
 0x62d   : > { %5100 = vrot.lane.b32.xlu0 %v16611_v50, %s19469_s16  ;;  %6521 = vrot.lane.b32.xlu1 %v16617_v11, %s19487_s9  ;;  %v12521_v1 = vpack.c.bf16 %v7785_v0, %v7667_v30 }
 0x62f   : > { %v7633_v5 = vpop.permute.xlu0 %7632  ;;  %v7751_v45 = vpop.permute.xlu1 %7750  ;;  %12522 = vmatprep.subr.bf16.mxu0 %v12521_v1  ;;  %v16674_v1 = vld [vmem:[#allocation4 + $0x38] sm:$0xff] }
 0x630   : > { %v7666_v7 = vsel %vm926_vm3, %v7633_v5, %v7635_v20  ;;  %v7784_v62 = vsel %vm5538_vm15, %v7751_v45, %v7753_v29 }
 0x631   : > { %6523 = vrot.lane.b32.xlu0 %v16298_v51, %s19487_s9  ;;  %6639 = vrot.lane.b32.xlu1 %v16617_v11, %s13454_s27  ;;  %v12523_v31 = vpack.c.bf16 %v7784_v62, %v7666_v7  ;;  %v13350_v7 = vld [vmem:[#allocation3 + $0x70] sm:$0xff] }
 0x632   : > { %v5094_v62 = vmax.f32 %v13350_v7, %v16363_v58  ;;  %v16701_v58 = vld [vmem:[%s19358_s3] sm:$0xff] }
 0x633   : > { %v5393_v44 = vpop.permute.xlu0 %5392  ;;  %v16629_v24 = vpop.permute.xlu1 %5394  ;;  %12524 = vmatpush1.bf16.msra.mxu0 %v12523_v31 }
 0x634   : > { %v5422_v35 = vsel %vm926_vm3, %v16315_v17, %v5393_v44  ;;  %v5423_v56 = vsel %vm926_vm3, %v5393_v44, %v16629_v24 }
 0x635   : > { %6641 = vrot.lane.b32.xlu0 %v16298_v51, %s13454_s27  ;;  %6996 = vrot.lane.b32.xlu1 %v16580_v14, %s19476_s18 }
 0x637   : > { %v5511_v21 = vpop.permute.xlu0 %5510  ;;  %v16639_v8 = vpop.permute.xlu1 %5512 }
 0x638   : > { %v5541_v23 = vsel %vm5538_vm15, %v16323_v61, %v5511_v21  ;;  %v5542_v48 = vsel %vm5538_vm15, %v5511_v21, %v16639_v8 }
 0x639   : > { %6998 = vrot.lane.b32.xlu0 %v16592_v59, %s19476_s18  ;;  %7119 = vrot.lane.b32.xlu1 %v16580_v14, %s19478_s30  ;;  %v12529_v17 = vpack.c.bf16 %v5542_v48, %v5423_v56  ;;  %v12531_v60 = vpack.c.bf16 %v5541_v23, %v5422_v35  ;;  %v5124_v35 = vsel %vm527_vm0, %v16424_v39, %v16426_v26 }
 0x63a   : > { %v5125_v56 = vsel %vm527_vm0, %v16426_v26, %v16431_v4  ;;  %v8244_v26 = vld [vmem:[#allocation2 + $0x20] sm:$0xff] }
 0x63b   : > { %v5279_v33 = vpop.permute.xlu0 %5278  ;;  %v16649_v9 = vpop.permute.xlu1 %5280  ;;  %12530 = vmatprep.subr.bf16.mxu1 %v12529_v17 }
 0x63c   : > { %v5306_v25 = vsel %vm660_vm1, %v5277_v12, %v5279_v33  ;;  %v5307_v61 = vsel %vm660_vm1, %v5279_v33, %v16649_v9  ;;  %12532 = vmatpush1.bf16.msra.mxu1 %v12531_v60  ;;  %v13351_v60 = vld [vmem:[#allocation3 + $0x78] sm:$0xff] }
 0x63d   : > { %7121 = vrot.lane.b32.xlu0 %v16592_v59, %s19478_s30  ;;  %6757 = vrot.lane.b32.xlu1 %v16617_v11, %s13455_s14  ;;  %v12575_v17 = vpack.c.bf16 %v5306_v25, %v8244_v26  ;;  %v16709_v33 = vmax.f32 %v13351_v60, %v5125_v56 }
 0x63f   : > { %v5630_v13 = vpop.permute.xlu0 %5629  ;;  %v16658_v20 = vpop.permute.xlu1 %5631 }
 0x640   : > { %v5660_v3 = vsel %vm5657_vm8, %v16337_v34, %v5630_v13  ;;  %v5661_v30 = vsel %vm5657_vm8, %v5630_v13, %v16658_v20 }
 0x641   : > { %6759 = vrot.lane.b32.xlu0 %v16298_v51, %s13455_s14  ;;  %6877 = vrot.lane.b32.xlu1 %v16617_v11, %s19474_s28 }
 0x643   : > { %v5751_v12 = vpop.permute.xlu0 %5750  ;;  %v16668_v28 = vpop.permute.xlu1 %5752 }
 0x644   : > { %v5782_v29 = vsel %vm1753_vm10, %v16345_v43, %v5751_v12  ;;  %v5783_v0 = vsel %vm1753_vm10, %v5751_v12, %v16668_v28 }
 0x645   : > { %6879 = vrot.lane.b32.xlu0 %v16674_v1, %s19474_s28  ;;  %7242 = vrot.lane.b32.xlu1 %v16580_v14, %s13456_s19  ;;  %v12533_v51 = vpack.c.bf16 %v5783_v0, %v5661_v30  ;;  %v12535_v34 = vpack.c.bf16 %v5782_v29, %v5660_v3 }
 0x647   : > { %v7871_v5 = vpop.permute.xlu0 %7870  ;;  %v16680_v45 = vpop.permute.xlu1 %7872  ;;  %12534 = vmatprep.subr.bf16.mxu1 %v12533_v51 }
 0x648   : > { %v7903_v43 = vsel %vm5657_vm8, %v7871_v5, %v16680_v45  ;;  %12536 = vmatpush1.bf16.msra.mxu1 %v12535_v34 }
 0x649   : > { %7244 = vrot.lane.b32.xlu0 %v16592_v59, %s13456_s19  ;;  %7365 = vrot.lane.b32.xlu1 %v16580_v14, %s13457_s20  ;;  %v8245_v14 = vld [vmem:[#allocation2 + $0x28] sm:$0xff] }
 0x64a   : > { %8072 = vmatprep.subr.mxu0 %v7903_v43  ;;  %v12573_v39 = vpack.c.bf16 %v5307_v61, %v8245_v14 }
 0x64b   : > { %v5066_v31 = vpop.permute.xlu0 %5065  ;;  %v7869_v44 = vpop.permute.xlu1 %7868 }
 0x64c   : > { %v5068_v21 = vsel %vm1063_vm4, %v16516_v42, %v5066_v31  ;;  %v7902_v23 = vsel %vm5657_vm8, %v7869_v44, %v7871_v5  ;;  %v16707_v42 = vmax.f32 %v13350_v7, %v5124_v35 }
 0x64d   : > { %v5072_v48 = vmax.f32 %v16277_v10, %v5068_v21  ;;  %7367 = vrot.lane.b32.xlu0 %v16592_v59, %s13457_s20  ;;  %5102 = vrot.lane.b32.xlu1 %v5094_v62, %s19469_s16 }
 0x64e   : > { %8073 = vmatpush1.msra.mxu0 %v7902_v23 }
 0x64f   : > { %5074 = vst [vmem:[#allocation4 + $0x58] sm:$0xff] %v5072_v48  ;;  %6352 = vst [vmem:[#allocation2 + $0x640] sm:$0xff] %v5072_v48  ;;  %v5397_v13 = vpop.permute.xlu0 %5396  ;;  %v16711_v10 = vpop.permute.xlu1 %5398  ;;  %12574 = vmatprep.subr.bf16.mxu0 %v12573_v39  ;;  %8089 = vmatmul.mubr.f32.vlgmr.msra.gmra.mrb[10].mxu0 %v16701_v58 }
 0x650   : > { %5227 = vst [vmem:[#allocation2 + $0x58] sm:$0xff] %v5072_v48  ;;  %7472 = vst [vmem:[#allocation2 + $0xc28] sm:$0xff] %v5072_v48  ;;  %v5424_v61 = vsel %vm926_vm3, %v16629_v24, %v5397_v13  ;;  %v5425_v25 = vsel %vm926_vm3, %v5397_v13, %v16711_v10  ;;  %12576 = vmatpush1.bf16.msra.mxu0 %v12575_v17 }
 0x651   : > { %5135 = vrot.lane.b32.xlu0 %v16707_v42, %s19469_s16  ;;  %5137 = vrot.lane.b32.xlu1 %v16709_v33, %s19469_s16 }
 0x653   : > { %v5515_v3 = vpop.permute.xlu0 %5514  ;;  %v16722_v30 = vpop.permute.xlu1 %5516 }
 0x654   : > { %v5543_v12 = vsel %vm5538_vm15, %v16639_v8, %v5515_v3  ;;  %v5544_v29 = vsel %vm5538_vm15, %v5515_v3, %v16722_v30 }
 0x655   : > { %7000 = vrot.lane.b32.xlu0 %v16617_v11, %s19476_s18  ;;  %7002 = vrot.lane.b32.xlu1 %v16674_v1, %s19476_s18  ;;  %v12577_v24 = vpack.c.bf16 %v5544_v29, %v5425_v25  ;;  %v12579_v0 = vpack.c.bf16 %v5543_v12, %v5424_v61 }
 0x657   : > { %v5874_v51 = vpop.permute.xlu0 %5873  ;;  %v5876_v34 = vpop.permute.xlu1 %5875  ;;  %12578 = vmatprep.subr.bf16.mxu0 %v12577_v24 }
 0x658   : > { %v5905_v5 = vsel %vm19642_vm6, %v16369_v47, %v5874_v51  ;;  %v5906_v43 = vsel %vm19643_vm14, %v5874_v51, %v5876_v34  ;;  %12580 = vmatpush1.bf16.msra.mxu0 %v12579_v0  ;;  %vm19649_vm6 = vmmov %vm19644_vm2  ;;  %vm19650_vm14 = vcmask 588800  }
 0x659   : > { %7123 = vrot.lane.b32.xlu0 %v16617_v11, %s19478_s30  ;;  %7125 = vrot.lane.b32.xlu1 %v16674_v1, %s19478_s30 }
 0x65b   : > { %v5997_v8 = vpop.permute.xlu0 %5996  ;;  %v5999_v7 = vpop.permute.xlu1 %5998 }
 0x65c   : > { %v6028_v62 = vsel %vm19644_vm2, %v16377_v6, %v5997_v8  ;;  %v6029_v31 = vsel %vm19645_vm12, %v5997_v8, %v5999_v7  ;;  %vm19651_vm2 = vmmov %vm19650_vm14 }
 0x65d   : > { %7520 = vrot.lane.b32.xlu0 %v16592_v59, %s19485_s11  ;;  %7522 = vrot.lane.b32.xlu1 %v16617_v11, %s19485_s11  ;;  %v12537_v47 = vpack.c.bf16 %v6029_v31, %v5906_v43  ;;  %v12539_v44 = vpack.c.bf16 %v6028_v62, %v5905_v5  ;;  %vm19652_vm12 = vmmov %vm19646_vm5 }
 0x65f   : > { %v5634_v35 = vpop.permute.xlu0 %5633  ;;  %v16746_v56 = vpop.permute.xlu1 %5635  ;;  %12538 = vmatprep.subr.bf16.mxu1 %v12537_v47 }
 0x660   : > { %v5662_v21 = vsel %vm5657_vm8, %v16658_v20, %v5634_v35  ;;  %v5663_v6 = vsel %vm5657_vm8, %v5634_v35, %v16746_v56  ;;  %12540 = vmatpush1.bf16.msra.mxu1 %v12539_v44 }
 0x661   : > { %7246 = vrot.lane.b32.xlu0 %v16617_v11, %s13456_s19  ;;  %7248 = vrot.lane.b32.xlu1 %v16674_v1, %s13456_s19 }
 0x663   : > { %v5755_v23 = vpop.permute.xlu0 %5754  ;;  %v16756_v14 = vpop.permute.xlu1 %5756 }
 0x664   : > { %v5784_v48 = vsel %vm1753_vm10, %v16668_v28, %v5755_v23  ;;  %v5785_v39 = vsel %vm1753_vm10, %v5755_v23, %v16756_v14 }
 0x665   : > { %7369 = vrot.lane.b32.xlu0 %v16617_v11, %s13457_s20  ;;  %7371 = vrot.lane.b32.xlu1 %v16674_v1, %s13457_s20  ;;  %v12581_v20 = vpack.c.bf16 %v5785_v39, %v5663_v6  ;;  %v12583_v26 = vpack.c.bf16 %v5784_v48, %v5662_v21  ;;  %v16816_v48 = vld [vmem:[#allocation4 + $0x40] sm:$0xff]  ;;  %v8130_v39 = vld [vmem:[#allocation2 + $0x608] sm:$0xff] }
 0x667   : > { %v6120_v17 = vpop.permute.xlu0 %6119  ;;  %v6122_v60 = vpop.permute.xlu1 %6121  ;;  %12582 = vmatprep.subr.bf16.mxu0 %v12581_v20 }
 0x668   : > { %v6152_v13 = vsel %vm6149_vm7, %v16391_v32, %v6120_v17  ;;  %v6153_v61 = vsel %vm6149_vm7, %v6120_v17, %v6122_v60  ;;  %12584 = vmatpush1.bf16.msra.mxu0 %v12583_v26 }
 0x669   : > { %7638 = vrot.lane.b32.xlu0 %v16592_v59, %s19487_s9  ;;  %7640 = vrot.lane.b32.xlu1 %v16617_v11, %s19487_s9 }
 0x66b   : > { %v6244_v28 = vpop.permute.xlu0 %6243  ;;  %v6246_v25 = vpop.permute.xlu1 %6245 }
 0x66c   : > { %v6276_v3 = vsel %vm6273_vm11, %v16399_v27, %v6244_v28  ;;  %v6277_v12 = vsel %vm6273_vm11, %v6244_v28, %v6246_v25 }
 0x66d   : > { %7756 = vrot.lane.b32.xlu0 %v16592_v59, %s13454_s27  ;;  %7758 = vrot.lane.b32.xlu1 %v16617_v11, %s13454_s27  ;;  %v12541_v32 = vpack.c.bf16 %v6277_v12, %v6153_v61  ;;  %v12543_v29 = vpack.c.bf16 %v6276_v3, %v6152_v13 }
 0x66f   : > { %v16780_v24 = vpop.permute.xlu0 %5155  ;;  %v16782_v0 = vpop.permute.xlu1 %5157  ;;  %12542 = vmatprep.subr.bf16.mxu1 %v12541_v32 }
 0x670   : > { %12544 = vmatpush1.bf16.msra.mxu1 %v12543_v29 }
 0x671   : > { %7524 = vrot.lane.b32.xlu0 %v16674_v1, %s19485_s11  ;;  %7526 = vrot.lane.b32.xlu1 %v16449_v53, %s19485_s11 }
 0x673   : > { %v16788_v27 = vpop.permute.xlu0 %5159  ;;  %v5878_v51 = vpop.permute.xlu1 %5877 }
 0x674   : > { %v5907_v5 = vsel %vm19646_vm5, %v5876_v34, %v5878_v51 }
 0x675   : > { %5282 = vrot.lane.b32.xlu0 %v16674_v1, %s19485_s11  ;;  %5284 = vrot.lane.b32.xlu1 %v16449_v53, %s19485_s11 }
 0x677   : > { %v16795_v43 = vpop.permute.xlu0 %5879  ;;  %v6001_v8 = vpop.permute.xlu1 %6000 }
 0x678   : > { %v5908_v62 = vsel %vm19647_vm13, %v5878_v51, %v16795_v43  ;;  %v6030_v31 = vsel %vm19648_vm9, %v5999_v7, %v6001_v8  ;;  %vm19653_vm13 = vmmov %vm19649_vm6 }
 0x679   : > { %7874 = vrot.lane.b32.xlu0 %v16592_v59, %s13455_s14  ;;  %7876 = vrot.lane.b32.xlu1 %v16617_v11, %s13455_s14  ;;  %v12587_v59 = vpack.c.bf16 %v6030_v31, %v5907_v5  ;;  %v16851_v31 = vld [vmem:[%s19358_s3 + $0x18] sm:$0xff]  ;;  %vm19654_vm9 = vmmov %vm19649_vm6 }
 0x67a   : > { %11418 = vmatprep.mubr.msk.f32.mxu0 %vm19650_vm14, %v16851_v31  ;;  %vm19656_vm14 = vmmov %vm19646_vm5 }
 0x67b   : > { %v16804_v34 = vpop.permute.xlu0 %6002  ;;  %v6400_v47 = vpop.permute.xlu1 %6399 }
 0x67c   : > { %v6031_v44 = vsel %vm19649_vm6, %v6001_v8, %v16804_v34  ;;  %v6429_v35 = vsel %vm660_vm1, %v16437_v40, %v6400_v47  ;;  %vm19655_vm6 = vmmov %vm19646_vm5 }
 0x67d   : > { %7642 = vrot.lane.b32.xlu0 %v16674_v1, %s19487_s9  ;;  %7644 = vrot.lane.b32.xlu1 %v16449_v53, %s19487_s9  ;;  %v12585_v7 = vpack.c.bf16 %v6031_v44, %v5908_v62  ;;  %v8129_v53 = vld [vmem:[#allocation2 + $0x600] sm:$0xff] }
 0x67e   : > { %v12547_v20 = vpack.c.bf16 %v6429_v35, %v8129_v53 }
 0x67f   : > { %v6402_v21 = vpop.permute.xlu0 %6401  ;;  %v6124_v6 = vpop.permute.xlu1 %6123  ;;  %12586 = vmatprep.subr.bf16.mxu0 %v12585_v7 }
 0x680   : > { %v6430_v11 = vsel %vm660_vm1, %v6400_v47, %v6402_v21  ;;  %v6154_v23 = vsel %vm6149_vm7, %v6122_v60, %v6124_v6  ;;  %12588 = vmatpush1.bf16.msra.mxu0 %v12587_v59 }
 0x681   : > { %7760 = vrot.lane.b32.xlu0 %v16674_v1, %s13454_s27  ;;  %7762 = vrot.lane.b32.xlu1 %v16816_v48, %s13454_s27  ;;  %v12545_v40 = vpack.c.bf16 %v6430_v11, %v8130_v39 }
 0x683   : > { %v16822_v26 = vpop.permute.xlu0 %6125  ;;  %v6248_v17 = vpop.permute.xlu1 %6247  ;;  %12546 = vmatprep.subr.bf16.mxu1 %v12545_v40 }
 0x684   : > { %v6155_v60 = vsel %vm6149_vm7, %v6124_v6, %v16822_v26  ;;  %v6278_v13 = vsel %vm6273_vm11, %v6246_v25, %v6248_v17  ;;  %12548 = vmatpush1.bf16.msra.mxu1 %v12547_v20  ;;  %v8265_v6 = vld [vmem:[#allocation2 + $0x618] sm:$0xff] }
 0x685   : > { %5400 = vrot.lane.b32.xlu0 %v16674_v1, %s19487_s9  ;;  %5402 = vrot.lane.b32.xlu1 %v16816_v48, %s19487_s9  ;;  %v12591_v32 = vpack.c.bf16 %v6278_v13, %v6154_v23  ;;  %v8264_v23 = vld [vmem:[#allocation2 + $0x610] sm:$0xff] }
 0x687   : > { %v16831_v61 = vpop.permute.xlu0 %6249  ;;  %v6518_v28 = vpop.permute.xlu1 %6517 }
 0x688   : > { %v6279_v3 = vsel %vm6273_vm11, %v6248_v17, %v16831_v61  ;;  %v6547_v12 = vsel %vm926_vm3, %v16460_v37, %v6518_v28 }
 0x689   : > { %5518 = vrot.lane.b32.xlu0 %v16674_v1, %s13454_s27  ;;  %5520 = vrot.lane.b32.xlu1 %v16816_v48, %s13454_s27  ;;  %v12589_v25 = vpack.c.bf16 %v6279_v3, %v6155_v60  ;;  %v16891_v3 = vld [vmem:[#allocation4 + $0x48] sm:$0xff] }
 0x68b   : > { %v6520_v29 = vpop.permute.xlu0 %6519  ;;  %v6636_v51 = vpop.permute.xlu1 %6635  ;;  %12590 = vmatprep.subr.bf16.mxu0 %v12589_v25 }
 0x68c   : > { %v6548_v5 = vsel %vm926_vm3, %v6518_v28, %v6520_v29  ;;  %v6665_v8 = vsel %vm5538_vm15, %v16468_v55, %v6636_v51  ;;  %12592 = vmatpush1.bf16.msra.mxu0 %v12591_v32  ;;  %v16860_v55 = vld [vmem:[%s19358_s3 + $0x10] sm:$0xff] }
 0x68d   : > { %5286 = vrot.lane.b32.xlu0 %v16507_v2, %s19485_s11  ;;  %5288 = vrot.lane.b32.xlu1 %v16521_v16, %s19485_s11  ;;  %v12551_v16 = vpack.c.bf16 %v6665_v8, %v6547_v12 }
 0x68e   : > { %8095 = vmatmul.mubr.f32.gmra.mrb[12].mxu0 %v16860_v55 }
 0x68f   : > { %v6638_v37 = vpop.permute.xlu0 %6637  ;;  %v6404_v62 = vpop.permute.xlu1 %6403  ;;  %11421 = vmatprep.mubr.msk.f32.mxu0 %vm19651_vm2, %v16410_v52  ;;  %vm19657_vm2 = vmmov %vm19654_vm9 }
 0x690   : > { %v6666_v47 = vsel %vm5538_vm15, %v6636_v51, %v6638_v37  ;;  %v6431_v44 = vsel %vm660_vm1, %v6402_v21, %v6404_v62 }
 0x691   : > { %5637 = vrot.lane.b32.xlu0 %v16674_v1, %s13455_s14  ;;  %5639 = vrot.lane.b32.xlu1 %v16816_v48, %s13455_s14  ;;  %v12549_v2 = vpack.c.bf16 %v6666_v47, %v6548_v5  ;;  %v12595_v39 = vpack.c.bf16 %v6431_v44, %v8264_v23  ;;  %v16901_v5 = vld [vmem:[#allocation4 + $0x50] sm:$0xff] }
 0x693   : > { %v16867_v35 = vpop.permute.xlu0 %6405  ;;  %v6754_v7 = vpop.permute.xlu1 %6753  ;;  %12550 = vmatprep.subr.bf16.mxu1 %v12549_v2 }
 0x694   : > { %v6432_v59 = vsel %vm660_vm1, %v6404_v62, %v16867_v35  ;;  %v6783_v21 = vsel %vm5657_vm8, %v16482_v18, %v6754_v7  ;;  %12552 = vmatpush1.bf16.msra.mxu1 %v12551_v16  ;;  %v16886_v18 = vld [vmem:[#allocation3 + $0x80] sm:$0xff] }
 0x695   : > { %5758 = vrot.lane.b32.xlu0 %v16674_v1, %s19474_s28  ;;  %5760 = vrot.lane.b32.xlu1 %v16816_v48, %s19474_s28  ;;  %v12593_v11 = vpack.c.bf16 %v6432_v59, %v8265_v6  ;;  %v5131_v17 = vmax.f32 %v16886_v18, %v16431_v4 }
 0x697   : > { %v6756_v40 = vpop.permute.xlu0 %6755  ;;  %v6874_v53 = vpop.permute.xlu1 %6873  ;;  %12594 = vmatprep.subr.bf16.mxu0 %v12593_v11 }
 0x698   : > { %v6784_v52 = vsel %vm5657_vm8, %v6754_v7, %v6756_v40  ;;  %v6905_v20 = vsel %vm1753_vm10, %v16490_v49, %v6874_v53  ;;  %12596 = vmatpush1.bf16.msra.mxu0 %v12595_v39 }
 0x699   : > { %7878 = vrot.lane.b32.xlu0 %v16674_v1, %s13455_s14  ;;  %7880 = vrot.lane.b32.xlu1 %v16816_v48, %s13455_s14  ;;  %v12555_v12 = vpack.c.bf16 %v6905_v20, %v6783_v21 }
 0x69b   : > { %v6876_v60 = vpop.permute.xlu0 %6875  ;;  %v5099_v13 = vpop.permute.xlu1 %5098 }
 0x69c   : > { %v6906_v28 = vsel %vm1753_vm10, %v6874_v53, %v6876_v60 }
 0x69d   : > { %5139 = vrot.lane.b32.xlu0 %v5131_v17, %s19469_s16  ;;  %5404 = vrot.lane.b32.xlu1 %v16891_v3, %s19487_s9  ;;  %v12553_v49 = vpack.c.bf16 %v6906_v28, %v6784_v52 }
 0x69f   : > { %v16896_v25 = vpop.permute.xlu0 %5100  ;;  %v6522_v32 = vpop.permute.xlu1 %6521  ;;  %12554 = vmatprep.subr.bf16.mxu1 %v12553_v49 }
 0x6a0   : > { %v5104_v4 = vsel %vm1063_vm4, %v5099_v13, %v16896_v25  ;;  %v6549_v51 = vsel %vm926_vm3, %v6520_v29, %v6522_v32  ;;  %12556 = vmatpush1.bf16.msra.mxu1 %v12555_v12 }
 0x6a1   : > { %v5108_v8 = vmax.f32 %v16598_v41, %v5104_v4  ;;  %5406 = vrot.lane.b32.xlu0 %v16901_v5, %s19487_s9  ;;  %5522 = vrot.lane.b32.xlu1 %v16891_v3, %s13454_s27 }
 0x6a3   : > { %5110 = vst [vmem:[#allocation4 + $0x60] sm:$0xff] %v5108_v8  ;;  %5228 = vst [vmem:[#allocation2 + $0x60] sm:$0xff] %v5108_v8  ;;  %v16908_v62 = vpop.permute.xlu0 %6523  ;;  %v6640_v47 = vpop.permute.xlu1 %6639 }
 0x6a4   : > { %7473 = vst [vmem:[#allocation2 + $0xc30] sm:$0xff] %v5108_v8  ;;  %6353 = vst [vmem:[#allocation2 + $0x648] sm:$0xff] %v5108_v8  ;;  %v6550_v29 = vsel %vm926_vm3, %v6522_v32, %v16908_v62  ;;  %v6667_v44 = vsel %vm5538_vm15, %v6638_v37, %v6640_v47 }
 0x6a5   : > { %5524 = vrot.lane.b32.xlu0 %v16901_v5, %s13454_s27  ;;  %5881 = vrot.lane.b32.xlu1 %v16674_v1, %s19476_s18  ;;  %v12599_v59 = vpack.c.bf16 %v6667_v44, %v6549_v51 }
 0x6a7   : > { %v16917_v41 = vpop.permute.xlu0 %6641  ;;  %v6997_v2 = vpop.permute.xlu1 %6996 }
 0x6a8   : > { %v6668_v16 = vsel %vm5538_vm15, %v6640_v47, %v16917_v41  ;;  %v7028_v7 = vsel %vm19652_vm12, %v16531_v46, %v6997_v2  ;;  %vm19658_vm12 = vmmov %vm19657_vm2 }
 0x6a9   : > { %5883 = vrot.lane.b32.xlu0 %v16816_v48, %s19476_s18  ;;  %6004 = vrot.lane.b32.xlu1 %v16674_v1, %s19478_s30  ;;  %v12597_v37 = vpack.c.bf16 %v6668_v16, %v6550_v29 }
 0x6ab   : > { %v16927_v21 = vpop.permute.xlu0 %6998  ;;  %v7120_v6 = vpop.permute.xlu1 %7119  ;;  %12598 = vmatprep.subr.bf16.mxu0 %v12597_v37 }
 0x6ac   : > { %v7029_v11 = vsel %vm19646_vm5, %v6997_v2, %v16927_v21  ;;  %v7151_v23 = vsel %vm19653_vm13, %v16539_v57, %v7120_v6  ;;  %12600 = vmatpush1.bf16.msra.mxu0 %v12599_v59 }
 0x6ad   : > { %6006 = vrot.lane.b32.xlu0 %v16816_v48, %s19478_s30  ;;  %5641 = vrot.lane.b32.xlu1 %v16891_v3, %s13455_s14  ;;  %v12559_v20 = vpack.c.bf16 %v7151_v23, %v7028_v7 }
 0x6af   : > { %v16937_v46 = vpop.permute.xlu0 %7121  ;;  %v6758_v39 = vpop.permute.xlu1 %6757 }
 0x6b0   : > { %v7152_v53 = vsel %vm19654_vm9, %v7120_v6, %v16937_v46  ;;  %v6785_v52 = vsel %vm5657_vm8, %v6756_v40, %v6758_v39 }
 0x6b1   : > { %5643 = vrot.lane.b32.xlu0 %v16901_v5, %s13455_s14  ;;  %5762 = vrot.lane.b32.xlu1 %v16891_v3, %s19474_s28  ;;  %v12557_v57 = vpack.c.bf16 %v7152_v53, %v7029_v11 }
 0x6b3   : > { %v16946_v17 = vpop.permute.xlu0 %6759  ;;  %v6878_v13 = vpop.permute.xlu1 %6877  ;;  %12558 = vmatprep.subr.bf16.mxu1 %v12557_v57 }
 0x6b4   : > { %v6786_v28 = vsel %vm5657_vm8, %v6758_v39, %v16946_v17  ;;  %v6907_v49 = vsel %vm1753_vm10, %v6876_v60, %v6878_v13  ;;  %12560 = vmatpush1.bf16.msra.mxu1 %v12559_v20 }
 0x6b5   : > { %5764 = vrot.lane.b32.xlu0 %v16901_v5, %s19474_s28  ;;  %6127 = vrot.lane.b32.xlu1 %v16674_v1, %s13456_s19  ;;  %v12603_v51 = vpack.c.bf16 %v6907_v49, %v6785_v52 }
 0x6b7   : > { %v16955_v40 = vpop.permute.xlu0 %6879  ;;  %v7243_v12 = vpop.permute.xlu1 %7242 }
 0x6b8   : > { %v6908_v32 = vsel %vm1753_vm10, %v6878_v13, %v16955_v40  ;;  %v7274_v4 = vsel %vm6149_vm7, %v16553_v38, %v7243_v12 }
 0x6b9   : > { %6129 = vrot.lane.b32.xlu0 %v16816_v48, %s13456_s19  ;;  %6251 = vrot.lane.b32.xlu1 %v16674_v1, %s13457_s20  ;;  %v12601_v60 = vpack.c.bf16 %v6908_v32, %v6786_v28 }
 0x6bb   : > { %v16965_v8 = vpop.permute.xlu0 %7244  ;;  %v7366_v47 = vpop.permute.xlu1 %7365  ;;  %12602 = vmatprep.subr.bf16.mxu0 %v12601_v60 }
 0x6bc   : > { %v7275_v29 = vsel %vm6149_vm7, %v7243_v12, %v16965_v8  ;;  %v7397_v44 = vsel %vm6273_vm11, %v16561_v63, %v7366_v47  ;;  %12604 = vmatpush1.bf16.msra.mxu0 %v12603_v51 }
 0x6bd   : > { %6253 = vrot.lane.b32.xlu0 %v16816_v48, %s13457_s20  ;;  %5885 = vrot.lane.b32.xlu1 %v16891_v3, %s19476_s18  ;;  %v12563_v37 = vpack.c.bf16 %v7397_v44, %v7274_v4  ;;  %v8149_v4 = vld [vmem:[#allocation2 + $0xbf0] sm:$0xff] }
 0x6bf   : > { %v7368_v38 = vpop.permute.xlu0 %7367  ;;  %v5103_v1 = vpop.permute.xlu1 %5102 }
 0x6c0   : > { %v7398_v2 = vsel %vm6273_vm11, %v7366_v47, %v7368_v38  ;;  %v5105_v16 = vsel %vm1063_vm4, %v16896_v25, %v5103_v1 }
 0x6c1   : > { %v16979_v7 = vmax.f32 %v16611_v50, %v5105_v16  ;;  %5887 = vrot.lane.b32.xlu0 %v16901_v5, %s19476_s18  ;;  %6008 = vrot.lane.b32.xlu1 %v16891_v3, %s19478_s30  ;;  %v12561_v63 = vpack.c.bf16 %v7398_v2, %v7275_v29 }
 0x6c3   : > { %5111 = vst [vmem:[#allocation4 + $0x68] sm:$0xff] %v16979_v7  ;;  %6354 = vst [vmem:[#allocation2 + $0x650] sm:$0xff] %v16979_v7  ;;  %v5136_v25 = vpop.permute.xlu0 %5135  ;;  %v16989_v59 = vpop.permute.xlu1 %5137  ;;  %12562 = vmatprep.subr.bf16.mxu1 %v12561_v63 }
 0x6c4   : > { %5229 = vst [vmem:[#allocation2 + $0x68] sm:$0xff] %v16979_v7  ;;  %7474 = vst [vmem:[#allocation2 + $0xc38] sm:$0xff] %v16979_v7  ;;  %v5141_v50 = vsel %vm1063_vm4, %v5136_v25, %v16989_v59  ;;  %12564 = vmatpush1.bf16.msra.mxu1 %v12563_v37 }
 0x6c5   : > { %v16994_v6 = vmax.f32 %v16707_v42, %v5141_v50  ;;  %6010 = vrot.lane.b32.xlu0 %v16901_v5, %s19478_s30  ;;  %6407 = vrot.lane.b32.xlu1 %v16816_v48, %s19485_s11 }
 0x6c7   : > { %5147 = vst [vmem:[#allocation4 + $0x70] sm:$0xff] %v16994_v6  ;;  %5230 = vst [vmem:[#allocation2 + $0x70] sm:$0xff] %v16994_v6  ;;  %v7001_v11 = vpop.permute.xlu0 %7000  ;;  %v17004_v23 = vpop.permute.xlu1 %7002 }
 0x6c8   : > { %7475 = vst [vmem:[#allocation2 + $0xc40] sm:$0xff] %v16994_v6  ;;  %6355 = vst [vmem:[#allocation2 + $0x658] sm:$0xff] %v16994_v6  ;;  %v7030_v42 = vsel %vm19655_vm6, %v16927_v21, %v7001_v11  ;;  %v7031_v39 = vsel %vm19656_vm14, %v7001_v11, %v17004_v23 }
 0x6c9   : > { %6409 = vrot.lane.b32.xlu0 %v16891_v3, %s19485_s11  ;;  %6131 = vrot.lane.b32.xlu1 %v16891_v3, %s13456_s19  ;;  %vm19663_vm14 = vmmov %vm19655_vm6 }
 0x6cb   : > { %v7124_v53 = vpop.permute.xlu0 %7123  ;;  %v17014_v52 = vpop.permute.xlu1 %7125 }
 0x6cc   : > { %v7153_v57 = vsel %vm19657_vm2, %v16937_v46, %v7124_v53  ;;  %v7154_v20 = vsel %vm19658_vm12, %v7124_v53, %v17014_v52  ;;  %v8150_v46 = vld [vmem:[#allocation2 + $0xbf8] sm:$0xff]  ;;  %vm19664_vm12 = vmmov %vm19657_vm2 }
 0x6cd   : > { %6133 = vrot.lane.b32.xlu0 %v16901_v5, %s13456_s19  ;;  %6255 = vrot.lane.b32.xlu1 %v16891_v3, %s13457_s20  ;;  %v12605_v21 = vpack.c.bf16 %v7154_v20, %v7031_v39  ;;  %v12607_v13 = vpack.c.bf16 %v7153_v57, %v7030_v42  ;;  %v5161_v57 = vsel %vm527_vm0, %v16780_v24, %v16782_v0 }
 0x6cf   : > { %v7521_v28 = vpop.permute.xlu0 %7520  ;;  %v7523_v49 = vpop.permute.xlu1 %7522  ;;  %12606 = vmatprep.subr.bf16.mxu0 %v12605_v21 }
 0x6d0   : > { %v7550_v12 = vsel %vm660_vm1, %v16575_v19, %v7521_v28  ;;  %v7551_v32 = vsel %vm660_vm1, %v7521_v28, %v7523_v49  ;;  %12608 = vmatpush1.bf16.msra.mxu0 %v12607_v13  ;;  %v17070_v28 = vmax.f32 %v16886_v18, %v5161_v57 }
 0x6d1   : > { %6257 = vrot.lane.b32.xlu0 %v16901_v5, %s13457_s20  ;;  %6525 = vrot.lane.b32.xlu1 %v16816_v48, %s19487_s9  ;;  %v12565_v60 = vpack.c.bf16 %v7551_v32, %v8150_v46  ;;  %v12567_v51 = vpack.c.bf16 %v7550_v12, %v8149_v4  ;;  %v8285_v4 = vld [vmem:[#allocation2 + $0xc08] sm:$0xff] }
 0x6d3   : > { %v7247_v47 = vpop.permute.xlu0 %7246  ;;  %v17031_v29 = vpop.permute.xlu1 %7248  ;;  %12566 = vmatprep.subr.bf16.mxu1 %v12565_v60  ;;  %v8284_v60 = vld [vmem:[#allocation2 + $0xc00] sm:$0xff] }
 0x6d4   : > { %v7276_v19 = vsel %vm6149_vm7, %v16965_v8, %v7247_v47  ;;  %v7277_v44 = vsel %vm6149_vm7, %v7247_v47, %v17031_v29  ;;  %12568 = vmatpush1.bf16.msra.mxu1 %v12567_v51  ;;  %v13353_v47 = vld [vmem:[#allocation3 + $0x88] sm:$0xff] }
 0x6d5   : > { %6527 = vrot.lane.b32.xlu0 %v16891_v3, %s19487_s9  ;;  %6643 = vrot.lane.b32.xlu1 %v16816_v48, %s13454_s27 }
 0x6d7   : > { %v7370_v1 = vpop.permute.xlu0 %7369  ;;  %v17041_v2 = vpop.permute.xlu1 %7371 }
 0x6d8   : > { %v7399_v16 = vsel %vm6273_vm11, %v7368_v38, %v7370_v1  ;;  %v7400_v63 = vsel %vm6273_vm11, %v7370_v1, %v17041_v2  ;;  %v17053_v38 = vld [vmem:[#allocation4 + $0x58] sm:$0xff] }
 0x6d9   : > { %6645 = vrot.lane.b32.xlu0 %v16891_v3, %s13454_s27  ;;  %6411 = vrot.lane.b32.xlu1 %v16901_v5, %s19485_s11  ;;  %v12609_v8 = vpack.c.bf16 %v7400_v63, %v7277_v44  ;;  %v12611_v37 = vpack.c.bf16 %v7399_v16, %v7276_v19 }
 0x6db   : > { %v7639_v25 = vpop.permute.xlu0 %7638  ;;  %v7641_v50 = vpop.permute.xlu1 %7640  ;;  %12610 = vmatprep.subr.bf16.mxu0 %v12609_v8 }
 0x6dc   : > { %v7668_v11 = vsel %vm926_vm3, %v16600_v22, %v7639_v25  ;;  %v7669_v42 = vsel %vm926_vm3, %v7639_v25, %v7641_v50  ;;  %12612 = vmatpush1.bf16.msra.mxu0 %v12611_v37 }
 0x6dd   : > { %6413 = vrot.lane.b32.xlu0 %v17053_v38, %s19485_s11  ;;  %6761 = vrot.lane.b32.xlu1 %v16816_v48, %s13455_s14 }
 0x6df   : > { %v7757_v39 = vpop.permute.xlu0 %7756  ;;  %v7759_v53 = vpop.permute.xlu1 %7758 }
 0x6e0   : > { %v7786_v22 = vsel %vm5538_vm15, %v16613_v54, %v7757_v39  ;;  %v7787_v20 = vsel %vm5538_vm15, %v7757_v39, %v7759_v53  ;;  %v5162_v54 = vsel %vm527_vm0, %v16782_v0, %v16788_v27  ;;  %v8379_v39 = vld [vmem:[#allocation2 + $0x30] sm:$0xff]  ;;  %vm19659_vm0 = vcmask 588800  }
 0x6e1   : > { %6763 = vrot.lane.b32.xlu0 %v16891_v3, %s13455_s14  ;;  %6881 = vrot.lane.b32.xlu1 %v16816_v48, %s19474_s28  ;;  %v12569_v21 = vpack.c.bf16 %v7787_v20, %v7669_v42  ;;  %v12571_v13 = vpack.c.bf16 %v7786_v22, %v7668_v11  ;;  %v17084_v19 = vmax.f32 %v13353_v47, %v5162_v54  ;;  %v17128_v54 = vld [vmem:[%s19358_s3 + $0x8] sm:$0xff]  ;;  %vm19660_vm5 = vmmov %vm19659_vm0 }
 0x6e2   : > { %vm19661_vm13 = vmmov %vm19659_vm0 }
 0x6e3   : > { %v7525_v12 = vpop.permute.xlu0 %7524  ;;  %v17072_v32 = vpop.permute.xlu1 %7526  ;;  %12570 = vmatprep.subr.bf16.mxu1 %v12569_v21  ;;  %vm19662_vm9 = vmmov %vm19659_vm0 }
 0x6e4   : > { %v7552_v24 = vsel %vm660_vm1, %v7523_v49, %v7525_v12  ;;  %v7553_v46 = vsel %vm660_vm1, %v7525_v12, %v17072_v32  ;;  %12572 = vmatpush1.bf16.msra.mxu1 %v12571_v13 }
 0x6e5   : > { %6883 = vrot.lane.b32.xlu0 %v16891_v3, %s19474_s28  ;;  %5172 = vrot.lane.b32.xlu1 %v17070_v28, %s19469_s16  ;;  %v12613_v18 = vpack.c.bf16 %v7553_v46, %v8285_v4  ;;  %v12615_v51 = vpack.c.bf16 %v7552_v24, %v8284_v60 }
 0x6e7   : > { %v5283_v0 = vpop.permute.xlu0 %5282  ;;  %v5285_v44 = vpop.permute.xlu1 %5284  ;;  %12614 = vmatprep.subr.bf16.mxu0 %v12613_v18 }
 0x6e8   : > { %v5308_v49 = vsel %vm660_vm1, %v16649_v9, %v5283_v0  ;;  %v5309_v1 = vsel %vm660_vm1, %v5283_v0, %v5285_v44  ;;  %12616 = vmatpush1.bf16.msra.mxu0 %v12615_v51  ;;  %v8380_v9 = vld [vmem:[#allocation2 + $0x38] sm:$0xff] }
 0x6e9   : > { %5174 = vrot.lane.b32.xlu0 %v17084_v19, %s19469_s16  ;;  %6529 = vrot.lane.b32.xlu1 %v16901_v5, %s19487_s9  ;;  %v12621_v25 = vpack.c.bf16 %v5309_v1, %v8380_v9  ;;  %v12623_v22 = vpack.c.bf16 %v5308_v49, %v8379_v39 }
 0x6eb   : > { %v7875_v16 = vpop.permute.xlu0 %7874  ;;  %v17093_v63 = vpop.permute.xlu1 %7876 }
 0x6ec   : > { %v7904_v8 = vsel %vm5657_vm8, %v16680_v45, %v7875_v16  ;;  %v7905_v37 = vsel %vm5657_vm8, %v7875_v16, %v17093_v63 }
 0x6ed   : > { %6531 = vrot.lane.b32.xlu0 %v17053_v38, %s19487_s9  ;;  %6647 = vrot.lane.b32.xlu1 %v16901_v5, %s13454_s27 }
 0x6ee   : > { %8207 = vmatprep.subr.mxu1 %v7905_v37 }
 0x6ef   : > { %v7643_v11 = vpop.permute.xlu0 %7642  ;;  %v17103_v42 = vpop.permute.xlu1 %7644  ;;  %8208 = vmatpush1.msra.mxu1 %v7904_v8 }
 0x6f0   : > { %v7670_v57 = vsel %vm926_vm3, %v7641_v50, %v7643_v11  ;;  %v7671_v45 = vsel %vm926_vm3, %v7643_v11, %v17103_v42  ;;  %12622 = vmatprep.subr.bf16.mxu1 %v12621_v25  ;;  %8224 = vmatmul.mubr.f32.vlgmr.msra.gmra.mrb[10].mxu1 %v16701_v58 }
 0x6f1   : > { %6649 = vrot.lane.b32.xlu0 %v17053_v38, %s13454_s27  ;;  %7004 = vrot.lane.b32.xlu1 %v16816_v48, %s19476_s18 }
 0x6f2   : > { %12624 = vmatpush1.bf16.msra.mxu1 %v12623_v22  ;;  %11420 = vmatprep.mubr.msk.f32.mxu1 %vm19659_vm0, %v16851_v31  ;;  %vm19665_vm0 = vmmov %vm19655_vm6 }
 0x6f3   : > { %v7761_v20 = vpop.permute.xlu0 %7760  ;;  %v17115_v21 = vpop.permute.xlu1 %7762 }
 0x6f4   : > { %v7788_v50 = vsel %vm5538_vm15, %v7759_v53, %v7761_v20  ;;  %v7789_v13 = vsel %vm5538_vm15, %v7761_v20, %v17115_v21  ;;  %8230 = vmatmul.mubr.f32.gmra.mrb[12].mxu1 %v16860_v55 }
 0x6f5   : > { %7006 = vrot.lane.b32.xlu0 %v16891_v3, %s19476_s18  ;;  %7127 = vrot.lane.b32.xlu1 %v16816_v48, %s19478_s30  ;;  %v12617_v58 = vpack.c.bf16 %v7789_v13, %v7671_v45  ;;  %v12619_v12 = vpack.c.bf16 %v7788_v50, %v7670_v57  ;;  %v8515_v50 = vld [vmem:[#allocation2 + $0x48] sm:$0xff] }
 0x6f6   : > { %11423 = vmatprep.mubr.msk.f32.mxu1 %vm19660_vm5, %v17128_v54  ;;  %vm19666_vm5 = vmmov %vm19665_vm0 }
 0x6f7   : > { %v5401_v53 = vpop.permute.xlu0 %5400  ;;  %v5403_v24 = vpop.permute.xlu1 %5402  ;;  %12618 = vmatprep.subr.bf16.mxu0 %v12617_v58 }
 0x6f8   : > { %v5426_v46 = vsel %vm926_vm3, %v16711_v10, %v5401_v53  ;;  %v5427_v4 = vsel %vm926_vm3, %v5401_v53, %v5403_v24  ;;  %12620 = vmatpush1.bf16.msra.mxu0 %v12619_v12  ;;  %v8514_v53 = vld [vmem:[#allocation2 + $0x40] sm:$0xff] }
 0x6f9   : > { %7129 = vrot.lane.b32.xlu0 %v16891_v3, %s19478_s30  ;;  %6765 = vrot.lane.b32.xlu1 %v16901_v5, %s13455_s14 }
 0x6fb   : > { %v5519_v60 = vpop.permute.xlu0 %5518  ;;  %v17139_v18 = vpop.permute.xlu1 %5520 }
 0x6fc   : > { %v5545_v51 = vsel %vm5538_vm15, %v16722_v30, %v5519_v60  ;;  %v5546_v47 = vsel %vm5538_vm15, %v5519_v60, %v17139_v18 }
 0x6fd   : > { %6767 = vrot.lane.b32.xlu0 %v17053_v38, %s13455_s14  ;;  %6885 = vrot.lane.b32.xlu1 %v16901_v5, %s19474_s28  ;;  %v12625_v10 = vpack.c.bf16 %v5546_v47, %v5427_v4  ;;  %v12627_v0 = vpack.c.bf16 %v5545_v51, %v5426_v46  ;;  %v17194_v4 = vld [vmem:[%s19358_s3] sm:$0xff] }
 0x6ff   : > { %v5287_v49 = vpop.permute.xlu0 %5286  ;;  %v17149_v1 = vpop.permute.xlu1 %5288  ;;  %12626 = vmatprep.subr.bf16.mxu1 %v12625_v10 }
 0x700   : > { %v5310_v16 = vsel %vm660_vm1, %v5285_v44, %v5287_v49  ;;  %v5311_v30 = vsel %vm660_vm1, %v5287_v49, %v17149_v1  ;;  %12628 = vmatpush1.bf16.msra.mxu1 %v12627_v0 }
 0x701   : > { %6887 = vrot.lane.b32.xlu0 %v17053_v38, %s19474_s28  ;;  %7250 = vrot.lane.b32.xlu1 %v16816_v48, %s13456_s19  ;;  %v12669_v13 = vpack.c.bf16 %v5311_v30, %v8515_v50  ;;  %v12671_v60 = vpack.c.bf16 %v5310_v16, %v8514_v53 }
 0x703   : > { %v5638_v8 = vpop.permute.xlu0 %5637  ;;  %v17158_v37 = vpop.permute.xlu1 %5639 }
 0x704   : > { %v5664_v9 = vsel %vm5657_vm8, %v16746_v56, %v5638_v8  ;;  %v5665_v25 = vsel %vm5657_vm8, %v5638_v8, %v17158_v37 }
 0x705   : > { %7252 = vrot.lane.b32.xlu0 %v16891_v3, %s13456_s19  ;;  %7373 = vrot.lane.b32.xlu1 %v16816_v48, %s13457_s20 }
 0x707   : > { %v5759_v44 = vpop.permute.xlu0 %5758  ;;  %v17168_v11 = vpop.permute.xlu1 %5760 }
 0x708   : > { %v5786_v39 = vsel %vm1753_vm10, %v16756_v14, %v5759_v44  ;;  %v5787_v57 = vsel %vm1753_vm10, %v5759_v44, %v17168_v11 }
 0x709   : > { %7375 = vrot.lane.b32.xlu0 %v16891_v3, %s13457_s20  ;;  %7008 = vrot.lane.b32.xlu1 %v16901_v5, %s19476_s18  ;;  %v12629_v56 = vpack.c.bf16 %v5787_v57, %v5665_v25  ;;  %v12631_v45 = vpack.c.bf16 %v5786_v39, %v5664_v9 }
 0x70b   : > { %v7879_v22 = vpop.permute.xlu0 %7878  ;;  %v17178_v20 = vpop.permute.xlu1 %7880  ;;  %12630 = vmatprep.subr.bf16.mxu1 %v12629_v56 }
 0x70c   : > { %v7906_v48 = vsel %vm5657_vm8, %v17093_v63, %v7879_v22  ;;  %v7907_v14 = vsel %vm5657_vm8, %v7879_v22, %v17178_v20  ;;  %12632 = vmatpush1.bf16.msra.mxu1 %v12631_v45 }
 0x70d   : > { %7010 = vrot.lane.b32.xlu0 %v17053_v38, %s19476_s18  ;;  %7131 = vrot.lane.b32.xlu1 %v16901_v5, %s19478_s30 }
 0x70e   : > { %8342 = vmatprep.subr.mxu0 %v7907_v14 }
 0x70f   : > { %v5140_v58 = vpop.permute.xlu0 %5139  ;;  %v5405_v12 = vpop.permute.xlu1 %5404  ;;  %8343 = vmatpush1.msra.mxu0 %v7906_v48 }
 0x710   : > { %v5142_v63 = vsel %vm1063_vm4, %v16989_v59, %v5140_v58  ;;  %v5428_v46 = vsel %vm926_vm3, %v5403_v24, %v5405_v12  ;;  %12670 = vmatprep.subr.bf16.mxu0 %v12669_v13  ;;  %8359 = vmatmul.mubr.f32.vlgmr.msra.gmra.mrb[14].mxu0 %v17194_v4  ;;  %v17263_v13 = vld [vmem:[#allocation4 + $0x60] sm:$0xff] }
 0x711   : > { %v17198_v51 = vmax.f32 %v16709_v33, %v5142_v63  ;;  %7133 = vrot.lane.b32.xlu0 %v17053_v38, %s19478_s30  ;;  %7528 = vrot.lane.b32.xlu1 %v16891_v3, %s19485_s11 }
 0x712   : > { %12672 = vmatpush1.bf16.msra.mxu0 %v12671_v60  ;;  %11422 = vmatprep.mubr.msk.f32.mxu0 %vm19661_vm13, %v16851_v31  ;;  %vm19667_vm13 = vmmov %vm19657_vm2 }
 0x713   : > { %5148 = vst [vmem:[#allocation4 + $0x78] sm:$0xff] %v17198_v51  ;;  %6356 = vst [vmem:[#allocation2 + $0x660] sm:$0xff] %v17198_v51  ;;  %v17210_v33 = vpop.permute.xlu0 %5406  ;;  %v5523_v59 = vpop.permute.xlu1 %5522 }
 0x714   : > { %5231 = vst [vmem:[#allocation2 + $0x78] sm:$0xff] %v17198_v51  ;;  %7476 = vst [vmem:[#allocation2 + $0xc48] sm:$0xff] %v17198_v51  ;;  %v5429_v24 = vsel %vm926_vm3, %v5405_v12, %v17210_v33  ;;  %v5547_v47 = vsel %vm5538_vm15, %v17139_v18, %v5523_v59  ;;  %8365 = vmatmul.mubr.f32.gmra.mrb[16].mxu0 %v16860_v55 }
 0x715   : > { %7530 = vrot.lane.b32.xlu0 %v16901_v5, %s19485_s11  ;;  %7254 = vrot.lane.b32.xlu1 %v16901_v5, %s13456_s19  ;;  %v12675_v49 = vpack.c.bf16 %v5547_v47, %v5428_v46  ;;  %v7841_v46 = vld [vmem:[#allocation4 + $0x48] sm:$0xff]  ;;  %v7842_v47 = vld [vmem:[#allocation4 + $0x50] sm:$0xff] }
 0x716   : > { %11425 = vmatprep.mubr.msk.f32.mxu0 %vm19662_vm9, %v17128_v54  ;;  %vm19668_vm9 = vmmov %vm19657_vm2 }
 0x717   : > { %v17223_v31 = vpop.permute.xlu0 %5524  ;;  %v5882_v10 = vpop.permute.xlu1 %5881 }
 0x718   : > { %v5548_v0 = vsel %vm5538_vm15, %v5523_v59, %v17223_v31  ;;  %v5909_v18 = vsel %vm19655_vm6, %v16795_v43, %v5882_v10  ;;  %vm5232_vm6 = vcmask 539648  }
 0x719   : > { %7256 = vrot.lane.b32.xlu0 %v17053_v38, %s13456_s19  ;;  %7377 = vrot.lane.b32.xlu1 %v16901_v5, %s13457_s20  ;;  %v12673_v55 = vpack.c.bf16 %v5548_v0, %v5429_v24 }
 0x71b   : > { %v5884_v16 = vpop.permute.xlu0 %5883  ;;  %v6005_v30 = vpop.permute.xlu1 %6004  ;;  %12674 = vmatprep.subr.bf16.mxu0 %v12673_v55 }
 0x71c   : > { %v5910_v8 = vsel %vm19663_vm14, %v5882_v10, %v5884_v16  ;;  %v6032_v9 = vsel %vm19657_vm2, %v16804_v34, %v6005_v30  ;;  %12676 = vmatpush1.bf16.msra.mxu0 %v12675_v49  ;;  %vm19669_vm14 = vmmov %vm19665_vm0 }
 0x71d   : > { %7379 = vrot.lane.b32.xlu0 %v17053_v38, %s13457_s20  ;;  %7646 = vrot.lane.b32.xlu1 %v16891_v3, %s19487_s9  ;;  %v12635_v57 = vpack.c.bf16 %v6032_v9, %v5909_v18  ;;  %vm19670_vm2 = vmmov %vm19665_vm0 }
 0x71f   : > { %v6007_v43 = vpop.permute.xlu0 %6006  ;;  %v5642_v25 = vpop.permute.xlu1 %5641 }
 0x720   : > { %v6033_v44 = vsel %vm19664_vm12, %v6005_v30, %v6007_v43  ;;  %v5666_v39 = vsel %vm5657_vm8, %v17158_v37, %v5642_v25  ;;  %vm19671_vm12 = vmmov %vm19668_vm9 }
 0x721   : > { %7648 = vrot.lane.b32.xlu0 %v16901_v5, %s19487_s9  ;;  %7764 = vrot.lane.b32.xlu1 %v16891_v3, %s13454_s27  ;;  %v12633_v34 = vpack.c.bf16 %v6033_v44, %v5910_v8 }
 0x723   : > { %v17247_v56 = vpop.permute.xlu0 %5643  ;;  %v5763_v45 = vpop.permute.xlu1 %5762  ;;  %12634 = vmatprep.subr.bf16.mxu1 %v12633_v34 }
 0x724   : > { %v5667_v22 = vsel %vm5657_vm8, %v5642_v25, %v17247_v56  ;;  %v5788_v48 = vsel %vm1753_vm10, %v17168_v11, %v5763_v45  ;;  %12636 = vmatpush1.bf16.msra.mxu1 %v12635_v57 }
 0x725   : > { %7766 = vrot.lane.b32.xlu0 %v16901_v5, %s13454_s27  ;;  %7532 = vrot.lane.b32.xlu1 %v17053_v38, %s19485_s11  ;;  %v12679_v11 = vpack.c.bf16 %v5788_v48, %v5666_v39 }
 0x727   : > { %v17257_v3 = vpop.permute.xlu0 %5764  ;;  %v6128_v37 = vpop.permute.xlu1 %6127 }
 0x728   : > { %v5789_v14 = vsel %vm1753_vm10, %v5763_v45, %v17257_v3  ;;  %v6156_v50 = vsel %vm6149_vm7, %v16822_v26, %v6128_v37  ;;  %v8400_v45 = vld [vmem:[#allocation2 + $0x628] sm:$0xff] }
 0x729   : > { %7534 = vrot.lane.b32.xlu0 %v17263_v13, %s19485_s11  ;;  %5290 = vrot.lane.b32.xlu1 %v17053_v38, %s19485_s11  ;;  %v12677_v5 = vpack.c.bf16 %v5789_v14, %v5667_v22  ;;  %v8399_v22 = vld [vmem:[#allocation2 + $0x620] sm:$0xff] }
 0x72b   : > { %v6130_v58 = vpop.permute.xlu0 %6129  ;;  %v6252_v12 = vpop.permute.xlu1 %6251  ;;  %12678 = vmatprep.subr.bf16.mxu0 %v12677_v5 }
 0x72c   : > { %v6157_v53 = vsel %vm6149_vm7, %v6128_v37, %v6130_v58  ;;  %v6280_v63 = vsel %vm6273_vm11, %v16831_v61, %v6252_v12  ;;  %12680 = vmatpush1.bf16.msra.mxu0 %v12679_v11 }
 0x72d   : > { %5292 = vrot.lane.b32.xlu0 %v17263_v13, %s19485_s11  ;;  %7882 = vrot.lane.b32.xlu1 %v7841_v46, %s13455_s14  ;;  %v12639_v10 = vpack.c.bf16 %v6280_v63, %v6156_v50 }
 0x72f   : > { %v6254_v26 = vpop.permute.xlu0 %6253  ;;  %v5886_v60 = vpop.permute.xlu1 %5885 }
 0x730   : > { %v6281_v59 = vsel %vm6273_vm11, %v6252_v12, %v6254_v26  ;;  %v5911_v24 = vsel %vm19665_vm0, %v5884_v16, %v5886_v60  ;;  %vm19672_vm0 = vmmov %vm19668_vm9 }
 0x731   : > { %7884 = vrot.lane.b32.xlu0 %v7842_v47, %s13455_s14  ;;  %7650 = vrot.lane.b32.xlu1 %v17053_v38, %s19487_s9  ;;  %v12637_v61 = vpack.c.bf16 %v6281_v59, %v6157_v53 }
 0x733   : > { %v17280_v0 = vpop.permute.xlu0 %5887  ;;  %v6009_v18 = vpop.permute.xlu1 %6008  ;;  %12638 = vmatprep.subr.bf16.mxu1 %v12637_v61 }
 0x734   : > { %v5912_v55 = vsel %vm19666_vm5, %v5886_v60, %v17280_v0  ;;  %v6034_v49 = vsel %vm19667_vm13, %v6007_v43, %v6009_v18  ;;  %12640 = vmatpush1.bf16.msra.mxu1 %v12639_v10  ;;  %vm19673_vm5 = vmmov %vm19670_vm2 }
 0x735   : > { %7652 = vrot.lane.b32.xlu0 %v17263_v13, %s19487_s9  ;;  %7768 = vrot.lane.b32.xlu1 %v17053_v38, %s13454_s27  ;;  %v12683_v25 = vpack.c.bf16 %v6034_v49, %v5911_v24  ;;  %vm19674_vm13 = vmmov %vm19670_vm2 }
 0x737   : > { %v17289_v16 = vpop.permute.xlu0 %6010  ;;  %v6408_v30 = vpop.permute.xlu1 %6407 }
 0x738   : > { %v6035_v8 = vsel %vm19668_vm9, %v6009_v18, %v17289_v16  ;;  %v6433_v9 = vsel %vm660_vm1, %v16867_v35, %v6408_v30  ;;  %vm19675_vm9 = vmmov %vm19672_vm0 }
 0x739   : > { %7770 = vrot.lane.b32.xlu0 %v17263_v13, %s13454_s27  ;;  %5408 = vrot.lane.b32.xlu1 %v17053_v38, %s19487_s9  ;;  %v12681_v43 = vpack.c.bf16 %v6035_v8, %v5912_v55  ;;  %v12643_v48 = vpack.c.bf16 %v6433_v9, %v8399_v22  ;;  %v8535_v8 = vld [vmem:[#allocation2 + $0x638] sm:$0xff] }
 0x73b   : > { %v6410_v44 = vpop.permute.xlu0 %6409  ;;  %v6132_v39 = vpop.permute.xlu1 %6131  ;;  %12682 = vmatprep.subr.bf16.mxu0 %v12681_v43  ;;  %v8534_v43 = vld [vmem:[#allocation2 + $0x630] sm:$0xff] }
 0x73c   : > { %v6434_v34 = vsel %vm660_vm1, %v6408_v30, %v6410_v44  ;;  %v6158_v57 = vsel %vm6149_vm7, %v6130_v58, %v6132_v39  ;;  %12684 = vmatpush1.bf16.msra.mxu0 %v12683_v25  ;;  %v17343_v30 = vld [vmem:[#allocation4 + $0x68] sm:$0xff] }
 0x73d   : > { %5410 = vrot.lane.b32.xlu0 %v17263_v13, %s19487_s9  ;;  %5526 = vrot.lane.b32.xlu1 %v17053_v38, %s13454_s27  ;;  %v12641_v35 = vpack.c.bf16 %v6434_v34, %v8400_v45 }
 0x73f   : > { %v17305_v37 = vpop.permute.xlu0 %6133  ;;  %v6256_v14 = vpop.permute.xlu1 %6255  ;;  %12642 = vmatprep.subr.bf16.mxu1 %v12641_v35 }
 0x740   : > { %v6159_v50 = vsel %vm6149_vm7, %v6132_v39, %v17305_v37  ;;  %v6282_v5 = vsel %vm6273_vm11, %v6254_v26, %v6256_v14  ;;  %12644 = vmatpush1.bf16.msra.mxu1 %v12643_v48 }
 0x741   : > { %5528 = vrot.lane.b32.xlu0 %v17263_v13, %s13454_s27  ;;  %5294 = vrot.lane.b32.xlu1 %v16979_v7, %s19485_s11  ;;  %v12687_v46 = vpack.c.bf16 %v6282_v5, %v6158_v57  ;;  %v17352_v57 = vld [vmem:[#allocation4 + $0x70] sm:$0xff] }
 0x743   : > { %v17314_v11 = vpop.permute.xlu0 %6257  ;;  %v6526_v58 = vpop.permute.xlu1 %6525 }
 0x744   : > { %v6283_v12 = vsel %vm6273_vm11, %v6256_v14, %v17314_v11  ;;  %v6551_v53 = vsel %vm926_vm3, %v16908_v62, %v6526_v58 }
 0x745   : > { %5296 = vrot.lane.b32.xlu0 %v16994_v6, %s19485_s11  ;;  %5645 = vrot.lane.b32.xlu1 %v17053_v38, %s13455_s14  ;;  %v12685_v63 = vpack.c.bf16 %v6283_v12, %v6159_v50 }
 0x747   : > { %v6528_v26 = vpop.permute.xlu0 %6527  ;;  %v6644_v60 = vpop.permute.xlu1 %6643  ;;  %12686 = vmatprep.subr.bf16.mxu0 %v12685_v63 }
 0x748   : > { %v6552_v7 = vsel %vm926_vm3, %v6526_v58, %v6528_v26  ;;  %v6669_v59 = vsel %vm5538_vm15, %v16917_v41, %v6644_v60  ;;  %12688 = vmatpush1.bf16.msra.mxu0 %v12687_v46 }
 0x749   : > { %5647 = vrot.lane.b32.xlu0 %v17263_v13, %s13455_s14  ;;  %5766 = vrot.lane.b32.xlu1 %v17053_v38, %s19474_s28  ;;  %v12647_v61 = vpack.c.bf16 %v6669_v59, %v6551_v53 }
 0x74b   : > { %v6646_v62 = vpop.permute.xlu0 %6645  ;;  %v6412_v6 = vpop.permute.xlu1 %6411 }
 0x74c   : > { %v6670_v24 = vsel %vm5538_vm15, %v6644_v60, %v6646_v62  ;;  %v6435_v47 = vsel %vm660_vm1, %v6410_v44, %v6412_v6 }
 0x74d   : > { %5768 = vrot.lane.b32.xlu0 %v17263_v13, %s19474_s28  ;;  %7886 = vrot.lane.b32.xlu1 %v17053_v38, %s13455_s14  ;;  %v12645_v41 = vpack.c.bf16 %v6670_v24, %v6552_v7  ;;  %v12691_v25 = vpack.c.bf16 %v6435_v47, %v8534_v43 }
 0x74f   : > { %v17337_v10 = vpop.permute.xlu0 %6413  ;;  %v6762_v18 = vpop.permute.xlu1 %6761  ;;  %12646 = vmatprep.subr.bf16.mxu1 %v12645_v41 }
 0x750   : > { %v6436_v55 = vsel %vm660_vm1, %v6412_v6, %v17337_v10  ;;  %v6787_v49 = vsel %vm5657_vm8, %v16946_v17, %v6762_v18  ;;  %12648 = vmatpush1.bf16.msra.mxu1 %v12647_v61  ;;  %v6088_v61 = vld [vmem:[#allocation4 + $0x58] sm:$0xff] }
 0x751   : > { %7888 = vrot.lane.b32.xlu0 %v17263_v13, %s13455_s14  ;;  %5412 = vrot.lane.b32.xlu1 %v17343_v30, %s19487_s9  ;;  %v12689_v9 = vpack.c.bf16 %v6436_v55, %v8535_v8 }
 0x753   : > { %v6764_v44 = vpop.permute.xlu0 %6763  ;;  %v6882_v39 = vpop.permute.xlu1 %6881  ;;  %12690 = vmatprep.subr.bf16.mxu0 %v12689_v9 }
 0x754   : > { %v6788_v34 = vsel %vm5657_vm8, %v6762_v18, %v6764_v44  ;;  %v6909_v17 = vsel %vm1753_vm10, %v16955_v40, %v6882_v39  ;;  %12692 = vmatpush1.bf16.msra.mxu0 %v12691_v25 }
 0x755   : > { %5414 = vrot.lane.b32.xlu0 %v17352_v57, %s19487_s9  ;;  %5530 = vrot.lane.b32.xlu1 %v17343_v30, %s13454_s27  ;;  %v12651_v48 = vpack.c.bf16 %v6909_v17, %v6787_v49 }
 0x757   : > { %v6884_v45 = vpop.permute.xlu0 %6883  ;;  %v5173_v35 = vpop.permute.xlu1 %5172 }
 0x758   : > { %v6910_v22 = vsel %vm1753_vm10, %v6882_v39, %v6884_v45 }
 0x759   : > { %5532 = vrot.lane.b32.xlu0 %v17352_v57, %s13454_s27  ;;  %5889 = vrot.lane.b32.xlu1 %v17053_v38, %s19476_s18  ;;  %v12649_v40 = vpack.c.bf16 %v6910_v22, %v6788_v34 }
 0x75b   : > { %v17363_v14 = vpop.permute.xlu0 %5174  ;;  %v6530_v50 = vpop.permute.xlu1 %6529  ;;  %12650 = vmatprep.subr.bf16.mxu1 %v12649_v40 }
 0x75c   : > { %v5178_v5 = vsel %vm1063_vm4, %v5173_v35, %v17363_v14  ;;  %v6553_v58 = vsel %vm926_vm3, %v6528_v26, %v6530_v50  ;;  %12652 = vmatpush1.bf16.msra.mxu1 %v12651_v48 }
 0x75d   : > { %v17369_v12 = vmax.f32 %v17070_v28, %v5178_v5  ;;  %5891 = vrot.lane.b32.xlu0 %v17263_v13, %s19476_s18  ;;  %6012 = vrot.lane.b32.xlu1 %v17053_v38, %s19478_s30 }
 0x75f   : > { %5184 = vst [vmem:[#allocation4 + $0x80] sm:$0xff] %v17369_v12  ;;  %7477 = vst [vmem:[#allocation2 + $0xc50] sm:$0xff] %v17369_v12  ;;  %v17378_v53 = vpop.permute.xlu0 %6531  ;;  %v6648_v63 = vpop.permute.xlu1 %6647 }
 0x760   : > { %6357 = vst [vmem:[#allocation2 + $0x668] sm:$0xff] %v17369_v12  ;;  %5233 = vst.msk [vmem:[#allocation2 + $0x80] sm:$0xff] %vm5232_vm6, %v17369_v12  ;;  %v6554_v28 = vsel %vm926_vm3, %v6530_v50, %v17378_v53  ;;  %v6671_v46 = vsel %vm5538_vm15, %v6646_v62, %v6648_v63 }
 0x761   : > { %6014 = vrot.lane.b32.xlu0 %v17263_v13, %s19478_s30  ;;  %5649 = vrot.lane.b32.xlu1 %v17343_v30, %s13455_s14  ;;  %v12695_v62 = vpack.c.bf16 %v6671_v46, %v6553_v58 }
 0x763   : > { %v17389_v38 = vpop.permute.xlu0 %6649  ;;  %v7005_v26 = vpop.permute.xlu1 %7004 }
 0x764   : > { %v6672_v60 = vsel %vm5538_vm15, %v6648_v63, %v17389_v38  ;;  %v7032_v7 = vsel %vm19669_vm14, %v17004_v23, %v7005_v26  ;;  %vm19676_vm14 = vmmov %vm19672_vm0 }
 0x765   : > { %5651 = vrot.lane.b32.xlu0 %v17352_v57, %s13455_s14  ;;  %5770 = vrot.lane.b32.xlu1 %v17343_v30, %s19474_s28  ;;  %v12693_v59 = vpack.c.bf16 %v6672_v60, %v6554_v28 }
 0x767   : > { %v7007_v6 = vpop.permute.xlu0 %7006  ;;  %v7128_v24 = vpop.permute.xlu1 %7127  ;;  %12694 = vmatprep.subr.bf16.mxu0 %v12693_v59 }
 0x768   : > { %v7033_v47 = vsel %vm19670_vm2, %v7005_v26, %v7007_v6  ;;  %v7155_v41 = vsel %vm19671_vm12, %v17014_v52, %v7128_v24  ;;  %12696 = vmatpush1.bf16.msra.mxu0 %v12695_v62  ;;  %vm19677_vm2 = vcmask 588800  }
 0x769   : > { %5772 = vrot.lane.b32.xlu0 %v17352_v57, %s19474_s28  ;;  %6135 = vrot.lane.b32.xlu1 %v6088_v61, %s13456_s19  ;;  %v12655_v52 = vpack.c.bf16 %v7155_v41, %v7032_v7  ;;  %vm19678_vm12 = vmmov %vm19677_vm2 }
 0x76b   : > { %v7130_v23 = vpop.permute.xlu0 %7129  ;;  %v6766_v18 = vpop.permute.xlu1 %6765 }
 0x76c   : > { %v7156_v55 = vsel %vm19672_vm0, %v7128_v24, %v7130_v23  ;;  %v6789_v49 = vsel %vm5657_vm8, %v6764_v44, %v6766_v18  ;;  %vm19679_vm0 = vmmov %vm19677_vm2 }
 0x76d   : > { %6137 = vrot.lane.b32.xlu0 %v17263_v13, %s13456_s19  ;;  %6259 = vrot.lane.b32.xlu1 %v6088_v61, %s13457_s20  ;;  %v12653_v8 = vpack.c.bf16 %v7156_v55, %v7033_v47 }
 0x76f   : > { %v17410_v9 = vpop.permute.xlu0 %6767  ;;  %v6886_v43 = vpop.permute.xlu1 %6885  ;;  %12654 = vmatprep.subr.bf16.mxu1 %v12653_v8  ;;  %v8420_v8 = vld [vmem:[#allocation2 + $0xc18] sm:$0xff] }
 0x770   : > { %v6790_v25 = vsel %vm5657_vm8, %v6766_v18, %v17410_v9  ;;  %v6911_v39 = vsel %vm1753_vm10, %v6884_v45, %v6886_v43  ;;  %12656 = vmatpush1.bf16.msra.mxu1 %v12655_v52  ;;  %v8419_v52 = vld [vmem:[#allocation2 + $0xc10] sm:$0xff] }
 0x771   : > { %6261 = vrot.lane.b32.xlu0 %v17263_v13, %s13457_s20  ;;  %5893 = vrot.lane.b32.xlu1 %v17343_v30, %s19476_s18  ;;  %v12699_v22 = vpack.c.bf16 %v6911_v39, %v6789_v49 }
 0x773   : > { %v17419_v44 = vpop.permute.xlu0 %6887  ;;  %v7251_v34 = vpop.permute.xlu1 %7250 }
 0x774   : > { %v6912_v17 = vsel %vm1753_vm10, %v6886_v43, %v17419_v44  ;;  %v7278_v35 = vsel %vm6149_vm7, %v17031_v29, %v7251_v34 }
 0x775   : > { %5895 = vrot.lane.b32.xlu0 %v17352_v57, %s19476_s18  ;;  %6016 = vrot.lane.b32.xlu1 %v17343_v30, %s19478_s30  ;;  %v12697_v45 = vpack.c.bf16 %v6912_v17, %v6790_v25 }
 0x777   : > { %v7253_v40 = vpop.permute.xlu0 %7252  ;;  %v7374_v48 = vpop.permute.xlu1 %7373  ;;  %12698 = vmatprep.subr.bf16.mxu0 %v12697_v45 }
 0x778   : > { %v7279_v50 = vsel %vm6149_vm7, %v7251_v34, %v7253_v40  ;;  %v7401_v5 = vsel %vm6273_vm11, %v17041_v2, %v7374_v48  ;;  %12700 = vmatpush1.bf16.msra.mxu0 %v12699_v22 }
 0x779   : > { %6018 = vrot.lane.b32.xlu0 %v17352_v57, %s19478_s30  ;;  %6415 = vrot.lane.b32.xlu1 %v17263_v13, %s19485_s11  ;;  %v12659_v46 = vpack.c.bf16 %v7401_v5, %v7278_v35 }
 0x77b   : > { %v7376_v29 = vpop.permute.xlu0 %7375  ;;  %v7009_v58 = vpop.permute.xlu1 %7008 }
 0x77c   : > { %v7402_v63 = vsel %vm6273_vm11, %v7374_v48, %v7376_v29  ;;  %v7034_v28 = vsel %vm19673_vm5, %v7007_v6, %v7009_v58 }
 0x77d   : > { %6417 = vrot.lane.b32.xlu0 %v17343_v30, %s19485_s11  ;;  %6139 = vrot.lane.b32.xlu1 %v17343_v30, %s13456_s19  ;;  %v12657_v2 = vpack.c.bf16 %v7402_v63, %v7279_v50 }
 0x77f   : > { %v17442_v26 = vpop.permute.xlu0 %7010  ;;  %v7132_v60 = vpop.permute.xlu1 %7131  ;;  %12658 = vmatprep.subr.bf16.mxu1 %v12657_v2 }
 0x780   : > { %v7035_v7 = vsel %vm19674_vm13, %v7009_v58, %v17442_v26  ;;  %v7157_v59 = vsel %vm19675_vm9, %v7130_v23, %v7132_v60  ;;  %12660 = vmatpush1.bf16.msra.mxu1 %v12659_v46  ;;  %vm19680_vm13 = vmmov %vm19679_vm0 }
 0x781   : > { %6141 = vrot.lane.b32.xlu0 %v17352_v57, %s13456_s19  ;;  %6263 = vrot.lane.b32.xlu1 %v17343_v30, %s13457_s20  ;;  %v12703_v61 = vpack.c.bf16 %v7157_v59, %v7034_v28  ;;  %vm19681_vm9 = vmmov %vm19673_vm5 }
 0x783   : > { %v17451_v62 = vpop.permute.xlu0 %7133  ;;  %v7529_v6 = vpop.permute.xlu1 %7528 }
 0x784   : > { %v7158_v24 = vsel %vm19676_vm14, %v7132_v60, %v17451_v62  ;;  %v7554_v47 = vsel %vm660_vm1, %v17072_v32, %v7529_v6 }
 0x785   : > { %6265 = vrot.lane.b32.xlu0 %v17352_v57, %s13457_s20  ;;  %6533 = vrot.lane.b32.xlu1 %v17263_v13, %s19487_s9  ;;  %v12701_v41 = vpack.c.bf16 %v7158_v24, %v7035_v7  ;;  %v12663_v43 = vpack.c.bf16 %v7554_v47, %v8419_v52  ;;  %v17505_v24 = vld [vmem:[#allocation4 + $0x78] sm:$0xff] }
 0x786   : > { %v8555_v47 = vld [vmem:[#allocation2 + $0xc28] sm:$0xff] }
 0x787   : > { %v7531_v23 = vpop.permute.xlu0 %7530  ;;  %v7255_v18 = vpop.permute.xlu1 %7254  ;;  %12702 = vmatprep.subr.bf16.mxu0 %v12701_v41 }
 0x788   : > { %v7555_v55 = vsel %vm660_vm1, %v7529_v6, %v7531_v23  ;;  %v7280_v49 = vsel %vm6149_vm7, %v7253_v40, %v7255_v18  ;;  %12704 = vmatpush1.bf16.msra.mxu0 %v12703_v61  ;;  %v8554_v61 = vld [vmem:[#allocation2 + $0xc20] sm:$0xff] }
 0x789   : > { %6535 = vrot.lane.b32.xlu0 %v17343_v30, %s19487_s9  ;;  %6651 = vrot.lane.b32.xlu1 %v17263_v13, %s13454_s27  ;;  %v12661_v32 = vpack.c.bf16 %v7555_v55, %v8420_v8 }
 0x78b   : > { %v17467_v25 = vpop.permute.xlu0 %7256  ;;  %v7378_v39 = vpop.permute.xlu1 %7377  ;;  %12662 = vmatprep.subr.bf16.mxu1 %v12661_v32 }
 0x78c   : > { %v7281_v34 = vsel %vm6149_vm7, %v7255_v18, %v17467_v25  ;;  %v7403_v17 = vsel %vm6273_vm11, %v7376_v29, %v7378_v39  ;;  %12664 = vmatpush1.bf16.msra.mxu1 %v12663_v43 }
 0x78d   : > { %6653 = vrot.lane.b32.xlu0 %v17343_v30, %s13454_s27  ;;  %6419 = vrot.lane.b32.xlu1 %v17352_v57, %s19485_s11  ;;  %v12707_v50 = vpack.c.bf16 %v7403_v17, %v7280_v49 }
 0x78f   : > { %v17476_v35 = vpop.permute.xlu0 %7379  ;;  %v7647_v45 = vpop.permute.xlu1 %7646 }
 0x790   : > { %v7404_v22 = vsel %vm6273_vm11, %v7378_v39, %v17476_v35  ;;  %v7672_v40 = vsel %vm926_vm3, %v17103_v42, %v7647_v45 }
 0x791   : > { %6421 = vrot.lane.b32.xlu0 %v17198_v51, %s19485_s11  ;;  %6769 = vrot.lane.b32.xlu1 %v17263_v13, %s13455_s14  ;;  %v12705_v48 = vpack.c.bf16 %v7404_v22, %v7281_v34 }
 0x793   : > { %v7649_v5 = vpop.permute.xlu0 %7648  ;;  %v7765_v29 = vpop.permute.xlu1 %7764  ;;  %12706 = vmatprep.subr.bf16.mxu0 %v12705_v48 }
 0x794   : > { %v7673_v58 = vsel %vm926_vm3, %v7647_v45, %v7649_v5  ;;  %v7790_v63 = vsel %vm5538_vm15, %v17115_v21, %v7765_v29  ;;  %12708 = vmatpush1.bf16.msra.mxu0 %v12707_v50  ;;  %v8649_v45 = vld [vmem:[#allocation2 + $0x50] sm:$0xff]  ;;  %v17540_v50 = vld [vmem:[%s19358_s3 + $0x18] sm:$0xff] }
 0x795   : > { %6771 = vrot.lane.b32.xlu0 %v17343_v30, %s13455_s14  ;;  %6889 = vrot.lane.b32.xlu1 %v17263_v13, %s19474_s28  ;;  %v12667_v46 = vpack.c.bf16 %v7790_v63, %v7672_v40 }
 0x797   : > { %v7767_v42 = vpop.permute.xlu0 %7766  ;;  %v7533_v51 = vpop.permute.xlu1 %7532 }
 0x798   : > { %v7791_v28 = vsel %vm5538_vm15, %v7765_v29, %v7767_v42  ;;  %v7556_v2 = vsel %vm660_vm1, %v7531_v23, %v7533_v51 }
 0x799   : > { %6891 = vrot.lane.b32.xlu0 %v17343_v30, %s19474_s28  ;;  %6537 = vrot.lane.b32.xlu1 %v17352_v57, %s19487_s9  ;;  %v12665_v21 = vpack.c.bf16 %v7791_v28, %v7673_v58  ;;  %v12711_v23 = vpack.c.bf16 %v7556_v2, %v8554_v61 }
 0x79b   : > { %v17499_v60 = vpop.permute.xlu0 %7534  ;;  %v5291_v7 = vpop.permute.xlu1 %5290  ;;  %12666 = vmatprep.subr.bf16.mxu1 %v12665_v21 }
 0x79c   : > { %v7557_v59 = vsel %vm660_vm1, %v7533_v51, %v17499_v60  ;;  %v5312_v6 = vsel %vm660_vm1, %v17149_v1, %v5291_v7  ;;  %12668 = vmatpush1.bf16.msra.mxu1 %v12667_v46 }
 0x79d   : > { %6539 = vrot.lane.b32.xlu0 %v17505_v24, %s19487_s9  ;;  %6655 = vrot.lane.b32.xlu1 %v17352_v57, %s13454_s27  ;;  %v12709_v41 = vpack.c.bf16 %v7557_v59, %v8555_v47  ;;  %v12719_v48 = vpack.c.bf16 %v5312_v6, %v8649_v45  ;;  %v7334_v47 = vld [vmem:[#allocation4 + $0x60] sm:$0xff] }
 0x79f   : > { %v5293_v18 = vpop.permute.xlu0 %5292  ;;  %v7883_v55 = vpop.permute.xlu1 %7882  ;;  %12710 = vmatprep.subr.bf16.mxu0 %v12709_v41 }
 0x7a0   : > { %v5313_v49 = vsel %vm660_vm1, %v5291_v7, %v5293_v18  ;;  %v7908_v1 = vsel %vm5657_vm8, %v17178_v20, %v7883_v55  ;;  %12712 = vmatpush1.bf16.msra.mxu0 %v12711_v23  ;;  %v8650_v20 = vld [vmem:[#allocation2 + $0x58] sm:$0xff] }
 0x7a1   : > { %6657 = vrot.lane.b32.xlu0 %v17505_v24, %s13454_s27  ;;  %7012 = vrot.lane.b32.xlu1 %v17263_v13, %s19476_s18  ;;  %v12717_v39 = vpack.c.bf16 %v5313_v49, %v8650_v20 }
 0x7a3   : > { %v17518_v8 = vpop.permute.xlu0 %7884  ;;  %v7651_v32 = vpop.permute.xlu1 %7650 }
 0x7a4   : > { %v7909_v52 = vsel %vm5657_vm8, %v7883_v55, %v17518_v8  ;;  %v7674_v43 = vsel %vm926_vm3, %v7649_v5, %v7651_v32 }
 0x7a5   : > { %7014 = vrot.lane.b32.xlu0 %v17343_v30, %s19476_s18  ;;  %7135 = vrot.lane.b32.xlu1 %v17263_v13, %s19478_s30 }
 0x7a6   : > { %8477 = vmatprep.subr.mxu1 %v7909_v52 }
 0x7a7   : > { %v17527_v34 = vpop.permute.xlu0 %7652  ;;  %v7769_v17 = vpop.permute.xlu1 %7768  ;;  %8478 = vmatpush1.msra.mxu1 %v7908_v1 }
 0x7a8   : > { %v7675_v22 = vsel %vm926_vm3, %v7651_v32, %v17527_v34  ;;  %v7792_v40 = vsel %vm5538_vm15, %v7767_v42, %v7769_v17  ;;  %12718 = vmatprep.subr.bf16.mxu1 %v12717_v39  ;;  %8494 = vmatmul.mubr.f32.vlgmr.msra.gmra.mrb[14].mxu1 %v17194_v4  ;;  %v17553_v42 = vld [vmem:[%s19358_s3 + $0x10] sm:$0xff] }
 0x7a9   : > { %7137 = vrot.lane.b32.xlu0 %v17343_v30, %s19478_s30  ;;  %6773 = vrot.lane.b32.xlu1 %v17352_v57, %s13455_s14  ;;  %v12715_v28 = vpack.c.bf16 %v7792_v40, %v7674_v43 }
 0x7aa   : > { %12720 = vmatpush1.bf16.msra.mxu1 %v12719_v48  ;;  %11424 = vmatprep.mubr.msk.f32.mxu1 %vm19677_vm2, %v17540_v50  ;;  %vm19682_vm2 = vmmov %vm19676_vm14 }
 0x7ab   : > { %v17544_v5 = vpop.permute.xlu0 %7770  ;;  %v5409_v29 = vpop.permute.xlu1 %5408 }
 0x7ac   : > { %v7793_v58 = vsel %vm5538_vm15, %v7769_v17, %v17544_v5  ;;  %v5430_v63 = vsel %vm926_vm3, %v17210_v33, %v5409_v29  ;;  %8500 = vmatmul.mubr.f32.gmra.mrb[16].mxu1 %v17553_v42 }
 0x7ad   : > { %6775 = vrot.lane.b32.xlu0 %v17505_v24, %s13455_s14  ;;  %6893 = vrot.lane.b32.xlu1 %v17352_v57, %s19474_s28  ;;  %v12713_v51 = vpack.c.bf16 %v7793_v58, %v7675_v22 }
 0x7ae   : > { %11427 = vmatprep.mubr.msk.f32.mxu1 %vm19678_vm12, %v17128_v54  ;;  %vm19683_vm12 = vmmov %vm19673_vm5 }
 0x7af   : > { %v5411_v2 = vpop.permute.xlu0 %5410  ;;  %v5527_v33 = vpop.permute.xlu1 %5526  ;;  %12714 = vmatprep.subr.bf16.mxu0 %v12713_v51 }
 0x7b0   : > { %v5431_v21 = vsel %vm926_vm3, %v5409_v29, %v5411_v2  ;;  %v5549_v46 = vsel %vm5538_vm15, %v17223_v31, %v5527_v33  ;;  %12716 = vmatpush1.bf16.msra.mxu0 %v12715_v28 }
 0x7b1   : > { %6895 = vrot.lane.b32.xlu0 %v17505_v24, %s19474_s28  ;;  %7258 = vrot.lane.b32.xlu1 %v17263_v13, %s13456_s19  ;;  %v12723_v41 = vpack.c.bf16 %v5549_v46, %v5430_v63  ;;  %v8784_v63 = vld [vmem:[#allocation2 + $0x60] sm:$0xff] }
 0x7b3   : > { %v5529_v7 = vpop.permute.xlu0 %5528  ;;  %v5295_v59 = vpop.permute.xlu1 %5294 }
 0x7b4   : > { %v5550_v6 = vsel %vm5538_vm15, %v5527_v33, %v5529_v7  ;;  %v5314_v54 = vsel %vm660_vm1, %v5293_v18, %v5295_v59 }
 0x7b5   : > { %7260 = vrot.lane.b32.xlu0 %v17343_v30, %s13456_s19  ;;  %7381 = vrot.lane.b32.xlu1 %v7334_v47, %s13457_s20  ;;  %v12721_v31 = vpack.c.bf16 %v5550_v6, %v5431_v21  ;;  %v17636_v6 = vld [vmem:[%s19358_s3 + $0x8] sm:$0xff] }
 0x7b7   : > { %v17574_v61 = vpop.permute.xlu0 %5296  ;;  %v5646_v23 = vpop.permute.xlu1 %5645  ;;  %12722 = vmatprep.subr.bf16.mxu1 %v12721_v31 }
 0x7b8   : > { %v5315_v13 = vsel %vm660_vm1, %v5295_v59, %v17574_v61  ;;  %v5668_v55 = vsel %vm5657_vm8, %v17247_v56, %v5646_v23  ;;  %12724 = vmatpush1.bf16.msra.mxu1 %v12723_v41 }
 0x7b9   : > { %7383 = vrot.lane.b32.xlu0 %v17343_v30, %s13457_s20  ;;  %7016 = vrot.lane.b32.xlu1 %v17352_v57, %s19476_s18 }
 0x7bb   : > { %v5648_v18 = vpop.permute.xlu0 %5647  ;;  %v5767_v49 = vpop.permute.xlu1 %5766 }
 0x7bc   : > { %v5669_v1 = vsel %vm5657_vm8, %v5646_v23, %v5648_v18  ;;  %v5790_v32 = vsel %vm1753_vm10, %v17257_v3, %v5767_v49 }
 0x7bd   : > { %7018 = vrot.lane.b32.xlu0 %v17505_v24, %s19476_s18  ;;  %7139 = vrot.lane.b32.xlu1 %v17352_v57, %s19478_s30  ;;  %v12727_v39 = vpack.c.bf16 %v5790_v32, %v5668_v55 }
 0x7bf   : > { %v17591_v56 = vpop.permute.xlu0 %5768  ;;  %v7887_v52 = vpop.permute.xlu1 %7886 }
 0x7c0   : > { %v5791_v43 = vsel %vm1753_vm10, %v5767_v49, %v17591_v56  ;;  %v7910_v20 = vsel %vm5657_vm8, %v17518_v8, %v7887_v52  ;;  %v8785_v8 = vld [vmem:[#allocation2 + $0x68] sm:$0xff] }
 0x7c1   : > { %7141 = vrot.lane.b32.xlu0 %v17505_v24, %s19478_s30  ;;  %7536 = vrot.lane.b32.xlu1 %v17343_v30, %s19485_s11  ;;  %v12725_v3 = vpack.c.bf16 %v5791_v43, %v5669_v1  ;;  %v12765_v48 = vpack.c.bf16 %v5315_v13, %v8785_v8 }
 0x7c3   : > { %v17601_v17 = vpop.permute.xlu0 %7888  ;;  %v5413_v45 = vpop.permute.xlu1 %5412  ;;  %12726 = vmatprep.subr.bf16.mxu1 %v12725_v3 }
 0x7c4   : > { %v7911_v22 = vsel %vm5657_vm8, %v7887_v52, %v17601_v17  ;;  %v5432_v40 = vsel %vm926_vm3, %v5411_v2, %v5413_v45  ;;  %12728 = vmatpush1.bf16.msra.mxu1 %v12727_v39  ;;  %v12767_v2 = vpack.c.bf16 %v5314_v54, %v8784_v63 }
 0x7c5   : > { %7538 = vrot.lane.b32.xlu0 %v17352_v57, %s19485_s11  ;;  %7262 = vrot.lane.b32.xlu1 %v17352_v57, %s13456_s19 }
 0x7c6   : > { %8612 = vmatprep.subr.mxu0 %v7911_v22 }
 0x7c7   : > { %v17610_v29 = vpop.permute.xlu0 %5414  ;;  %v5531_v58 = vpop.permute.xlu1 %5530  ;;  %8613 = vmatpush1.msra.mxu0 %v7910_v20 }
 0x7c8   : > { %v5433_v51 = vsel %vm926_vm3, %v5413_v45, %v17610_v29  ;;  %v5551_v28 = vsel %vm5538_vm15, %v5529_v7, %v5531_v58  ;;  %12766 = vmatprep.subr.bf16.mxu0 %v12765_v48  ;;  %8629 = vmatmul.mubr.f32.vlgmr.msra.gmra.mrb[18].mxu0 %v17194_v4 }
 0x7c9   : > { %7264 = vrot.lane.b32.xlu0 %v17505_v24, %s13456_s19  ;;  %7385 = vrot.lane.b32.xlu1 %v17352_v57, %s13457_s20  ;;  %v12771_v59 = vpack.c.bf16 %v5551_v28, %v5432_v40 }
 0x7ca   : > { %12768 = vmatpush1.bf16.msra.mxu0 %v12767_v2  ;;  %11426 = vmatprep.mubr.msk.f32.mxu0 %vm19679_vm0, %v17540_v50  ;;  %vm19684_vm0 = vmmov %vm19673_vm5 }
 0x7cb   : > { %v17622_v33 = vpop.permute.xlu0 %5532  ;;  %v5890_v21 = vpop.permute.xlu1 %5889 }
 0x7cc   : > { %v5552_v46 = vsel %vm5538_vm15, %v5531_v58, %v17622_v33  ;;  %v5913_v4 = vsel %vm19673_vm5, %v17280_v0, %v5890_v21  ;;  %8635 = vmatmul.mubr.f32.gmra.mrb[20].mxu0 %v17553_v42  ;;  %vm19685_vm5 = vmmov %vm19682_vm2 }
 0x7cd   : > { %7387 = vrot.lane.b32.xlu0 %v17505_v24, %s13457_s20  ;;  %7654 = vrot.lane.b32.xlu1 %v17343_v30, %s19487_s9  ;;  %v12769_v7 = vpack.c.bf16 %v5552_v46, %v5433_v51  ;;  %v17691_v46 = vld [vmem:[#allocation4 + $0x80] sm:$0xff] }
 0x7ce   : > { %11429 = vmatprep.mubr.msk.f32.mxu0 %vm19680_vm13, %v17636_v6  ;;  %vm19686_vm13 = vmmov %vm19682_vm2 }
 0x7cf   : > { %v5892_v54 = vpop.permute.xlu0 %5891  ;;  %v6013_v0 = vpop.permute.xlu1 %6012  ;;  %12770 = vmatprep.subr.bf16.mxu0 %v12769_v7 }
 0x7d0   : > { %v5914_v47 = vsel %vm19681_vm9, %v5890_v21, %v5892_v54  ;;  %v6036_v31 = vsel %vm19676_vm14, %v17289_v16, %v6013_v0  ;;  %12772 = vmatpush1.bf16.msra.mxu0 %v12771_v59  ;;  %vm19687_vm9 = vmmov %vm19684_vm0 }
 0x7d1   : > { %7656 = vrot.lane.b32.xlu0 %v17352_v57, %s19487_s9  ;;  %7772 = vrot.lane.b32.xlu1 %v17343_v30, %s13454_s27  ;;  %v12731_v49 = vpack.c.bf16 %v6036_v31, %v5913_v4  ;;  %v17693_v4 = vld [vmem:[#allocation3 + $0x90] sm:$0xff]  ;;  %vm19688_vm14 = vmmov %vm19684_vm0 }
 0x7d3   : > { %v6015_v41 = vpop.permute.xlu0 %6014  ;;  %v5650_v23 = vpop.permute.xlu1 %5649 }
 0x7d4   : > { %v6037_v13 = vsel %vm19682_vm2, %v6013_v0, %v6015_v41  ;;  %v5670_v55 = vsel %vm5657_vm8, %v5648_v18, %v5650_v23 }
 0x7d5   : > { %7774 = vrot.lane.b32.xlu0 %v17352_v57, %s13454_s27  ;;  %7540 = vrot.lane.b32.xlu1 %v17505_v24, %s19485_s11  ;;  %v12729_v16 = vpack.c.bf16 %v6037_v13, %v5914_v47 }
 0x7d7   : > { %v17653_v1 = vpop.permute.xlu0 %5651  ;;  %v5771_v32 = vpop.permute.xlu1 %5770  ;;  %12730 = vmatprep.subr.bf16.mxu1 %v12729_v16 }
 0x7d8   : > { %v5671_v52 = vsel %vm5657_vm8, %v5650_v23, %v17653_v1  ;;  %v5792_v43 = vsel %vm1753_vm10, %v17591_v56, %v5771_v32  ;;  %12732 = vmatpush1.bf16.msra.mxu1 %v12731_v49  ;;  %v8670_v49 = vld [vmem:[#allocation2 + $0x648] sm:$0xff] }
 0x7d9   : > { %7542 = vrot.lane.b32.xlu0 %v17369_v12, %s19485_s11  ;;  %7890 = vrot.lane.b32.xlu1 %v17343_v30, %s13455_s14  ;;  %v12775_v45 = vpack.c.bf16 %v5792_v43, %v5670_v55 }
 0x7db   : > { %v17663_v18 = vpop.permute.xlu0 %5772  ;;  %v6136_v20 = vpop.permute.xlu1 %6135 }
 0x7dc   : > { %v5793_v3 = vsel %vm1753_vm10, %v5771_v32, %v17663_v18  ;;  %v6160_v39 = vsel %vm6149_vm7, %v17305_v37, %v6136_v20  ;;  %v8669_v32 = vld [vmem:[#allocation2 + $0x640] sm:$0xff] }
 0x7dd   : > { %7892 = vrot.lane.b32.xlu0 %v17352_v57, %s13455_s14  ;;  %7658 = vrot.lane.b32.xlu1 %v17505_v24, %s19487_s9  ;;  %v12773_v56 = vpack.c.bf16 %v5793_v3, %v5671_v52 }
 0x7df   : > { %v6138_v22 = vpop.permute.xlu0 %6137  ;;  %v6260_v40 = vpop.permute.xlu1 %6259  ;;  %12774 = vmatprep.subr.bf16.mxu0 %v12773_v56 }
 0x7e0   : > { %v6161_v30 = vsel %vm6149_vm7, %v6136_v20, %v6138_v22  ;;  %v6284_v8 = vsel %vm6273_vm11, %v17314_v11, %v6260_v40  ;;  %12776 = vmatpush1.bf16.msra.mxu0 %v12775_v45 }
 0x7e1   : > { %7660 = vrot.lane.b32.xlu0 %v17369_v12, %s19487_s9  ;;  %7776 = vrot.lane.b32.xlu1 %v17505_v24, %s13454_s27  ;;  %v12735_v63 = vpack.c.bf16 %v6284_v8, %v6160_v39 }
 0x7e3   : > { %v6262_v37 = vpop.permute.xlu0 %6261  ;;  %v5894_v57 = vpop.permute.xlu1 %5893 }
 0x7e4   : > { %v6285_v48 = vsel %vm6273_vm11, %v6260_v40, %v6262_v37  ;;  %v5915_v58 = vsel %vm19683_vm12, %v5892_v54, %v5894_v57  ;;  %vm19689_vm12 = vmmov %vm19682_vm2 }
 0x7e5   : > { %7778 = vrot.lane.b32.xlu0 %v17369_v12, %s13454_s27  ;;  %7894 = vrot.lane.b32.xlu1 %v17505_v24, %s13455_s14  ;;  %v12733_v11 = vpack.c.bf16 %v6285_v48, %v6161_v30  ;;  %v7956_v12 = vld [vmem:[%s19359_s4] sm:$0xff]  ;;  %v13359_v24 = vld [vmem:[#allocation3 + $0x90] sm:$0xff] }
 0x7e6   : > { %v5168_v7 = vmax.f32 %v13359_v24, %v16788_v27 }
 0x7e7   : > { %v17686_v51 = vpop.permute.xlu0 %5895  ;;  %v6017_v28 = vpop.permute.xlu1 %6016  ;;  %12734 = vmatprep.subr.bf16.mxu1 %v12733_v11 }
 0x7e8   : > { %v5916_v2 = vsel %vm19684_vm0, %v5894_v57, %v17686_v51  ;;  %v6038_v21 = vsel %vm19685_vm5, %v6015_v41, %v6017_v28  ;;  %12736 = vmatpush1.bf16.msra.mxu1 %v12735_v63  ;;  %v7957_v41 = vld [vmem:[%s19359_s4 + $0x8] sm:$0xff]  ;;  %v17735_v11 = vpop.f32.mrb[10].mxu0  ;;  %v17739_v63 = vpop.f32.mrb[10].mxu1  ;;  %vm19690_vm5 = vmmov %vm19684_vm0 }
 0x7e9   : > { %7896 = vrot.lane.b32.xlu0 %v17691_v46, %s13455_s14  ;;  %5188 = vrot.lane.b32.xlu1 %v17693_v4, %s19484_s12  ;;  %v12779_v23 = vpack.c.bf16 %v6038_v21, %v5915_v58  ;;  %s19769_s12 = sld [smem:[#allocation11_spill]] }
 0x7eb   : > { %v17703_v59 = vpop.permute.xlu0 %6018  ;;  %v6416_v54 = vpop.permute.xlu1 %6415 }
 0x7ec   : > { %v6039_v0 = vsel %vm19686_vm13, %v6017_v28, %v17703_v59  ;;  %v6437_v47 = vsel %vm660_vm1, %v17337_v10, %v6416_v54  ;;  %vm19691_vm13 = vmmov %vm19682_vm2 }
 0x7ed   : > { %5176 = vrot.lane.b32.xlu0 %v5168_v7, %s19469_s16  ;;  %8010 = vperm.xlu1 %13224, %v7956_v12   ;;  %v12777_v31 = vpack.c.bf16 %v6039_v0, %v5916_v2  ;;  %v12739_v52 = vpack.c.bf16 %v6437_v47, %v8669_v32 }
 0x7ef   : > { %v6418_v13 = vpop.permute.xlu0 %6417  ;;  %v6140_v27 = vpop.permute.xlu1 %6139  ;;  %12778 = vmatprep.subr.bf16.mxu0 %v12777_v31  ;;  %v8805_v31 = vld [vmem:[#allocation2 + $0x658] sm:$0xff] }
 0x7f0   : > { %v6438_v55 = vsel %vm660_vm1, %v6416_v54, %v6418_v13  ;;  %v6162_v16 = vsel %vm6149_vm7, %v6138_v22, %v6140_v27  ;;  %12780 = vmatpush1.bf16.msra.mxu0 %v12779_v23  ;;  %v8804_v23 = vld [vmem:[#allocation2 + $0x650] sm:$0xff] }
 0x7f1   : > { %8015 = vperm.xlu1 %13224, %v7957_v41   ;;  %v12737_v10 = vpack.c.bf16 %v6438_v55, %v8670_v49 }
 0x7f3   : > { %v17715_v43 = vpop.permute.xlu0 %6141  ;;  %v6264_v20 = vpop.permute.xlu1 %6263  ;;  %12738 = vmatprep.subr.bf16.mxu1 %v12737_v10 }
 0x7f4   : > { %v6163_v3 = vsel %vm6149_vm7, %v6140_v27, %v17715_v43  ;;  %v6286_v39 = vsel %vm6273_vm11, %v6262_v37, %v6264_v20  ;;  %12740 = vmatpush1.bf16.msra.mxu1 %v12739_v52 }
 0x7f5   : > { %5418 = vrot.lane.b32.xlu1 %v17691_v46, %s19487_s9  ;;  %v12783_v8 = vpack.c.bf16 %v6286_v39, %v6162_v16 }
 0x7f7   : > { %v17722_v56 = vpop.permute.xlu0 %6265  ;;  %v6534_v45 = vpop.permute.xlu1 %6533 }
 0x7f8   : > { %v6287_v22 = vsel %vm6273_vm11, %v6264_v20, %v17722_v56  ;;  %v6555_v40 = vsel %vm926_vm3, %v17378_v53, %v6534_v45  ;;  %v17737_v53 = vpop.f32.mrb[11].mxu0 }
 0x7f9   : > { %5776 = vrot.lane.b32.xlu1 %v17691_v46, %s19474_s28  ;;  %v12781_v30 = vpack.c.bf16 %v6287_v22, %v6163_v3 }
 0x7fb   : > { %v6536_v57 = vpop.permute.xlu0 %6535  ;;  %v6652_v37 = vpop.permute.xlu1 %6651  ;;  %12782 = vmatprep.subr.bf16.mxu0 %v12781_v30 }
 0x7fc   : > { %v6556_v48 = vsel %vm926_vm3, %v6534_v45, %v6536_v57  ;;  %v6673_v58 = vsel %vm5538_vm15, %v17389_v38, %v6652_v37  ;;  %12784 = vmatpush1.bf16.msra.mxu0 %v12783_v8 }
 0x7fd   : > { %5655 = vrot.lane.b32.xlu1 %v17691_v46, %s13455_s14  ;;  %v12743_v7 = vpack.c.bf16 %v6673_v58, %v6555_v40  ;;  %v17765_v58 = vpop.f32.mrb[11].mxu1 }
 0x7ff   : > { %v6654_v28 = vpop.permute.xlu0 %6653  ;;  %v6420_v2 = vpop.permute.xlu1 %6419 }
 0x800   : > { %v6674_v21 = vsel %vm5538_vm15, %v6652_v37, %v6654_v28  ;;  %v6439_v12 = vsel %vm660_vm1, %v6418_v13, %v6420_v2 }
 0x801   : > { %v12741_v24 = vpack.c.bf16 %v6674_v21, %v6556_v48  ;;  %v12787_v27 = vpack.c.bf16 %v6439_v12, %v8804_v23 }
 0x803   : > { %v17743_v54 = vpop.permute.xlu0 %6421  ;;  %v6770_v38 = vpop.permute.xlu1 %6769  ;;  %12742 = vmatprep.subr.bf16.mxu1 %v12741_v24 }
 0x804   : > { %v6440_v0 = vsel %vm660_vm1, %v6420_v2, %v17743_v54  ;;  %v6791_v47 = vsel %vm5657_vm8, %v17410_v9, %v6770_v38  ;;  %12744 = vmatpush1.bf16.msra.mxu1 %v12743_v7 }
 0x805   : > { %v12785_v41 = vpack.c.bf16 %v6440_v0, %v8805_v31 }
 0x807   : > { %v6772_v55 = vpop.permute.xlu0 %6771  ;;  %v6890_v16 = vpop.permute.xlu1 %6889  ;;  %12786 = vmatprep.subr.bf16.mxu0 %v12785_v41 }
 0x808   : > { %v6792_v13 = vsel %vm5657_vm8, %v6770_v38, %v6772_v55  ;;  %v6913_v49 = vsel %vm1753_vm10, %v17419_v44, %v6890_v16  ;;  %12788 = vmatpush1.bf16.msra.mxu0 %v12787_v27 }
 0x809   : > { %v12747_v3 = vpack.c.bf16 %v6913_v49, %v6791_v47 }
 0x80b   : > { %v6892_v10 = vpop.permute.xlu0 %6891  ;;  %v6538_v32 = vpop.permute.xlu1 %6537 }
 0x80c   : > { %v6914_v52 = vsel %vm1753_vm10, %v6890_v16, %v6892_v10  ;;  %v6557_v9 = vsel %vm926_vm3, %v6536_v57, %v6538_v32 }
 0x80d   : > { %v12745_v20 = vpack.c.bf16 %v6914_v52, %v6792_v13 }
 0x80f   : > { %v17754_v39 = vpop.permute.xlu0 %6539  ;;  %v6656_v45 = vpop.permute.xlu1 %6655  ;;  %12746 = vmatprep.subr.bf16.mxu1 %v12745_v20 }
 0x810   : > { %v6558_v22 = vsel %vm926_vm3, %v6538_v32, %v17754_v39  ;;  %v6675_v40 = vsel %vm5538_vm15, %v6654_v28, %v6656_v45  ;;  %12748 = vmatpush1.bf16.msra.mxu1 %v12747_v3 }
 0x811   : > { %v12791_v48 = vpack.c.bf16 %v6675_v40, %v6557_v9 }
 0x813   : > { %v17759_v44 = vpop.permute.xlu0 %6657  ;;  %v7013_v30 = vpop.permute.xlu1 %7012 }
 0x814   : > { %v6676_v8 = vsel %vm5538_vm15, %v6656_v45, %v17759_v44  ;;  %v7036_v57 = vsel %vm19687_vm9, %v17442_v26, %v7013_v30  ;;  %vm19692_vm9 = vmmov %vm19682_vm2 }
 0x815   : > { %v12789_v37 = vpack.c.bf16 %v6676_v8, %v6558_v22 }
 0x817   : > { %v7015_v2 = vpop.permute.xlu0 %7014  ;;  %v7136_v21 = vpop.permute.xlu1 %7135  ;;  %12790 = vmatprep.subr.bf16.mxu0 %v12789_v37 }
 0x818   : > { %v7037_v12 = vsel %vm19688_vm14, %v7013_v30, %v7015_v2  ;;  %v7159_v28 = vsel %vm19682_vm2, %v17451_v62, %v7136_v21  ;;  %12792 = vmatpush1.bf16.msra.mxu0 %v12791_v48  ;;  %vm19694_vm14 = vcmask 588800  }
 0x819   : > { %v12751_v47 = vpack.c.bf16 %v7159_v28, %v7036_v57  ;;  %vm19696_vm2 = vmmov %vm19694_vm14 }
 0x81b   : > { %v7138_v24 = vpop.permute.xlu0 %7137  ;;  %v6774_v7 = vpop.permute.xlu1 %6773 }
 0x81c   : > { %v7160_v38 = vsel %vm19689_vm12, %v7136_v21, %v7138_v24  ;;  %v6793_v0 = vsel %vm5657_vm8, %v6772_v55, %v6774_v7  ;;  %vm19698_vm12 = vmmov %vm19696_vm2 }
 0x81d   : > { %v12749_v26 = vpack.c.bf16 %v7160_v38, %v7037_v12 }
 0x81f   : > { %v17772_v31 = vpop.permute.xlu0 %6775  ;;  %v6894_v41 = vpop.permute.xlu1 %6893  ;;  %12750 = vmatprep.subr.bf16.mxu1 %v12749_v26 }
 0x820   : > { %v6794_v23 = vsel %vm5657_vm8, %v6774_v7, %v17772_v31  ;;  %v6915_v27 = vsel %vm1753_vm10, %v6892_v10, %v6894_v41  ;;  %12752 = vmatpush1.bf16.msra.mxu1 %v12751_v47 }
 0x821   : > { %v12795_v32 = vpack.c.bf16 %v6915_v27, %v6793_v0 }
 0x823   : > { %v17777_v62 = vpop.permute.xlu0 %6895  ;;  %v7259_v16 = vpop.permute.xlu1 %7258 }
 0x824   : > { %v6916_v13 = vsel %vm1753_vm10, %v6894_v41, %v17777_v62  ;;  %v7282_v55 = vsel %vm6149_vm7, %v17467_v25, %v7259_v16 }
 0x825   : > { %v12793_v49 = vpack.c.bf16 %v6916_v13, %v6794_v23  ;;  %v8689_v23 = vld [vmem:[#allocation2 + $0xc30] sm:$0xff] }
 0x827   : > { %v7261_v52 = vpop.permute.xlu0 %7260  ;;  %v7382_v9 = vpop.permute.xlu1 %7381  ;;  %12794 = vmatprep.subr.bf16.mxu0 %v12793_v49 }
 0x828   : > { %v7283_v20 = vsel %vm6149_vm7, %v7259_v16, %v7261_v52  ;;  %v7405_v10 = vsel %vm6273_vm11, %v17476_v35, %v7382_v9  ;;  %12796 = vmatpush1.bf16.msra.mxu0 %v12795_v32 }
 0x829   : > { %v12755_v8 = vpack.c.bf16 %v7405_v10, %v7282_v55 }
 0x82b   : > { %v7384_v3 = vpop.permute.xlu0 %7383  ;;  %v7017_v45 = vpop.permute.xlu1 %7016 }
 0x82c   : > { %v7406_v22 = vsel %vm6273_vm11, %v7382_v9, %v7384_v3  ;;  %v7038_v40 = vsel %vm19684_vm0, %v7015_v2, %v7017_v45  ;;  %vm5197_vm0 = vcmask 605184  }
 0x82d   : > { %v12753_v30 = vpack.c.bf16 %v7406_v22, %v7283_v20 }
 0x82f   : > { %v17788_v25 = vpop.permute.xlu0 %7018  ;;  %v7140_v57 = vpop.permute.xlu1 %7139  ;;  %12754 = vmatprep.subr.bf16.mxu1 %v12753_v30 }
 0x830   : > { %v7039_v37 = vsel %vm19690_vm5, %v7017_v45, %v17788_v25  ;;  %v7161_v48 = vsel %vm19691_vm13, %v7138_v24, %v7140_v57  ;;  %12756 = vmatpush1.bf16.msra.mxu1 %v12755_v8  ;;  %v8690_v24 = vld [vmem:[#allocation2 + $0xc38] sm:$0xff]  ;;  %vm19700_vm13 = vmmov %vm19692_vm9 }
 0x831   : > { %v12799_v7 = vpack.c.bf16 %v7161_v48, %v7038_v40 }
 0x833   : > { %v17793_v35 = vpop.permute.xlu0 %7141  ;;  %v7537_v21 = vpop.permute.xlu1 %7536 }
 0x834   : > { %v7162_v12 = vsel %vm19692_vm9, %v7140_v57, %v17793_v35  ;;  %v7558_v2 = vsel %vm660_vm1, %v17499_v60, %v7537_v21 }
 0x835   : > { %v12797_v28 = vpack.c.bf16 %v7162_v12, %v7039_v37  ;;  %v12759_v27 = vpack.c.bf16 %v7558_v2, %v8689_v23 }
 0x837   : > { %v7539_v38 = vpop.permute.xlu0 %7538  ;;  %v7263_v0 = vpop.permute.xlu1 %7262  ;;  %12798 = vmatprep.subr.bf16.mxu0 %v12797_v28 }
 0x838   : > { %v7559_v26 = vsel %vm660_vm1, %v7537_v21, %v7539_v38  ;;  %v7284_v47 = vsel %vm6149_vm7, %v7261_v52, %v7263_v0  ;;  %12800 = vmatpush1.bf16.msra.mxu0 %v12799_v7 }
 0x839   : > { %v12757_v41 = vpack.c.bf16 %v7559_v26, %v8690_v24 }
 0x83b   : > { %v17801_v16 = vpop.permute.xlu0 %7264  ;;  %v7386_v13 = vpop.permute.xlu1 %7385  ;;  %12758 = vmatprep.subr.bf16.mxu1 %v12757_v41 }
 0x83c   : > { %v7285_v60 = vsel %vm6149_vm7, %v7263_v0, %v17801_v16  ;;  %v7407_v55 = vsel %vm6273_vm11, %v7384_v3, %v7386_v13  ;;  %12760 = vmatpush1.bf16.msra.mxu1 %v12759_v27  ;;  %v8824_v0 = vld [vmem:[#allocation2 + $0xc40] sm:$0xff] }
 0x83d   : > { %v12803_v10 = vpack.c.bf16 %v7407_v55, %v7284_v47  ;;  %v8096_v55 = vpop.f32.mrb[12].mxu0 }
 0x83f   : > { %v17806_v49 = vpop.permute.xlu0 %7387  ;;  %v7655_v32 = vpop.permute.xlu1 %7654 }
 0x840   : > { %v7408_v52 = vsel %vm6273_vm11, %v7386_v13, %v17806_v49  ;;  %v7676_v9 = vsel %vm926_vm3, %v17527_v34, %v7655_v32 }
 0x841   : > { %v12801_v20 = vpack.c.bf16 %v7408_v52, %v7285_v60  ;;  %v8098_v52 = vpop.f32.mrb[13].mxu0 }
 0x843   : > { %v7657_v45 = vpop.permute.xlu0 %7656  ;;  %v7773_v22 = vpop.permute.xlu1 %7772  ;;  %12802 = vmatprep.subr.bf16.mxu0 %v12801_v20 }
 0x844   : > { %v7677_v40 = vsel %vm926_vm3, %v7655_v32, %v7657_v45  ;;  %v7794_v3 = vsel %vm5538_vm15, %v17544_v5, %v7773_v22  ;;  %12804 = vmatpush1.bf16.msra.mxu0 %v12803_v10  ;;  %v8825_v5 = vld [vmem:[#allocation2 + $0xc48] sm:$0xff]  ;;  %v8231_v32 = vpop.f32.mrb[12].mxu1 }
 0x845   : > { %v12763_v21 = vpack.c.bf16 %v7794_v3, %v7676_v9  ;;  %v8233_v9 = vpop.f32.mrb[13].mxu1 }
 0x847   : > { %v7775_v30 = vpop.permute.xlu0 %7774  ;;  %v7541_v8 = vpop.permute.xlu1 %7540 }
 0x848   : > { %v7795_v57 = vsel %vm5538_vm15, %v7773_v22, %v7775_v30  ;;  %v7560_v37 = vsel %vm660_vm1, %v7539_v38, %v7541_v8 }
 0x849   : > { %v12761_v48 = vpack.c.bf16 %v7795_v57, %v7677_v40  ;;  %v12807_v26 = vpack.c.bf16 %v7560_v37, %v8824_v0  ;;  %v8360_v40 = vpop.f32.mrb[14].mxu0 }
 0x84b   : > { %v17817_v34 = vpop.permute.xlu0 %7542  ;;  %v7891_v12 = vpop.permute.xlu1 %7890  ;;  %12762 = vmatprep.subr.bf16.mxu1 %v12761_v48 }
 0x84c   : > { %v7561_v2 = vsel %vm660_vm1, %v7541_v8, %v17817_v34  ;;  %v7912_v28 = vsel %vm5657_vm8, %v17601_v17, %v7891_v12  ;;  %12764 = vmatpush1.bf16.msra.mxu1 %v12763_v21  ;;  %v13360_v17 = vld [vmem:[%s19358_s3] sm:$0xff] }
 0x84d   : > { %v12805_v7 = vpack.c.bf16 %v7561_v2, %v8825_v5 }
 0x84f   : > { %v7893_v47 = vpop.permute.xlu0 %7892  ;;  %v7659_v24 = vpop.permute.xlu1 %7658  ;;  %12806 = vmatprep.subr.bf16.mxu0 %v12805_v7 }
 0x850   : > { %v7913_v38 = vsel %vm5657_vm8, %v7891_v12, %v7893_v47  ;;  %v7678_v41 = vsel %vm926_vm3, %v7657_v45, %v7659_v24  ;;  %12808 = vmatpush1.bf16.msra.mxu0 %v12807_v26 }
 0x851   : > { %8747 = vmatprep.subr.mxu1 %v7913_v38 }
 0x852   : > { %8748 = vmatpush1.msra.mxu1 %v7912_v28 }
 0x853   : > { %v17825_v23 = vpop.permute.xlu0 %7660  ;;  %v7777_v27 = vpop.permute.xlu1 %7776  ;;  %8764 = vmatmul.mubr.f32.vlgmr.msra.gmra.mrb[18].mxu1 %v13360_v17 }
 0x854   : > { %19693 = vst [vmem:[#allocation19_spill] sm:$0xff] %v17825_v23  ;;  %v7679_v13 = vsel %vm926_vm3, %v7659_v24, %v17825_v23  ;;  %v7796_v60 = vsel %vm5538_vm15, %v7775_v30, %v7777_v27  ;;  %11428 = vmatprep.mubr.msk.f32.mxu1 %vm19694_vm14, %v17540_v50  ;;  %v8362_v30 = vpop.f32.mrb[15].mxu0  ;;  %vm19718_vm14 = vmmov %vm19692_vm9 }
 0x855   : > { %v12811_v8 = vpack.c.bf16 %v7796_v60, %v7678_v41 }
 0x857   : > { %v17835_v20 = vpop.permute.xlu0 %7778  ;;  %v7895_v10 = vpop.permute.xlu1 %7894  ;;  %8770 = vmatmul.mubr.f32.gmra.mrb[20].mxu1 %v17553_v42 }
 0x858   : > { %19695 = vst [vmem:[#allocation20_spill] sm:$0xff] %v17835_v20  ;;  %v7797_v45 = vsel %vm5538_vm15, %v7777_v27, %v17835_v20  ;;  %v7914_v22 = vsel %vm5657_vm8, %v7893_v47, %v7895_v10  ;;  %11431 = vmatprep.mubr.msk.f32.mxu1 %vm19696_vm2, %v17636_v6 }
 0x859   : > { %v12809_v3 = vpack.c.bf16 %v7797_v45, %v7679_v13 }
 0x85b   : > { %v17843_v57 = vpop.permute.xlu0 %7896  ;;  %v5189_v37 = vpop.permute.xlu1 %5188  ;;  %12810 = vmatprep.subr.bf16.mxu0 %v12809_v3 }
 0x85c   : > { %19697 = vst [vmem:[#allocation21_spill] sm:$0xff] %v17843_v57  ;;  %v7915_v48 = vsel %vm5657_vm8, %v7895_v10, %v17843_v57  ;;  %v17848_v21 = vmax.f32 %v17693_v4, %v5189_v37  ;;  %12812 = vmatpush1.bf16.msra.mxu0 %v12811_v8 }
 0x85d   : > { %8882 = vmatprep.subr.mxu0 %v7915_v48 }
 0x85e   : > { %5193 = vrot.lane.b32.xlu0 %v17848_v21, %s19469_s16 }
 0x85f   : > { %v5177_v12 = vpop.permute.xlu0 %5176 }
 0x860   : > { %v5179_v2 = vsel %vm1063_vm4, %v17363_v14, %v5177_v12  ;;  %8883 = vmatpush1.msra.mxu0 %v7914_v22  ;;  %vm19699_vm4 = vmmov %vm19696_vm2 }
 0x861   : > { %v17855_v28 = vmax.f32 %v17084_v19, %v5179_v2  ;;  %8899 = vmatmul.mubr.f32.vlgmr.msra.gmra.mrb[22].mxu0 %v13360_v17  ;;  %12861 = vmatprep.subr.bf16.mxu0 %v19437_v36  ;;  %v8366_v19 = vpop.f32.mrb[16].mxu0  ;;  %v17925_v17 = vld [vmem:[#allocation4 + $0x78] sm:$0xff]  ;;  %vm19719_vm2 = vmmov %vm19690_vm5 }
 0x862   : > { %5300 = vrot.lane.b32.xlu0 %v17691_v46, %s19485_s11  ;;  %11430 = vmatprep.mubr.msk.f32.mxu0 %vm19698_vm12, %v17540_v50  ;;  %v8368_v50 = vpop.f32.mrb[17].mxu0  ;;  %vm19720_vm12 = vmmov %vm19692_vm9 }
 0x863   : > { %6358 = vst.msk [vmem:[#allocation2 + $0x670] sm:$0xff] %vm5232_vm6, %v17855_v28  ;;  %7478 = vst [vmem:[#allocation2 + $0xc58] sm:$0xff] %v17855_v28  ;;  %5901 = vrot.lane.b32.xlu1 %v17855_v28, %s19476_s18 }
 0x865   : > { %8905 = vmatmul.mubr.f32.gmra.mrb[24].mxu0 %v17553_v42 }
 0x866   : > { %5536 = vrot.lane.b32.xlu0 %v17691_v46, %s13454_s27  ;;  %11433 = vmatprep.mubr.msk.f32.mxu0 %vm19699_vm4, %v17636_v6  ;;  %vm19721_vm4 = vmmov %vm19719_vm2 }
 0x867   : > { %6024 = vrot.lane.b32.xlu1 %v17855_v28, %s19478_s30 }
 0x86a   : > { %5778 = vrot.lane.b32.xlu0 %v17855_v28, %s19474_s28 }
 0x86b   : > { %6147 = vrot.lane.b32.xlu1 %v17855_v28, %s13456_s19 }
 0x86c   : > { %v17878_v14 = vpop.permute.xlu1 %8010 }
 0x86d   : > { %v17882_v42 = vadd.f32 %v17735_v11, %v17878_v14  ;;  %v17886_v6 = vadd.f32 %v17737_v53, %v17878_v14  ;;  %v17890_v4 = vadd.f32 %v17739_v63, %v17878_v14  ;;  %v17894_v5 = vadd.f32 %v17765_v58, %v17878_v14 }
 0x86e   : > { %5899 = vrot.lane.b32.xlu0 %v17691_v46, %s19476_s18  ;;  %v17899_v7 = vadd.f32 %v8360_v40, %v17878_v14  ;;  %v17902_v11 = vadd.f32 %v8362_v30, %v17878_v14 }
 0x86f   : > { %6271 = vrot.lane.b32.xlu1 %v17855_v28, %s13457_s20  ;;  %v19435_v53 = vmax.f32 %v17882_v42, 0.0  ;;  %v19430_v63 = vmax.f32 %v17886_v6, 0.0  ;;  %v19429_v0 = vmax.f32 %v17890_v4, 0.0  ;;  %v19434_v58 = vmax.f32 %v17894_v5, 0.0 }
 0x870   : > { %v17910_v26 = vpop.permute.xlu1 %8015  ;;  %v19433_v24 = vmax.f32 %v17902_v11, 0.0 }
 0x871   : > { %v17915_v38 = vadd.f32 %v8096_v55, %v17910_v26  ;;  %v17918_v41 = vadd.f32 %v8231_v32, %v17910_v26  ;;  %v17921_v27 = vadd.f32 %v8098_v52, %v17910_v26  ;;  %v17928_v13 = vadd.f32 %v8233_v9, %v17910_v26  ;;  %v8919_v32 = vld [vmem:[#allocation2 + $0x70] sm:$0xff] }
 0x872   : > { %6022 = vrot.lane.b32.xlu0 %v17691_v46, %s19478_s30  ;;  %8376 = vst [vmem:[#allocation5 + $0x28] sm:$0xff] %v19433_v24  ;;  %v17933_v60 = vadd.f32 %v8366_v19, %v17910_v26  ;;  %v17936_v55 = vadd.f32 %v8368_v50, %v17910_v26  ;;  %v13230_v10 = vpack.i.bf16 %v19435_v53, %v19434_v58  ;;  %v8920_v53 = vld [vmem:[#allocation2 + $0x78] sm:$0xff] }
 0x873   : > { %5298 = vrot.lane.b32.xlu1 %v17925_v17, %s19485_s11  ;;  %v19436_v45 = vmax.f32 %v17928_v13, 0.0 }
 0x874   : > { %v17943_v9 = vpop.permute.xlu1 %5418  ;;  %v19432_v22 = vmax.f32 %v17933_v60, 0.0  ;;  %v19431_v40 = vmax.f32 %v17936_v55, 0.0 }
 0x875   : > { %5469 = vst.msk [vmem:[#allocation2 + $0x1b0] sm:$0xff] %vm5232_vm6, %v17943_v9  ;;  %8243 = vst [vmem:[#allocation5 + $0xa0] sm:$0xff] %v19436_v45 }
 0x876   : > { %6145 = vrot.lane.b32.xlu0 %v17691_v46, %s13456_s19  ;;  %8377 = vst [vmem:[#allocation5 + $0xa8] sm:$0xff] %v19432_v22  ;;  %8378 = vst [vmem:[#allocation5 + $0xb0] sm:$0xff] %v19431_v40 }
 0x877   : > { %6661 = vrot.lane.b32.xlu1 %v17855_v28, %s13454_s27 }
 0x878   : > { %v17960_v3 = vpop.permute.xlu1 %5776 }
 0x87a   : > { %6269 = vrot.lane.b32.xlu0 %v17691_v46, %s13457_s20  ;;  %v13225_v46 = vpack.i.bf16 %v19429_v0, %v19430_v63 }
 0x87b   : > { %5534 = vrot.lane.b32.xlu1 %v17925_v17, %s13454_s27  ;;  %v8495_v30 = vpop.f32.mrb[14].mxu1 }
 0x87c   : > { %v17966_v8 = vpop.permute.xlu1 %5655  ;;  %v8497_v37 = vpop.f32.mrb[15].mxu1 }
 0x87d   : > { %5707 = vst.msk [vmem:[#allocation2 + $0x2e0] sm:$0xff] %vm5232_vm6, %v17966_v8 }
 0x87e   : > { %6425 = vrot.lane.b32.xlu0 %v17855_v28, %s19485_s11 }
 0x87f   : > { %v8501_v48 = vpop.f32.mrb[16].mxu1 }
 0x880   : > { %v8503_v12 = vpop.f32.mrb[17].mxu1 }
 0x882   : > { %6543 = vrot.lane.b32.xlu0 %v17855_v28, %s19487_s9 }
 0x884   : > { %v9058_v58 = vld [vmem:[#allocation2 + $0x2e0] sm:$0xff] }
 0x886   : > { %5416 = vrot.lane.b32.xlu0 %v17925_v17, %s19487_s9 }
 0x88a   : > { %6899 = vrot.lane.b32.xlu0 %v17855_v28, %s19474_s28 }
 0x88e   : > { %13226 = vrot.lane.b32.xlu0 %v13225_v46, %s19485_s11 }
 0x892   : > { %6779 = vrot.lane.b32.xlu0 %v17855_v28, %s13455_s14 }
 0x896   : > { %5774 = vrot.lane.b32.xlu0 %v17925_v17, %s19474_s28 }
 0x89b   : > { %v8630_v2 = vpop.f32.mrb[18].mxu0 }
 0x89c   : > { %v17988_v19 = vadd.f32 %v8630_v2, %v17878_v14  ;;  %v8632_v50 = vpop.f32.mrb[19].mxu0 }
 0x89d   : > { %v17991_v30 = vadd.f32 %v8632_v50, %v17878_v14 }
 0x89f   : > { %v8636_v12 = vpop.f32.mrb[20].mxu0 }
 0x8a0   : > { %v17996_v46 = vadd.f32 %v8636_v12, %v17910_v26  ;;  %v8638_v15 = vpop.f32.mrb[21].mxu0 }
 0x8a1   : > { %v17999_v0 = vadd.f32 %v8638_v15, %v17910_v26 }
 0x8d0   : > { %v5194_v40 = vpop.permute.xlu0 %5193 }
 0x8d1   : > { %v5196_v50 = vmax.f32 %v17848_v21, %v5194_v40  ;;  %v9054_v40 = vld [vmem:[#allocation2 + $0x80] sm:$0xff] }
 0x8d3   : > { %5198 = vst.msk [vmem:[#allocation4 + $0x90] sm:$0xff] %vm5197_vm0, %v5196_v50  ;;  %vm19722_vm0 = vmmov %vm19719_vm2 }
 0x8d4   : > { %v5301_v22 = vpop.permute.xlu0 %5300 }
 0x8d5   : > { %5351 = vst.msk [vmem:[#allocation2 + $0x118] sm:$0xff] %vm5232_vm6, %v5301_v22  ;;  %v5902_v37 = vpop.permute.xlu1 %5901 }
 0x8d8   : > { %v18005_v48 = vpop.permute.xlu0 %5536 }
 0x8d9   : > { %5588 = vst.msk [vmem:[#allocation2 + $0x248] sm:$0xff] %vm5232_vm6, %v18005_v48  ;;  %v6025_v15 = vpop.permute.xlu1 %6024 }
 0x8da   : > { %v18009_v12 = vld [vmem:[#allocation4 + $0x90] sm:$0xff] }
 0x8db   : > { %7479 = vst.msk [vmem:[#allocation2 + $0xc60] sm:$0xff] %vm5232_vm6, %v18009_v12  ;;  %6901 = vrot.lane.b32.xlu1 %v18009_v12, %s19474_s28  ;;  %7024 = vrot.lane.b32.xlu0 %v18009_v12, %s19476_s18 }
 0x8dc   : > { %v5779_v21 = vpop.permute.xlu0 %5778  ;;  %v9055_v50 = vld [vmem:[#allocation2 + $0x118] sm:$0xff] }
 0x8dd   : > { %v5796_v63 = vsel %vm1753_vm10, %v17960_v3, %v5779_v21  ;;  %v12862_v2 = vpack.c.bf16 %v9055_v50, %v9054_v40  ;;  %v6148_v52 = vpop.permute.xlu1 %6147  ;;  %v9056_v21 = vld [vmem:[#allocation2 + $0x1b0] sm:$0xff] }
 0x8de   : > { %5830 = vst.msk [vmem:[#allocation2 + $0x378] sm:$0xff] %vm5232_vm6, %v5796_v63 }
 0x8df   : > { %12863 = vmatpush1.bf16.msra.mxu0 %v12862_v2  ;;  %7147 = vrot.lane.b32.xlu0 %v18009_v12, %s19478_s30 }
 0x8e0   : > { %13231 = vrot.lane.b32.xlu1 %v13230_v10, %s19485_s11  ;;  %v18027_v24 = vpop.permute.xlu0 %5899  ;;  %12864 = vmatprep.subr.bf16.mxu0 %v19437_v36  ;;  %v9057_v40 = vld [vmem:[#allocation2 + $0x248] sm:$0xff] }
 0x8e1   : > { %v5919_v63 = vsel %vm19690_vm5, %v18027_v24, %v5902_v37  ;;  %v12865_v50 = vpack.c.bf16 %v9057_v40, %v9056_v21  ;;  %v6272_v47 = vpop.permute.xlu1 %6271  ;;  %vm19734_vm5 = vmmov %vm19722_vm0 }
 0x8e2   : > { %5953 = vst.msk [vmem:[#allocation2 + $0x410] sm:$0xff] %vm5232_vm6, %v5919_v63 }
 0x8e3   : > { %6020 = vrot.lane.b32.xlu0 %v17925_v17, %s19478_s30  ;;  %12866 = vmatpush1.bf16.msra.mxu0 %v12865_v50 }
 0x8e4   : > { %5653 = vrot.lane.b32.xlu1 %v17925_v17, %s13455_s14  ;;  %v18037_v10 = vpop.permute.xlu0 %6022  ;;  %12867 = vmatprep.subr.bf16.mxu0 %v19437_v36 }
 0x8e5   : > { %v6042_v2 = vsel %vm19700_vm13, %v18037_v10, %v6025_v15  ;;  %v9059_v37 = vld [vmem:[#allocation2 + $0x378] sm:$0xff]  ;;  %v5299_v21 = vpop.permute.xlu1 %5298  ;;  %vm19735_vm13 = vmmov %vm19722_vm0 }
 0x8e6   : > { %6076 = vst.msk [vmem:[#allocation2 + $0x4a8] sm:$0xff] %vm5232_vm6, %v6042_v2  ;;  %v12868_v40 = vpack.c.bf16 %v9059_v37, %v9058_v58  ;;  %v5316_v63 = vsel %vm660_vm1, %v17574_v61, %v5299_v21  ;;  %v5317_v50 = vsel %vm660_vm1, %v5299_v21, %v5301_v22  ;;  %v19701_v2 = vmov 0.0|0.0  }
 0x8e7   : > { %7270 = vrot.lane.b32.xlu0 %v18009_v12, %s13456_s19  ;;  %v12813_v45 = vpack.c.bf16 %v5317_v50, %v8920_v53  ;;  %v12815_v36 = vpack.c.bf16 %v5316_v63, %v8919_v32 }
 0x8e8   : > { %7022 = vrot.lane.b32.xlu1 %v17855_v28, %s19476_s18  ;;  %v18050_v15 = vpop.permute.xlu0 %6145  ;;  %12869 = vmatpush1.bf16.msra.mxu0 %v12868_v40 }
 0x8e9   : > { %v6166_v58 = vsel %vm6149_vm7, %v18050_v15, %v6148_v52  ;;  %12870 = vmatprep.subr.bf16.mxu0 %v19701_v2  ;;  %v18055_v61 = vpop.permute.xlu1 %6661  ;;  %12814 = vmatprep.subr.bf16.mxu1 %v12813_v45  ;;  %v9060_v52 = vld [vmem:[#allocation2 + $0x410] sm:$0xff] }
 0x8ea   : > { %6200 = vst.msk [vmem:[#allocation2 + $0x540] sm:$0xff] %vm5232_vm6, %v6166_v58  ;;  %6712 = vst.msk [vmem:[#allocation2 + $0x838] sm:$0xff] %vm5232_vm6, %v18055_v61  ;;  %12816 = vmatpush1.bf16.msra.mxu1 %v12815_v36 }
 0x8eb   : > { %7393 = vrot.lane.b32.xlu0 %v18009_v12, %s13457_s20 }
 0x8ec   : > { %7145 = vrot.lane.b32.xlu1 %v17855_v28, %s19478_s30  ;;  %v18064_v53 = vpop.permute.xlu0 %6269 }
 0x8ed   : > { %v6290_v32 = vsel %vm6273_vm11, %v18064_v53, %v6272_v47  ;;  %v9061_v22 = vld [vmem:[#allocation2 + $0x4a8] sm:$0xff]  ;;  %v5535_v45 = vpop.permute.xlu1 %5534  ;;  %v18082_v47 = vld [vmem:[#allocation4 + $0x80] sm:$0xff] }
 0x8ee   : > { %6324 = vst.msk [vmem:[#allocation2 + $0x5d8] sm:$0xff] %vm5232_vm6, %v6290_v32  ;;  %v12871_v37 = vpack.c.bf16 %v9061_v22, %v9060_v52  ;;  %v5553_v36 = vsel %vm5538_vm15, %v17622_v33, %v5535_v45  ;;  %v5554_v21 = vsel %vm5538_vm15, %v5535_v45, %v18005_v48  ;;  %v9064_v32 = vld [vmem:[#allocation2 + $0x670] sm:$0xff] }
 0x8ef   : > { %6267 = vrot.lane.b32.xlu0 %v17925_v17, %s13457_s20 }
 0x8f0   : > { %5897 = vrot.lane.b32.xlu1 %v17925_v17, %s19476_s18  ;;  %v18077_v40 = vpop.permute.xlu0 %6425  ;;  %12872 = vmatpush1.bf16.msra.mxu0 %v12871_v37 }
 0x8f1   : > { %6476 = vst.msk [vmem:[#allocation2 + $0x708] sm:$0xff] %vm5232_vm6, %v18077_v40  ;;  %12873 = vmatprep.subr.bf16.mxu0 %v19701_v2  ;;  %v9062_v48 = vld [vmem:[#allocation2 + $0x540] sm:$0xff]  ;;  %v9067_v20 = vld [vmem:[#allocation2 + $0x838] sm:$0xff] }
 0x8f3   : > { %6423 = vrot.lane.b32.xlu0 %v18082_v47, %s19485_s11 }
 0x8f4   : > { %7268 = vrot.lane.b32.xlu1 %v17855_v28, %s13456_s19  ;;  %v18088_v33 = vpop.permute.xlu0 %6543 }
 0x8f5   : > { %6594 = vst.msk [vmem:[#allocation2 + $0x7a0] sm:$0xff] %vm5232_vm6, %v18088_v33  ;;  %v9063_v63 = vld [vmem:[#allocation2 + $0x5d8] sm:$0xff] }
 0x8f6   : > { %v12874_v50 = vpack.c.bf16 %v9063_v63, %v9062_v48 }
 0x8f7   : > { %7782 = vrot.lane.b32.xlu0 %v18009_v12, %s13454_s27 }
 0x8f8   : > { %7391 = vrot.lane.b32.xlu1 %v17855_v28, %s13457_s20  ;;  %v5417_v58 = vpop.permute.xlu0 %5416  ;;  %12875 = vmatpush1.bf16.msra.mxu0 %v12874_v50  ;;  %v9065_v52 = vld [vmem:[#allocation2 + $0x708] sm:$0xff] }
 0x8f9   : > { %v5434_v22 = vsel %vm926_vm3, %v17610_v29, %v5417_v58  ;;  %v5435_v45 = vsel %vm926_vm3, %v5417_v58, %v17943_v9  ;;  %12876 = vmatprep.subr.bf16.mxu0 %v19701_v2  ;;  %v12877_v37 = vpack.c.bf16 %v9065_v52, %v9064_v32  ;;  %v19702_v29 = vmax.f32 %v17928_v13, 0.0 }
 0x8fa   : > { %v12817_v48 = vpack.c.bf16 %v5554_v21, %v5435_v45  ;;  %v12819_v63 = vpack.c.bf16 %v5553_v36, %v5434_v22  ;;  %v19703_v9 = vmax.f32 %v17915_v38, 0.0  ;;  %v19706_v45 = vmax.f32 %v17921_v27, 0.0 }
 0x8fb   : > { %6659 = vrot.lane.b32.xlu0 %v18082_v47, %s13454_s27 }
 0x8fc   : > { %6143 = vrot.lane.b32.xlu1 %v17925_v17, %s13456_s19  ;;  %v18105_v50 = vpop.permute.xlu0 %6899  ;;  %12878 = vmatpush1.bf16.msra.mxu0 %v12877_v37  ;;  %v9066_v57 = vld [vmem:[#allocation2 + $0x7a0] sm:$0xff]  ;;  %v13240_v58 = vpack.i.bf16 %v19703_v9, %v19702_v29  ;;  %v19707_v37 = vmax.f32 %v17918_v41, 0.0 }
 0x8fd   : > { %12879 = vmatprep.subr.bf16.mxu0 %v19701_v2  ;;  %v12880_v21 = vpack.c.bf16 %v9067_v20, %v9066_v57  ;;  %12818 = vmatprep.subr.bf16.mxu1 %v12817_v48  ;;  %v19704_v20 = vmax.f32 %v17899_v7, 0.0  ;;  %v19705_v57 = vmax.f32 %v17902_v11, 0.0 }
 0x8fe   : > { %12820 = vmatpush1.bf16.msra.mxu1 %v12819_v63  ;;  %v13235_v11 = vpack.i.bf16 %v19707_v37, %v19706_v45 }
 0x8ff   : > { %13241 = vrot.lane.b32.xlu0 %v13240_v58, %s19485_s11  ;;  %v13245_v36 = vpack.i.bf16 %v19705_v57, %v19704_v20  ;;  %v19708_v57 = vmax.f32 %v17991_v30, 0.0 }
 0x900   : > { %7546 = vrot.lane.b32.xlu1 %v18009_v12, %s19485_s11  ;;  %v18115_v17 = vpop.permute.xlu0 %13226  ;;  %12881 = vmatpush1.bf16.msra.mxu0 %v12880_v21 }
 0x901   : > { %12882 = vmatprep.subr.bf16.mxu0 %v19701_v2 }
 0x903   : > { %6897 = vrot.lane.b32.xlu0 %v18082_v47, %s19474_s28 }
 0x904   : > { %7664 = vrot.lane.b32.xlu1 %v18009_v12, %s19487_s9  ;;  %v18122_v13 = vpop.permute.xlu0 %6779 }
 0x905   : > { %6830 = vst.msk [vmem:[#allocation2 + $0x8d0] sm:$0xff] %vm5232_vm6, %v18122_v13 }
 0x907   : > { %13246 = vrot.lane.b32.xlu0 %v13245_v36, %s19485_s11 }
 0x908   : > { %6541 = vrot.lane.b32.xlu1 %v18082_v47, %s19487_s9  ;;  %v5775_v32 = vpop.permute.xlu0 %5774 }
 0x909   : > { %v18135_v52 = vsel %vm1753_vm10, %v17663_v18, %v5775_v32  ;;  %v18139_v22 = vsel %vm1753_vm10, %v5775_v32, %v17960_v3  ;;  %v19710_v32 = vmax.f32 %v17988_v19, 0.0 }
 0x90c   : > { %13236 = vrot.lane.b32.xlu1 %v13235_v11, %s19485_s11 }
 0x910   : > { %6777 = vrot.lane.b32.xlu1 %v18082_v47, %s13455_s14 }
 0x914   : > { %7900 = vrot.lane.b32.xlu1 %v18009_v12, %s13455_s14 }
 0x926   : > { %v8765_v48 = vpop.f32.mrb[18].mxu1 }
 0x927   : > { %v18151_v18 = vadd.f32 %v8765_v48, %v17878_v14  ;;  %v8767_v63 = vpop.f32.mrb[19].mxu1  ;;  %v19711_v48 = vmax.f32 %v17933_v60, 0.0 }
 0x928   : > { %v18154_v3 = vadd.f32 %v8767_v63, %v17878_v14  ;;  %v19712_v63 = vmax.f32 %v17936_v55, 0.0  ;;  %v19714_v55 = vmax.f32 %v17996_v46, 0.0 }
 0x929   : > { %v19448_v29 = vmax.f32 %v18151_v18, 0.0 }
 0x92a   : > { %v19441_v9 = vmax.f32 %v18154_v3, 0.0  ;;  %v8771_v58 = vpop.f32.mrb[20].mxu1 }
 0x92b   : > { %v18159_v21 = vadd.f32 %v8771_v58, %v17910_v26  ;;  %v8773_v20 = vpop.f32.mrb[21].mxu1  ;;  %v13250_v12 = vpack.i.bf16 %v19448_v29, %v19708_v57  ;;  %v13260_v58 = vpack.i.bf16 %v19712_v63, %v19711_v48  ;;  %v19713_v57 = vmax.f32 %v17999_v0, 0.0 }
 0x92c   : > { %v18166_v36 = vadd.f32 %v8773_v20, %v17910_v26  ;;  %v13255_v45 = vpack.i.bf16 %v19710_v32, %v19441_v9 }
 0x92d   : > { %v19442_v37 = vmax.f32 %v18159_v21, 0.0  ;;  %13251 = vrot.lane.b32.xlu1 %v13250_v12, %s19485_s11 }
 0x92e   : > { %19709 = vst [vmem:[#allocation22_spill] sm:$0xff] %v18166_v36  ;;  %v19443_v11 = vmax.f32 %v18166_v36, 0.0  ;;  %13256 = vrot.lane.b32.xlu0 %v13255_v45, %s19485_s11 }
 0x92f   : > { %v13265_v12 = vpack.i.bf16 %v19442_v37, %v19713_v57 }
 0x930   : > { %v13270_v48 = vpack.i.bf16 %v19714_v55, %v19443_v11 }
 0x931   : > { %7020 = vrot.lane.b32.xlu1 %v18082_v47, %s19476_s18 }
 0x932   : > { %7143 = vrot.lane.b32.xlu0 %v18082_v47, %s19478_s30 }
 0x934   : > { %v8900_v20 = vpop.f32.mrb[22].mxu0 }
 0x935   : > { %v18189_v32 = vadd.f32 %v8900_v20, %v17878_v14  ;;  %v8902_v45 = vpop.f32.mrb[23].mxu0  ;;  %13261 = vrot.lane.b32.xlu1 %v13260_v58, %s19485_s11 }
 0x936   : > { %v18193_v9 = vadd.f32 %v8902_v45, %v17878_v14  ;;  %13266 = vrot.lane.b32.xlu0 %v13265_v12, %s19485_s11 }
 0x937   : > { %v19447_v60 = vmax.f32 %v18189_v32, 0.0 }
 0x938   : > { %v19446_v63 = vmax.f32 %v18193_v9, 0.0  ;;  %v8906_v57 = vpop.f32.mrb[24].mxu0 }
 0x939   : > { %v18203_v20 = vadd.f32 %v8906_v57, %v17910_v26  ;;  %v8908_v37 = vpop.f32.mrb[25].mxu0  ;;  %13271 = vrot.lane.b32.xlu1 %v13270_v48, %s19485_s11  ;;  %v13229_v48 = vunpack.i.h.bf16 %v18115_v17  ;;  %v19449_v57 = vunpack.i.l.bf16 %v18115_v17 }
 0x93a   : > { %v18207_v14 = vadd.f32 %v8908_v37, %v17910_v26  ;;  %7266 = vrot.lane.b32.xlu0 %v18082_v47, %s13456_s19  ;;  %v13275_v45 = vpack.i.bf16 %v19446_v63, %v19447_v60 }
 0x93b   : > { %v19445_v58 = vmax.f32 %v18203_v20, 0.0  ;;  %v9207_v11 = vsel %vm660_vm1, %v19449_v57, %v13229_v48 }
 0x93c   : > { %19715 = vst [vmem:[#allocation23_spill] sm:$0xff] %v18207_v14  ;;  %v19444_v12 = vmax.f32 %v18207_v14, 0.0  ;;  %v9068_v14 = vld [vmem:[#allocation2 + $0x8d0] sm:$0xff] }
 0x93d   : > { %7389 = vrot.lane.b32.xlu1 %v18082_v47, %s13457_s20 }
 0x93e   : > { %13276 = vrot.lane.b32.xlu0 %v13275_v45, %s19485_s11  ;;  %v13280_v26 = vpack.i.bf16 %v19444_v12, %v19445_v58  ;;  %v19716_v58 = vmax.f32 %v17886_v6, 0.0 }
 0x940   : > { %v18249_v63 = vmax.f32 %v19716_v58, %v9207_v11 }
 0x941   : > { %7544 = vrot.lane.b32.xlu1 %v17855_v28, %s19485_s11 }
 0x942   : > { %13281 = vrot.lane.b32.xlu0 %v13280_v26, %s19485_s11  ;;  %s19771_s11 = sld [smem:[#allocation25_spill]] }
 0x945   : > { %7662 = vrot.lane.b32.xlu1 %v17855_v28, %s19487_s9  ;;  %s13374_s9 = scalar_lea.vmem %s13373_s26, 64 }
 0x946   : > { %7780 = vrot.lane.b32.xlu0 %v17855_v28, %s13454_s27  ;;  %s404_s27 = sand.u32 1, %s19769_s12  }
 0x947   : > { %s11405_s19 = sshll.u32 %s404_s27, 1  ;;  %s11329_s12 = scalar_lea.sflag [#allocation8], %s404_s27 }
 0x948   : > { %s406_s17 = scalar_lea.vmem [#allocation7], %s11405_s19 }
 0x949   : > { %7898 = vrot.lane.b32.xlu1 %v17855_v28, %s13455_s14  ;;  %s11342_s13 = sshll.u32 %s406_s17, 4  ;;  %s19315_s13 = int_to_ptr.vmem [resolvable:$true] %s11342_s13 }
 0x94a   : > { %s13368_s21 = scalar_lea.vmem %s19315_s13, 32  ;;  %p13375_p0 = scmp.lt.s32.totalorder %s19315_s13, %s13373_s26 }
 0x94b   : > { %p13369_p11 = scmp.ne.s32.totalorder %s19315_s13, %s13368_s21  ;;  %p13376_p1 = scmp.lt.s32.totalorder %s13374_s9, %s13368_s21 }
 0x94d   : > { %v7025_v47 = vpop.permute.xlu0 %7024  ;;  %v6902_v37 = vpop.permute.xlu1 %6901  ;;  %p13370_p12 = pnand %p13369_p11, %p13563_p5  ;;  %p13377_p2 = por %p13376_p1, %p13375_p0 }
 0x94e   : > { %v6919_v55 = vsel %vm1753_vm10, %v18105_v50, %v6902_v37 }
 0x94f   : > { %6953 = vst.msk [vmem:[#allocation2 + $0x968] sm:$0xff] %vm5232_vm6, %v6919_v55  ;;  %v19717_v55 = vmax.f32 %v17890_v4, 0.0  ;;  %p13371_p13 = pneg %p13370_p12 }
 0x951   : > { %v7148_v45 = vpop.permute.xlu0 %7147  ;;  %p13378_p3 = pnand %p13377_p2, %p13371_p13 }
 0x952   : > { %v18238_v26 = vpop.permute.xlu1 %13231 }
 0x953   : > { %v13233_v28 = vunpack.i.l.bf16 %v18238_v26 }
 0x955   : > { %v9208_v12 = vsel %vm660_vm1, %v13229_v48, %v13233_v28  ;;  %v6021_v37 = vpop.permute.xlu0 %6020 }
 0x956   : > { %v18253_v60 = vmax.f32 %v19717_v55, %v9208_v12  ;;  %v6040_v29 = vsel %vm19692_vm9, %v17703_v59, %v6021_v37  ;;  %v6041_v57 = vsel %vm19718_vm14, %v6021_v37, %v18037_v10  ;;  %v5654_v36 = vpop.permute.xlu1 %5653  ;;  %v9069_v23 = vld [vmem:[#allocation2 + $0x968] sm:$0xff]  ;;  %vm19736_vm14 = vmmov %vm19692_vm9 }
 0x957   : > { %v5672_v48 = vsel %vm5657_vm8, %v17653_v1, %v5654_v36  ;;  %v5673_v6 = vsel %vm5657_vm8, %v5654_v36, %v17966_v8  ;;  %v12883_v11 = vpack.c.bf16 %v9069_v23, %v9068_v14 }
 0x958   : > { %v13285_v4 = vpack.i.bf16 %v18253_v60, %v18249_v63  ;;  %v12821_v58 = vpack.c.bf16 %v18139_v22, %v5673_v6  ;;  %v12823_v59 = vpack.c.bf16 %v18135_v52, %v5672_v48 }
 0x959   : > { %v7271_v12 = vpop.permute.xlu0 %7270  ;;  %12884 = vmatpush1.bf16.msra.mxu0 %v12883_v11 }
 0x95a   : > { %v18267_v10 = vpop.permute.xlu1 %7022  ;;  %13286 = vrot.lane.b32.xlu0 %v13285_v4, %s19474_s28  ;;  %12822 = vmatprep.subr.bf16.mxu1 %v12821_v58 }
 0x95b   : > { %v7042_v1 = vsel %vm19719_vm2, %v18267_v10, %v7025_v47  ;;  %12824 = vmatpush1.bf16.msra.mxu1 %v12823_v59  ;;  %12885 = vmatprep.subr.bf16.mxu0 %v19701_v2 }
 0x95c   : > { %7076 = vst.msk [vmem:[#allocation2 + $0xa00] sm:$0xff] %vm5232_vm6, %v7042_v1 }
 0x95d   : > { %v7394_v23 = vpop.permute.xlu0 %7393 }
 0x95e   : > { %v18274_v8 = vpop.permute.xlu1 %7145 }
 0x95f   : > { %v7165_v52 = vsel %vm19720_vm12, %v18274_v8, %v7148_v45 }
 0x960   : > { %7199 = vst.msk [vmem:[#allocation2 + $0xa98] sm:$0xff] %vm5232_vm6, %v7165_v52 }
 0x961   : > { %v6268_v22 = vpop.permute.xlu0 %6267 }
 0x962   : > { %v6288_v36 = vsel %vm6273_vm11, %v17722_v56, %v6268_v22  ;;  %v6289_v14 = vsel %vm6273_vm11, %v6268_v22, %v18064_v53  ;;  %v5898_v47 = vpop.permute.xlu1 %5897 }
 0x963   : > { %v5917_v37 = vsel %vm19721_vm4, %v17686_v51, %v5898_v47  ;;  %v5918_v55 = vsel %vm19722_vm0, %v5898_v47, %v18027_v24  ;;  %v9070_v58 = vld [vmem:[#allocation2 + $0xa00] sm:$0xff] }
 0x964   : > { %v12825_v48 = vpack.c.bf16 %v6041_v57, %v5918_v55  ;;  %v12827_v6 = vpack.c.bf16 %v6040_v29, %v5917_v37  ;;  %v8940_v55 = vld [vmem:[#allocation2 + $0x668] sm:$0xff] }
 0x965   : > { %v6424_v11 = vpop.permute.xlu0 %6423 }
 0x966   : > { %v6441_v45 = vsel %vm660_vm1, %v17743_v54, %v6424_v11  ;;  %v6442_v4 = vsel %vm660_vm1, %v6424_v11, %v18077_v40  ;;  %v18291_v56 = vpop.permute.xlu1 %7268  ;;  %12826 = vmatprep.subr.bf16.mxu1 %v12825_v48 }
 0x967   : > { %v7288_v53 = vsel %vm6149_vm7, %v18291_v56, %v7271_v12  ;;  %v9071_v51 = vld [vmem:[#allocation2 + $0xa98] sm:$0xff]  ;;  %12828 = vmatpush1.bf16.msra.mxu1 %v12827_v6  ;;  %v12833_v6 = vpack.c.bf16 %v6442_v4, %v8940_v55 }
 0x968   : > { %7322 = vst.msk [vmem:[#allocation2 + $0xb30] sm:$0xff] %vm5232_vm6, %v7288_v53  ;;  %v12886_v24 = vpack.c.bf16 %v9071_v51, %v9070_v58  ;;  %v13234_v51 = vunpack.i.h.bf16 %v18238_v26  ;;  %v19725_v26 = vmax.f32 %v17918_v41, 0.0 }
 0x969   : > { %v18296_v29 = vpop.permute.xlu0 %7782 }
 0x96a   : > { %7833 = vst.msk [vmem:[#allocation2 + $0xe28] sm:$0xff] %vm5232_vm6, %v18296_v29  ;;  %12887 = vmatpush1.bf16.msra.mxu0 %v12886_v24  ;;  %v18300_v54 = vpop.permute.xlu1 %7391  ;;  %v9074_v24 = vld [vmem:[#allocation2 + $0xc60] sm:$0xff] }
 0x96b   : > { %v7411_v40 = vsel %vm6273_vm11, %v18300_v54, %v7394_v23  ;;  %12888 = vmatprep.subr.bf16.mxu0 %v19701_v2 }
 0x96c   : > { %7445 = vst.msk [vmem:[#allocation2 + $0xbc8] sm:$0xff] %vm5232_vm6, %v7411_v40 }
 0x96d   : > { %v6660_v57 = vpop.permute.xlu0 %6659 }
 0x96e   : > { %v6677_v59 = vsel %vm5538_vm15, %v17759_v44, %v6660_v57  ;;  %v6678_v12 = vsel %vm5538_vm15, %v6660_v57, %v18055_v61  ;;  %v6144_v1 = vpop.permute.xlu1 %6143 }
 0x96f   : > { %v6164_v52 = vsel %vm6149_vm7, %v17715_v43, %v6144_v1  ;;  %v6165_v22 = vsel %vm6149_vm7, %v6144_v1, %v18050_v15  ;;  %v9072_v44 = vld [vmem:[#allocation2 + $0xb30] sm:$0xff]  ;;  %v8939_v43 = vld [vmem:[#allocation2 + $0x660] sm:$0xff] }
 0x970   : > { %v12829_v47 = vpack.c.bf16 %v6289_v14, %v6165_v22  ;;  %v12831_v23 = vpack.c.bf16 %v6288_v36, %v6164_v52  ;;  %v12835_v15 = vpack.c.bf16 %v6441_v45, %v8939_v43 }
 0x971   : > { %v18314_v37 = vpop.permute.xlu0 %13241 }
 0x972   : > { %v18316_v48 = vpop.permute.xlu1 %7546  ;;  %12830 = vmatprep.subr.bf16.mxu1 %v12829_v47 }
 0x973   : > { %7597 = vst.msk [vmem:[#allocation2 + $0xcf8] sm:$0xff] %vm5232_vm6, %v18316_v48  ;;  %v9073_v61 = vld [vmem:[#allocation2 + $0xbc8] sm:$0xff]  ;;  %12832 = vmatpush1.bf16.msra.mxu1 %v12831_v23  ;;  %v19723_v23 = vunpack.i.l.bf16 %v18115_v17 }
 0x974   : > { %v12889_v11 = vpack.c.bf16 %v9073_v61, %v9072_v44  ;;  %12834 = vmatprep.subr.bf16.mxu1 %v12833_v6  ;;  %v13244_v6 = vunpack.i.h.bf16 %v18314_v37  ;;  %v9077_v61 = vld [vmem:[#allocation2 + $0xe28] sm:$0xff] }
 0x975   : > { %v6898_v53 = vpop.permute.xlu0 %6897  ;;  %v9206_v55 = vsel %vm660_vm1, %v13234_v51, %v19723_v23  ;;  %v19730_v23 = vmax.f32 %v17899_v7, 0.0  ;;  %v9511_v7 = vld [vmem:[%s19360_s5 + $0x80] sm:$0xff] }
 0x976   : > { %v6917_v36 = vsel %vm1753_vm10, %v17777_v62, %v6898_v53  ;;  %v6918_v14 = vsel %vm1753_vm10, %v6898_v53, %v18105_v50  ;;  %12890 = vmatpush1.bf16.msra.mxu0 %v12889_v11  ;;  %v18324_v58 = vpop.permute.xlu1 %7664 }
 0x977   : > { %7715 = vst.msk [vmem:[#allocation2 + $0xd90] sm:$0xff] %vm5232_vm6, %v18324_v58  ;;  %12891 = vmatprep.subr.bf16.mxu0 %v19701_v2  ;;  %12836 = vmatpush1.bf16.msra.mxu1 %v12835_v15 }
 0x979   : > { %v18329_v4 = vpop.permute.xlu0 %13246 }
 0x97a   : > { %v6542_v45 = vpop.permute.xlu1 %6541  ;;  %v9075_v40 = vld [vmem:[#allocation2 + $0xcf8] sm:$0xff]  ;;  %v13249_v1 = vunpack.i.h.bf16 %v18329_v4  ;;  %v13248_v52 = vunpack.i.l.bf16 %v18329_v4  ;;  %v19742_v4 = vmax.f32 %v18189_v32, 0.0 }
 0x97b   : > { %v6559_v62 = vsel %vm926_vm3, %v17754_v39, %v6542_v45  ;;  %v6560_v50 = vsel %vm926_vm3, %v6542_v45, %v18088_v33  ;;  %v12892_v57 = vpack.c.bf16 %v9075_v40, %v9074_v24  ;;  %v13243_v33 = vunpack.i.l.bf16 %v18314_v37 }
 0x97c   : > { %v12837_v22 = vpack.c.bf16 %v6678_v12, %v6560_v50  ;;  %v12839_v47 = vpack.c.bf16 %v6677_v59, %v6559_v62  ;;  %v9209_v17 = vsel %vm660_vm1, %v13233_v28, %v13248_v52  ;;  %v9210_v59 = vsel %vm660_vm1, %v13248_v52, %v13249_v1 }
 0x97d   : > { %12893 = vmatpush1.bf16.msra.mxu0 %v12892_v57  ;;  %v19724_v45 = vmax.f32 %v17882_v42, 0.0  ;;  %v19726_v40 = vmax.f32 %v17915_v38, 0.0  ;;  %v19727_v50 = vmax.f32 %v17921_v27, 0.0  ;;  %v18378_v41 = vmax.f32 %v19730_v23, %v9210_v59  ;;  %v9500_v23 = vld [vmem:[%s19360_s5 + $0x28] sm:$0xff] }
 0x97e   : > { %v13237_v44 = vpop.permute.xlu1 %13236  ;;  %12894 = vmatprep.subr.bf16.mxu0 %v19701_v2  ;;  %v9076_v39 = vld [vmem:[#allocation2 + $0xd90] sm:$0xff]  ;;  %12838 = vmatprep.subr.bf16.mxu1 %v12837_v22  ;;  %v19728_v22 = vmov 0.0  }
 0x97f   : > { %v13239_v11 = vunpack.i.h.bf16 %v13237_v44  ;;  %v13238_v43 = vunpack.i.l.bf16 %v13237_v44  ;;  %v12895_v53 = vpack.c.bf16 %v9077_v61, %v9076_v39  ;;  %12840 = vmatpush1.bf16.msra.mxu1 %v12839_v47  ;;  %v18357_v24 = vmax.f32 %v19724_v45, %v9206_v55  ;;  %v9513_v61 = vld [vmem:[%s19360_s5 + $0x90] sm:$0xff]  ;;  %v9516_v45 = vld [vmem:[%s19360_s5 + $0xa8] sm:$0xff] }
 0x980   : > { %v19729_v47 = vmax.f32 %v17894_v5, 0.0 }
 0x981   : > { %v9213_v12 = vsel %vm660_vm1, %v13239_v11, %v13243_v33  ;;  %v9211_v15 = vsel %vm660_vm1, %v13244_v6, %v13238_v43  ;;  %v9212_v51 = vsel %vm660_vm1, %v13238_v43, %v13239_v11  ;;  %12896 = vmatpush1.bf16.msra.mxu0 %v12895_v53  ;;  %v9514_v11 = vld [vmem:[%s19360_s5 + $0x98] sm:$0xff] }
 0x982   : > { %v18361_v28 = vmax.f32 %v19725_v26, %v9213_v12  ;;  %v18365_v62 = vmax.f32 %v19726_v40, %v9211_v15  ;;  %v18369_v57 = vmax.f32 %v19727_v50, %v9212_v51  ;;  %v6778_v52 = vpop.permute.xlu1 %6777  ;;  %9127 = vmatprep.subr.mxu0 %v19728_v22  ;;  %v18374_v42 = vmax.f32 %v19729_v47, %v9209_v17  ;;  %v9497_v12 = vld [vmem:[%s19360_s5 + $0x10] sm:$0xff]  ;;  %v9498_v15 = vld [vmem:[%s19360_s5 + $0x18] sm:$0xff]  ;;  %v9515_v51 = vld [vmem:[%s19360_s5 + $0xa0] sm:$0xff] }
 0x983   : > { %v6795_v38 = vsel %vm5657_vm8, %v17772_v31, %v6778_v52  ;;  %v6796_v55 = vsel %vm5657_vm8, %v6778_v52, %v18122_v13  ;;  %v9512_v13 = vld [vmem:[%s19360_s5 + $0x88] sm:$0xff]  ;;  %v12901_v59 = vpack.c.bf16 %v9514_v11, %v9513_v61  ;;  %v18430_v26 = vld [vmem:[%s19358_s3] sm:$0xff]  ;;  %v18436_v40 = vld [vmem:[%s19358_s3 + $0x18] sm:$0xff]  ;;  %v12903_v50 = vpack.c.bf16 %v9498_v15, %v9497_v12 }
 0x984   : > { %v13290_v27 = vpack.i.bf16 %v18369_v57, %v18357_v24  ;;  %v13295_v6 = vpack.i.bf16 %v18365_v62, %v18361_v28  ;;  %v12841_v44 = vpack.c.bf16 %v6918_v14, %v6796_v55  ;;  %v12843_v5 = vpack.c.bf16 %v6917_v36, %v6795_v38  ;;  %v9495_v36 = vld [vmem:[%s19360_s5] sm:$0xff]  ;;  %v9496_v14 = vld [vmem:[%s19360_s5 + $0x8] sm:$0xff]  ;;  %v9517_v38 = vld [vmem:[%s19360_s5 + $0xb0] sm:$0xff] }
 0x985   : > { %v13300_v31 = vpack.i.bf16 %v18378_v41, %v18374_v42  ;;  %v12897_v43 = vpack.c.bf16 %v9512_v13, %v9511_v7  ;;  %v12899_v53 = vpack.c.bf16 %v9496_v14, %v9495_v36  ;;  %v12905_v52 = vpack.c.bf16 %v9516_v45, %v9515_v51  ;;  %v9499_v47 = vld [vmem:[%s19360_s5 + $0x20] sm:$0xff]  ;;  %v9518_v55 = vld [vmem:[%s19360_s5 + $0xb8] sm:$0xff]  ;;  %v9520_v13 = vld [vmem:[%s19360_s5 + $0xc8] sm:$0xff] }
 0x986   : > { %v18388_v39 = vpop.permute.xlu1 %7900  ;;  %13291 = vrot.lane.b32.xlu1 %v13290_v27, %s19474_s28  ;;  %13296 = vrot.lane.b32.xlu0 %v13295_v6, %s19474_s28  ;;  %v18455_v27 = vld [vmem:[%s19358_s3 + $0x10] sm:$0xff]  ;;  %v12907_v6 = vpack.c.bf16 %v9500_v23, %v9499_v47  ;;  %v9519_v7 = vld [vmem:[%s19360_s5 + $0xc0] sm:$0xff] }
 0x987   : > { %7951 = vst.msk [vmem:[#allocation2 + $0xec0] sm:$0xff] %vm5232_vm6, %v18388_v39  ;;  %12842 = vmatprep.subr.bf16.mxu1 %v12841_v44  ;;  %vm19731_vm6 = vcmask 588800   ;;  %v12909_v44 = vpack.c.bf16 %v9518_v55, %v9517_v38  ;;  %v12913_v14 = vpack.c.bf16 %v9520_v13, %v9519_v7  ;;  %v9503_v61 = vld [vmem:[%s19360_s5 + $0x40] sm:$0xff]  ;;  %v9504_v11 = vld [vmem:[%s19360_s5 + $0x48] sm:$0xff]  ;;  %v9505_v12 = vld [vmem:[%s19360_s5 + $0x50] sm:$0xff]  ;;  %v19732_v7 = vmax.f32 %v17991_v30, 0.0 }
 0x988   : > { %12844 = vmatpush1.bf16.msra.mxu1 %v12843_v5  ;;  %v9501_v5 = vld [vmem:[%s19360_s5 + $0x30] sm:$0xff]  ;;  %v9506_v15 = vld [vmem:[%s19360_s5 + $0x58] sm:$0xff]  ;;  %v9523_v45 = vld [vmem:[%s19360_s5 + $0xe0] sm:$0xff] }
 0x989   : > { %v12919_v55 = vpack.c.bf16 %v9506_v15, %v9505_v12 }
 0x98a   : > { %13301 = vrot.lane.b32.xlu1 %v13300_v31, %s19474_s28  ;;  %v9502_v31 = vld [vmem:[%s19360_s5 + $0x38] sm:$0xff] }
 0x98b   : > { %v12911_v36 = vpack.c.bf16 %v9502_v31, %v9501_v5  ;;  %v9507_v5 = vld [vmem:[%s19360_s5 + $0x60] sm:$0xff]  ;;  %v9508_v31 = vld [vmem:[%s19360_s5 + $0x68] sm:$0xff] }
 0x98e   : > { %v9078_v17 = vld [vmem:[#allocation2 + $0xec0] sm:$0xff] }
 0x98f   : > { %9128 = vmatpush1.msra.mxu0 %v9078_v17  ;;  %v12915_v17 = vpack.c.bf16 %v9504_v11, %v9503_v61  ;;  %v9525_v61 = vld [vmem:[%s19360_s5 + $0xf0] sm:$0xff]  ;;  %v9526_v11 = vld [vmem:[%s19360_s5 + $0xf8] sm:$0xff] }
 0x990   : > { %9144 = vmatmul.mubr.f32.vlgmr.msra.gmra.mrb[26].mxu0 %v18430_v26  ;;  %12898 = vmatprep.subr.bf16.mxu0 %v12897_v43  ;;  %v9521_v43 = vld [vmem:[%s19360_s5 + $0xd0] sm:$0xff] }
 0x991   : > { %11434 = vmatprep.mubr.msk.f32.mxu0 %vm19731_vm6, %v18436_v40  ;;  %12900 = vmatpush3.bf16.msra.mxu0 %v12899_v53  ;;  %v9522_v53 = vld [vmem:[%s19360_s5 + $0xd8] sm:$0xff] }
 0x992   : > { %12902 = vmatprep.subr.bf16.mxu0 %v12901_v59  ;;  %v12917_v59 = vpack.c.bf16 %v9522_v53, %v9521_v43  ;;  %v19733_v53 = vmax.f32 %v18151_v18, 0.0 }
 0x994   : > { %9149 = vmatmul.mubr.f32.gmra.mrb[28].mxu0 %v18455_v27 }
 0x995   : > { %12904 = vmatpush3.bf16.msra.mxu0 %v12903_v50  ;;  %v9524_v50 = vld [vmem:[%s19360_s5 + $0xe8] sm:$0xff] }
 0x996   : > { %12906 = vmatprep.subr.bf16.mxu0 %v12905_v52 }
 0x999   : > { %12908 = vmatpush3.bf16.msra.mxu0 %v12907_v6 }
 0x99a   : > { %12910 = vmatprep.subr.bf16.mxu0 %v12909_v44  ;;  %v12921_v44 = vpack.c.bf16 %v9524_v50, %v9523_v45  ;;  %v12923_v45 = vpack.c.bf16 %v9508_v31, %v9507_v5 }
 0x99d   : > { %12912 = vmatpush3.bf16.msra.mxu0 %v12911_v36 }
 0x99e   : > { %12914 = vmatprep.subr.bf16.mxu0 %v12913_v14 }
 0x99f   : > { %v13252_v51 = vpop.permute.xlu1 %13251 }
 0x9a0   : > { %v13254_v52 = vunpack.i.h.bf16 %v13252_v51  ;;  %v13253_v47 = vunpack.i.l.bf16 %v13252_v51  ;;  %v18494_v23 = vpop.permute.xlu0 %13256 }
 0x9a1   : > { %v13258_v38 = vunpack.i.l.bf16 %v18494_v23  ;;  %12916 = vmatpush3.bf16.msra.mxu0 %v12915_v17  ;;  %v13259_v43 = vunpack.i.h.bf16 %v18494_v23 }
 0x9a2   : > { %v9365_v6 = vsel %vm660_vm1, %v13253_v47, %v13254_v52  ;;  %12918 = vmatprep.subr.bf16.mxu0 %v12917_v59 }
 0x9a3   : > { %v18506_v13 = vmax.f32 %v19732_v7, %v9365_v6  ;;  %v9366_v36 = vsel %vm660_vm1, %v13254_v52, %v13258_v38  ;;  %v7021_v14 = vpop.permute.xlu1 %7020  ;;  %v12925_v6 = vpack.c.bf16 %v9526_v11, %v9525_v61 }
 0x9a4   : > { %v18520_v30 = vmax.f32 %v19733_v53, %v9366_v36  ;;  %v7040_v17 = vsel %vm19734_vm5, %v17788_v25, %v7021_v14  ;;  %v7041_v59 = vsel %vm19735_vm13, %v7021_v14, %v18267_v10  ;;  %v7144_v12 = vpop.permute.xlu0 %7143  ;;  %v9509_v25 = vld [vmem:[%s19360_s5 + $0x70] sm:$0xff] }
 0x9a5   : > { %v7163_v15 = vsel %vm19692_vm9, %v17793_v35, %v7144_v12  ;;  %v7164_v51 = vsel %vm19736_vm14, %v7144_v12, %v18274_v8  ;;  %12920 = vmatpush3.bf16.msra.mxu0 %v12919_v55  ;;  %v9510_v35 = vld [vmem:[%s19360_s5 + $0x78] sm:$0xff]  ;;  %v9559_v8 = vld [vmem:[%s19360_s5 + $0x200] sm:$0xff]  ;;  %v9560_v55 = vld [vmem:[%s19360_s5 + $0x208] sm:$0xff] }
 0x9a6   : > { %v13305_v18 = vpack.i.bf16 %v18520_v30, %v18506_v13  ;;  %v12845_v50 = vpack.c.bf16 %v7164_v51, %v7041_v59  ;;  %v12847_v52 = vpack.c.bf16 %v7163_v15, %v7040_v17  ;;  %12922 = vmatprep.subr.bf16.mxu0 %v12921_v44  ;;  %v9364_v44 = vsel %vm660_vm1, %v13259_v43, %v13253_v47  ;;  %v13364_v59 = vld [vmem:[#allocation5 + $0xa0] sm:$0xff]  ;;  %v13365_v15 = vld [vmem:[#allocation5 + $0xa8] sm:$0xff] }
 0x9a7   : > { %v13262_v10 = vpop.permute.xlu1 %13261  ;;  %v12927_v61 = vpack.c.bf16 %v9510_v35, %v9509_v25  ;;  %v18550_v17 = vpack.c.bf16 %v9560_v55, %v9559_v8  ;;  %v19737_v47 = vmax.f32 %v17988_v19, 0.0 }
 0x9a8   : > { %v13264_v5 = vunpack.i.h.bf16 %v13262_v10  ;;  %v13263_v31 = vunpack.i.l.bf16 %v13262_v10  ;;  %v13267_v7 = vpop.permute.xlu0 %13266  ;;  %13306 = vrot.lane.b32.xlu0 %v13305_v18, %s19474_s28  ;;  %12846 = vmatprep.subr.bf16.mxu1 %v12845_v50 }
 0x9a9   : > { %v13269_v36 = vunpack.i.h.bf16 %v13267_v7  ;;  %v13268_v14 = vunpack.i.l.bf16 %v13267_v7  ;;  %12848 = vmatpush1.bf16.msra.mxu1 %v12847_v52  ;;  %12924 = vmatpush3.bf16.msra.mxu0 %v12923_v45  ;;  %v18554_v43 = vmax.f32 %v19737_v47, %v9364_v44 }
 0x9aa   : > { %v9214_v11 = vsel %vm660_vm1, %v13243_v33, %v13263_v31  ;;  %v9215_v53 = vsel %vm660_vm1, %v13263_v31, %v13264_v5  ;;  %12926 = vmatprep.subr.bf16.mxu0 %v12925_v6  ;;  %v19738_v33 = vmax.f32 %v17999_v0, 0.0 }
 0x9ab   : > { %v18556_v12 = vmax.f32 %v13364_v59, %v9214_v11  ;;  %v18558_v51 = vmax.f32 %v13365_v15, %v9215_v53  ;;  %v9370_v45 = vsel %vm660_vm1, %v13268_v14, %v13269_v36  ;;  %v18561_v37 = vpop.permute.xlu1 %13271  ;;  %v13366_v53 = vld [vmem:[#allocation5 + $0x28] sm:$0xff]  ;;  %v13367_v15 = vld [vmem:[#allocation5 + $0xb0] sm:$0xff] }
 0x9ac   : > { %v18565_v18 = vmax.f32 %v19738_v33, %v9370_v45  ;;  %v13274_v50 = vunpack.i.h.bf16 %v18561_v37  ;;  %v13273_v19 = vunpack.i.l.bf16 %v18561_v37  ;;  %v7267_v52 = vpop.permute.xlu0 %7266  ;;  %v9238_v47 = vmax.f32 %v13366_v53, %v13249_v1  ;;  %v9545_v37 = vld [vmem:[%s19360_s5 + $0x190] sm:$0xff] }
 0x9ad   : > { %v7286_v6 = vsel %vm6149_vm7, %v17801_v16, %v7267_v52  ;;  %v7287_v25 = vsel %vm6149_vm7, %v7267_v52, %v18291_v56  ;;  %v13310_v35 = vpack.i.bf16 %v18556_v12, %v18554_v43  ;;  %12928 = vmatpush3.bf16.msra.mxu0 %v12927_v61  ;;  %v19739_v16 = vmax.f32 %v17996_v46, 0.0 }
 0x9ae   : > { %v9369_v10 = vsel %vm660_vm1, %v13274_v50, %v13268_v14  ;;  %v9371_v0 = vsel %vm660_vm1, %v13269_v36, %v13273_v19  ;;  %v13315_v8 = vpack.i.bf16 %v18565_v18, %v18558_v51  ;;  %12962 = vmatprep.subr.bf16.mxu0 %v18550_v17  ;;  %v19740_v56 = vmax.f32 %v18159_v21, 0.0 }
 0x9af   : > { %v18584_v55 = vmax.f32 %v19739_v16, %v9369_v10  ;;  %v7390_v31 = vpop.permute.xlu1 %7389  ;;  %13311 = vrot.lane.b32.xlu1 %v13310_v35, %s19474_s28  ;;  %v9239_v45 = vmax.f32 %v13367_v15, %v13264_v5  ;;  %v19741_v50 = vmax.f32 %v18154_v3, 0.0 }
 0x9b0   : > { %v18588_v44 = vmax.f32 %v19740_v56, %v9371_v0  ;;  %v7409_v7 = vsel %vm6273_vm11, %v17806_v49, %v7390_v31  ;;  %v7410_v36 = vsel %vm6273_vm11, %v7390_v31, %v18300_v54  ;;  %v13277_v14 = vpop.permute.xlu0 %13276  ;;  %13316 = vrot.lane.b32.xlu0 %v13315_v8, %s19474_s28 }
 0x9b1   : > { %v13279_v61 = vunpack.i.h.bf16 %v13277_v14  ;;  %v13278_v46 = vunpack.i.l.bf16 %v13277_v14  ;;  %v12849_v21 = vpack.c.bf16 %v7410_v36, %v7287_v25  ;;  %v12851_v59 = vpack.c.bf16 %v7409_v7, %v7286_v6  ;;  %v8960_v6 = vld [vmem:[#allocation2 + $0xc58] sm:$0xff]  ;;  %v8959_v25 = vld [vmem:[#allocation2 + $0xc50] sm:$0xff] }
 0x9b2   : > { %v13320_v11 = vpack.i.bf16 %v18584_v55, %v18588_v44  ;;  %v19745_v36 = vld [vmem:[#allocation19_spill] sm:$0xff] }
 0x9b3   : > { %v9367_v49 = vsel %vm660_vm1, %v13258_v38, %v13278_v46  ;;  %v9368_v54 = vsel %vm660_vm1, %v13278_v46, %v13279_v61  ;;  %v7545_v33 = vpop.permute.xlu1 %7544  ;;  %12850 = vmatprep.subr.bf16.mxu1 %v12849_v21  ;;  %v19746_v21 = vld [vmem:[#allocation20_spill] sm:$0xff] }
 0x9b4   : > { %13321 = vrot.lane.b32.xlu1 %v13320_v11, %s19474_s28  ;;  %v18607_v52 = vmax.f32 %v19741_v50, %v9367_v49  ;;  %v18611_v1 = vmax.f32 %v19742_v4, %v9368_v54  ;;  %v7562_v5 = vsel %vm660_vm1, %v17817_v34, %v7545_v33  ;;  %v7563_v23 = vsel %vm660_vm1, %v7545_v33, %v18316_v48  ;;  %v13282_v38 = vpop.permute.xlu0 %13281  ;;  %v9543_v49 = vld [vmem:[%s19360_s5 + $0x180] sm:$0xff]  ;;  %v9544_v54 = vld [vmem:[%s19360_s5 + $0x188] sm:$0xff] }
 0x9b5   : > { %12852 = vmatpush1.bf16.msra.mxu1 %v12851_v59  ;;  %v13284_v35 = vunpack.i.h.bf16 %v13282_v38  ;;  %v13283_v10 = vunpack.i.l.bf16 %v13282_v38  ;;  %v12853_v0 = vpack.c.bf16 %v7563_v23, %v8960_v6  ;;  %v12855_v3 = vpack.c.bf16 %v7562_v5, %v8959_v25  ;;  %v19749_v33 = vld [vmem:[#allocation21_spill] sm:$0xff]  ;;  %v9527_v5 = vld [vmem:[%s19360_s5 + $0x100] sm:$0xff]  ;;  %v19750_v38 = vld [vmem:[#allocation22_spill] sm:$0xff] }
 0x9b6   : > { %v13330_v8 = vpack.i.bf16 %v9239_v45, %v18611_v1  ;;  %v13325_v32 = vpack.i.bf16 %v18607_v52, %v9238_v47  ;;  %v19743_v34 = vmax.f32 %v18193_v9, 0.0  ;;  %v19744_v48 = vmax.f32 %v18203_v20, 0.0  ;;  %v19747_v20 = vld [vmem:[#allocation23_spill] sm:$0xff]  ;;  %v9528_v23 = vld [vmem:[%s19360_s5 + $0x108] sm:$0xff] }
 0x9b7   : > { %v9373_v16 = vsel %vm660_vm1, %v13283_v10, %v13284_v35  ;;  %v7663_v56 = vpop.permute.xlu1 %7662  ;;  %12854 = vmatprep.subr.bf16.mxu1 %v12853_v0  ;;  %v19751_v6 = vmax.f32 %v19750_v38, 0.0  ;;  %v9529_v0 = vld [vmem:[%s19360_s5 + $0x110] sm:$0xff]  ;;  %v9558_v38 = vld [vmem:[%s19360_s5 + $0x1f8] sm:$0xff] }
 0x9b8   : > { %v9396_v31 = vmax.f32 %v19743_v34, %v13279_v61  ;;  %v18624_v7 = vmax.f32 %v19744_v48, %v9373_v16  ;;  %v7680_v14 = vsel %vm926_vm3, %v19745_v36, %v7663_v56  ;;  %v7681_v46 = vsel %vm926_vm3, %v7663_v56, %v18324_v58  ;;  %v7781_v11 = vpop.permute.xlu0 %7780  ;;  %13331 = vrot.lane.b32.xlu1 %v13330_v8, %s19474_s28  ;;  %v9547_v8 = vld [vmem:[%s19360_s5 + $0x1a0] sm:$0xff] }
 0x9b9   : > { %v7798_v53 = vsel %vm5538_vm15, %v19746_v21, %v7781_v11  ;;  %v7799_v9 = vsel %vm5538_vm15, %v7781_v11, %v18296_v29  ;;  %13326 = vrot.lane.b32.xlu0 %v13325_v32, %s19474_s28  ;;  %12856 = vmatpush1.bf16.msra.mxu1 %v12855_v3  ;;  %v19748_v61 = vmax.f32 %v19747_v20, 0.0  ;;  %v9372_v29 = vsel %vm660_vm1, %v13273_v19, %v13283_v10  ;;  %v9530_v3 = vld [vmem:[%s19360_s5 + $0x118] sm:$0xff]  ;;  %v9548_v32 = vld [vmem:[%s19360_s5 + $0x1a8] sm:$0xff]  ;;  %vm19752_vm1 = vmmov %vm19731_vm6 }
 0x9ba   : > { %v13335_v59 = vpack.i.bf16 %v18624_v7, %v9396_v31  ;;  %v12857_v15 = vpack.c.bf16 %v7799_v9, %v7681_v46  ;;  %v12859_v45 = vpack.c.bf16 %v7798_v53, %v7680_v14  ;;  %v12929_v19 = vpack.c.bf16 %v9544_v54, %v9543_v49  ;;  %v9531_v34 = vld [vmem:[%s19360_s5 + $0x120] sm:$0xff]  ;;  %v9532_v31 = vld [vmem:[%s19360_s5 + $0x128] sm:$0xff]  ;;  %v9533_v14 = vld [vmem:[%s19360_s5 + $0x130] sm:$0xff] }
 0x9bb   : > { %v9397_v47 = vmax.f32 %v19748_v61, %v13284_v35  ;;  %v7899_v58 = vpop.permute.xlu1 %7898  ;;  %v18668_v25 = vmax.f32 %v19751_v6, %v9372_v29  ;;  %v12931_v35 = vpack.c.bf16 %v9528_v23, %v9527_v5  ;;  %v12935_v16 = vpack.c.bf16 %v9530_v3, %v9529_v0  ;;  %v9534_v46 = vld [vmem:[%s19360_s5 + $0x138] sm:$0xff]  ;;  %v9551_v11 = vld [vmem:[%s19360_s5 + $0x1c0] sm:$0xff]  ;;  %v9536_v61 = vld [vmem:[%s19360_s5 + $0x148] sm:$0xff] }
 0x9bc   : > { %v7916_v50 = vsel %vm5657_vm8, %v19749_v33, %v7899_v58  ;;  %v7917_v4 = vsel %vm5657_vm8, %v7899_v58, %v18388_v39  ;;  %12858 = vmatprep.subr.bf16.mxu1 %v12857_v15  ;;  %v9546_v39 = vld [vmem:[%s19360_s5 + $0x198] sm:$0xff]  ;;  %v12937_v56 = vpack.c.bf16 %v9548_v32, %v9547_v8  ;;  %v12939_v48 = vpack.c.bf16 %v9532_v31, %v9531_v34  ;;  %v9535_v20 = vld [vmem:[%s19360_s5 + $0x140] sm:$0xff]  ;;  %v9553_v15 = vld [vmem:[%s19360_s5 + $0x1d0] sm:$0xff] }
 0x9bd   : > { %9432 = vrot.lane.b32.xlu1 %v9397_v47, %s19474_s28  ;;  %13336 = vrot.lane.b32.xlu0 %v13335_v59, %s19474_s28  ;;  %v12933_v10 = vpack.c.bf16 %v9546_v39, %v9545_v37  ;;  %v12943_v21 = vpack.c.bf16 %v9534_v46, %v9533_v14  ;;  %v12947_v49 = vpack.c.bf16 %v9536_v61, %v9535_v20  ;;  %v9537_v33 = vld [vmem:[%s19360_s5 + $0x150] sm:$0xff]  ;;  %v9556_v5 = vld [vmem:[%s19360_s5 + $0x1e8] sm:$0xff]  ;;  %vm13458_vm3 = vmmov 0  }
 0x9be   : > { %12860 = vmatpush1.bf16.msra.mxu1 %v12859_v45  ;;  %v9554_v45 = vld [vmem:[%s19360_s5 + $0x1d8] sm:$0xff]  ;;  %v9539_v37 = vld [vmem:[%s19360_s5 + $0x160] sm:$0xff]  ;;  %v9540_v39 = vld [vmem:[%s19360_s5 + $0x168] sm:$0xff]  ;;  %vm19753_vm15 = vcmask 261120  }
 0x9bf   : > { %9017 = vmatprep.subr.mxu1 %v7917_v4  ;;  %v12949_v29 = vpack.c.bf16 %v9554_v45, %v9553_v15  ;;  %v9555_v4 = vld [vmem:[%s19360_s5 + $0x1e0] sm:$0xff]  ;;  %v12955_v6 = vpack.c.bf16 %v9540_v39, %v9539_v37  ;;  %v9542_v0 = vld [vmem:[%s19360_s5 + $0x178] sm:$0xff]  ;;  %v9564_v61 = vld [vmem:[%s19360_s5 + $0x228] sm:$0xff] }
 0x9c0   : > { %v12953_v23 = vpack.c.bf16 %v9556_v5, %v9555_v4  ;;  %v9563_v20 = vld [vmem:[%s19360_s5 + $0x220] sm:$0xff]  ;;  %v9572_v4 = vld [vmem:[%s19360_s5 + $0x268] sm:$0xff]  ;;  %vm19754_vm7 = vmmov %vm19753_vm15 }
 0x9c1   : > { %9428 = vrot.lane.b32.xlu0 %v18668_v25, %s19474_s28  ;;  %vm19755_vm11 = vmmov %vm19754_vm7  ;;  %s19773_s28 = sld [smem:[#allocation26_spill]] }
 0x9c2   : > { %9018 = vmatpush1.msra.mxu1 %v7916_v50  ;;  %v9538_v50 = vld [vmem:[%s19360_s5 + $0x158] sm:$0xff]  ;;  %vm19756_vm2 = vmmov %vm19754_vm7 }
 0x9c3   : > { %9034 = vmatmul.mubr.f32.vlgmr.msra.gmra.mrb[22].mxu1 %v18430_v26  ;;  %12930 = vmatprep.subr.bf16.mxu1 %v12929_v19  ;;  %v9549_v26 = vld [vmem:[%s19360_s5 + $0x1b0] sm:$0xff]  ;;  %vm19757_vm12 = vmmov %vm19756_vm2 }
 0x9c4   : > { %11432 = vmatprep.mubr.msk.f32.mxu1 %vm19752_vm1, %v18436_v40  ;;  %12932 = vmatpush3.bf16.msra.mxu1 %v12931_v35  ;;  %v9550_v40 = vld [vmem:[%s19360_s5 + $0x1b8] sm:$0xff]  ;;  %v9557_v19 = vld [vmem:[%s19360_s5 + $0x1f0] sm:$0xff]  ;;  %vm19758_vm4 = vmmov %vm19756_vm2 }
 0x9c5   : > { %12934 = vmatprep.subr.bf16.mxu1 %v12933_v10  ;;  %v12941_v36 = vpack.c.bf16 %v9550_v40, %v9549_v26  ;;  %v12957_v35 = vpack.c.bf16 %v9558_v38, %v9557_v19  ;;  %v9541_v10 = vld [vmem:[%s19360_s5 + $0x170] sm:$0xff]  ;;  %v9562_v40 = vld [vmem:[%s19360_s5 + $0x218] sm:$0xff]  ;;  %vm19759_vm0 = vmmov %vm19756_vm2 }
 0x9c6   : > { %v12959_v3 = vpack.c.bf16 %v9542_v0, %v9541_v10  ;;  %v9561_v26 = vld [vmem:[%s19360_s5 + $0x210] sm:$0xff]  ;;  %vm19760_vm6 = vmmov %vm19759_vm0 }
 0x9c7   : > { %9040 = vmatmul.mubr.f32.gmra.mrb[24].mxu1 %v18455_v27  ;;  %v9552_v27 = vld [vmem:[%s19360_s5 + $0x1c8] sm:$0xff]  ;;  %vm19761_vm5 = vmmov %vm19759_vm0 }
 0x9c8   : > { %12936 = vmatpush3.bf16.msra.mxu1 %v12935_v16  ;;  %v12945_v9 = vpack.c.bf16 %v9552_v27, %v9551_v11  ;;  %v12965_v27 = vpack.c.bf16 %v9562_v40, %v9561_v26  ;;  %vm19762_vm13 = vmmov %vm19759_vm0 }
 0x9c9   : > { %12938 = vmatprep.subr.bf16.mxu1 %v12937_v56  ;;  %vm19763_vm9 = vmmov %vm19759_vm0 }
 0x9ca   : > { %vm19764_vm14 = vmmov %vm19759_vm0 }
 0x9cb   : > { %vm19765_vm1 = vmmov %vm19759_vm0 }
 0x9cc   : > { %12940 = vmatpush3.bf16.msra.mxu1 %v12939_v48  ;;  %v13287_v53 = vpop.permute.xlu0 %13286 }
 0x9cd   : > { %12942 = vmatprep.subr.bf16.mxu1 %v12941_v36  ;;  %v13289_v47 = vunpack.i.h.bf16 %v13287_v53  ;;  %v13288_v59 = vunpack.i.l.bf16 %v13287_v53 }
 0x9cf   : > { %v9277_v58 = vsel %vm1753_vm10, %v13288_v59, %v13289_v47 }
 0x9d0   : > { %12944 = vmatpush3.bf16.msra.mxu1 %v12943_v21  ;;  %v9297_v54 = vmax.f32 %v18249_v63, %v9277_v58  ;;  %v12951_v63 = vpack.c.bf16 %v9538_v50, %v9537_v33  ;;  %v12969_v58 = vpack.c.bf16 %v9564_v61, %v9563_v20  ;;  %v9571_v50 = vld [vmem:[%s19360_s5 + $0x260] sm:$0xff] }
 0x9d1   : > { %12946 = vmatprep.subr.bf16.mxu1 %v12945_v9  ;;  %v12985_v5 = vpack.c.bf16 %v9572_v4, %v9571_v50 }
 0x9d2   : > { %9639 = vmatprep.mubr.f32.mxu0 %v9297_v54  ;;  %v9569_v54 = vld [vmem:[%s19360_s5 + $0x250] sm:$0xff] }
 0x9d4   : > { %12948 = vmatpush3.bf16.msra.mxu1 %v12947_v49  ;;  %v9565_v49 = vld [vmem:[%s19360_s5 + $0x230] sm:$0xff] }
 0x9d5   : > { %12950 = vmatprep.subr.bf16.mxu1 %v12949_v29  ;;  %v9570_v29 = vld [vmem:[%s19360_s5 + $0x258] sm:$0xff] }
 0x9d6   : > { %v12981_v33 = vpack.c.bf16 %v9570_v29, %v9569_v54 }
 0x9d8   : > { %12952 = vmatpush3.bf16.msra.mxu1 %v12951_v63  ;;  %v9573_v63 = vld [vmem:[%s19360_s5 + $0x270] sm:$0xff] }
 0x9d9   : > { %12954 = vmatprep.subr.bf16.mxu1 %v12953_v23  ;;  %v9574_v23 = vld [vmem:[%s19360_s5 + $0x278] sm:$0xff] }
 0x9da   : > { %v12989_v37 = vpack.c.bf16 %v9574_v23, %v9573_v63 }
 0x9dc   : > { %12956 = vmatpush3.bf16.msra.mxu1 %v12955_v6 }
 0x9dd   : > { %12958 = vmatprep.subr.bf16.mxu1 %v12957_v35 }
 0x9e0   : > { %12960 = vmatpush3.bf16.msra.mxu1 %v12959_v3 }
 0x9e1   : > { %12993 = vmatprep.subr.bf16.mxu1 %v19701_v2 }
 0x9f8   : > { %v13292_v8 = vpop.permute.xlu1 %13291  ;;  %v18757_v32 = vpop.permute.xlu0 %13296 }
 0x9f9   : > { %v13294_v16 = vunpack.i.h.bf16 %v13292_v8  ;;  %v13293_v56 = vunpack.i.l.bf16 %v13292_v8  ;;  %v13299_v34 = vunpack.i.h.bf16 %v18757_v32  ;;  %v13298_v31 = vunpack.i.l.bf16 %v18757_v32 }
 0x9fb   : > { %v9276_v48 = vsel %vm1753_vm10, %v13293_v56, %v13288_v59  ;;  %v9282_v36 = vsel %vm1753_vm10, %v13294_v16, %v13298_v31  ;;  %v9281_v9 = vsel %vm1753_vm10, %v13299_v34, %v13294_v16 }
 0x9fc   : > { %v9296_v14 = vmax.f32 %v18357_v24, %v9276_v48  ;;  %v18772_v46 = vpop.permute.xlu1 %13301  ;;  %v9302_v11 = vmax.f32 %v18369_v57, %v9282_v36  ;;  %v9301_v15 = vmax.f32 %v18365_v62, %v9281_v9  ;;  %v9567_v62 = vld [vmem:[%s19360_s5 + $0x240] sm:$0xff] }
 0x9fd   : > { %v13304_v21 = vunpack.i.h.bf16 %v18772_v46  ;;  %v13303_v53 = vunpack.i.l.bf16 %v18772_v46 }
 0x9fe   : > { %9640 = vmatmul.mubr.f32.vlgmr.msra.gmra.mrb[30].mxu0 %v9296_v14 }
 0x9ff   : > { %v9278_v24 = vsel %vm1753_vm10, %v13289_v47, %v13303_v53  ;;  %9644 = vmatprep.mubr.f32.mxu0 %v9302_v11  ;;  %v9279_v57 = vsel %vm1753_vm10, %v13303_v53, %v13304_v21  ;;  %12964 = vmatpush3.bf16.msra.mxu0 %v18550_v17  ;;  %v9566_v47 = vld [vmem:[%s19360_s5 + $0x238] sm:$0xff] }
 0xa00   : > { %v9298_v59 = vmax.f32 %v18253_v60, %v9278_v24  ;;  %v9299_v45 = vmax.f32 %v18374_v42, %v9279_v57  ;;  %12966 = vmatprep.subr.bf16.mxu0 %v12965_v27  ;;  %v12973_v60 = vpack.c.bf16 %v9566_v47, %v9565_v49  ;;  %v9568_v42 = vld [vmem:[%s19360_s5 + $0x248] sm:$0xff] }
 0xa01   : > { %v12977_v17 = vpack.c.bf16 %v9568_v42, %v9567_v62 }
 0xa02   : > { %9645 = vmatmul.mubr.f32.gmra.mrb[32].mxu0 %v9301_v15  ;;  %9724 = vmatprep.mubr.f32.mxu1 %v9299_v45 }
 0xa03   : > { %9725 = vmatmul.mubr.f32.vlgmr.msra.gmra.mrb[26].mxu1 %v9298_v59  ;;  %12968 = vmatpush3.bf16.msra.mxu0 %v12965_v27 }
 0xa04   : > { %12970 = vmatprep.subr.bf16.mxu0 %v12969_v58 }
 0xa07   : > { %12972 = vmatpush3.bf16.msra.mxu0 %v12969_v58 }
 0xa08   : > { %12974 = vmatprep.subr.bf16.mxu0 %v12973_v60 }
 0xa0b   : > { %12976 = vmatpush3.bf16.msra.mxu0 %v12973_v60 }
 0xa0c   : > { %12978 = vmatprep.subr.bf16.mxu0 %v12977_v17 }
 0xa0f   : > { %12980 = vmatpush3.bf16.msra.mxu0 %v12977_v17 }
 0xa10   : > { %12982 = vmatprep.subr.bf16.mxu0 %v12981_v33 }
 0xa13   : > { %12984 = vmatpush3.bf16.msra.mxu0 %v12981_v33 }
 0xa14   : > { %12986 = vmatprep.subr.bf16.mxu0 %v12985_v5 }
 0xa17   : > { %12988 = vmatpush3.bf16.msra.mxu0 %v12985_v5 }
 0xa18   : > { %12990 = vmatprep.subr.bf16.mxu0 %v12989_v37 }
 0xa1a   : > { %v13307_v39 = vpop.permute.xlu0 %13306 }
 0xa1b   : > { %v13309_v19 = vunpack.i.h.bf16 %v13307_v39  ;;  %v13308_v38 = vunpack.i.l.bf16 %v13307_v39  ;;  %12992 = vmatpush3.bf16.msra.mxu0 %v12989_v37 }
 0xa1c   : > { %13089 = vmatprep.subr.bf16.mxu0 %v19701_v2 }
 0xa1d   : > { %v9435_v6 = vsel %vm1753_vm10, %v13308_v38, %v13309_v19 }
 0xa1e   : > { %v9455_v35 = vmax.f32 %v18506_v13, %v9435_v6 }
 0xa20   : > { %9649 = vmatprep.mubr.f32.mxu0 %v9455_v35 }
 0xa21   : > { %v13312_v10 = vpop.permute.xlu1 %13311 }
 0xa22   : > { %v13314_v0 = vunpack.i.h.bf16 %v13312_v10  ;;  %v13313_v3 = vunpack.i.l.bf16 %v13312_v10  ;;  %v13317_v8 = vpop.permute.xlu0 %13316 }
 0xa23   : > { %v13318_v16 = vunpack.i.l.bf16 %v13317_v8  ;;  %v13319_v36 = vunpack.i.h.bf16 %v13317_v8 }
 0xa24   : > { %v9434_v56 = vsel %vm1753_vm10, %v13313_v3, %v13308_v38  ;;  %v9283_v34 = vsel %vm1753_vm10, %v13298_v31, %v13314_v0 }
 0xa25   : > { %v9454_v40 = vmax.f32 %v18554_v43, %v9434_v56  ;;  %v9284_v48 = vsel %vm1753_vm10, %v13314_v0, %v13318_v16  ;;  %v9303_v27 = vmax.f32 %v18361_v28, %v9283_v34 }
 0xa26   : > { %v13322_v26 = vpop.permute.xlu1 %13321  ;;  %v9304_v11 = vmax.f32 %v18556_v12, %v9284_v48 }
 0xa27   : > { %v13324_v14 = vunpack.i.h.bf16 %v13322_v26  ;;  %v13323_v13 = vunpack.i.l.bf16 %v13322_v26  ;;  %9650 = vmatmul.mubr.f32.gmra.mrb[34].mxu0 %v9454_v40 }
 0xa28   : > { %9729 = vmatprep.mubr.f32.mxu1 %v9304_v11 }
 0xa29   : > { %v9440_v53 = vsel %vm1753_vm10, %v13319_v36, %v13323_v13  ;;  %v9439_v32 = vsel %vm1753_vm10, %v13324_v14, %v13319_v36  ;;  %9730 = vmatmul.mubr.f32.gmra.mrb[28].mxu1 %v9303_v27 }
 0xa2a   : > { %v9460_v31 = vmax.f32 %v18565_v18, %v9440_v53  ;;  %v9459_v43 = vmax.f32 %v18584_v55, %v9439_v32  ;;  %v13332_v9 = vpop.permute.xlu1 %13331 }
 0xa2b   : > { %v13334_v20 = vunpack.i.h.bf16 %v13332_v9  ;;  %v13333_v61 = vunpack.i.l.bf16 %v13332_v9  ;;  %v13327_v24 = vpop.permute.xlu0 %13326 }
 0xa2c   : > { %9654 = vmatprep.mubr.f32.mxu0 %v9460_v31  ;;  %v13329_v57 = vunpack.i.h.bf16 %v13327_v24  ;;  %v13328_v12 = vunpack.i.l.bf16 %v13327_v24 }
 0xa2d   : > { %9655 = vmatmul.mubr.f32.gmra.mrb[36].mxu0 %v9459_v43  ;;  %v9285_v28 = vsel %vm1753_vm10, %v13318_v16, %v13334_v20  ;;  %v11437_v20 = vld [vmem:[%s19361_s6 + $0x20] sm:$0xff] }
 0xa2e   : > { %v9305_v59 = vmax.f32 %v18558_v51, %v9285_v28  ;;  %v9437_v15 = vsel %vm1753_vm10, %v13329_v57, %v13333_v61  ;;  %v9280_v18 = vsel %vm1753_vm10, %v13304_v21, %v13328_v12  ;;  %v9436_v55 = vsel %vm1753_vm10, %v13309_v19, %v13329_v57  ;;  %v11438_v12 = vld [vmem:[%s19361_s6 + $0x28] sm:$0xff]  ;;  %v18884_v28 = vld [vmem:[%s19361_s6 + $0x30] sm:$0xff] }
 0xa2f   : > { %v13337_v45 = vpop.permute.xlu0 %13336  ;;  %v9457_v58 = vmax.f32 %v18607_v52, %v9437_v15  ;;  %v9300_v49 = vmax.f32 %v18378_v41, %v9280_v18  ;;  %v9456_v47 = vmax.f32 %v18520_v30, %v9436_v55  ;;  %v9433_v42 = vpop.permute.xlu1 %9432  ;;  %v11134_v55 = vld [vmem:[%s19363_s8] sm:$0xff] }
 0xa30   : > { %v13339_v60 = vunpack.i.h.bf16 %v13337_v45  ;;  %v13338_v62 = vunpack.i.l.bf16 %v13337_v45 }
 0xa31   : > { %9734 = vmatprep.mubr.f32.mxu1 %v9457_v58  ;;  %11769 = vmatprep.mubr.f32.mxu0 %v9300_v49  ;;  %v13000_v49 = vpack.c.bf16 %v11438_v12, %v11437_v20 }
 0xa32   : > { %9735 = vmatmul.mubr.f32.gmra.mrb[30].mxu1 %v9456_v47  ;;  %11770 = vmatmul.mubr.f32.vlgmr.msra.gmra.mrb[38].mxu0 %v9305_v59  ;;  %v9438_v51 = vsel %vm1753_vm10, %v13333_v61, %v13338_v62  ;;  %v9443_v46 = vsel %vm1753_vm10, %v13339_v60, %v9433_v42  ;;  %v18889_v59 = vld [vmem:[%s19361_s6 + $0x38] sm:$0xff]  ;;  %v11136_v62 = vld [vmem:[%s19363_s8 + $0x10] sm:$0xff] }
 0xa33   : > { %v9429_v21 = vpop.permute.xlu0 %9428  ;;  %v9458_v17 = vmax.f32 %v18611_v1, %v9438_v51  ;;  %v9463_v52 = vmax.f32 %v18624_v7, %v9443_v46  ;;  %v9831_v1 = vld [vmem:[%s19361_s6] sm:$0xff]  ;;  %v9832_v7 = vld [vmem:[%s19361_s6 + $0x8] sm:$0xff]  ;;  %v13003_v47 = vpack.c.bf16 %v18889_v59, %v18884_v28  ;;  %v11137_v42 = vld [vmem:[%s19363_s8 + $0x18] sm:$0xff] }
 0xa34   : > { %v9441_v41 = vsel %vm1753_vm10, %v13323_v13, %v9429_v21  ;;  %v9442_v30 = vsel %vm1753_vm10, %v9429_v21, %v13339_v60  ;;  %v12994_v63 = vpack.c.bf16 %v9832_v7, %v9831_v1  ;;  %vm9838_vm10 = vcmask 1041409   ;;  %v11135_v60 = vld [vmem:[%s19363_s8 + $0x8] sm:$0xff]  ;;  %v11445_v28 = vld [vmem:[%s19361_s6 + $0x58] sm:$0xff] }
 0xa35   : > { %v9461_v54 = vmax.f32 %v18588_v44, %v9441_v41  ;;  %v9462_v29 = vmax.f32 %v18668_v25, %v9442_v30  ;;  %11772 = vmatprep.mubr.f32.mxu0 %v9458_v17  ;;  %v9833_v44 = vld [vmem:[%s19361_s6 + $0x10] sm:$0xff]  ;;  %v9834_v25 = vld [vmem:[%s19361_s6 + $0x18] sm:$0xff]  ;;  %v13090_v1 = vpack.c.bf16 %v11135_v60, %v11134_v55  ;;  %v13093_v7 = vpack.c.bf16 %v11137_v42, %v11136_v62 }
 0xa36   : > { %11773 = vmatmul.mubr.f32.gmra.mrb[40].mxu0 %v9463_v52  ;;  %12995 = vmatpush3.bf16.msra.mxu1 %v12994_v63  ;;  %v12997_v23 = vpack.c.bf16 %v9834_v25, %v9833_v44  ;;  %v11140_v55 = vld [vmem:[%s19363_s8 + $0x30] sm:$0xff] }
 0xa37   : > { %9739 = vmatprep.mubr.f32.mxu1 %v9462_v29  ;;  %12996 = vmatprep.subr.bf16.mxu1 %v19701_v2  ;;  %v11444_v42 = vld [vmem:[%s19361_s6 + $0x50] sm:$0xff] }
 0xa38   : > { %9740 = vmatmul.mubr.f32.gmra.mrb[32].mxu1 %v9461_v54  ;;  %11981 = vmatprep.mubr.msk.f32.mxu0 %vm13458_vm3, %v19728_v22 }
 0xa39   : > { %11783 = vmatprep.mubr.msk.f32.mxu1 %vm13458_vm3, %v19728_v22  ;;  %13091 = vmatpush3.bf16.msra.mxu0 %v13090_v1 }
 0xa3a   : > { %12998 = vmatpush3.bf16.msra.mxu1 %v12997_v23  ;;  %13092 = vmatprep.subr.bf16.mxu0 %v19701_v2 }
 0xa3b   : > { %12999 = vmatprep.subr.bf16.mxu1 %v19701_v2 }
 0xa3d   : > { %13094 = vmatpush3.bf16.msra.mxu0 %v13093_v7 }
 0xa3e   : > { %13095 = vmatprep.subr.bf16.mxu0 %v19701_v2 }
 0xa63   : > { %v9145_v33 = vpop.f32.mrb[26].mxu0 }
 0xa64   : > { %v9147_v50 = vpop.f32.mrb[27].mxu0 }
 0xa67   : > { %v9150_v4 = vpop.f32.mrb[28].mxu0 }
 0xa68   : > { %v9152_v5 = vpop.f32.mrb[29].mxu0 }
 0xa96   : > { %v9035_v37 = vpop.f32.mrb[22].mxu1 }
 0xa97   : > { %v9037_v39 = vpop.f32.mrb[23].mxu1 }
 0xa9a   : > { %v9041_v19 = vpop.f32.mrb[24].mxu1 }
 0xa9b   : > { %v9043_v38 = vpop.f32.mrb[25].mxu1 }
 0xad1   : > { %v11553_v6 = vpop.f32.mrb[30].mxu0 }
 0xad2   : > { %v11554_v35 = vpop.f32.mrb[31].mxu0 }
 0xad3   : > { %v11555_v10 = vadd.f32 %v11554_v35, %v11553_v6 }
 0xad5   : > { %v11556_v0 = vpop.f32.mrb[32].mxu0 }
 0xad6   : > { %v11557_v3 = vpop.f32.mrb[33].mxu0  ;;  %v11597_v8 = vpop.f32.mrb[26].mxu1 }
 0xad7   : > { %v11558_v16 = vadd.f32 %v11557_v3, %v11556_v0  ;;  %v11598_v56 = vpop.f32.mrb[27].mxu1  ;;  %v11138_v3 = vld [vmem:[%s19363_s8 + $0x20] sm:$0xff] }
 0xad8   : > { %v11599_v34 = vadd.f32 %v11598_v56, %v11597_v8  ;;  %v11139_v8 = vld [vmem:[%s19363_s8 + $0x28] sm:$0xff] }
 0xada   : > { %v9727_v26 = vadd.f32 %v11599_v34, %v11555_v10 }
 0xafa   : > { %v11559_v40 = vpop.f32.mrb[34].mxu0 }
 0xafb   : > { %v11560_v48 = vpop.f32.mrb[35].mxu0 }
 0xafc   : > { %v11561_v36 = vadd.f32 %v11560_v48, %v11559_v40  ;;  %v11600_v14 = vpop.f32.mrb[28].mxu1 }
 0xafd   : > { %v11601_v13 = vpop.f32.mrb[29].mxu1 }
 0xafe   : > { %v11602_v11 = vadd.f32 %v11601_v13, %v11600_v14  ;;  %v11442_v13 = vld [vmem:[%s19361_s6 + $0x40] sm:$0xff] }
 0xb00   : > { %v11562_v27 = vpop.f32.mrb[36].mxu0  ;;  %v9732_v32 = vadd.f32 %v11602_v11, %v11558_v16  ;;  %v11443_v11 = vld [vmem:[%s19361_s6 + $0x48] sm:$0xff] }
 0xb01   : > { %v11563_v53 = vpop.f32.mrb[37].mxu0 }
 0xb02   : > { %v11564_v31 = vadd.f32 %v11563_v53, %v11562_v27 }
 0xb05   : > { %v11603_v43 = vpop.f32.mrb[30].mxu1  ;;  %v11771_v9 = vpop.f32.mrb[38].mxu0 }
 0xb06   : > { %v18876_v61 = vadd.f32 %v11771_v9, %v9732_v32  ;;  %v11604_v24 = vpop.f32.mrb[31].mxu1  ;;  %v9811_v57 = vpop.f32.mrb[39].mxu0 }
 0xb07   : > { %v11605_v15 = vadd.f32 %v11604_v24, %v11603_v43  ;;  %v9812_v18 = vadd.f32 %v9811_v57, %v9727_v26 }
 0xb08   : > { %v10572_v17 = vrot.slane %v18876_v61, 1  ;;  %v10652_v52 = vrot.slane %v18876_v61, 2  ;;  %v10814_v14 = vrot.slane %v18876_v61, 4  ;;  %v10895_v27 = vrot.slane %v18876_v61, 5 }
 0xb09   : > { %v11774_v45 = vpop.f32.mrb[40].mxu0  ;;  %v9737_v58 = vadd.f32 %v11605_v15, %v11561_v36  ;;  %v9924_v46 = vrot.slane %v9812_v18, 1  ;;  %v10004_v21 = vrot.slane %v9812_v18, 2  ;;  %v10085_v54 = vrot.slane %v9812_v18, 3 }
 0xb0a   : > { %v9821_v51 = vpop.f32.mrb[41].mxu0  ;;  %v10166_v29 = vrot.slane %v9812_v18, 4  ;;  %v10247_v33 = vrot.slane %v9812_v18, 5  ;;  %v10328_v4 = vrot.slane %v9812_v18, 6  ;;  %v10409_v5 = vrot.slane %v9812_v18, 7 }
 0xb0b   : > { %v9822_v41 = vadd.f32 %v9821_v51, %v9737_v58  ;;  %v11606_v30 = vpop.f32.mrb[32].mxu1  ;;  %v10733_v36 = vrot.slane %v18876_v61, 3  ;;  %v10976_v53 = vrot.slane %v18876_v61, 6  ;;  %v11057_v32 = vrot.slane %v18876_v61, 7 }
 0xb0c   : > { %v11607_v50 = vpop.f32.mrb[33].mxu1  ;;  %v13006_v58 = vpack.c.bf16 %v11443_v11, %v11442_v13  ;;  %v11468_v13 = vld [vmem:[%s19361_s6 + $0xe8] sm:$0xff] }
 0xb0d   : > { %v11608_v63 = vadd.f32 %v11607_v50, %v11606_v30  ;;  %v9837_v44 = vrot.slane %v9822_v41, 7  ;;  %v9925_v25 = vsel %vm9838_vm10, %v9822_v41, %v9924_v46  ;;  %v10005_v23 = vrot.slane %v9822_v41, 1  ;;  %v11448_v30 = vld [vmem:[%s19361_s6 + $0x68] sm:$0xff] }
 0xb0e   : > { %v10086_v37 = vrot.slane %v9822_v41, 2  ;;  %v10167_v39 = vrot.slane %v9822_v41, 3  ;;  %v10248_v19 = vrot.slane %v9822_v41, 4  ;;  %v10329_v38 = vrot.slane %v9822_v41, 5 }
 0xb0f   : > { %v9742_v6 = vadd.f32 %v11608_v63, %v11564_v31  ;;  %v9839_v35 = vsel %vm9838_vm10, %v9837_v44, %v9812_v18  ;;  %v18910_v10 = vsel %vm9838_vm10, %v10005_v23, %v10004_v21  ;;  %v10410_v0 = vrot.slane %v9822_v41, 6  ;;  %v11142_v21 = vld [vmem:[%s19363_s8 + $0x40] sm:$0xff]  ;;  %v11453_v44 = vld [vmem:[%s19361_s6 + $0x88] sm:$0xff]  ;;  %v11454_v23 = vld [vmem:[%s19361_s6 + $0x90] sm:$0xff] }
 0xb10   : > { %11784 = vmatmul.mubr.msk.f32.vlgmr.msra.gmra.mrb[34].mxu1 %vm19753_vm15, %v9839_v35  ;;  %v18921_v16 = vsel %vm9838_vm10, %v10086_v37, %v10085_v54  ;;  %v18924_v56 = vsel %vm9838_vm10, %v10167_v39, %v10166_v29  ;;  %v18927_v34 = vsel %vm9838_vm10, %v10248_v19, %v10247_v33  ;;  %v18930_v26 = vsel %vm9838_vm10, %v10329_v38, %v10328_v4  ;;  %v11447_v41 = vld [vmem:[%s19361_s6 + $0x60] sm:$0xff]  ;;  %v11144_v29 = vld [vmem:[%s19363_s8 + $0x50] sm:$0xff]  ;;  %v11145_v33 = vld [vmem:[%s19363_s8 + $0x58] sm:$0xff] }
 0xb11   : > { %v9827_v40 = vadd.f32 %v11774_v45, %v9742_v6  ;;  %13001 = vmatpush3.bf16.msra.mxu1 %v13000_v49  ;;  %11794 = vmatprep.mubr.msk.f32.mxu1 %vm13458_vm3, %v19728_v22  ;;  %v18935_v48 = vsel %vm9838_vm10, %v10410_v0, %v10409_v5  ;;  %v13096_v31 = vpack.c.bf16 %v11139_v8, %v11138_v3  ;;  %v11141_v45 = vld [vmem:[%s19363_s8 + $0x38] sm:$0xff]  ;;  %v11449_v4 = vld [vmem:[%s19361_s6 + $0x70] sm:$0xff]  ;;  %v11452_v63 = vld [vmem:[%s19361_s6 + $0x80] sm:$0xff] }
 0xb12   : > { %13002 = vmatprep.subr.bf16.mxu1 %v19701_v2  ;;  %v13099_v46 = vpack.c.bf16 %v11141_v45, %v11140_v55  ;;  %v13012_v50 = vpack.c.bf16 %v11448_v30, %v11447_v41  ;;  %v11450_v5 = vld [vmem:[%s19361_s6 + $0x78] sm:$0xff]  ;;  %v13105_v1 = vpack.c.bf16 %v11145_v33, %v11144_v29  ;;  %v11457_v19 = vld [vmem:[%s19361_s6 + $0xa0] sm:$0xff]  ;;  %v11458_v38 = vld [vmem:[%s19361_s6 + $0xa8] sm:$0xff] }
 0xb13   : > { %v10492_v43 = vrot.slane %v9827_v40, 7  ;;  %v18950_v9 = vsel %vm9838_vm10, %v9827_v40, %v10572_v17  ;;  %v10653_v20 = vrot.slane %v9827_v40, 1  ;;  %v10734_v24 = vrot.slane %v9827_v40, 2  ;;  %13097 = vmatpush3.bf16.msra.mxu0 %v13096_v31  ;;  %v11143_v17 = vld [vmem:[%s19363_s8 + $0x48] sm:$0xff]  ;;  %v11455_v37 = vld [vmem:[%s19361_s6 + $0x98] sm:$0xff]  ;;  %v11459_v35 = vld [vmem:[%s19361_s6 + $0xb0] sm:$0xff] }
 0xb14   : > { %v10815_v57 = vrot.slane %v9827_v40, 3  ;;  %v10896_v12 = vrot.slane %v9827_v40, 4  ;;  %v10977_v15 = vrot.slane %v9827_v40, 5  ;;  %v11058_v18 = vrot.slane %v9827_v40, 6  ;;  %13098 = vmatprep.subr.bf16.mxu0 %v19701_v2  ;;  %v11462_v3 = vld [vmem:[%s19361_s6 + $0xc0] sm:$0xff]  ;;  %v11463_v8 = vld [vmem:[%s19361_s6 + $0xc8] sm:$0xff]  ;;  %vm19767_vm15 = vmmov %vm19759_vm0 }
 0xb15   : > { %13004 = vmatpush3.bf16.msra.mxu1 %v13003_v47  ;;  %v18964_v49 = vsel %vm9838_vm10, %v10492_v43, %v18876_v61  ;;  %v18967_v60 = vsel %vm9838_vm10, %v10653_v20, %v10652_v52  ;;  %v18970_v62 = vsel %vm9838_vm10, %v10734_v24, %v10733_v36  ;;  %v13009_v52 = vpack.c.bf16 %v11445_v28, %v11444_v42  ;;  %v11465_v40 = vld [vmem:[%s19361_s6 + $0xd8] sm:$0xff]  ;;  %v11473_v31 = vld [vmem:[%s19361_s6 + $0x108] sm:$0xff]  ;;  %v11482_v45 = vld [vmem:[%s19361_s6 + $0x140] sm:$0xff] }
 0xb16   : > { %13005 = vmatprep.subr.bf16.mxu1 %v19701_v2  ;;  %v18980_v59 = vsel %vm9838_vm10, %v10815_v57, %v10814_v14  ;;  %v18983_v61 = vsel %vm9838_vm10, %v10896_v12, %v10895_v27  ;;  %v18986_v47 = vsel %vm9838_vm10, %v10977_v15, %v10976_v53  ;;  %v18989_v51 = vsel %vm9838_vm10, %v11058_v18, %v11057_v32  ;;  %v11467_v14 = vld [vmem:[%s19361_s6 + $0xe0] sm:$0xff]  ;;  %v11470_v27 = vld [vmem:[%s19361_s6 + $0xf8] sm:$0xff]  ;;  %v11478_v12 = vld [vmem:[%s19361_s6 + $0x128] sm:$0xff] }
 0xb17   : > { %13100 = vmatpush3.bf16.msra.mxu0 %v13099_v46  ;;  %v13102_v54 = vpack.c.bf16 %v11143_v17, %v11142_v21  ;;  %v13015_v7 = vpack.c.bf16 %v11450_v5, %v11449_v4  ;;  %v13021_v39 = vpack.c.bf16 %v11455_v37, %v11454_v23  ;;  %v13024_v6 = vpack.c.bf16 %v11458_v38, %v11457_v19  ;;  %v11472_v32 = vld [vmem:[%s19361_s6 + $0x100] sm:$0xff]  ;;  %v11475_v20 = vld [vmem:[%s19361_s6 + $0x118] sm:$0xff]  ;;  %v11488_v17 = vld [vmem:[%s19361_s6 + $0x168] sm:$0xff] }
 0xb18   : > { %11795 = vmatmul.mubr.msk.f32.vlgmr.msra.gmra.mrb[34].mxu1 %vm19754_vm7, %v9925_v25  ;;  %13101 = vmatprep.subr.bf16.mxu0 %v19701_v2  ;;  %v13018_v25 = vpack.c.bf16 %v11453_v44, %v11452_v63  ;;  %v13036_v11 = vpack.c.bf16 %v11468_v13, %v11467_v14  ;;  %v13042_v43 = vpack.c.bf16 %v11473_v31, %v11472_v32  ;;  %v11477_v57 = vld [vmem:[%s19361_s6 + $0x120] sm:$0xff]  ;;  %v11480_v18 = vld [vmem:[%s19361_s6 + $0x138] sm:$0xff]  ;;  %v11493_v29 = vld [vmem:[%s19361_s6 + $0x188] sm:$0xff] }
 0xb19   : > { %13007 = vmatpush3.bf16.msra.mxu1 %v13006_v58  ;;  %11805 = vmatprep.mubr.msk.f32.mxu1 %vm13458_vm3, %v19728_v22  ;;  %v13048_v15 = vpack.c.bf16 %v11478_v12, %v11477_v57  ;;  %v11483_v58 = vld [vmem:[%s19361_s6 + $0x148] sm:$0xff]  ;;  %v11485_v28 = vld [vmem:[%s19361_s6 + $0x158] sm:$0xff]  ;;  %v11487_v21 = vld [vmem:[%s19361_s6 + $0x160] sm:$0xff] }
 0xb1a   : > { %13008 = vmatprep.subr.bf16.mxu1 %v19701_v2  ;;  %v13054_v42 = vpack.c.bf16 %v11483_v58, %v11482_v45  ;;  %v11490_v41 = vld [vmem:[%s19361_s6 + $0x178] sm:$0xff]  ;;  %v11497_v5 = vld [vmem:[%s19361_s6 + $0x1a0] sm:$0xff]  ;;  %v11503_v23 = vld [vmem:[%s19361_s6 + $0x1c8] sm:$0xff] }
 0xb1b   : > { %13103 = vmatpush3.bf16.msra.mxu0 %v13102_v54  ;;  %v11492_v54 = vld [vmem:[%s19361_s6 + $0x180] sm:$0xff]  ;;  %v11500_v63 = vld [vmem:[%s19361_s6 + $0x1b8] sm:$0xff]  ;;  %vm19766_vm10 = vmmov %vm19759_vm0 }
 0xb1c   : > { %13104 = vmatprep.subr.bf16.mxu0 %v19701_v2  ;;  %v13066_v33 = vpack.c.bf16 %v11493_v29, %v11492_v54  ;;  %v11507_v38 = vld [vmem:[%s19361_s6 + $0x1e0] sm:$0xff]  ;;  %vm19768_vm7 = vmmov %vm19759_vm0 }
 0xb1d   : > { %13010 = vmatpush3.bf16.msra.mxu1 %v13009_v52  ;;  %v13060_v52 = vpack.c.bf16 %v11488_v17, %v11487_v21  ;;  %v11234_v31 = vld [vmem:[%s19365_s10 + $0x20] sm:$0xff] }
 0xb1e   : > { %13011 = vmatprep.subr.bf16.mxu1 %v19701_v2  ;;  %v11238_v12 = vld [vmem:[%s19365_s10 + $0x40] sm:$0xff] }
 0xb1f   : > { %13106 = vmatpush3.bf16.msra.mxu0 %v13105_v1  ;;  %v11498_v1 = vld [vmem:[%s19361_s6 + $0x1a8] sm:$0xff] }
 0xb20   : > { %11806 = vmatmul.mubr.msk.f32.vlgmr.msra.gmra.mrb[34].mxu1 %vm19755_vm11, %v18910_v10  ;;  %13107 = vmatprep.subr.bf16.mxu0 %v19701_v2  ;;  %v11460_v10 = vld [vmem:[%s19361_s6 + $0xb8] sm:$0xff]  ;;  %vm11326_vm11 = vcmask 74752  }
 0xb21   : > { %13013 = vmatpush3.bf16.msra.mxu1 %v13012_v50  ;;  %11816 = vmatprep.mubr.msk.f32.mxu1 %vm13458_vm3, %v19728_v22  ;;  %v13027_v0 = vpack.c.bf16 %v11460_v10, %v11459_v35  ;;  %v11495_v50 = vld [vmem:[%s19361_s6 + $0x198] sm:$0xff] }
 0xb22   : > { %13014 = vmatprep.subr.bf16.mxu1 %v19701_v2  ;;  %v11510_v10 = vld [vmem:[%s19361_s6 + $0x1f8] sm:$0xff] }
 0xb25   : > { %13016 = vmatpush3.bf16.msra.mxu1 %v13015_v7  ;;  %v13072_v7 = vpack.c.bf16 %v11498_v1, %v11497_v5 }
 0xb26   : > { %13017 = vmatprep.subr.bf16.mxu1 %v19701_v2 }
 0xb28   : > { %11817 = vmatmul.mubr.msk.f32.vlgmr.msra.gmra.mrb[34].mxu1 %vm19756_vm2, %v18921_v16  ;;  %v13030_v16 = vpack.c.bf16 %v11463_v8, %v11462_v3  ;;  %v11146_v3 = vld [vmem:[%s19363_s8 + $0x60] sm:$0xff]  ;;  %v11147_v8 = vld [vmem:[%s19363_s8 + $0x68] sm:$0xff] }
 0xb29   : > { %13019 = vmatpush3.bf16.msra.mxu1 %v13018_v25  ;;  %11827 = vmatprep.mubr.msk.f32.mxu1 %vm13458_vm3, %v19728_v22  ;;  %v11502_v25 = vld [vmem:[%s19361_s6 + $0x1c0] sm:$0xff] }
 0xb2a   : > { %13020 = vmatprep.subr.bf16.mxu1 %v19701_v2  ;;  %v13078_v37 = vpack.c.bf16 %v11503_v23, %v11502_v25 }
 0xb2d   : > { %13022 = vmatpush3.bf16.msra.mxu1 %v13021_v39  ;;  %v11505_v39 = vld [vmem:[%s19361_s6 + $0x1d8] sm:$0xff] }
 0xb2e   : > { %13023 = vmatprep.subr.bf16.mxu1 %v19701_v2 }
 0xb30   : > { %11828 = vmatmul.mubr.msk.f32.vlgmr.msra.gmra.mrb[34].mxu1 %vm19757_vm12, %v18924_v56  ;;  %v11464_v56 = vld [vmem:[%s19361_s6 + $0xd0] sm:$0xff] }
 0xb31   : > { %13025 = vmatpush3.bf16.msra.mxu1 %v13024_v6  ;;  %11838 = vmatprep.mubr.msk.f32.mxu1 %vm13458_vm3, %v19728_v22  ;;  %v13033_v36 = vpack.c.bf16 %v11465_v40, %v11464_v56  ;;  %v11508_v6 = vld [vmem:[%s19361_s6 + $0x1e8] sm:$0xff]  ;;  %v11230_v56 = vld [vmem:[%s19365_s10] sm:$0xff] }
 0xb32   : > { %13026 = vmatprep.subr.bf16.mxu1 %v19701_v2  ;;  %v13084_v35 = vpack.c.bf16 %v11508_v6, %v11507_v38  ;;  %v11231_v40 = vld [vmem:[%s19365_s10 + $0x8] sm:$0xff] }
 0xb35   : > { %13028 = vmatpush3.bf16.msra.mxu1 %v13027_v0 }
 0xb36   : > { %13029 = vmatprep.subr.bf16.mxu1 %v19701_v2 }
 0xb38   : > { %11839 = vmatmul.mubr.msk.f32.vlgmr.msra.gmra.mrb[34].mxu1 %vm19758_vm4, %v18927_v34  ;;  %v11469_v34 = vld [vmem:[%s19361_s6 + $0xf0] sm:$0xff] }
 0xb39   : > { %13031 = vmatpush3.bf16.msra.mxu1 %v13030_v16  ;;  %11849 = vmatprep.mubr.msk.f32.mxu1 %vm13458_vm3, %v19728_v22  ;;  %v13039_v53 = vpack.c.bf16 %v11470_v27, %v11469_v34  ;;  %v11148_v16 = vld [vmem:[%s19363_s8 + $0x70] sm:$0xff] }
 0xb3a   : > { %13032 = vmatprep.subr.bf16.mxu1 %v19701_v2  ;;  %v11232_v27 = vld [vmem:[%s19365_s10 + $0x10] sm:$0xff] }
 0xb3d   : > { %13034 = vmatpush3.bf16.msra.mxu1 %v13033_v36 }
 0xb3e   : > { %13035 = vmatprep.subr.bf16.mxu1 %v19701_v2 }
 0xb40   : > { %11850 = vmatmul.mubr.msk.f32.vlgmr.msra.gmra.mrb[34].mxu1 %vm19759_vm0, %v18930_v26  ;;  %v11474_v26 = vld [vmem:[%s19361_s6 + $0x110] sm:$0xff] }
 0xb41   : > { %13037 = vmatpush3.bf16.msra.mxu1 %v13036_v11  ;;  %11860 = vmatprep.mubr.msk.f32.mxu1 %vm13458_vm3, %v19728_v22  ;;  %v13045_v24 = vpack.c.bf16 %v11475_v20, %v11474_v26  ;;  %v13111_v11 = vpack.c.bf16 %v11231_v40, %v11230_v56  ;;  %v11236_v20 = vld [vmem:[%s19365_s10 + $0x30] sm:$0xff] }
 0xb42   : > { %13038 = vmatprep.subr.bf16.mxu1 %v19701_v2 }
 0xb45   : > { %13040 = vmatpush3.bf16.msra.mxu1 %v13039_v53  ;;  %v11233_v53 = vld [vmem:[%s19365_s10 + $0x18] sm:$0xff] }
 0xb46   : > { %13041 = vmatprep.subr.bf16.mxu1 %v19701_v2  ;;  %v13114_v32 = vpack.c.bf16 %v11233_v53, %v11232_v27 }
 0xb48   : > { %11861 = vmatmul.mubr.msk.f32.vlgmr.msra.gmra.mrb[34].mxu1 %vm19760_vm6, %v18935_v48  ;;  %v11479_v48 = vld [vmem:[%s19361_s6 + $0x130] sm:$0xff] }
 0xb49   : > { %13043 = vmatpush3.bf16.msra.mxu1 %v13042_v43  ;;  %11871 = vmatprep.mubr.msk.f32.mxu1 %vm13458_vm3, %v19728_v22  ;;  %v13051_v55 = vpack.c.bf16 %v11480_v18, %v11479_v48  ;;  %v11235_v43 = vld [vmem:[%s19365_s10 + $0x28] sm:$0xff]  ;;  %v11240_v18 = vld [vmem:[%s19365_s10 + $0x50] sm:$0xf] }
 0xb4a   : > { %13044 = vmatprep.subr.bf16.mxu1 %v19701_v2  ;;  %v13117_v26 = vpack.c.bf16 %v11235_v43, %v11234_v31 }
 0xb4d   : > { %13046 = vmatpush3.bf16.msra.mxu1 %v13045_v24  ;;  %v11237_v24 = vld [vmem:[%s19365_s10 + $0x38] sm:$0xff] }
 0xb4e   : > { %13047 = vmatprep.subr.bf16.mxu1 %v19701_v2  ;;  %v13120_v57 = vpack.c.bf16 %v11237_v24, %v11236_v20 }
 0xb50   : > { %11872 = vmatmul.mubr.msk.f32.vlgmr.msra.gmra.mrb[34].mxu1 %vm19761_vm5, %v18964_v49  ;;  %v11484_v49 = vld [vmem:[%s19361_s6 + $0x150] sm:$0xff] }
 0xb51   : > { %13049 = vmatpush3.bf16.msra.mxu1 %v13048_v15  ;;  %11882 = vmatprep.mubr.msk.f32.mxu1 %vm13458_vm3, %v19728_v22  ;;  %v13057_v46 = vpack.c.bf16 %v11485_v28, %v11484_v49  ;;  %v11239_v15 = vld [vmem:[%s19365_s10 + $0x48] sm:$0xff] }
 0xb52   : > { %13050 = vmatprep.subr.bf16.mxu1 %v19701_v2  ;;  %v13123_v48 = vpack.c.bf16 %v11239_v15, %v11238_v12 }
 0xb55   : > { %13052 = vmatpush3.bf16.msra.mxu1 %v13051_v55 }
 0xb56   : > { %13053 = vmatprep.subr.bf16.mxu1 %v19701_v2 }
 0xb58   : > { %11883 = vmatmul.mubr.msk.f32.vlgmr.msra.gmra.mrb[34].mxu1 %vm19762_vm13, %v18950_v9  ;;  %v11489_v9 = vld [vmem:[%s19361_s6 + $0x170] sm:$0xff] }
 0xb59   : > { %13055 = vmatpush3.bf16.msra.mxu1 %v13054_v42  ;;  %11893 = vmatprep.mubr.msk.f32.mxu1 %vm13458_vm3, %v19728_v22  ;;  %v13063_v30 = vpack.c.bf16 %v11490_v41, %v11489_v9 }
 0xb5a   : > { %13056 = vmatprep.subr.bf16.mxu1 %v19701_v2 }
 0xb5d   : > { %13058 = vmatpush3.bf16.msra.mxu1 %v13057_v46 }
 0xb5e   : > { %13059 = vmatprep.subr.bf16.mxu1 %v19701_v2 }
 0xb60   : > { %11894 = vmatmul.mubr.msk.f32.vlgmr.msra.gmra.mrb[34].mxu1 %vm19763_vm9, %v18967_v60  ;;  %v11494_v60 = vld [vmem:[%s19361_s6 + $0x190] sm:$0xff] }
 0xb61   : > { %13061 = vmatpush3.bf16.msra.mxu1 %v13060_v52  ;;  %11904 = vmatprep.mubr.msk.f32.mxu1 %vm13458_vm3, %v19728_v22  ;;  %v13069_v4 = vpack.c.bf16 %v11495_v50, %v11494_v60 }
 0xb62   : > { %13062 = vmatprep.subr.bf16.mxu1 %v19701_v2 }
 0xb65   : > { %13064 = vmatpush3.bf16.msra.mxu1 %v13063_v30 }
 0xb66   : > { %13065 = vmatprep.subr.bf16.mxu1 %v19701_v2 }
 0xb68   : > { %11905 = vmatmul.mubr.msk.f32.vlgmr.msra.gmra.mrb[34].mxu1 %vm19764_vm14, %v18970_v62  ;;  %v11499_v62 = vld [vmem:[%s19361_s6 + $0x1b0] sm:$0xff] }
 0xb69   : > { %13067 = vmatpush3.bf16.msra.mxu1 %v13066_v33  ;;  %11915 = vmatprep.mubr.msk.f32.mxu1 %vm13458_vm3, %v19728_v22  ;;  %v13075_v44 = vpack.c.bf16 %v11500_v63, %v11499_v62 }
 0xb6a   : > { %13068 = vmatprep.subr.bf16.mxu1 %v19701_v2 }
 0xb6d   : > { %13070 = vmatpush3.bf16.msra.mxu1 %v13069_v4 }
 0xb6e   : > { %13071 = vmatprep.subr.bf16.mxu1 %v19701_v2 }
 0xb70   : > { %11916 = vmatmul.mubr.msk.f32.vlgmr.msra.gmra.mrb[34].mxu1 %vm19765_vm1, %v18980_v59  ;;  %v11504_v59 = vld [vmem:[%s19361_s6 + $0x1d0] sm:$0xff] }
 0xb71   : > { %13073 = vmatpush3.bf16.msra.mxu1 %v13072_v7  ;;  %11926 = vmatprep.mubr.msk.f32.mxu1 %vm13458_vm3, %v19728_v22  ;;  %v13081_v19 = vpack.c.bf16 %v11505_v39, %v11504_v59 }
 0xb72   : > { %13074 = vmatprep.subr.bf16.mxu1 %v19701_v2 }
 0xb75   : > { %13076 = vmatpush3.bf16.msra.mxu1 %v13075_v44 }
 0xb76   : > { %13077 = vmatprep.subr.bf16.mxu1 %v19701_v2 }
 0xb78   : > { %11927 = vmatmul.mubr.msk.f32.vlgmr.msra.gmra.mrb[34].mxu1 %vm19766_vm10, %v18983_v61  ;;  %v11509_v61 = vld [vmem:[%s19361_s6 + $0x1f0] sm:$0xff] }
 0xb79   : > { %13079 = vmatpush3.bf16.msra.mxu1 %v13078_v37  ;;  %11937 = vmatprep.mubr.msk.f32.mxu1 %vm13458_vm3, %v19728_v22  ;;  %v13087_v0 = vpack.c.bf16 %v11510_v10, %v11509_v61 }
 0xb7a   : > { %13080 = vmatprep.subr.bf16.mxu1 %v19701_v2 }
 0xb7d   : > { %13082 = vmatpush3.bf16.msra.mxu1 %v13081_v19 }
 0xb7e   : > { %13083 = vmatprep.subr.bf16.mxu1 %v19701_v2 }
 0xb80   : > { %11938 = vmatmul.mubr.msk.f32.vlgmr.msra.gmra.mrb[34].mxu1 %vm19767_vm15, %v18986_v47  ;;  %v13108_v47 = vpack.c.bf16 %v11147_v8, %v11146_v3 }
 0xb81   : > { %13085 = vmatpush3.bf16.msra.mxu1 %v13084_v35  ;;  %11948 = vmatprep.mubr.msk.f32.mxu1 %vm13458_vm3, %v19728_v22 }
 0xb82   : > { %13086 = vmatprep.subr.bf16.mxu1 %v19701_v2  ;;  %13109 = vmatpush3.bf16.msra.mxu0 %v13108_v47 }
 0xb83   : > { %11979 = vmatprep.subr.mxu0 %v19728_v22 }
 0xb85   : > { %13088 = vmatpush3.bf16.msra.mxu1 %v13087_v0 }
 0xb86   : > { %11980 = vmatpush3.msra.mxu0 %v11148_v16 }
 0xb87   : > { %13110 = vmatprep.subr.bf16.mxu0 %v19701_v2 }
 0xb88   : > { %11949 = vmatmul.mubr.msk.f32.vlgmr.msra.gmra.mrb[34].mxu1 %vm19768_vm7, %v18989_v51  ;;  %v11436_v51 = vld [vmem:[%s19362_s7] ss:$0 sm:$0xff] }
 0xc5b   : > { %v11128_v36 = vpop.f32.mrb[34].mxu1 }
 0xc5c   : > { %v13125_v14 = vadd.f32 %v11436_v51, %v11128_v36  ;;  %v11950_v13 = vpop.f32.mrb[35].mxu1 }
 0xc5e   : > { %v11133_v34 = vmax.f32 %v13125_v14, 0.0 }
 0xc60   : > { %11982 = vmatmul.mubr.msk.f32.vlgmr.msra.gmra.mrb[42].mxu0 %vm5657_vm8, %v11133_v34  ;;  %vm11252_vm8 = vcmask 1043456  }
 0xc61   : > { %13112 = vmatpush3.bf16.msra.mxu0 %v13111_v11  ;;  %12006 = vmatprep.mubr.msk.f32.mxu0 %vm13458_vm3, %v19728_v22  ;;  %vm11248_vm3 = vcmask 687104  }
 0xc62   : > { %13113 = vmatprep.subr.bf16.mxu0 %v19701_v2 }
 0xc65   : > { %13115 = vmatpush3.bf16.msra.mxu0 %v13114_v32 }
 0xc66   : > { %13116 = vmatprep.subr.bf16.mxu0 %v19701_v2 }
 0xc69   : > { %13118 = vmatpush3.bf16.msra.mxu0 %v13117_v26 }
 0xc6a   : > { %13119 = vmatprep.subr.bf16.mxu0 %v19701_v2 }
 0xc6d   : > { %13121 = vmatpush3.bf16.msra.mxu0 %v13120_v57 }
 0xc6e   : > { %13122 = vmatprep.subr.bf16.mxu0 %v19701_v2  ;;  %v11512_v2 = vld [vmem:[%s19771_s11] ss:$0 sm:$0xff] }
 0xc71   : > { %13124 = vmatpush3.bf16.msra.mxu0 %v13123_v48 }
 0xc72   : > { %12004 = vmatprep.subr.mxu0 %v19728_v22  ;;  %v11514_v22 = vld [vmem:[%s19773_s28] ss:$0 sm:$0xff] }
 0xc75   : > { %12005 = vmatpush3.msk.msra.mxu0 %vm11252_vm8, %v11240_v18 }
 0xd33   : > { %v11225_v55 = vpop.f32.mrb[42].mxu0 }
 0xd34   : > { %v11226_v45 = vadd.f32 %v11512_v2, %v11225_v55  ;;  %v11983_v58 = vpop.f32.mrb[43].mxu0 }
 0xd36   : > { %v11229_v42 = vmax.f32 %v11226_v45, 0.0 }
 0xd38   : > { %12007 = vmatmul.mubr.msk.f32.vlgmr.msra.gmra.mrb[44].mxu0 %vm11248_vm3, %v11229_v42 }
 0xe0b   : > { %v11322_v49 = vpop.f32.mrb[44].mxu0 }
 0xe0c   : > { %v11323_v28 = vadd.f32 %v11514_v22, %v11322_v49  ;;  %v12008_v46 = vpop.f32.mrb[45].mxu0 }
 0xe0e   : > { %11327 = vst.msk [vmem:[%s406_s17] sm:$0x3] %vm11326_vm11, %v11323_v28 }
 0xe0f   : > { %13381 = shalt.err (!%p13378_p3)
}
 0xe10   : > { %s13382_s30 = scalar_lea.hbm %s19313_s23, 32  ;;  %s13386_s11 = scalar_lea.hbm %s19774_s0, 64 }
 0xe11   : > { %p13383_p4 = scmp.ne.s32.totalorder %s19313_s23, %s13382_s30  ;;  %p13387_p9 = scmp.lt.u32.totalorder %s19313_s23, %s19774_s0 }
 0xe12   : > { %p13388_p10 = scmp.lt.u32.totalorder %s13386_s11, %s13382_s30  ;;  %p13390_p12 = scmp.lt.u32.totalorder %s13382_s30, %s19313_s23 }
 0xe13   : > { %p13384_p7 = pnand %p13383_p4, %p13563_p5 }
 0xe14   : > { %p13389_p11 = por %p13388_p10, %p13387_p9 }
 0xe15   : > { %p13385_p8 = pneg %p13384_p7 }
 0xe16   : > { %p13391_p13 = por %p13390_p12, %p13389_p11 }
 0xe18   : > { %p13392_p0 = pnand %p13391_p13, %p13385_p8 }
 0xe1a   : > { %13395 = shalt.err (!%p13392_p0)
}
 0xe1b   : > { %13157 = dma.vmem_to_hbm [thread:$0]  (%p13563_p5), %s19315_s13, 32, %s19313_s23, %s11329_s12  }
 0xe1c PF: > { %s19775_s20 = sld [smem:[#allocation13_spill]]  ;;  %s19776_s29 = sld [smem:[#allocation10_spill]] }
 0xe22   : > { %p13163_p1 = scmp.ge.s32.totalorder %s19775_s20, 2  ;;  %s11354_s15 = sand.u32 1, %s19776_s29  }
 0xe23   : > { %s11355_s17 = scalar_lea.sflag [#allocation8], %s11354_s15 }
 0xe24   : > { %p13160_p2 = pnand %p13163_p1, %p13567_p6 }
 0xe26   : > { %13413 = dma.done.wait (!%p13160_p2), %s11355_s17, 32  }
 0xe27   : > { %13415 = vsyncadd (!%p13160_p2), %s11355_s17, 4294967264  ;;  %s19778_s24 = sld [smem:[#allocation15_spill]]  ;;  %s19779_s21 = sld [smem:[#allocation11_spill]] }
 0xe28   : > { %s19780_s22 = sld [smem:[#allocation12_spill]]  ;;  %s19781_s23 = sld [smem:[#allocation16_spill]] }
 0xe2d   : > { %p22_p3 = scmp.ge.s32.totalorder %s19778_s24, 4  }
 0xe2f   :  { %24 = sbr.rel (!%p22_p3) target bundleno = 8 (0x8), region = 119 }
 0xe36   :  { %11360 = vsyncpa [#allocation8], 1 }
 0xe37   :  { %11362 = vsyncpa [#allocation8 + $0x1], 1 }

</bundles_post_ra>
